<compile_context>
chip_gen: v6e
topology: v6e:2x2x1
jax: 0.10.0
libtpu: 0.0.40
codegen_flags: <defaults>
</compile_context>

<pallas_src>
import jax
import jax.numpy as jnp
from jax import lax
from jax.experimental import pallas as pl
from jax.experimental.pallas import tpu as pltpu

BN_EPS = 1e-5

ALL_FEAT_NAMES = ['conv1', 'pool1', 'conv2', 'pool2', 'conv3', 'conv4',
                  'conv5', 'pool5', 'flatten']


# ------------------------------- helpers -----------------------------------

def _round_up(x, m):
    return ((x + m - 1) // m) * m


def _pick_tm(m):
    """M tile: biggest <=512 multiple of 8; split so nmt >= 2 when M > 8."""
    tm = min(512, _round_up(m, 8))
    if _round_up(m, tm) == tm and m > 8:          # would give a single M tile
        tm = _round_up((m + 1) // 2, 8)           # ensure >=2 parallel blocks
    return tm


# ----------------------------- Pallas kernels ------------------------------

def _matmul_stats_kernel(p_ref, w_ref, o_ref, st_ref):
    """One full-K MXU matmul per M tile + per-tile BN partial statistics.

    p: (TM, K_p) bf16 patches, w: (K_p, Cout_p) bf16 weight (VMEM resident).
    o: (TM, Cout_p) bf16 conv pre-activation (cast from the f32 accumulator).
    st: (8, Cout_p) f32; row 0 = per-channel sum over the tile's rows,
        row 1 = per-channel sum of squares (rows 2..7 unused).
    """
    acc = jnp.dot(p_ref[...], w_ref[...], preferred_element_type=jnp.float32)
    o_ref[...] = acc.astype(o_ref.dtype)
    st_ref[0:1, :] = jnp.sum(acc, axis=0, keepdims=True)
    st_ref[1:2, :] = jnp.sum(acc * acc, axis=0, keepdims=True)


def _bn_relu_kernel(x_ref, scale_ref, shift_ref, o_ref):
    """y = relu(x * scale + shift), lane-dense padded-channel store.

    x: (TM, Cout_p) bf16, scale/shift: (1, Cout_p) f32, o: (TM, Cout_p) bf16.
    Math in f32 (v5e VPU has no bf16 ops), cast only at the store.
    """
    y = x_ref[...].astype(jnp.float32) * scale_ref[...] + shift_ref[...]
    o_ref[...] = jnp.maximum(y, 0.0).astype(o_ref.dtype)


def _maxpool_rows_kernel(*refs):
    """Elementwise max of ksize overlapping single-row blocks (kh direction).

    rows: ksize refs of (1, 1, OW, C); o: (1, 1, OW, C).
    """
    *rows, o_ref = refs
    m = rows[0][...].astype(jnp.float32)
    for r in rows[1:]:
        m = jnp.maximum(m, r[...].astype(jnp.float32))
    o_ref[...] = m.astype(o_ref.dtype)


# ------------------------------ layer wrappers ------------------------------

def conv_bn_relu(x, w, gamma, beta, stride, padding):
    """Fused Conv2d + BatchNorm2d(train-mode stats) + ReLU, NHWC in/out.

    x: (N, H, W, Cin_act) with Cin_act >= w's Cin (carried channel padding is
    exactly zero).  w: (Cout, Cin, KH, KW) (PyTorch layout).
    Returns (N, OH, OW, Cout_p) bf16 with Cout_p = round_up(Cout, 128);
    padded output channels are exactly zero.
    """
    N, H, W, Cin_act = x.shape
    Cout, Cin_w, KH, KW = w.shape
    xp = jnp.pad(x, ((0, 0), (padding, padding), (padding, padding), (0, 0)))
    Hp, Wp = H + 2 * padding, W + 2 * padding
    OH = (Hp - KH) // stride + 1
    OW = (Wp - KW) // stride + 1

    # im2col in NHWC with K ordered (KH, KW, Cin_act) -> pure channel concat.
    # TODO(synk): move patch extraction into the conv kernel (overlapping
    # row-band DMA) to remove the KH*KW HBM amplification of the patches.
    slices = []
    for kh in range(KH):
        for kw in range(KW):
            slices.append(lax.slice(
                xp,
                (0, kh, kw, 0),
                (N, kh + (OH - 1) * stride + 1, kw + (OW - 1) * stride + 1,
                 Cin_act),
                (1, stride, stride, 1)))
    pat = jnp.concatenate(slices, axis=-1).reshape(N * OH * OW,
                                                   KH * KW * Cin_act)

    M, K = pat.shape
    K_p = _round_up(K, 128)
    Cout_p = _round_up(Cout, 128)
    TM = _pick_tm(M)
    M_p = _round_up(M, TM)
    nmt = M_p // TM

    # bf16 MXU inputs, zero-padded to aligned tiles (zeros are exact no-ops).
    pat_p = jnp.pad(pat, ((0, M_p - M), (0, K_p - K))).astype(jnp.bfloat16)

    # Weight: (Cout,Cin,KH,KW) -> (KH,KW,Cin_act,Cout_p) -> (K_p, Cout_p).
    # Cin is zero-padded to Cin_act so the K ordering matches the patches.
    wmat = jnp.transpose(w, (2, 3, 1, 0))
    wmat = jnp.pad(wmat, ((0, 0), (0, 0),
                          (0, Cin_act - Cin_w), (0, Cout_p - Cout)))
    wmat = wmat.reshape(KH * KW * Cin_act, Cout_p)
    wmat_p = jnp.pad(wmat, ((0, K_p - K), (0, 0))).astype(jnp.bfloat16)

    conv_out, stats = pl.pallas_call(
        _matmul_stats_kernel,
        grid=(nmt,),
        in_specs=[
            pl.BlockSpec((TM, K_p), lambda i: (i, 0)),
            # Full-extent, constant index_map -> weight is VMEM resident.
            pl.BlockSpec((K_p, Cout_p), lambda i: (0, 0)),
        ],
        out_specs=[
            pl.BlockSpec((TM, Cout_p), lambda i: (i, 0)),
            pl.BlockSpec((8, Cout_p), lambda i: (i, 0)),
        ],
        out_shape=[
            jax.ShapeDtypeStruct((M_p, Cout_p), jnp.bfloat16),
            jax.ShapeDtypeStruct((nmt * 8, Cout_p), jnp.float32),
        ],
        compiler_params=pltpu.CompilerParams(
            dimension_semantics=("parallel",)),
        cost_estimate=pl.CostEstimate(
            flops=2 * M_p * K_p * Cout_p,
            transcendentals=0,
            bytes_accessed=pat_p.size * 2 + wmat_p.size * 2
            + M_p * Cout_p * 2 + nmt * 8 * Cout_p * 4),
    )(pat_p, wmat_p)

    # Finalize BN parameters from the partial per-channel statistics.
    # Padded rows contribute 0 to sum/ssq; divide by the true row count M.
    # The Conv2d bias is exactly cancelled by the mean subtraction of
    # training-mode BN, so it is never added (it stays in the params dict).
    st = stats.reshape(nmt, 8, Cout_p)
    ch_sum = jnp.sum(st[:, 0, :], axis=0)
    ch_ssq = jnp.sum(st[:, 1, :], axis=0)
    mean = ch_sum / M
    # NOTE: E[x^2] - mean^2 can cancel when |mean| >> std; clamped at 0.
    var = jnp.maximum(ch_ssq / M - mean * mean, 0.0)
    gamma_p = jnp.pad(gamma.astype(jnp.float32), (0, Cout_p - Cout))
    beta_p = jnp.pad(beta.astype(jnp.float32), (0, Cout_p - Cout))
    scale = gamma_p * lax.rsqrt(var + BN_EPS)
    shift = beta_p - mean * scale
    # Padded channels: gamma_p = 0, mean = 0 -> scale = shift = 0 -> output 0.

    y = pl.pallas_call(
        _bn_relu_kernel,
        grid=(nmt,),
        in_specs=[
            pl.BlockSpec((TM, Cout_p), lambda i: (i, 0)),
            pl.BlockSpec((1, Cout_p), lambda i: (0, 0)),
            pl.BlockSpec((1, Cout_p), lambda i: (0, 0)),
        ],
        out_specs=pl.BlockSpec((TM, Cout_p), lambda i: (i, 0)),
        out_shape=jax.ShapeDtypeStruct((M_p, Cout_p), jnp.bfloat16),
        compiler_params=pltpu.CompilerParams(
            dimension_semantics=("parallel",)),
    )(conv_out, scale.reshape(1, Cout_p), shift.reshape(1, Cout_p))

    return y[:M].reshape(N, OH, OW, Cout_p)


def maxpool_nhwc(x, ksize=3, stride=2):
    """MaxPool2d(kernel=3, stride=2, no padding), NHWC in/out (bf16 ok).

    Separable formulation: the kw direction is a strided-slice max in XLA
    (reads x once, writes one (N, H, OW, C) intermediate), the kh direction
    is done in the Pallas kernel from three overlapping single-row blocks —
    no 9x HBM window materialization.
    """
    N, H, W, C = x.shape
    OH = (H - ksize) // stride + 1
    OW = (W - ksize) // stride + 1

    t = None
    for kw in range(ksize):
        s = lax.slice(x, (0, 0, kw, 0),
                      (N, H, kw + (OW - 1) * stride + 1, C),
                      (1, 1, stride, 1))
        t = s if t is None else jnp.maximum(t, s)          # (N, H, OW, C)

    in_specs = [
        pl.BlockSpec((1, 1, OW, C),
                     lambda n, oh, kh=kh: (n, stride * oh + kh, 0, 0))
        for kh in range(ksize)
    ]
    out = pl.pallas_call(
        _maxpool_rows_kernel,
        grid=(N, OH),
        in_specs=in_specs,
        out_specs=pl.BlockSpec((1, 1, OW, C), lambda n, oh: (n, oh, 0, 0)),
        out_shape=jax.ShapeDtypeStruct((N, OH, OW, C), x.dtype),
        compiler_params=pltpu.CompilerParams(
            dimension_semantics=("parallel", "parallel")),
    )(*([t] * ksize))
    return out


# ----------------------------- model definition -----------------------------

_CONV_SPECS = [
    # (Cin, Cout, K, stride, pad)
    (3, 64, 11, 4, 2),    # conv1
    (64, 192, 5, 1, 2),   # conv2
    (192, 384, 3, 1, 1),  # conv3
    (384, 256, 3, 1, 1),  # conv4
    (256, 256, 3, 1, 1),  # conv5
]


def init_params(key):
    params = []
    for (cin, cout, k, s, p) in _CONV_SPECS:
        key, k1, k2, k3, k4 = jax.random.split(key, 5)
        fan_in = cin * k * k
        params.append(dict(
            w=jax.random.normal(k1, (cout, cin, k, k), jnp.float32)
              * (1.0 / jnp.sqrt(fan_in)),
            # Conv bias kept for interface fidelity; it is exactly cancelled
            # by training-mode BatchNorm's mean subtraction, so unused.
            b=0.01 * jax.random.normal(k2, (cout,), jnp.float32),
            gamma=1.0 + 0.1 * jax.random.normal(k3, (cout,), jnp.float32),
            beta=0.1 * jax.random.normal(k4, (cout,), jnp.float32),
            stride=s, pad=p,
        ))
    return params


def alexnet_rotnet_forward(x_nchw, params, out_feat_keys=None):
    """Mirrors AlexNet_RotNet.forward (out_feat_keys=None -> last feature).

    x_nchw: (N, C, H, W) like PyTorch.  Internally activations are NHWC bf16
    with lane-padded channels; requested features are sliced to the true
    channel count, transposed back to NCHW and cast to f32 so the caller
    sees the PyTorch semantics (including the flatten order).
    """
    single = out_feat_keys is None or len(out_feat_keys) == 0
    if single:
        out_feat_keys = [ALL_FEAT_NAMES[-1]]
    max_out_feat = max(ALL_FEAT_NAMES.index(k) for k in out_feat_keys)

    conv_idx_for_block = {0: 0, 2: 1, 4: 2, 5: 3, 6: 4}
    pool_blocks = {1, 3, 7}

    out_feats = [None] * len(out_feat_keys)
    feat = jnp.transpose(x_nchw, (0, 2, 3, 1))     # NCHW -> NHWC (once)
    c_true = feat.shape[-1]

    for f in range(max_out_feat + 1):
        key = ALL_FEAT_NAMES[f]
        if key == 'flatten':
            # PyTorch flattens the NCHW tensor -> (N, C*H*W).
            nchw = jnp.transpose(feat[..., :c_true], (0, 3, 1, 2))
            feat = nchw.reshape(nchw.shape[0], -1).astype(jnp.float32)
            if key in out_feat_keys:
                out_feats[out_feat_keys.index(key)] = feat
        else:
            if f in pool_blocks:
                feat = maxpool_nhwc(feat)
            else:
                p = params[conv_idx_for_block[f]]
                feat = conv_bn_relu(feat, p['w'], p['gamma'], p['beta'],
                                    p['stride'], p['pad'])
                c_true = p['w'].shape[0]
            if key in out_feat_keys:
                out_feats[out_feat_keys.index(key)] = jnp.transpose(
                    feat[..., :c_true], (0, 3, 1, 2)).astype(jnp.float32)
    return out_feats[0] if single else out_feats


# ---------------------------------- main ------------------------------------

if __name__ == "__main__":
    key = jax.random.PRNGKey(0)
    kp, kx = jax.random.split(key)
    params = init_params(kp)

    # Small input that survives the AlexNet stride/pool pipeline:
    # 67 -> conv1 16 -> pool1 7 -> conv2 7 -> pool2 3 -> conv3/4/5 3 -> pool5 1
    x = jax.random.normal(kx, (2, 3, 67, 67), jnp.float32)

    fwd = jax.jit(lambda inp: alexnet_rotnet_forward(inp, params))
    out = jax.block_until_ready(fwd(x))             # default: 'flatten'
    assert out.shape == (2, 256 * 1 * 1), out.shape
    assert bool(jnp.all(jnp.isfinite(out)))
    print("KERNEL_OK")
</pallas_src>

<mosaic_0001>
module attributes {stable_mosaic.version = 11 : i64} {
  func.func @_matmul_stats_kernel(%arg0: i32, %arg1: memref<256x384xbf16, #tpu.memory_space<vmem>>, %arg2: memref<384x128xbf16, #tpu.memory_space<vmem>>, %arg3: memref<256x128xbf16, #tpu.memory_space<vmem>>, %arg4: memref<8x128xf32, #tpu.memory_space<vmem>>) attributes {dimension_semantics = [#tpu.dimension_semantics<parallel>], iteration_bounds = array<i64: 2>, scalar_prefetch = 0 : i64, scratch_operands = 0 : i64, tpu.core_type = #tpu.core_type<tc>, window_params = [{transform_indices = @transform_0, window_bounds = array<i64: 256, 384>}, {pipeline_mode = #tpu.pipeline_mode<synchronous>, transform_indices = @transform_1, window_bounds = array<i64: 384, 128>}, {transform_indices = @transform_2, window_bounds = array<i64: 256, 128>}, {transform_indices = @transform_3, window_bounds = array<i64: 8, 128>}]} {
    %c0 = arith.constant 0 : index
    %c0_0 = arith.constant 0 : index
    %0 = vector.load %arg1[%c0, %c0_0] : memref<256x384xbf16, #tpu.memory_space<vmem>>, vector<256x384xbf16>
    %c0_1 = arith.constant 0 : index
    %c0_2 = arith.constant 0 : index
    %1 = vector.load %arg2[%c0_1, %c0_2] : memref<384x128xbf16, #tpu.memory_space<vmem>>, vector<384x128xbf16>
    %cst = arith.constant dense<0.000000e+00> : vector<256x128xf32>
    %2 = tpu.matmul %0, %1, %cst {dimension_numbers = #tpu.dot_dimension_numbers<[1], [0], [0], [1], [0, 0, 1, 1], [], []>} : vector<256x384xbf16>, vector<384x128xbf16>, vector<256x128xf32> -> vector<256x128xf32>
    %3 = arith.truncf %2 : vector<256x128xf32> to vector<256x128xbf16>
    %c0_3 = arith.constant 0 : index
    %c0_4 = arith.constant 0 : index
    %4 = vector.load %arg3[%c0_3, %c0_4] : memref<256x128xbf16, #tpu.memory_space<vmem>>, vector<256x128xbf16>
    tpu.vector_store %arg3[%c0_3, %c0_4], %3 {strides = array<i32>} : memref<256x128xbf16, #tpu.memory_space<vmem>>, vector<256x128xbf16>,
    %cst_5 = arith.constant dense<0.000000e+00> : vector<128xf32>
    %5 = vector.multi_reduction <add>, %2, %cst_5 [0] : vector<256x128xf32> to vector<128xf32>
    %6 = vector.shape_cast %5 : vector<128xf32> to vector<1x128xf32>
    %c0_6 = arith.constant 0 : index
    %c0_7 = arith.constant 0 : index
    %7 = vector.load %arg4[%c0_6, %c0_7] : memref<8x128xf32, #tpu.memory_space<vmem>>, vector<1x128xf32>
    tpu.vector_store %arg4[%c0_6, %c0_7], %6 {strides = array<i32>} : memref<8x128xf32, #tpu.memory_space<vmem>>, vector<1x128xf32>,
    %8 = arith.mulf %2, %2 : vector<256x128xf32>
    %cst_8 = arith.constant dense<0.000000e+00> : vector<128xf32>
    %9 = vector.multi_reduction <add>, %8, %cst_8 [0] : vector<256x128xf32> to vector<128xf32>
    %10 = vector.shape_cast %9 : vector<128xf32> to vector<1x128xf32>
    %c1 = arith.constant 1 : index
    %c0_9 = arith.constant 0 : index
    %11 = vector.load %arg4[%c1, %c0_9] : memref<8x128xf32, #tpu.memory_space<vmem>>, vector<1x128xf32>
    tpu.vector_store %arg4[%c1, %c0_9], %10 {strides = array<i32>} : memref<8x128xf32, #tpu.memory_space<vmem>>, vector<1x128xf32>,
    return
  }
  func.func @transform_0(%arg0: i32) -> (i32, i32) {
    %c0_i32 = arith.constant 0 : i32
    %c0_i32_0 = arith.constant 0 : i32
    return %arg0, %c0_i32 : i32, i32
  }
  func.func @transform_1(%arg0: i32) -> (i32, i32) {
    %c0_i32 = arith.constant 0 : i32
    %c0_i32_0 = arith.constant 0 : i32
    %c0_i32_1 = arith.constant 0 : i32
    return %c0_i32, %c0_i32_0 : i32, i32
  }
  func.func @transform_2(%arg0: i32) -> (i32, i32) {
    %c0_i32 = arith.constant 0 : i32
    %c0_i32_0 = arith.constant 0 : i32
    return %arg0, %c0_i32 : i32, i32
  }
  func.func @transform_3(%arg0: i32) -> (i32, i32) {
    %c0_i32 = arith.constant 0 : i32
    %c0_i32_0 = arith.constant 0 : i32
    return %arg0, %c0_i32 : i32, i32
  }
}

module attributes {stable_mosaic.version = 11 : i64} {
  func.func @_bn_relu_kernel(%arg0: i32, %arg1: memref<256x128xbf16, #tpu.memory_space<vmem>>, %arg2: memref<1x128xf32, #tpu.memory_space<vmem>>, %arg3: memref<1x128xf32, #tpu.memory_space<vmem>>, %arg4: memref<256x128xbf16, #tpu.memory_space<vmem>>) attributes {dimension_semantics = [#tpu.dimension_semantics<parallel>], iteration_bounds = array<i64: 2>, scalar_prefetch = 0 : i64, scratch_operands = 0 : i64, tpu.core_type = #tpu.core_type<tc>, window_params = [{transform_indices = @transform_0, window_bounds = array<i64: 256, 128>}, {pipeline_mode = #tpu.pipeline_mode<synchronous>, transform_indices = @transform_1, window_bounds = array<i64: 1, 128>}, {pipeline_mode = #tpu.pipeline_mode<synchronous>, transform_indices = @transform_2, window_bounds = array<i64: 1, 128>}, {transform_indices = @transform_3, window_bounds = array<i64: 256, 128>}]} {
    %c0 = arith.constant 0 : index
    %c0_0 = arith.constant 0 : index
    %0 = vector.load %arg1[%c0, %c0_0] : memref<256x128xbf16, #tpu.memory_space<vmem>>, vector<256x128xbf16>
    %1 = arith.extf %0 : vector<256x128xbf16> to vector<256x128xf32>
    %c0_1 = arith.constant 0 : index
    %c0_2 = arith.constant 0 : index
    %2 = vector.load %arg2[%c0_1, %c0_2] : memref<1x128xf32, #tpu.memory_space<vmem>>, vector<1x128xf32>
    %3 = vector.broadcast %2 : vector<1x128xf32> to vector<256x128xf32>
    %4 = arith.mulf %1, %3 : vector<256x128xf32>
    %c0_3 = arith.constant 0 : index
    %c0_4 = arith.constant 0 : index
    %5 = vector.load %arg3[%c0_3, %c0_4] : memref<1x128xf32, #tpu.memory_space<vmem>>, vector<1x128xf32>
    %6 = vector.broadcast %5 : vector<1x128xf32> to vector<256x128xf32>
    %7 = arith.addf %4, %6 : vector<256x128xf32>
    %cst = arith.constant 0.000000e+00 : f32
    %8 = vector.broadcast %cst : f32 to vector<256x128xf32>
    %9 = arith.maximumf %7, %8 : vector<256x128xf32>
    %10 = arith.truncf %9 : vector<256x128xf32> to vector<256x128xbf16>
    %c0_5 = arith.constant 0 : index
    %c0_6 = arith.constant 0 : index
    %11 = vector.load %arg4[%c0_5, %c0_6] : memref<256x128xbf16, #tpu.memory_space<vmem>>, vector<256x128xbf16>
    tpu.vector_store %arg4[%c0_5, %c0_6], %10 {strides = array<i32>} : memref<256x128xbf16, #tpu.memory_space<vmem>>, vector<256x128xbf16>,
    return
  }
  func.func @transform_0(%arg0: i32) -> (i32, i32) {
    %c0_i32 = arith.constant 0 : i32
    %c0_i32_0 = arith.constant 0 : i32
    return %arg0, %c0_i32 : i32, i32
  }
  func.func @transform_1(%arg0: i32) -> (i32, i32) {
    %c0_i32 = arith.constant 0 : i32
    %c0_i32_0 = arith.constant 0 : i32
    %c0_i32_1 = arith.constant 0 : i32
    return %c0_i32, %c0_i32_0 : i32, i32
  }
  func.func @transform_2(%arg0: i32) -> (i32, i32) {
    %c0_i32 = arith.constant 0 : i32
    %c0_i32_0 = arith.constant 0 : i32
    %c0_i32_1 = arith.constant 0 : i32
    return %c0_i32, %c0_i32_0 : i32, i32
  }
  func.func @transform_3(%arg0: i32) -> (i32, i32) {
    %c0_i32 = arith.constant 0 : i32
    %c0_i32_0 = arith.constant 0 : i32
    return %arg0, %c0_i32 : i32, i32
  }
}

module attributes {stable_mosaic.version = 11 : i64} {
  func.func @_maxpool_rows_kernel(%arg0: i32, %arg1: i32, %arg2: memref<1x1x7x128xbf16, #tpu.memory_space<vmem>>, %arg3: memref<1x1x7x128xbf16, #tpu.memory_space<vmem>>, %arg4: memref<1x1x7x128xbf16, #tpu.memory_space<vmem>>, %arg5: memref<1x1x7x128xbf16, #tpu.memory_space<vmem>>) attributes {dimension_semantics = [#tpu.dimension_semantics<parallel>, #tpu.dimension_semantics<parallel>], iteration_bounds = array<i64: 2, 7>, scalar_prefetch = 0 : i64, scratch_operands = 0 : i64, tpu.core_type = #tpu.core_type<tc>, window_params = [{transform_indices = @transform_0, window_bounds = array<i64: 1, 1, 7, 128>}, {transform_indices = @transform_1, window_bounds = array<i64: 1, 1, 7, 128>}, {transform_indices = @transform_2, window_bounds = array<i64: 1, 1, 7, 128>}, {transform_indices = @transform_3, window_bounds = array<i64: 1, 1, 7, 128>}]} {
    %c0 = arith.constant 0 : index
    %c0_0 = arith.constant 0 : index
    %c0_1 = arith.constant 0 : index
    %c0_2 = arith.constant 0 : index
    %0 = vector.load %arg2[%c0, %c0_0, %c0_1, %c0_2] : memref<1x1x7x128xbf16, #tpu.memory_space<vmem>>, vector<1x1x7x128xbf16>
    %1 = arith.extf %0 : vector<1x1x7x128xbf16> to vector<1x1x7x128xf32>
    %c0_3 = arith.constant 0 : index
    %c0_4 = arith.constant 0 : index
    %c0_5 = arith.constant 0 : index
    %c0_6 = arith.constant 0 : index
    %2 = vector.load %arg3[%c0_3, %c0_4, %c0_5, %c0_6] : memref<1x1x7x128xbf16, #tpu.memory_space<vmem>>, vector<1x1x7x128xbf16>
    %3 = arith.extf %2 : vector<1x1x7x128xbf16> to vector<1x1x7x128xf32>
    %4 = arith.maximumf %1, %3 : vector<1x1x7x128xf32>
    %c0_7 = arith.constant 0 : index
    %c0_8 = arith.constant 0 : index
    %c0_9 = arith.constant 0 : index
    %c0_10 = arith.constant 0 : index
    %5 = vector.load %arg4[%c0_7, %c0_8, %c0_9, %c0_10] : memref<1x1x7x128xbf16, #tpu.memory_space<vmem>>, vector<1x1x7x128xbf16>
    %6 = arith.extf %5 : vector<1x1x7x128xbf16> to vector<1x1x7x128xf32>
    %7 = arith.maximumf %4, %6 : vector<1x1x7x128xf32>
    %8 = arith.truncf %7 : vector<1x1x7x128xf32> to vector<1x1x7x128xbf16>
    %c0_11 = arith.constant 0 : index
    %c0_12 = arith.constant 0 : index
    %c0_13 = arith.constant 0 : index
    %c0_14 = arith.constant 0 : index
    %9 = vector.load %arg5[%c0_11, %c0_12, %c0_13, %c0_14] : memref<1x1x7x128xbf16, #tpu.memory_space<vmem>>, vector<1x1x7x128xbf16>
    tpu.vector_store %arg5[%c0_11, %c0_12, %c0_13, %c0_14], %8 {strides = array<i32>} : memref<1x1x7x128xbf16, #tpu.memory_space<vmem>>, vector<1x1x7x128xbf16>,
    return
  }
  func.func @transform_0(%arg0: i32, %arg1: i32) -> (i32, i32, i32, i32) {
    %c2_i32 = arith.constant 2 : i32
    %0 = arith.muli %c2_i32, %arg1 : i32
    %c0_i32 = arith.constant 0 : i32
    %1 = arith.addi %0, %c0_i32 : i32
    %c0_i32_0 = arith.constant 0 : i32
    %c0_i32_1 = arith.constant 0 : i32
    %c0_i32_2 = arith.constant 0 : i32
    return %arg0, %1, %c0_i32_0, %c0_i32_1 : i32, i32, i32, i32
  }
  func.func @transform_1(%arg0: i32, %arg1: i32) -> (i32, i32, i32, i32) {
    %c2_i32 = arith.constant 2 : i32
    %0 = arith.muli %c2_i32, %arg1 : i32
    %c1_i32 = arith.constant 1 : i32
    %1 = arith.addi %0, %c1_i32 : i32
    %c0_i32 = arith.constant 0 : i32
    %c0_i32_0 = arith.constant 0 : i32
    %c0_i32_1 = arith.constant 0 : i32
    return %arg0, %1, %c0_i32, %c0_i32_0 : i32, i32, i32, i32
  }
  func.func @transform_2(%arg0: i32, %arg1: i32) -> (i32, i32, i32, i32) {
    %c2_i32 = arith.constant 2 : i32
    %0 = arith.muli %c2_i32, %arg1 : i32
    %c2_i32_0 = arith.constant 2 : i32
    %1 = arith.addi %0, %c2_i32_0 : i32
    %c0_i32 = arith.constant 0 : i32
    %c0_i32_1 = arith.constant 0 : i32
    %c0_i32_2 = arith.constant 0 : i32
    return %arg0, %1, %c0_i32, %c0_i32_1 : i32, i32, i32, i32
  }
  func.func @transform_3(%arg0: i32, %arg1: i32) -> (i32, i32, i32, i32) {
    %c0_i32 = arith.constant 0 : i32
    %c0_i32_0 = arith.constant 0 : i32
    %c0_i32_1 = arith.constant 0 : i32
    return %arg0, %arg1, %c0_i32, %c0_i32_0 : i32, i32, i32, i32
  }
}

module attributes {stable_mosaic.version = 11 : i64} {
  func.func @_matmul_stats_kernel(%arg0: i32, %arg1: memref<56x3200xbf16, #tpu.memory_space<vmem>>, %arg2: memref<3200x256xbf16, #tpu.memory_space<vmem>>, %arg3: memref<56x256xbf16, #tpu.memory_space<vmem>>, %arg4: memref<8x256xf32, #tpu.memory_space<vmem>>) attributes {dimension_semantics = [#tpu.dimension_semantics<parallel>], iteration_bounds = array<i64: 2>, scalar_prefetch = 0 : i64, scratch_operands = 0 : i64, tpu.core_type = #tpu.core_type<tc>, window_params = [{transform_indices = @transform_0, window_bounds = array<i64: 56, 3200>}, {pipeline_mode = #tpu.pipeline_mode<synchronous>, transform_indices = @transform_1, window_bounds = array<i64: 3200, 256>}, {transform_indices = @transform_2, window_bounds = array<i64: 56, 256>}, {transform_indices = @transform_3, window_bounds = array<i64: 8, 256>}]} {
    %c0 = arith.constant 0 : index
    %c0_0 = arith.constant 0 : index
    %0 = vector.load %arg1[%c0, %c0_0] : memref<56x3200xbf16, #tpu.memory_space<vmem>>, vector<56x3200xbf16>
    %c0_1 = arith.constant 0 : index
    %c0_2 = arith.constant 0 : index
    %1 = vector.load %arg2[%c0_1, %c0_2] : memref<3200x256xbf16, #tpu.memory_space<vmem>>, vector<3200x256xbf16>
    %cst = arith.constant dense<0.000000e+00> : vector<56x256xf32>
    %2 = tpu.matmul %0, %1, %cst {dimension_numbers = #tpu.dot_dimension_numbers<[1], [0], [0], [1], [0, 0, 1, 1], [], []>} : vector<56x3200xbf16>, vector<3200x256xbf16>, vector<56x256xf32> -> vector<56x256xf32>
    %3 = arith.truncf %2 : vector<56x256xf32> to vector<56x256xbf16>
    %c0_3 = arith.constant 0 : index
    %c0_4 = arith.constant 0 : index
    %4 = vector.load %arg3[%c0_3, %c0_4] : memref<56x256xbf16, #tpu.memory_space<vmem>>, vector<56x256xbf16>
    tpu.vector_store %arg3[%c0_3, %c0_4], %3 {strides = array<i32>} : memref<56x256xbf16, #tpu.memory_space<vmem>>, vector<56x256xbf16>,
    %cst_5 = arith.constant dense<0.000000e+00> : vector<256xf32>
    %5 = vector.multi_reduction <add>, %2, %cst_5 [0] : vector<56x256xf32> to vector<256xf32>
    %6 = vector.shape_cast %5 : vector<256xf32> to vector<1x256xf32>
    %c0_6 = arith.constant 0 : index
    %c0_7 = arith.constant 0 : index
    %7 = vector.load %arg4[%c0_6, %c0_7] : memref<8x256xf32, #tpu.memory_space<vmem>>, vector<1x256xf32>
    tpu.vector_store %arg4[%c0_6, %c0_7], %6 {strides = array<i32>} : memref<8x256xf32, #tpu.memory_space<vmem>>, vector<1x256xf32>,
    %8 = arith.mulf %2, %2 : vector<56x256xf32>
    %cst_8 = arith.constant dense<0.000000e+00> : vector<256xf32>
    %9 = vector.multi_reduction <add>, %8, %cst_8 [0] : vector<56x256xf32> to vector<256xf32>
    %10 = vector.shape_cast %9 : vector<256xf32> to vector<1x256xf32>
    %c1 = arith.constant 1 : index
    %c0_9 = arith.constant 0 : index
    %11 = vector.load %arg4[%c1, %c0_9] : memref<8x256xf32, #tpu.memory_space<vmem>>, vector<1x256xf32>
    tpu.vector_store %arg4[%c1, %c0_9], %10 {strides = array<i32>} : memref<8x256xf32, #tpu.memory_space<vmem>>, vector<1x256xf32>,
    return
  }
  func.func @transform_0(%arg0: i32) -> (i32, i32) {
    %c0_i32 = arith.constant 0 : i32
    %c0_i32_0 = arith.constant 0 : i32
    return %arg0, %c0_i32 : i32, i32
  }
  func.func @transform_1(%arg0: i32) -> (i32, i32) {
    %c0_i32 = arith.constant 0 : i32
    %c0_i32_0 = arith.constant 0 : i32
    %c0_i32_1 = arith.constant 0 : i32
    return %c0_i32, %c0_i32_0 : i32, i32
  }
  func.func @transform_2(%arg0: i32) -> (i32, i32) {
    %c0_i32 = arith.constant 0 : i32
    %c0_i32_0 = arith.constant 0 : i32
    return %arg0, %c0_i32 : i32, i32
  }
  func.func @transform_3(%arg0: i32) -> (i32, i32) {
    %c0_i32 = arith.constant 0 : i32
    %c0_i32_0 = arith.constant 0 : i32
    return %arg0, %c0_i32 : i32, i32
  }
}

module attributes {stable_mosaic.version = 11 : i64} {
  func.func @_bn_relu_kernel(%arg0: i32, %arg1: memref<56x256xbf16, #tpu.memory_space<vmem>>, %arg2: memref<1x256xf32, #tpu.memory_space<vmem>>, %arg3: memref<1x256xf32, #tpu.memory_space<vmem>>, %arg4: memref<56x256xbf16, #tpu.memory_space<vmem>>) attributes {dimension_semantics = [#tpu.dimension_semantics<parallel>], iteration_bounds = array<i64: 2>, scalar_prefetch = 0 : i64, scratch_operands = 0 : i64, tpu.core_type = #tpu.core_type<tc>, window_params = [{transform_indices = @transform_0, window_bounds = array<i64: 56, 256>}, {pipeline_mode = #tpu.pipeline_mode<synchronous>, transform_indices = @transform_1, window_bounds = array<i64: 1, 256>}, {pipeline_mode = #tpu.pipeline_mode<synchronous>, transform_indices = @transform_2, window_bounds = array<i64: 1, 256>}, {transform_indices = @transform_3, window_bounds = array<i64: 56, 256>}]} {
    %c0 = arith.constant 0 : index
    %c0_0 = arith.constant 0 : index
    %0 = vector.load %arg1[%c0, %c0_0] : memref<56x256xbf16, #tpu.memory_space<vmem>>, vector<56x256xbf16>
    %1 = arith.extf %0 : vector<56x256xbf16> to vector<56x256xf32>
    %c0_1 = arith.constant 0 : index
    %c0_2 = arith.constant 0 : index
    %2 = vector.load %arg2[%c0_1, %c0_2] : memref<1x256xf32, #tpu.memory_space<vmem>>, vector<1x256xf32>
    %3 = vector.broadcast %2 : vector<1x256xf32> to vector<56x256xf32>
    %4 = arith.mulf %1, %3 : vector<56x256xf32>
    %c0_3 = arith.constant 0 : index
    %c0_4 = arith.constant 0 : index
    %5 = vector.load %arg3[%c0_3, %c0_4] : memref<1x256xf32, #tpu.memory_space<vmem>>, vector<1x256xf32>
    %6 = vector.broadcast %5 : vector<1x256xf32> to vector<56x256xf32>
    %7 = arith.addf %4, %6 : vector<56x256xf32>
    %cst = arith.constant 0.000000e+00 : f32
    %8 = vector.broadcast %cst : f32 to vector<56x256xf32>
    %9 = arith.maximumf %7, %8 : vector<56x256xf32>
    %10 = arith.truncf %9 : vector<56x256xf32> to vector<56x256xbf16>
    %c0_5 = arith.constant 0 : index
    %c0_6 = arith.constant 0 : index
    %11 = vector.load %arg4[%c0_5, %c0_6] : memref<56x256xbf16, #tpu.memory_space<vmem>>, vector<56x256xbf16>
    tpu.vector_store %arg4[%c0_5, %c0_6], %10 {strides = array<i32>} : memref<56x256xbf16, #tpu.memory_space<vmem>>, vector<56x256xbf16>,
    return
  }
  func.func @transform_0(%arg0: i32) -> (i32, i32) {
    %c0_i32 = arith.constant 0 : i32
    %c0_i32_0 = arith.constant 0 : i32
    return %arg0, %c0_i32 : i32, i32
  }
  func.func @transform_1(%arg0: i32) -> (i32, i32) {
    %c0_i32 = arith.constant 0 : i32
    %c0_i32_0 = arith.constant 0 : i32
    %c0_i32_1 = arith.constant 0 : i32
    return %c0_i32, %c0_i32_0 : i32, i32
  }
  func.func @transform_2(%arg0: i32) -> (i32, i32) {
    %c0_i32 = arith.constant 0 : i32
    %c0_i32_0 = arith.constant 0 : i32
    %c0_i32_1 = arith.constant 0 : i32
    return %c0_i32, %c0_i32_0 : i32, i32
  }
  func.func @transform_3(%arg0: i32) -> (i32, i32) {
    %c0_i32 = arith.constant 0 : i32
    %c0_i32_0 = arith.constant 0 : i32
    return %arg0, %c0_i32 : i32, i32
  }
}

module attributes {stable_mosaic.version = 11 : i64} {
  func.func @_maxpool_rows_kernel(%arg0: i32, %arg1: i32, %arg2: memref<1x1x3x256xbf16, #tpu.memory_space<vmem>>, %arg3: memref<1x1x3x256xbf16, #tpu.memory_space<vmem>>, %arg4: memref<1x1x3x256xbf16, #tpu.memory_space<vmem>>, %arg5: memref<1x1x3x256xbf16, #tpu.memory_space<vmem>>) attributes {dimension_semantics = [#tpu.dimension_semantics<parallel>, #tpu.dimension_semantics<parallel>], iteration_bounds = array<i64: 2, 3>, scalar_prefetch = 0 : i64, scratch_operands = 0 : i64, tpu.core_type = #tpu.core_type<tc>, window_params = [{transform_indices = @transform_0, window_bounds = array<i64: 1, 1, 3, 256>}, {transform_indices = @transform_1, window_bounds = array<i64: 1, 1, 3, 256>}, {transform_indices = @transform_2, window_bounds = array<i64: 1, 1, 3, 256>}, {transform_indices = @transform_3, window_bounds = array<i64: 1, 1, 3, 256>}]} {
    %c0 = arith.constant 0 : index
    %c0_0 = arith.constant 0 : index
    %c0_1 = arith.constant 0 : index
    %c0_2 = arith.constant 0 : index
    %0 = vector.load %arg2[%c0, %c0_0, %c0_1, %c0_2] : memref<1x1x3x256xbf16, #tpu.memory_space<vmem>>, vector<1x1x3x256xbf16>
    %1 = arith.extf %0 : vector<1x1x3x256xbf16> to vector<1x1x3x256xf32>
    %c0_3 = arith.constant 0 : index
    %c0_4 = arith.constant 0 : index
    %c0_5 = arith.constant 0 : index
    %c0_6 = arith.constant 0 : index
    %2 = vector.load %arg3[%c0_3, %c0_4, %c0_5, %c0_6] : memref<1x1x3x256xbf16, #tpu.memory_space<vmem>>, vector<1x1x3x256xbf16>
    %3 = arith.extf %2 : vector<1x1x3x256xbf16> to vector<1x1x3x256xf32>
    %4 = arith.maximumf %1, %3 : vector<1x1x3x256xf32>
    %c0_7 = arith.constant 0 : index
    %c0_8 = arith.constant 0 : index
    %c0_9 = arith.constant 0 : index
    %c0_10 = arith.constant 0 : index
    %5 = vector.load %arg4[%c0_7, %c0_8, %c0_9, %c0_10] : memref<1x1x3x256xbf16, #tpu.memory_space<vmem>>, vector<1x1x3x256xbf16>
    %6 = arith.extf %5 : vector<1x1x3x256xbf16> to vector<1x1x3x256xf32>
    %7 = arith.maximumf %4, %6 : vector<1x1x3x256xf32>
    %8 = arith.truncf %7 : vector<1x1x3x256xf32> to vector<1x1x3x256xbf16>
    %c0_11 = arith.constant 0 : index
    %c0_12 = arith.constant 0 : index
    %c0_13 = arith.constant 0 : index
    %c0_14 = arith.constant 0 : index
    %9 = vector.load %arg5[%c0_11, %c0_12, %c0_13, %c0_14] : memref<1x1x3x256xbf16, #tpu.memory_space<vmem>>, vector<1x1x3x256xbf16>
    tpu.vector_store %arg5[%c0_11, %c0_12, %c0_13, %c0_14], %8 {strides = array<i32>} : memref<1x1x3x256xbf16, #tpu.memory_space<vmem>>, vector<1x1x3x256xbf16>,
    return
  }
  func.func @transform_0(%arg0: i32, %arg1: i32) -> (i32, i32, i32, i32) {
    %c2_i32 = arith.constant 2 : i32
    %0 = arith.muli %c2_i32, %arg1 : i32
    %c0_i32 = arith.constant 0 : i32
    %1 = arith.addi %0, %c0_i32 : i32
    %c0_i32_0 = arith.constant 0 : i32
    %c0_i32_1 = arith.constant 0 : i32
    %c0_i32_2 = arith.constant 0 : i32
    return %arg0, %1, %c0_i32_0, %c0_i32_1 : i32, i32, i32, i32
  }
  func.func @transform_1(%arg0: i32, %arg1: i32) -> (i32, i32, i32, i32) {
    %c2_i32 = arith.constant 2 : i32
    %0 = arith.muli %c2_i32, %arg1 : i32
    %c1_i32 = arith.constant 1 : i32
    %1 = arith.addi %0, %c1_i32 : i32
    %c0_i32 = arith.constant 0 : i32
    %c0_i32_0 = arith.constant 0 : i32
    %c0_i32_1 = arith.constant 0 : i32
    return %arg0, %1, %c0_i32, %c0_i32_0 : i32, i32, i32, i32
  }
  func.func @transform_2(%arg0: i32, %arg1: i32) -> (i32, i32, i32, i32) {
    %c2_i32 = arith.constant 2 : i32
    %0 = arith.muli %c2_i32, %arg1 : i32
    %c2_i32_0 = arith.constant 2 : i32
    %1 = arith.addi %0, %c2_i32_0 : i32
    %c0_i32 = arith.constant 0 : i32
    %c0_i32_1 = arith.constant 0 : i32
    %c0_i32_2 = arith.constant 0 : i32
    return %arg0, %1, %c0_i32, %c0_i32_1 : i32, i32, i32, i32
  }
  func.func @transform_3(%arg0: i32, %arg1: i32) -> (i32, i32, i32, i32) {
    %c0_i32 = arith.constant 0 : i32
    %c0_i32_0 = arith.constant 0 : i32
    %c0_i32_1 = arith.constant 0 : i32
    return %arg0, %arg1, %c0_i32, %c0_i32_0 : i32, i32, i32, i32
  }
}

module attributes {stable_mosaic.version = 11 : i64} {
  func.func @_matmul_stats_kernel(%arg0: i32, %arg1: memref<16x2304xbf16, #tpu.memory_space<vmem>>, %arg2: memref<2304x384xbf16, #tpu.memory_space<vmem>>, %arg3: memref<16x384xbf16, #tpu.memory_space<vmem>>, %arg4: memref<8x384xf32, #tpu.memory_space<vmem>>) attributes {dimension_semantics = [#tpu.dimension_semantics<parallel>], iteration_bounds = array<i64: 2>, scalar_prefetch = 0 : i64, scratch_operands = 0 : i64, tpu.core_type = #tpu.core_type<tc>, window_params = [{transform_indices = @transform_0, window_bounds = array<i64: 16, 2304>}, {pipeline_mode = #tpu.pipeline_mode<synchronous>, transform_indices = @transform_1, window_bounds = array<i64: 2304, 384>}, {transform_indices = @transform_2, window_bounds = array<i64: 16, 384>}, {transform_indices = @transform_3, window_bounds = array<i64: 8, 384>}]} {
    %c0 = arith.constant 0 : index
    %c0_0 = arith.constant 0 : index
    %0 = vector.load %arg1[%c0, %c0_0] : memref<16x2304xbf16, #tpu.memory_space<vmem>>, vector<16x2304xbf16>
    %c0_1 = arith.constant 0 : index
    %c0_2 = arith.constant 0 : index
    %1 = vector.load %arg2[%c0_1, %c0_2] : memref<2304x384xbf16, #tpu.memory_space<vmem>>, vector<2304x384xbf16>
    %cst = arith.constant dense<0.000000e+00> : vector<16x384xf32>
    %2 = tpu.matmul %0, %1, %cst {dimension_numbers = #tpu.dot_dimension_numbers<[1], [0], [0], [1], [0, 0, 1, 1], [], []>} : vector<16x2304xbf16>, vector<2304x384xbf16>, vector<16x384xf32> -> vector<16x384xf32>
    %3 = arith.truncf %2 : vector<16x384xf32> to vector<16x384xbf16>
    %c0_3 = arith.constant 0 : index
    %c0_4 = arith.constant 0 : index
    %4 = vector.load %arg3[%c0_3, %c0_4] : memref<16x384xbf16, #tpu.memory_space<vmem>>, vector<16x384xbf16>
    tpu.vector_store %arg3[%c0_3, %c0_4], %3 {strides = array<i32>} : memref<16x384xbf16, #tpu.memory_space<vmem>>, vector<16x384xbf16>,
    %cst_5 = arith.constant dense<0.000000e+00> : vector<384xf32>
    %5 = vector.multi_reduction <add>, %2, %cst_5 [0] : vector<16x384xf32> to vector<384xf32>
    %6 = vector.shape_cast %5 : vector<384xf32> to vector<1x384xf32>
    %c0_6 = arith.constant 0 : index
    %c0_7 = arith.constant 0 : index
    %7 = vector.load %arg4[%c0_6, %c0_7] : memref<8x384xf32, #tpu.memory_space<vmem>>, vector<1x384xf32>
    tpu.vector_store %arg4[%c0_6, %c0_7], %6 {strides = array<i32>} : memref<8x384xf32, #tpu.memory_space<vmem>>, vector<1x384xf32>,
    %8 = arith.mulf %2, %2 : vector<16x384xf32>
    %cst_8 = arith.constant dense<0.000000e+00> : vector<384xf32>
    %9 = vector.multi_reduction <add>, %8, %cst_8 [0] : vector<16x384xf32> to vector<384xf32>
    %10 = vector.shape_cast %9 : vector<384xf32> to vector<1x384xf32>
    %c1 = arith.constant 1 : index
    %c0_9 = arith.constant 0 : index
    %11 = vector.load %arg4[%c1, %c0_9] : memref<8x384xf32, #tpu.memory_space<vmem>>, vector<1x384xf32>
    tpu.vector_store %arg4[%c1, %c0_9], %10 {strides = array<i32>} : memref<8x384xf32, #tpu.memory_space<vmem>>, vector<1x384xf32>,
    return
  }
  func.func @transform_0(%arg0: i32) -> (i32, i32) {
    %c0_i32 = arith.constant 0 : i32
    %c0_i32_0 = arith.constant 0 : i32
    return %arg0, %c0_i32 : i32, i32
  }
  func.func @transform_1(%arg0: i32) -> (i32, i32) {
    %c0_i32 = arith.constant 0 : i32
    %c0_i32_0 = arith.constant 0 : i32
    %c0_i32_1 = arith.constant 0 : i32
    return %c0_i32, %c0_i32_0 : i32, i32
  }
  func.func @transform_2(%arg0: i32) -> (i32, i32) {
    %c0_i32 = arith.constant 0 : i32
    %c0_i32_0 = arith.constant 0 : i32
    return %arg0, %c0_i32 : i32, i32
  }
  func.func @transform_3(%arg0: i32) -> (i32, i32) {
    %c0_i32 = arith.constant 0 : i32
    %c0_i32_0 = arith.constant 0 : i32
    return %arg0, %c0_i32 : i32, i32
  }
}

module attributes {stable_mosaic.version = 11 : i64} {
  func.func @_bn_relu_kernel(%arg0: i32, %arg1: memref<16x384xbf16, #tpu.memory_space<vmem>>, %arg2: memref<1x384xf32, #tpu.memory_space<vmem>>, %arg3: memref<1x384xf32, #tpu.memory_space<vmem>>, %arg4: memref<16x384xbf16, #tpu.memory_space<vmem>>) attributes {dimension_semantics = [#tpu.dimension_semantics<parallel>], iteration_bounds = array<i64: 2>, scalar_prefetch = 0 : i64, scratch_operands = 0 : i64, tpu.core_type = #tpu.core_type<tc>, window_params = [{transform_indices = @transform_0, window_bounds = array<i64: 16, 384>}, {pipeline_mode = #tpu.pipeline_mode<synchronous>, transform_indices = @transform_1, window_bounds = array<i64: 1, 384>}, {pipeline_mode = #tpu.pipeline_mode<synchronous>, transform_indices = @transform_2, window_bounds = array<i64: 1, 384>}, {transform_indices = @transform_3, window_bounds = array<i64: 16, 384>}]} {
    %c0 = arith.constant 0 : index
    %c0_0 = arith.constant 0 : index
    %0 = vector.load %arg1[%c0, %c0_0] : memref<16x384xbf16, #tpu.memory_space<vmem>>, vector<16x384xbf16>
    %1 = arith.extf %0 : vector<16x384xbf16> to vector<16x384xf32>
    %c0_1 = arith.constant 0 : index
    %c0_2 = arith.constant 0 : index
    %2 = vector.load %arg2[%c0_1, %c0_2] : memref<1x384xf32, #tpu.memory_space<vmem>>, vector<1x384xf32>
    %3 = vector.broadcast %2 : vector<1x384xf32> to vector<16x384xf32>
    %4 = arith.mulf %1, %3 : vector<16x384xf32>
    %c0_3 = arith.constant 0 : index
    %c0_4 = arith.constant 0 : index
    %5 = vector.load %arg3[%c0_3, %c0_4] : memref<1x384xf32, #tpu.memory_space<vmem>>, vector<1x384xf32>
    %6 = vector.broadcast %5 : vector<1x384xf32> to vector<16x384xf32>
    %7 = arith.addf %4, %6 : vector<16x384xf32>
    %cst = arith.constant 0.000000e+00 : f32
    %8 = vector.broadcast %cst : f32 to vector<16x384xf32>
    %9 = arith.maximumf %7, %8 : vector<16x384xf32>
    %10 = arith.truncf %9 : vector<16x384xf32> to vector<16x384xbf16>
    %c0_5 = arith.constant 0 : index
    %c0_6 = arith.constant 0 : index
    %11 = vector.load %arg4[%c0_5, %c0_6] : memref<16x384xbf16, #tpu.memory_space<vmem>>, vector<16x384xbf16>
    tpu.vector_store %arg4[%c0_5, %c0_6], %10 {strides = array<i32>} : memref<16x384xbf16, #tpu.memory_space<vmem>>, vector<16x384xbf16>,
    return
  }
  func.func @transform_0(%arg0: i32) -> (i32, i32) {
    %c0_i32 = arith.constant 0 : i32
    %c0_i32_0 = arith.constant 0 : i32
    return %arg0, %c0_i32 : i32, i32
  }
  func.func @transform_1(%arg0: i32) -> (i32, i32) {
    %c0_i32 = arith.constant 0 : i32
    %c0_i32_0 = arith.constant 0 : i32
    %c0_i32_1 = arith.constant 0 : i32
    return %c0_i32, %c0_i32_0 : i32, i32
  }
  func.func @transform_2(%arg0: i32) -> (i32, i32) {
    %c0_i32 = arith.constant 0 : i32
    %c0_i32_0 = arith.constant 0 : i32
    %c0_i32_1 = arith.constant 0 : i32
    return %c0_i32, %c0_i32_0 : i32, i32
  }
  func.func @transform_3(%arg0: i32) -> (i32, i32) {
    %c0_i32 = arith.constant 0 : i32
    %c0_i32_0 = arith.constant 0 : i32
    return %arg0, %c0_i32 : i32, i32
  }
}

module attributes {stable_mosaic.version = 11 : i64} {
  func.func @_matmul_stats_kernel(%arg0: i32, %arg1: memref<16x3456xbf16, #tpu.memory_space<vmem>>, %arg2: memref<3456x256xbf16, #tpu.memory_space<vmem>>, %arg3: memref<16x256xbf16, #tpu.memory_space<vmem>>, %arg4: memref<8x256xf32, #tpu.memory_space<vmem>>) attributes {dimension_semantics = [#tpu.dimension_semantics<parallel>], iteration_bounds = array<i64: 2>, scalar_prefetch = 0 : i64, scratch_operands = 0 : i64, tpu.core_type = #tpu.core_type<tc>, window_params = [{transform_indices = @transform_0, window_bounds = array<i64: 16, 3456>}, {pipeline_mode = #tpu.pipeline_mode<synchronous>, transform_indices = @transform_1, window_bounds = array<i64: 3456, 256>}, {transform_indices = @transform_2, window_bounds = array<i64: 16, 256>}, {transform_indices = @transform_3, window_bounds = array<i64: 8, 256>}]} {
    %c0 = arith.constant 0 : index
    %c0_0 = arith.constant 0 : index
    %0 = vector.load %arg1[%c0, %c0_0] : memref<16x3456xbf16, #tpu.memory_space<vmem>>, vector<16x3456xbf16>
    %c0_1 = arith.constant 0 : index
    %c0_2 = arith.constant 0 : index
    %1 = vector.load %arg2[%c0_1, %c0_2] : memref<3456x256xbf16, #tpu.memory_space<vmem>>, vector<3456x256xbf16>
    %cst = arith.constant dense<0.000000e+00> : vector<16x256xf32>
    %2 = tpu.matmul %0, %1, %cst {dimension_numbers = #tpu.dot_dimension_numbers<[1], [0], [0], [1], [0, 0, 1, 1], [], []>} : vector<16x3456xbf16>, vector<3456x256xbf16>, vector<16x256xf32> -> vector<16x256xf32>
    %3 = arith.truncf %2 : vector<16x256xf32> to vector<16x256xbf16>
    %c0_3 = arith.constant 0 : index
    %c0_4 = arith.constant 0 : index
    %4 = vector.load %arg3[%c0_3, %c0_4] : memref<16x256xbf16, #tpu.memory_space<vmem>>, vector<16x256xbf16>
    tpu.vector_store %arg3[%c0_3, %c0_4], %3 {strides = array<i32>} : memref<16x256xbf16, #tpu.memory_space<vmem>>, vector<16x256xbf16>,
    %cst_5 = arith.constant dense<0.000000e+00> : vector<256xf32>
    %5 = vector.multi_reduction <add>, %2, %cst_5 [0] : vector<16x256xf32> to vector<256xf32>
    %6 = vector.shape_cast %5 : vector<256xf32> to vector<1x256xf32>
    %c0_6 = arith.constant 0 : index
    %c0_7 = arith.constant 0 : index
    %7 = vector.load %arg4[%c0_6, %c0_7] : memref<8x256xf32, #tpu.memory_space<vmem>>, vector<1x256xf32>
    tpu.vector_store %arg4[%c0_6, %c0_7], %6 {strides = array<i32>} : memref<8x256xf32, #tpu.memory_space<vmem>>, vector<1x256xf32>,
    %8 = arith.mulf %2, %2 : vector<16x256xf32>
    %cst_8 = arith.constant dense<0.000000e+00> : vector<256xf32>
    %9 = vector.multi_reduction <add>, %8, %cst_8 [0] : vector<16x256xf32> to vector<256xf32>
    %10 = vector.shape_cast %9 : vector<256xf32> to vector<1x256xf32>
    %c1 = arith.constant 1 : index
    %c0_9 = arith.constant 0 : index
    %11 = vector.load %arg4[%c1, %c0_9] : memref<8x256xf32, #tpu.memory_space<vmem>>, vector<1x256xf32>
    tpu.vector_store %arg4[%c1, %c0_9], %10 {strides = array<i32>} : memref<8x256xf32, #tpu.memory_space<vmem>>, vector<1x256xf32>,
    return
  }
  func.func @transform_0(%arg0: i32) -> (i32, i32) {
    %c0_i32 = arith.constant 0 : i32
    %c0_i32_0 = arith.constant 0 : i32
    return %arg0, %c0_i32 : i32, i32
  }
  func.func @transform_1(%arg0: i32) -> (i32, i32) {
    %c0_i32 = arith.constant 0 : i32
    %c0_i32_0 = arith.constant 0 : i32
    %c0_i32_1 = arith.constant 0 : i32
    return %c0_i32, %c0_i32_0 : i32, i32
  }
  func.func @transform_2(%arg0: i32) -> (i32, i32) {
    %c0_i32 = arith.constant 0 : i32
    %c0_i32_0 = arith.constant 0 : i32
    return %arg0, %c0_i32 : i32, i32
  }
  func.func @transform_3(%arg0: i32) -> (i32, i32) {
    %c0_i32 = arith.constant 0 : i32
    %c0_i32_0 = arith.constant 0 : i32
    return %arg0, %c0_i32 : i32, i32
  }
}

module attributes {stable_mosaic.version = 11 : i64} {
  func.func @_bn_relu_kernel(%arg0: i32, %arg1: memref<16x256xbf16, #tpu.memory_space<vmem>>, %arg2: memref<1x256xf32, #tpu.memory_space<vmem>>, %arg3: memref<1x256xf32, #tpu.memory_space<vmem>>, %arg4: memref<16x256xbf16, #tpu.memory_space<vmem>>) attributes {dimension_semantics = [#tpu.dimension_semantics<parallel>], iteration_bounds = array<i64: 2>, scalar_prefetch = 0 : i64, scratch_operands = 0 : i64, tpu.core_type = #tpu.core_type<tc>, window_params = [{transform_indices = @transform_0, window_bounds = array<i64: 16, 256>}, {pipeline_mode = #tpu.pipeline_mode<synchronous>, transform_indices = @transform_1, window_bounds = array<i64: 1, 256>}, {pipeline_mode = #tpu.pipeline_mode<synchronous>, transform_indices = @transform_2, window_bounds = array<i64: 1, 256>}, {transform_indices = @transform_3, window_bounds = array<i64: 16, 256>}]} {
    %c0 = arith.constant 0 : index
    %c0_0 = arith.constant 0 : index
    %0 = vector.load %arg1[%c0, %c0_0] : memref<16x256xbf16, #tpu.memory_space<vmem>>, vector<16x256xbf16>
    %1 = arith.extf %0 : vector<16x256xbf16> to vector<16x256xf32>
    %c0_1 = arith.constant 0 : index
    %c0_2 = arith.constant 0 : index
    %2 = vector.load %arg2[%c0_1, %c0_2] : memref<1x256xf32, #tpu.memory_space<vmem>>, vector<1x256xf32>
    %3 = vector.broadcast %2 : vector<1x256xf32> to vector<16x256xf32>
    %4 = arith.mulf %1, %3 : vector<16x256xf32>
    %c0_3 = arith.constant 0 : index
    %c0_4 = arith.constant 0 : index
    %5 = vector.load %arg3[%c0_3, %c0_4] : memref<1x256xf32, #tpu.memory_space<vmem>>, vector<1x256xf32>
    %6 = vector.broadcast %5 : vector<1x256xf32> to vector<16x256xf32>
    %7 = arith.addf %4, %6 : vector<16x256xf32>
    %cst = arith.constant 0.000000e+00 : f32
    %8 = vector.broadcast %cst : f32 to vector<16x256xf32>
    %9 = arith.maximumf %7, %8 : vector<16x256xf32>
    %10 = arith.truncf %9 : vector<16x256xf32> to vector<16x256xbf16>
    %c0_5 = arith.constant 0 : index
    %c0_6 = arith.constant 0 : index
    %11 = vector.load %arg4[%c0_5, %c0_6] : memref<16x256xbf16, #tpu.memory_space<vmem>>, vector<16x256xbf16>
    tpu.vector_store %arg4[%c0_5, %c0_6], %10 {strides = array<i32>} : memref<16x256xbf16, #tpu.memory_space<vmem>>, vector<16x256xbf16>,
    return
  }
  func.func @transform_0(%arg0: i32) -> (i32, i32) {
    %c0_i32 = arith.constant 0 : i32
    %c0_i32_0 = arith.constant 0 : i32
    return %arg0, %c0_i32 : i32, i32
  }
  func.func @transform_1(%arg0: i32) -> (i32, i32) {
    %c0_i32 = arith.constant 0 : i32
    %c0_i32_0 = arith.constant 0 : i32
    %c0_i32_1 = arith.constant 0 : i32
    return %c0_i32, %c0_i32_0 : i32, i32
  }
  func.func @transform_2(%arg0: i32) -> (i32, i32) {
    %c0_i32 = arith.constant 0 : i32
    %c0_i32_0 = arith.constant 0 : i32
    %c0_i32_1 = arith.constant 0 : i32
    return %c0_i32, %c0_i32_0 : i32, i32
  }
  func.func @transform_3(%arg0: i32) -> (i32, i32) {
    %c0_i32 = arith.constant 0 : i32
    %c0_i32_0 = arith.constant 0 : i32
    return %arg0, %c0_i32 : i32, i32
  }
}

module attributes {stable_mosaic.version = 11 : i64} {
  func.func @_matmul_stats_kernel(%arg0: i32, %arg1: memref<16x2304xbf16, #tpu.memory_space<vmem>>, %arg2: memref<2304x256xbf16, #tpu.memory_space<vmem>>, %arg3: memref<16x256xbf16, #tpu.memory_space<vmem>>, %arg4: memref<8x256xf32, #tpu.memory_space<vmem>>) attributes {dimension_semantics = [#tpu.dimension_semantics<parallel>], iteration_bounds = array<i64: 2>, scalar_prefetch = 0 : i64, scratch_operands = 0 : i64, tpu.core_type = #tpu.core_type<tc>, window_params = [{transform_indices = @transform_0, window_bounds = array<i64: 16, 2304>}, {pipeline_mode = #tpu.pipeline_mode<synchronous>, transform_indices = @transform_1, window_bounds = array<i64: 2304, 256>}, {transform_indices = @transform_2, window_bounds = array<i64: 16, 256>}, {transform_indices = @transform_3, window_bounds = array<i64: 8, 256>}]} {
    %c0 = arith.constant 0 : index
    %c0_0 = arith.constant 0 : index
    %0 = vector.load %arg1[%c0, %c0_0] : memref<16x2304xbf16, #tpu.memory_space<vmem>>, vector<16x2304xbf16>
    %c0_1 = arith.constant 0 : index
    %c0_2 = arith.constant 0 : index
    %1 = vector.load %arg2[%c0_1, %c0_2] : memref<2304x256xbf16, #tpu.memory_space<vmem>>, vector<2304x256xbf16>
    %cst = arith.constant dense<0.000000e+00> : vector<16x256xf32>
    %2 = tpu.matmul %0, %1, %cst {dimension_numbers = #tpu.dot_dimension_numbers<[1], [0], [0], [1], [0, 0, 1, 1], [], []>} : vector<16x2304xbf16>, vector<2304x256xbf16>, vector<16x256xf32> -> vector<16x256xf32>
    %3 = arith.truncf %2 : vector<16x256xf32> to vector<16x256xbf16>
    %c0_3 = arith.constant 0 : index
    %c0_4 = arith.constant 0 : index
    %4 = vector.load %arg3[%c0_3, %c0_4] : memref<16x256xbf16, #tpu.memory_space<vmem>>, vector<16x256xbf16>
    tpu.vector_store %arg3[%c0_3, %c0_4], %3 {strides = array<i32>} : memref<16x256xbf16, #tpu.memory_space<vmem>>, vector<16x256xbf16>,
    %cst_5 = arith.constant dense<0.000000e+00> : vector<256xf32>
    %5 = vector.multi_reduction <add>, %2, %cst_5 [0] : vector<16x256xf32> to vector<256xf32>
    %6 = vector.shape_cast %5 : vector<256xf32> to vector<1x256xf32>
    %c0_6 = arith.constant 0 : index
    %c0_7 = arith.constant 0 : index
    %7 = vector.load %arg4[%c0_6, %c0_7] : memref<8x256xf32, #tpu.memory_space<vmem>>, vector<1x256xf32>
    tpu.vector_store %arg4[%c0_6, %c0_7], %6 {strides = array<i32>} : memref<8x256xf32, #tpu.memory_space<vmem>>, vector<1x256xf32>,
    %8 = arith.mulf %2, %2 : vector<16x256xf32>
    %cst_8 = arith.constant dense<0.000000e+00> : vector<256xf32>
    %9 = vector.multi_reduction <add>, %8, %cst_8 [0] : vector<16x256xf32> to vector<256xf32>
    %10 = vector.shape_cast %9 : vector<256xf32> to vector<1x256xf32>
    %c1 = arith.constant 1 : index
    %c0_9 = arith.constant 0 : index
    %11 = vector.load %arg4[%c1, %c0_9] : memref<8x256xf32, #tpu.memory_space<vmem>>, vector<1x256xf32>
    tpu.vector_store %arg4[%c1, %c0_9], %10 {strides = array<i32>} : memref<8x256xf32, #tpu.memory_space<vmem>>, vector<1x256xf32>,
    return
  }
  func.func @transform_0(%arg0: i32) -> (i32, i32) {
    %c0_i32 = arith.constant 0 : i32
    %c0_i32_0 = arith.constant 0 : i32
    return %arg0, %c0_i32 : i32, i32
  }
  func.func @transform_1(%arg0: i32) -> (i32, i32) {
    %c0_i32 = arith.constant 0 : i32
    %c0_i32_0 = arith.constant 0 : i32
    %c0_i32_1 = arith.constant 0 : i32
    return %c0_i32, %c0_i32_0 : i32, i32
  }
  func.func @transform_2(%arg0: i32) -> (i32, i32) {
    %c0_i32 = arith.constant 0 : i32
    %c0_i32_0 = arith.constant 0 : i32
    return %arg0, %c0_i32 : i32, i32
  }
  func.func @transform_3(%arg0: i32) -> (i32, i32) {
    %c0_i32 = arith.constant 0 : i32
    %c0_i32_0 = arith.constant 0 : i32
    return %arg0, %c0_i32 : i32, i32
  }
}

module attributes {stable_mosaic.version = 11 : i64} {
  func.func @_maxpool_rows_kernel(%arg0: i32, %arg1: i32, %arg2: memref<1x1x1x256xbf16, #tpu.memory_space<vmem>>, %arg3: memref<1x1x1x256xbf16, #tpu.memory_space<vmem>>, %arg4: memref<1x1x1x256xbf16, #tpu.memory_space<vmem>>, %arg5: memref<1x1x1x256xbf16, #tpu.memory_space<vmem>>) attributes {dimension_semantics = [#tpu.dimension_semantics<parallel>, #tpu.dimension_semantics<parallel>], iteration_bounds = array<i64: 2, 1>, scalar_prefetch = 0 : i64, scratch_operands = 0 : i64, tpu.core_type = #tpu.core_type<tc>, window_params = [{transform_indices = @transform_0, window_bounds = array<i64: 1, 1, 1, 256>}, {transform_indices = @transform_1, window_bounds = array<i64: 1, 1, 1, 256>}, {transform_indices = @transform_2, window_bounds = array<i64: 1, 1, 1, 256>}, {transform_indices = @transform_3, window_bounds = array<i64: 1, 1, 1, 256>}]} {
    %c0 = arith.constant 0 : index
    %c0_0 = arith.constant 0 : index
    %c0_1 = arith.constant 0 : index
    %c0_2 = arith.constant 0 : index
    %0 = vector.load %arg2[%c0, %c0_0, %c0_1, %c0_2] : memref<1x1x1x256xbf16, #tpu.memory_space<vmem>>, vector<1x1x1x256xbf16>
    %1 = arith.extf %0 : vector<1x1x1x256xbf16> to vector<1x1x1x256xf32>
    %c0_3 = arith.constant 0 : index
    %c0_4 = arith.constant 0 : index
    %c0_5 = arith.constant 0 : index
    %c0_6 = arith.constant 0 : index
    %2 = vector.load %arg3[%c0_3, %c0_4, %c0_5, %c0_6] : memref<1x1x1x256xbf16, #tpu.memory_space<vmem>>, vector<1x1x1x256xbf16>
    %3 = arith.extf %2 : vector<1x1x1x256xbf16> to vector<1x1x1x256xf32>
    %4 = arith.maximumf %1, %3 : vector<1x1x1x256xf32>
    %c0_7 = arith.constant 0 : index
    %c0_8 = arith.constant 0 : index
    %c0_9 = arith.constant 0 : index
    %c0_10 = arith.constant 0 : index
    %5 = vector.load %arg4[%c0_7, %c0_8, %c0_9, %c0_10] : memref<1x1x1x256xbf16, #tpu.memory_space<vmem>>, vector<1x1x1x256xbf16>
    %6 = arith.extf %5 : vector<1x1x1x256xbf16> to vector<1x1x1x256xf32>
    %7 = arith.maximumf %4, %6 : vector<1x1x1x256xf32>
    %8 = arith.truncf %7 : vector<1x1x1x256xf32> to vector<1x1x1x256xbf16>
    %c0_11 = arith.constant 0 : index
    %c0_12 = arith.constant 0 : index
    %c0_13 = arith.constant 0 : index
    %c0_14 = arith.constant 0 : index
    %9 = vector.load %arg5[%c0_11, %c0_12, %c0_13, %c0_14] : memref<1x1x1x256xbf16, #tpu.memory_space<vmem>>, vector<1x1x1x256xbf16>
    tpu.vector_store %arg5[%c0_11, %c0_12, %c0_13, %c0_14], %8 {strides = array<i32>} : memref<1x1x1x256xbf16, #tpu.memory_space<vmem>>, vector<1x1x1x256xbf16>,
    return
  }
  func.func @transform_0(%arg0: i32, %arg1: i32) -> (i32, i32, i32, i32) {
    %c2_i32 = arith.constant 2 : i32
    %0 = arith.muli %c2_i32, %arg1 : i32
    %c0_i32 = arith.constant 0 : i32
    %1 = arith.addi %0, %c0_i32 : i32
    %c0_i32_0 = arith.constant 0 : i32
    %c0_i32_1 = arith.constant 0 : i32
    %c0_i32_2 = arith.constant 0 : i32
    return %arg0, %1, %c0_i32_0, %c0_i32_1 : i32, i32, i32, i32
  }
  func.func @transform_1(%arg0: i32, %arg1: i32) -> (i32, i32, i32, i32) {
    %c2_i32 = arith.constant 2 : i32
    %0 = arith.muli %c2_i32, %arg1 : i32
    %c1_i32 = arith.constant 1 : i32
    %1 = arith.addi %0, %c1_i32 : i32
    %c0_i32 = arith.constant 0 : i32
    %c0_i32_0 = arith.constant 0 : i32
    %c0_i32_1 = arith.constant 0 : i32
    return %arg0, %1, %c0_i32, %c0_i32_0 : i32, i32, i32, i32
  }
  func.func @transform_2(%arg0: i32, %arg1: i32) -> (i32, i32, i32, i32) {
    %c2_i32 = arith.constant 2 : i32
    %0 = arith.muli %c2_i32, %arg1 : i32
    %c2_i32_0 = arith.constant 2 : i32
    %1 = arith.addi %0, %c2_i32_0 : i32
    %c0_i32 = arith.constant 0 : i32
    %c0_i32_1 = arith.constant 0 : i32
    %c0_i32_2 = arith.constant 0 : i32
    return %arg0, %1, %c0_i32, %c0_i32_1 : i32, i32, i32, i32
  }
  func.func @transform_3(%arg0: i32, %arg1: i32) -> (i32, i32, i32, i32) {
    %c0_i32 = arith.constant 0 : i32
    %c0_i32_0 = arith.constant 0 : i32
    %c0_i32_1 = arith.constant 0 : i32
    return %arg0, %arg1, %c0_i32, %c0_i32_0 : i32, i32, i32, i32
  }
}

</mosaic_0001>

<bundles_post_ra>
// kernel: _lambda_.14
= control target key start
LH: loop header
LB: loop body
LE: loop exit
PB: predicated region body
PF: predicated region fallthrough
CT: control target
= control target key end

     0   :  { %s851_s12 = smov 0   ;;  %s985_s0 = inlined_call_operand.vmem [shape: bf16[512,128], index: 0, kind: input, shape index: {}]   ;;  %s986_s1 = inlined_call_operand.vmem [shape: f32[1,128], index: 1, kind: input, shape index: {}]   ;;  %s987_s2 = inlined_call_operand.vmem [shape: f32[1,128], index: 2, kind: input, shape index: {}]   ;;  %s988_s3 = inlined_call_operand.vmem [shape: bf16[512,128], index: 3, kind: output, shape index: {}]  }
   0x1 LB: > { %s564_s13 = sadd.s32 4294967295, %s829_s12   ;;  %p568_p0 = scmp.ge.s32.totalorder %s829_s12, 1  ;;  %s829_s12 = sphi %s851_s12, %s13_s12  }
   0x2   : > { %p138_p1 = scmp.lt.s32.totalorder %s829_s12, 3 }
   0x4   : > { %p139_p2 = pnand %p568_p0, %p138_p1 }
   0x5   : > { %s569_s14 = sshll.u32 (!%p139_p2), %s564_s13, 5 }
   0x6   : > { %142 = sbr.rel (%p139_p2) target bundleno = 57 (0x39), region = 32  ;;  %p163_p3 = scmp.lt.s32.totalorder (!%p139_p2), %s569_s14, 63 }
   0xb   : > { %s990_s14 = smov (!%p163_p3, %s569_s14), 63  ;;  %v872_v0 = vld [vmem:[%s986_s1] ss:$0 sm:$0xff] }
   0xc   : > { %s570_s15 = sshll.u32 %s990_s14, 2  ;;  %v881_v9 = vld [vmem:[%s987_s2] ss:$0 sm:$0xff] }
   0xd   : > { %s867_s18 = scalar_lea.vmem %s985_s0, %s570_s15  ;;  %s906_s25 = scalar_lea.vmem %s988_s3, %s570_s15 }
   0xe   : > { %v642_v1 = vld [vmem:[%s867_s18] sm:$0xff]   ;;  %v785_v2 = vld [vmem:[%s867_s18 + $0x8] sm:$0xff]   ;;  %v786_v3 = vld [vmem:[%s867_s18 + $0x10] sm:$0xff]  }
   0xf   : > { %v643_v4 = vunpack.c.l.bf16 %v642_v1  ;;  %v644_v5 = vunpack.c.h.bf16 %v642_v1  ;;  %v647_v6 = vunpack.c.l.bf16 %v785_v2  ;;  %v648_v7 = vunpack.c.h.bf16 %v785_v2  ;;  %v787_v8 = vld [vmem:[%s867_s18 + $0x18] sm:$0xff]   ;;  %v788_v30 = vld [vmem:[%s867_s18 + $0x20] sm:$0xff]   ;;  %v789_v35 = vld [vmem:[%s867_s18 + $0x28] sm:$0xff]  }
  0x10   : > { %v651_v10 = vunpack.c.l.bf16 %v786_v3  ;;  %v652_v11 = vunpack.c.h.bf16 %v786_v3  ;;  %v655_v12 = vunpack.c.l.bf16 %v787_v8  ;;  %v656_v13 = vunpack.c.h.bf16 %v787_v8  ;;  %v790_v40 = vld [vmem:[%s867_s18 + $0x30] sm:$0xff]   ;;  %v791_v45 = vld [vmem:[%s867_s18 + $0x38] sm:$0xff]   ;;  %v792_v3 = vld [vmem:[%s867_s18 + $0x40] sm:$0xff]  }
  0x11   : > { %v245_v14 = vmul.f32 %v643_v4, %v872_v0  ;;  %v246_v15 = vmul.f32 %v644_v5, %v872_v0  ;;  %v247_v16 = vmul.f32 %v647_v6, %v872_v0  ;;  %v248_v17 = vmul.f32 %v648_v7, %v872_v0 }
  0x12   : > { %v249_v18 = vmul.f32 %v651_v10, %v872_v0  ;;  %v250_v19 = vmul.f32 %v652_v11, %v872_v0  ;;  %v251_v20 = vmul.f32 %v655_v12, %v872_v0  ;;  %v252_v21 = vmul.f32 %v656_v13, %v872_v0  ;;  %v793_v13 = vld [vmem:[%s867_s18 + $0x48] sm:$0xff]  }
  0x13   : > { %v284_v22 = vadd.f32 %v881_v9, %v245_v14  ;;  %v285_v23 = vadd.f32 %v881_v9, %v246_v15  ;;  %v286_v24 = vadd.f32 %v881_v9, %v247_v16  ;;  %v287_v25 = vadd.f32 %v881_v9, %v248_v17 }
  0x14   : > { %v288_v26 = vadd.f32 %v881_v9, %v249_v18  ;;  %v289_v27 = vadd.f32 %v881_v9, %v250_v19  ;;  %v290_v28 = vadd.f32 %v881_v9, %v251_v20  ;;  %v291_v29 = vadd.f32 %v881_v9, %v252_v21  ;;  %v794_v18 = vld [vmem:[%s867_s18 + $0x50] sm:$0xff]  }
  0x15   : > { %v316_v31 = vmax.f32 %v284_v22, 0.0  ;;  %v317_v32 = vmax.f32 %v285_v23, 0.0  ;;  %v318_v33 = vmax.f32 %v286_v24, 0.0  ;;  %v319_v34 = vmax.f32 %v287_v25, 0.0  ;;  %v795_v23 = vld [vmem:[%s867_s18 + $0x58] sm:$0xff]  }
  0x16   : > { %v320_v36 = vmax.f32 %v288_v26, 0.0  ;;  %v321_v37 = vmax.f32 %v289_v27, 0.0  ;;  %v322_v38 = vmax.f32 %v290_v28, 0.0  ;;  %v323_v39 = vmax.f32 %v291_v29, 0.0 }
  0x17   : > { %v708_v41 = vpack.c.bf16 %v317_v32, %v316_v31  ;;  %v713_v42 = vpack.c.bf16 %v319_v34, %v318_v33  ;;  %v659_v43 = vunpack.c.l.bf16 %v788_v30  ;;  %v660_v44 = vunpack.c.h.bf16 %v788_v30 }
  0x18   : > { %v718_v46 = vpack.c.bf16 %v321_v37, %v320_v36  ;;  %v723_v47 = vpack.c.bf16 %v323_v39, %v322_v38  ;;  %v663_v48 = vunpack.c.l.bf16 %v789_v35  ;;  %v664_v49 = vunpack.c.h.bf16 %v789_v35 }
  0x19   : > { %709 = vst [vmem:[%s906_s25] sm:$0xff] %v708_v41   ;;  %800 = vst [vmem:[%s906_s25 + $0x8] sm:$0xff] %v713_v42   ;;  %v253_v50 = vmul.f32 %v659_v43, %v872_v0  ;;  %v254_v51 = vmul.f32 %v660_v44, %v872_v0  ;;  %v667_v52 = vunpack.c.l.bf16 %v790_v40  ;;  %v668_v53 = vunpack.c.h.bf16 %v790_v40  ;;  %v796_v40 = vld [vmem:[%s867_s18 + $0x60] sm:$0xff]  }
  0x1a   : > { %801 = vst [vmem:[%s906_s25 + $0x10] sm:$0xff] %v718_v46   ;;  %802 = vst [vmem:[%s906_s25 + $0x18] sm:$0xff] %v723_v47   ;;  %v255_v54 = vmul.f32 %v663_v48, %v872_v0  ;;  %v256_v55 = vmul.f32 %v664_v49, %v872_v0  ;;  %v671_v56 = vunpack.c.l.bf16 %v791_v45  ;;  %v672_v57 = vunpack.c.h.bf16 %v791_v45 }
  0x1b   : > { %v292_v58 = vadd.f32 %v881_v9, %v253_v50  ;;  %v293_v59 = vadd.f32 %v881_v9, %v254_v51  ;;  %v257_v60 = vmul.f32 %v667_v52, %v872_v0  ;;  %v258_v61 = vmul.f32 %v668_v53, %v872_v0  ;;  %v797_v53 = vld [vmem:[%s867_s18 + $0x68] sm:$0xff]  }
  0x1c   : > { %v294_v62 = vadd.f32 %v881_v9, %v255_v54  ;;  %v295_v63 = vadd.f32 %v881_v9, %v256_v55  ;;  %v259_v1 = vmul.f32 %v671_v56, %v872_v0  ;;  %v260_v2 = vmul.f32 %v672_v57, %v872_v0 }
  0x1d   : > { %v324_v4 = vmax.f32 %v292_v58, 0.0  ;;  %v325_v5 = vmax.f32 %v293_v59, 0.0  ;;  %v296_v6 = vadd.f32 %v881_v9, %v257_v60  ;;  %v297_v7 = vadd.f32 %v881_v9, %v258_v61  ;;  %v798_v58 = vld [vmem:[%s867_s18 + $0x70] sm:$0xff]  }
  0x1e   : > { %v326_v8 = vmax.f32 %v294_v62, 0.0  ;;  %v327_v10 = vmax.f32 %v295_v63, 0.0  ;;  %v298_v11 = vadd.f32 %v881_v9, %v259_v1  ;;  %v299_v12 = vadd.f32 %v881_v9, %v260_v2  ;;  %v799_v63 = vld [vmem:[%s867_s18 + $0x78] sm:$0xff]  }
  0x1f   : > { %v728_v14 = vpack.c.bf16 %v325_v5, %v324_v4  ;;  %v328_v15 = vmax.f32 %v296_v6, 0.0  ;;  %v329_v16 = vmax.f32 %v297_v7, 0.0  ;;  %v675_v17 = vunpack.c.l.bf16 %v792_v3 }
  0x20   : > { %v733_v19 = vpack.c.bf16 %v327_v10, %v326_v8  ;;  %v330_v20 = vmax.f32 %v298_v11, 0.0  ;;  %v331_v21 = vmax.f32 %v299_v12, 0.0  ;;  %v676_v22 = vunpack.c.h.bf16 %v792_v3 }
  0x21   : > { %803 = vst [vmem:[%s906_s25 + $0x20] sm:$0xff] %v728_v14   ;;  %v738_v24 = vpack.c.bf16 %v329_v16, %v328_v15  ;;  %v261_v25 = vmul.f32 %v675_v17, %v872_v0  ;;  %v679_v26 = vunpack.c.l.bf16 %v793_v13  ;;  %v680_v27 = vunpack.c.h.bf16 %v793_v13 }
  0x22   : > { %804 = vst [vmem:[%s906_s25 + $0x28] sm:$0xff] %v733_v19   ;;  %v743_v28 = vpack.c.bf16 %v331_v21, %v330_v20  ;;  %v262_v29 = vmul.f32 %v676_v22, %v872_v0  ;;  %v683_v30 = vunpack.c.l.bf16 %v794_v18  ;;  %v684_v31 = vunpack.c.h.bf16 %v794_v18 }
  0x23   : > { %805 = vst [vmem:[%s906_s25 + $0x30] sm:$0xff] %v738_v24   ;;  %v300_v32 = vadd.f32 %v881_v9, %v261_v25  ;;  %v263_v33 = vmul.f32 %v679_v26, %v872_v0  ;;  %v264_v34 = vmul.f32 %v680_v27, %v872_v0  ;;  %v687_v35 = vunpack.c.l.bf16 %v795_v23 }
  0x24   : > { %806 = vst [vmem:[%s906_s25 + $0x38] sm:$0xff] %v743_v28   ;;  %v301_v36 = vadd.f32 %v881_v9, %v262_v29  ;;  %v265_v37 = vmul.f32 %v683_v30, %v872_v0  ;;  %v266_v38 = vmul.f32 %v684_v31, %v872_v0  ;;  %v688_v39 = vunpack.c.h.bf16 %v795_v23 }
  0x25   : > { %v332_v41 = vmax.f32 %v300_v32, 0.0  ;;  %v302_v42 = vadd.f32 %v881_v9, %v263_v33  ;;  %v303_v43 = vadd.f32 %v881_v9, %v264_v34  ;;  %v267_v44 = vmul.f32 %v687_v35, %v872_v0 }
  0x26   : > { %v333_v45 = vmax.f32 %v301_v36, 0.0  ;;  %v304_v46 = vadd.f32 %v881_v9, %v265_v37  ;;  %v305_v47 = vadd.f32 %v881_v9, %v266_v38  ;;  %v268_v48 = vmul.f32 %v688_v39, %v872_v0 }
  0x27   : > { %v334_v49 = vmax.f32 %v302_v42, 0.0  ;;  %v335_v50 = vmax.f32 %v303_v43, 0.0  ;;  %v306_v51 = vadd.f32 %v881_v9, %v267_v44  ;;  %v691_v52 = vunpack.c.l.bf16 %v796_v40 }
  0x28   : > { %v748_v54 = vpack.c.bf16 %v333_v45, %v332_v41  ;;  %v336_v55 = vmax.f32 %v304_v46, 0.0  ;;  %v337_v56 = vmax.f32 %v305_v47, 0.0  ;;  %v307_v57 = vadd.f32 %v881_v9, %v268_v48 }
  0x29   : > { %v753_v59 = vpack.c.bf16 %v335_v50, %v334_v49  ;;  %v338_v60 = vmax.f32 %v306_v51, 0.0  ;;  %v692_v61 = vunpack.c.h.bf16 %v796_v40  ;;  %v269_v62 = vmul.f32 %v691_v52, %v872_v0 }
  0x2a   : > { %807 = vst [vmem:[%s906_s25 + $0x40] sm:$0xff] %v748_v54   ;;  %v758_v1 = vpack.c.bf16 %v337_v56, %v336_v55  ;;  %v339_v2 = vmax.f32 %v307_v57, 0.0  ;;  %v695_v3 = vunpack.c.l.bf16 %v797_v53  ;;  %v696_v4 = vunpack.c.h.bf16 %v797_v53 }
  0x2b   : > { %808 = vst [vmem:[%s906_s25 + $0x48] sm:$0xff] %v753_v59   ;;  %v270_v5 = vmul.f32 %v692_v61, %v872_v0  ;;  %v308_v6 = vadd.f32 %v881_v9, %v269_v62  ;;  %v699_v7 = vunpack.c.l.bf16 %v798_v58  ;;  %v700_v8 = vunpack.c.h.bf16 %v798_v58 }
  0x2c   : > { %809 = vst [vmem:[%s906_s25 + $0x50] sm:$0xff] %v758_v1   ;;  %v763_v10 = vpack.c.bf16 %v339_v2, %v338_v60  ;;  %v271_v11 = vmul.f32 %v695_v3, %v872_v0  ;;  %v272_v12 = vmul.f32 %v696_v4, %v872_v0  ;;  %v703_v13 = vunpack.c.l.bf16 %v799_v63 }
  0x2d   : > { %v309_v14 = vadd.f32 %v881_v9, %v270_v5  ;;  %v340_v15 = vmax.f32 %v308_v6, 0.0  ;;  %v273_v16 = vmul.f32 %v699_v7, %v872_v0  ;;  %v274_v17 = vmul.f32 %v700_v8, %v872_v0 }
  0x2e   : > { %810 = vst [vmem:[%s906_s25 + $0x58] sm:$0xff] %v763_v10   ;;  %v310_v18 = vadd.f32 %v881_v9, %v271_v11  ;;  %v311_v19 = vadd.f32 %v881_v9, %v272_v12  ;;  %v704_v20 = vunpack.c.h.bf16 %v799_v63  ;;  %v275_v21 = vmul.f32 %v703_v13, %v872_v0 }
  0x2f   : > { %v341_v22 = vmax.f32 %v309_v14, 0.0  ;;  %v312_v23 = vadd.f32 %v881_v9, %v273_v16  ;;  %v313_v24 = vadd.f32 %v881_v9, %v274_v17 }
  0x30   : > { %v342_v25 = vmax.f32 %v310_v18, 0.0  ;;  %v343_v26 = vmax.f32 %v311_v19, 0.0  ;;  %v276_v27 = vmul.f32 %v704_v20, %v872_v0  ;;  %v314_v28 = vadd.f32 %v881_v9, %v275_v21 }
  0x31   : > { %v768_v29 = vpack.c.bf16 %v341_v22, %v340_v15  ;;  %v344_v30 = vmax.f32 %v312_v23, 0.0  ;;  %v345_v31 = vmax.f32 %v313_v24, 0.0 }
  0x32   : > { %v773_v32 = vpack.c.bf16 %v343_v26, %v342_v25  ;;  %v315_v33 = vadd.f32 %v881_v9, %v276_v27  ;;  %v346_v34 = vmax.f32 %v314_v28, 0.0 }
  0x33   : > { %811 = vst [vmem:[%s906_s25 + $0x60] sm:$0xff] %v768_v29   ;;  %v778_v35 = vpack.c.bf16 %v345_v31, %v344_v30 }
  0x34   : > { %812 = vst [vmem:[%s906_s25 + $0x68] sm:$0xff] %v773_v32   ;;  %v347_v36 = vmax.f32 %v315_v33, 0.0 }
  0x35   : > { %813 = vst [vmem:[%s906_s25 + $0x70] sm:$0xff] %v778_v35  }
  0x36   : > { %v783_v37 = vpack.c.bf16 %v347_v36, %v346_v34 }
  0x38   : > { %814 = vst [vmem:[%s906_s25 + $0x78] sm:$0xff] %v783_v37  }
  0x39 PF: > { %s13_s12 = sadd.s32 1, %s829_s12  }
  0x3a   : > { %p10_p4 = scmp.ge.s32.totalorder %s13_s12, 4  }
  0x3c   :  { %12 = sbr.rel (!%p10_p4) target bundleno = 1 (0x1), region = 62 }

// kernel: _lambda_.15
= control target key start
LH: loop header
LB: loop body
LE: loop exit
PB: predicated region body
PF: predicated region fallthrough
CT: control target
= control target key end

     0   :  { %s560_s12 = smov 0   ;;  %s562_s13 = smov 0   ;;  %s622_s0 = inlined_call_operand.vmem [shape: bf16[2,16,7,128], index: 0, kind: input, shape index: {}, may-alias: {0,1,2}]   ;;  %s623_s1 = inlined_call_operand.vmem [shape: bf16[2,16,7,128], index: 1, kind: input, shape index: {}, may-alias: {0,1,2}]   ;;  %s624_s2 = inlined_call_operand.vmem [shape: bf16[2,16,7,128], index: 2, kind: input, shape index: {}, may-alias: {0,1,2}]   ;;  %s625_s3 = inlined_call_operand.vmem [shape: bf16[2,7,7,128], index: 3, kind: output, shape index: {}]  }
   0x1   :  { %s564_s14 = smov 0   ;;  %s566_s15 = smov 0  }
   0x2   :  { %s568_s16 = smov 0  }
   0x3 LB: > { %s22_s17 = sadd.s32 1, %s530_s14  ;;  %s25_s18 = sadd.s32 1, %s534_s15  ;;  %s538_s16 = sphi %s568_s16, %s13_s16   ;;  %s534_s15 = sphi %s566_s15, %s629_s15   ;;  %s530_s14 = sphi %s564_s14, %s628_s14   ;;  %s526_s13 = sphi %s562_s13, %s627_s13   ;;  %s522_s12 = sphi %s560_s12, %s626_s12  }
   0x4   : > { %p23_p0 = scmp.ge.s32.totalorder %s22_s17, 7  ;;  %p446_p1 = scmp.ge.s32.totalorder %s538_s16, 1 }
   0x5   : > { %p206_p2 = scmp.lt.s32.totalorder %s538_s16, 15 }
   0x6   : > { %s631_s17 = smov (%p23_p0, %s22_s17), 0  ;;  %s633_s18 = smov (!%p23_p0, %s25_s18), %s534_s15 }
   0x7   : > { %p207_p3 = pnand %p446_p1, %p206_p2  ;;  %p27_p4 = scmp.ge.s32.totalorder %s633_s18, 2 }
   0x8   : > { %s447_s19 = sshll.u32 (!%p207_p3), %s522_s12, 1  ;;  %p258_p5 = scmp.lt.s32.totalorder (!%p207_p3), %s526_s13, 1 }
   0x9   : > { %s635_s18 = smov (%p27_p4, %s633_s18), 0  ;;  %210 = sbr.rel (%p207_p3) target bundleno = 32 (0x20), region = 32 }
   0xa   : > { %p260_p6 = scmp.lt.s32.totalorder (!%p207_p3), %s447_s19, 15  ;;  %s268_s20 = sadd.s32 (!%p207_p3), 1, %s447_s19 }
   0xb   : > { %p271_p7 = scmp.lt.s32.totalorder (!%p207_p3), %s268_s20, 15  ;;  %s280_s24 = sadd.s32 (!%p207_p3), 2, %s447_s19 }
   0xc   : > { %p283_p8 = scmp.lt.s32.totalorder (!%p207_p3), %s280_s24, 15  ;;  %p293_p9 = scmp.lt.s32.totalorder (!%p207_p3), %s522_s12, 6 }
   0xe   : > { %s637_s13 = smov (!%p258_p5, %s526_s13), 1  ;;  %s639_s20 = smov (!%p271_p7, %s268_s20), 15  ;;  %vm308_vm0 = vcmask 1043456   ;;  %vm309_vm1 = vsmask.f32 3328 }
   0xf   : > { %s261_s21 = scalar_select %p260_p6, %s447_s19, 15  ;;  %vm310_vm2 = vmand %vm308_vm0, %vm309_vm1 }
  0x10   : > { %s448_s22 = sshll.u32 %s637_s13, 4  ;;  %s641_s24 = smov (!%p283_p8, %s280_s24), 15 }
  0x11   : > { %s263_s23 = sadd.s32 %s448_s22, %s261_s21  ;;  %s274_s29 = sadd.s32 %s448_s22, %s639_s20 }
  0x12   : > { %s449_s25 = sshll.u32 %s263_s23, 2  ;;  %s459_s30 = smul.u32 7, %s637_s13 }
  0x13   : > { %s265_s28 = scalar_lea.vmem %s622_s0, %s449_s25  ;;  %s452_s4 = sshll.u32 %s274_s29, 2 }
  0x14   : > { %v299_v0 = vld [vmem:[%s265_s28] sm:$0xf]  ;;  %s286_s5 = sadd.s32 %s448_s22, %s641_s24  ;;  %s276_s8 = scalar_lea.vmem %s623_s1, %s452_s4 }
  0x15   : > { %s455_s9 = sshll.u32 %s286_s5, 2  ;;  %v300_v1 = vunpack.c.l.bf16 %v299_v0  ;;  %v301_v2 = vld [vmem:[%s276_s8] sm:$0xf]  ;;  %s643_s12 = smov (!%p293_p9, %s522_s12), 6 }
  0x16   : > { %s288_s19 = scalar_lea.vmem %s624_s2, %s455_s9  ;;  %v302_v3 = vunpack.c.l.bf16 %v301_v2  ;;  %s296_s21 = sadd.s32 %s459_s30, %s643_s12 }
  0x17   : > { %v304_v4 = vld [vmem:[%s288_s19] sm:$0xf]  ;;  %s456_s13 = sshll.u32 %s296_s21, 2 }
  0x18   : > { %v305_v5 = vunpack.c.l.bf16 %v304_v4  ;;  %v303_v6 = vmax.f32 %v300_v1, %v302_v3  ;;  %s298_s23 = scalar_lea.vmem %s625_s3, %s456_s13 }
  0x19   : > { %v311_v8 = vld [vmem:[%s298_s23] sm:$0xf] }
  0x1a   : > { %v306_v7 = vmax.f32 %v303_v6, %v305_v5 }
  0x1c   : > { %v307_v9 = vpack.c.bf16 %v306_v7, %v306_v7 }
  0x1e   : > { %v312_v10 = vsel %vm310_vm2, %v307_v9, %v311_v8 }
  0x1f   : > { %313 = vst [vmem:[%s298_s23] sm:$0xf] %v312_v10 }
  0x20 PF: > { %s13_s16 = sadd.s32 1, %s538_s16   ;;  %s626_s12 = smov %s530_s14 }
  0x21   : > { %p10_p10 = scmp.ge.s32.totalorder %s13_s16, 16   ;;  %s627_s13 = smov %s534_s15 }
  0x22   : > { %s628_s14 = smov %s631_s17  ;;  %s629_s15 = smov %s635_s18 }
  0x23   :  { %12 = sbr.rel (!%p10_p10) target bundleno = 3 (0x3), region = 68 }

// kernel: _lambda_.13
= control target key start
LH: loop header
LB: loop body
LE: loop exit
PB: predicated region body
PF: predicated region fallthrough
CT: control target
= control target key end

     0   :  { %s1946_s12 = smov 0   ;;  %s2160_s0 = inlined_call_operand.vmem [shape: bf16[512,384], index: 0, kind: input, shape index: {}]   ;;  %s2161_s1 = inlined_call_operand.vmem [shape: bf16[384,128], index: 1, kind: input, shape index: {}]   ;;  %s2162_s2 = inlined_call_operand.vmem [shape: bf16[512,128], index: 2, kind: output, shape index: {0}]   ;;  %s2163_s3 = inlined_call_operand.vmem [shape: f32[16,128], index: 3, kind: output, shape index: {1}]  }
   0x1 LB: > { %s1952_s13 = sadd.s32 4294967295, %s1924_s12   ;;  %p1382_p0 = scmp.ge.s32.totalorder %s1924_s12, 1  ;;  %s1924_s12 = sphi %s1946_s12, %s14_s12  }
   0x2   : > { %p142_p1 = scmp.lt.s32.totalorder %s1924_s12, 3 }
   0x4   : > { %p143_p2 = pnand %p1382_p0, %p142_p1 }
   0x5   : > { %s1383_s16 = sshll.u32 (!%p143_p2), %s1952_s13, 5  ;;  %p184_p4 = scmp.lt.s32.totalorder (!%p143_p2), %s1952_s13, 1 }
   0x6   : > { %146 = sbr.rel (%p143_p2) target bundleno = 368 (0x170), region = 28  ;;  %p172_p3 = scmp.lt.s32.totalorder (!%p143_p2), %s1383_s16, 63 }
   0xb   : > { %v1830_v0 = vld [vmem:[%s2161_s1 + $0x78] sm:$0xff]   ;;  %v1832_v2 = vld [vmem:[%s2161_s1 + $0x70] sm:$0xff]   ;;  %v1834_v4 = vld [vmem:[%s2161_s1 + $0x68] sm:$0xff]   ;;  %s2165_s16 = smov (!%p172_p3, %s1383_s16), 63  ;;  %s2167_s13 = smov (!%p184_p4, %s1952_s13), 1 }
   0xc   : > { %v1831_v1 = vld [vmem:[%s2161_s1 + $0x38] sm:$0xff]   ;;  %1621 = vmatprep.subr.bf16.mxu0 %v1830_v0  ;;  %1805 = vmatprep.subr.bf16.mxu1 %v1830_v0  ;;  %v1833_v3 = vld [vmem:[%s2161_s1 + $0x30] sm:$0xff]   ;;  %v1835_v5 = vld [vmem:[%s2161_s1 + $0x28] sm:$0xff]   ;;  %s1821_s29 = smul.u32 12, %s2165_s16 }
   0xd   : > { %1622 = vmatpush3.bf16.msra.mxu0 %v1831_v1  ;;  %1813 = vmatpush3.bf16.msra.mxu1 %v1831_v1  ;;  %v1836_v6 = vld [vmem:[%s2161_s1 + $0x60] sm:$0xff]   ;;  %v1838_v8 = vld [vmem:[%s2161_s1 + $0x58] sm:$0xff]   ;;  %v1840_v10 = vld [vmem:[%s2161_s1 + $0x50] sm:$0xff]  }
   0xe   : > { %1623 = vmatprep.subr.bf16.mxu0 %v1832_v2  ;;  %1806 = vmatprep.subr.bf16.mxu1 %v1832_v2  ;;  %v1837_v7 = vld [vmem:[%s2161_s1 + $0x20] sm:$0xff]   ;;  %s1990_s9 = scalar_lea.vmem %s2160_s0, %s1821_s29  ;;  %v1839_v9 = vld [vmem:[%s2161_s1 + $0x18] sm:$0xff]   ;;  %v1841_v13 = vld [vmem:[%s2161_s1 + $0x10] sm:$0xff]  }
   0xf   : > { %v1848_v11 = vld [vmem:[%s1990_s9 + $0x4] ss:$12 sps:$4 sm:$0xff]   ;;  %v1842_v14 = vld [vmem:[%s2161_s1 + $0x48] sm:$0xff]   ;;  %v1852_v18 = vld [vmem:[%s2161_s1 + $0xb8] sm:$0xff]  }
  0x10   : > { %v1851_v12 = vld [vmem:[%s1990_s9 + $0x124] ss:$12 sps:$4 sm:$0xff]   ;;  %733 = vmatprep.mubr.bf16.mxu0 %v1848_v11  ;;  %v1843_v15 = vld [vmem:[%s2161_s1 + $0x8] sm:$0xff]   ;;  %v1862_v28 = vld [vmem:[%s1990_s9 + $0x34] ss:$12 sps:$4 sm:$0xff]  }
  0x11   : > { %1624 = vmatpush3.bf16.msra.mxu0 %v1833_v3  ;;  %1814 = vmatpush3.bf16.msra.mxu1 %v1833_v3  ;;  %v1844_v16 = vld [vmem:[%s2161_s1 + $0x40] sm:$0xff]   ;;  %v1854_v21 = vld [vmem:[%s1990_s9 + $0x1c] ss:$12 sps:$4 sm:$0xff]   ;;  %v1853_v22 = vld [vmem:[%s2161_s1 + $0xb0] sm:$0xff]  }
  0x12   : > { %1625 = vmatprep.subr.bf16.mxu0 %v1834_v4  ;;  %1807 = vmatprep.subr.bf16.mxu1 %v1834_v4  ;;  %v1845_v17 = vld [vmem:[%s2161_s1] sm:$0xff]   ;;  %v1856_v23 = vld [vmem:[%s1990_s9 + $0x13c] ss:$12 sps:$4 sm:$0xff]   ;;  %v1869_v33 = vld [vmem:[%s2161_s1 + $0x90] sm:$0xff]  }
  0x13   : > { %829 = vmatprep.mubr.bf16.mxu1 %v1851_v12  ;;  %v1846_v19 = vld [vmem:[%s1990_s9] ss:$12 sps:$4 sm:$0xff]   ;;  %v1858_v24 = vld [vmem:[%s1990_s9 + $0x18] ss:$12 sps:$4 sm:$0xff]   ;;  %v1866_v31 = vld [vmem:[%s1990_s9 + $0x30] ss:$12 sps:$4 sm:$0xff]  }
  0x14   : > { %v1849_v20 = vld [vmem:[%s1990_s9 + $0x120] ss:$12 sps:$4 sm:$0xff]   ;;  %v1859_v26 = vld [vmem:[%s1990_s9 + $0x138] ss:$12 sps:$4 sm:$0xff]   ;;  %v1867_v32 = vld [vmem:[%s1990_s9 + $0x150] ss:$12 sps:$4 sm:$0xff]  }
  0x15   : > { %1626 = vmatpush3.bf16.msra.mxu0 %v1835_v5  ;;  %1815 = vmatpush3.bf16.msra.mxu1 %v1835_v5  ;;  %v1860_v25 = vld [vmem:[%s2161_s1 + $0xa8] sm:$0xff]   ;;  %v1861_v27 = vld [vmem:[%s2161_s1 + $0xa0] sm:$0xff]   ;;  %v1868_v30 = vld [vmem:[%s2161_s1 + $0x98] sm:$0xff]  }
  0x16   : > { %1627 = vmatprep.subr.bf16.mxu0 %v1836_v6  ;;  %1808 = vmatprep.subr.bf16.mxu1 %v1836_v6  ;;  %v1864_v29 = vld [vmem:[%s1990_s9 + $0x154] ss:$12 sps:$4 sm:$0xff]   ;;  %v1870_v34 = vld [vmem:[%s1990_s9 + $0x4c] ss:$12 sps:$4 sm:$0xff]   ;;  %v1878_v39 = vld [vmem:[%s1990_s9 + $0x64] ss:$12 sps:$4 sm:$0xff]  }
  0x17   : > { %v1872_v35 = vld [vmem:[%s1990_s9 + $0x16c] ss:$12 sps:$4 sm:$0xff]   ;;  %v1874_v37 = vld [vmem:[%s1990_s9 + $0x48] ss:$12 sps:$4 sm:$0xff]   ;;  %v1877_v40 = vld [vmem:[%s2161_s1 + $0x80] sm:$0xff]  }
  0x18   : > { %v1876_v36 = vld [vmem:[%s2161_s1 + $0x88] sm:$0xff]   ;;  %v1885_v45 = vld [vmem:[%s1990_s9 + $0x38] ss:$12 sps:$4 sm:$0xff]   ;;  %v1887_v47 = vld [vmem:[%s1990_s9 + $0x50] ss:$12 sps:$4 sm:$0xff]  }
  0x19   : > { %1628 = vmatpush3.bf16.msra.mxu0 %v1837_v7  ;;  %1816 = vmatpush3.bf16.msra.mxu1 %v1837_v7  ;;  %v1875_v38 = vld [vmem:[%s1990_s9 + $0x168] ss:$12 sps:$4 sm:$0xff]   ;;  %v1881_v42 = vld [vmem:[%s1990_s9 + $0x60] ss:$12 sps:$4 sm:$0xff]   ;;  %v1886_v46 = vld [vmem:[%s1990_s9 + $0x78] ss:$12 sps:$4 sm:$0xff]  }
  0x1a   : > { %1629 = vmatprep.subr.bf16.mxu0 %v1838_v8  ;;  %1809 = vmatprep.subr.bf16.mxu1 %v1838_v8  ;;  %v1880_v41 = vld [vmem:[%s1990_s9 + $0x8] ss:$12 sps:$4 sm:$0xff]   ;;  %v1882_v43 = vld [vmem:[%s1990_s9 + $0x20] ss:$12 sps:$4 sm:$0xff]   ;;  %v1891_v50 = vld [vmem:[%s1990_s9 + $0x90] ss:$12 sps:$4 sm:$0xff]  }
  0x1b   : > { %v1883_v44 = vld [vmem:[%s1990_s9 + $0x7c] ss:$12 sps:$4 sm:$0xff]   ;;  %v1888_v48 = vld [vmem:[%s1990_s9 + $0x94] ss:$12 sps:$4 sm:$0xff]   ;;  %v1893_v52 = vld [vmem:[%s1990_s9 + $0xac] ss:$12 sps:$4 sm:$0xff]  }
  0x1c   : > { %v1890_v49 = vld [vmem:[%s1990_s9 + $0x68] ss:$12 sps:$4 sm:$0xff]   ;;  %v1892_v51 = vld [vmem:[%s1990_s9 + $0x80] ss:$12 sps:$4 sm:$0xff]   ;;  %v1895_v53 = vld [vmem:[%s1990_s9 + $0x98] ss:$12 sps:$4 sm:$0xff]  }
  0x1d   : > { %1630 = vmatpush3.bf16.msra.mxu0 %v1839_v9  ;;  %1817 = vmatpush3.bf16.msra.mxu1 %v1839_v9  ;;  %v1896_v54 = vld [vmem:[%s1990_s9 + $0xa8] ss:$12 sps:$4 sm:$0xff]   ;;  %v1897_v55 = vld [vmem:[%s1990_s9 + $0xb0] ss:$12 sps:$4 sm:$0xff]   ;;  %v1901_v58 = vld [vmem:[%s1990_s9 + $0xc0] ss:$12 sps:$4 sm:$0xff]  }
  0x1e   : > { %1631 = vmatprep.subr.bf16.mxu0 %v1840_v10  ;;  %1810 = vmatprep.subr.bf16.mxu1 %v1840_v10  ;;  %v1898_v56 = vld [vmem:[%s1990_s9 + $0xc4] ss:$12 sps:$4 sm:$0xff]   ;;  %v1900_v57 = vld [vmem:[%s1990_s9 + $0xc8] ss:$12 sps:$4 sm:$0xff]   ;;  %v1902_v59 = vld [vmem:[%s1990_s9 + $0xe0] ss:$12 sps:$4 sm:$0xff]  }
  0x1f   : > { %v1903_v60 = vld [vmem:[%s1990_s9 + $0xdc] ss:$12 sps:$4 sm:$0xff]   ;;  %v1905_v61 = vld [vmem:[%s1990_s9 + $0xf8] ss:$12 sps:$4 sm:$0xff]   ;;  %v1908_v0 = vld [vmem:[%s1990_s9 + $0xf4] ss:$12 sps:$4 sm:$0xff]  }
  0x20   : > { %v1906_v62 = vld [vmem:[%s1990_s9 + $0xd8] ss:$12 sps:$4 sm:$0xff]   ;;  %v1907_v63 = vld [vmem:[%s1990_s9 + $0x110] ss:$12 sps:$4 sm:$0xff]   ;;  %v1910_v1 = vld [vmem:[%s1990_s9 + $0x128] ss:$12 sps:$4 sm:$0xff]  }
  0x21   : > { %1632 = vmatpush3.bf16.msra.mxu0 %v1841_v13  ;;  %1818 = vmatpush3.bf16.msra.mxu1 %v1841_v13  ;;  %v1911_v2 = vld [vmem:[%s1990_s9 + $0xf0] ss:$12 sps:$4 sm:$0xff]   ;;  %v1912_v3 = vld [vmem:[%s1990_s9 + $0x140] ss:$12 sps:$4 sm:$0xff]   ;;  %v1915_v5 = vld [vmem:[%s1990_s9 + $0x158] ss:$12 sps:$4 sm:$0xff]  }
  0x22   : > { %1633 = vmatprep.subr.bf16.mxu0 %v1842_v14  ;;  %1811 = vmatprep.subr.bf16.mxu1 %v1842_v14  ;;  %v1913_v4 = vld [vmem:[%s1990_s9 + $0x10c] ss:$12 sps:$4 sm:$0xff]   ;;  %v1916_v6 = vld [vmem:[%s1990_s9 + $0x108] ss:$12 sps:$4 sm:$0xff]   ;;  %v1917_v7 = vld [vmem:[%s1990_s9 + $0x170] ss:$12 sps:$4 sm:$0xff]  }
  0x23   : > { %s1386_s9 = sshll.u32 %s2165_s16, 2  ;;  %s1387_s16 = sshll.u32 %s2167_s13, 3 }
  0x24   : > { %s2107_s22 = scalar_lea.vmem %s2162_s2, %s1386_s9  ;;  %s187_s25 = scalar_lea.vmem %s2163_s3, %s1387_s16 }
  0x25   : > { %1634 = vmatpush3.bf16.msra.mxu0 %v1843_v15  ;;  %1819 = vmatpush3.bf16.msra.mxu1 %v1843_v15 }
  0x26   : > { %1635 = vmatprep.subr.bf16.mxu0 %v1844_v16  ;;  %1812 = vmatprep.subr.bf16.mxu1 %v1844_v16 }
  0x29   : > { %1636 = vmatpush3.bf16.msra.mxu0 %v1845_v17  ;;  %1820 = vmatpush3.bf16.msra.mxu1 %v1845_v17 }
  0x2a   : > { %1757 = vmatprep.subr.bf16.mxu1 %v1852_v18 }
  0x2c   : > { %734 = vmatmul.mubr.bf16.vlgmr.msra.gmra.mxu0 %v1846_v19  ;;  %830 = vmatmul.mubr.bf16.vlgmr.msra.gmra.mxu1 %v1849_v20 }
  0x2d   : > { %1758 = vmatpush3.bf16.msra.mxu1 %v1852_v18  ;;  %741 = vmatprep.mubr.bf16.mxu0 %v1854_v21 }
  0x2e   : > { %1759 = vmatprep.subr.bf16.mxu1 %v1853_v22  ;;  %837 = vmatprep.mubr.bf16.mxu1 %v1856_v23 }
  0x31   : > { %1760 = vmatpush3.bf16.msra.mxu1 %v1853_v22 }
  0x32   : > { %1761 = vmatprep.subr.bf16.mxu1 %v1860_v25 }
  0x34   : > { %742 = vmatmul.mubr.bf16.gmra.mxu0 %v1858_v24  ;;  %838 = vmatmul.mubr.bf16.gmra.mxu1 %v1859_v26 }
  0x35   : > { %1762 = vmatpush3.bf16.msra.mxu1 %v1860_v25  ;;  %749 = vmatprep.mubr.bf16.mxu0 %v1862_v28 }
  0x36   : > { %1763 = vmatprep.subr.bf16.mxu1 %v1861_v27  ;;  %845 = vmatprep.mubr.bf16.mxu1 %v1864_v29 }
  0x39   : > { %1764 = vmatpush3.bf16.msra.mxu1 %v1861_v27 }
  0x3a   : > { %1765 = vmatprep.subr.bf16.mxu1 %v1868_v30 }
  0x3c   : > { %750 = vmatmul.mubr.bf16.gmra.mxu0 %v1866_v31  ;;  %846 = vmatmul.mubr.bf16.gmra.mxu1 %v1867_v32 }
  0x3d   : > { %1766 = vmatpush3.bf16.msra.mxu1 %v1868_v30  ;;  %757 = vmatprep.mubr.bf16.mxu0 %v1870_v34 }
  0x3e   : > { %1767 = vmatprep.subr.bf16.mxu1 %v1869_v33  ;;  %853 = vmatprep.mubr.bf16.mxu1 %v1872_v35 }
  0x41   : > { %1768 = vmatpush3.bf16.msra.mxu1 %v1869_v33 }
  0x42   : > { %1769 = vmatprep.subr.bf16.mxu1 %v1876_v36 }
  0x44   : > { %758 = vmatmul.mubr.bf16.gmra.mxu0 %v1874_v37  ;;  %854 = vmatmul.mubr.bf16.gmra.mxu1 %v1875_v38 }
  0x45   : > { %1770 = vmatpush3.bf16.msra.mxu1 %v1876_v36  ;;  %765 = vmatprep.mubr.bf16.mxu0 %v1878_v39 }
  0x46   : > { %1771 = vmatprep.subr.bf16.mxu1 %v1877_v40  ;;  %1773 = vmatprep.mubr.bf16.mxu1 %v1880_v41 }
  0x49   : > { %1772 = vmatpush3.bf16.msra.mxu1 %v1877_v40 }
  0x4c   : > { %766 = vmatmul.mubr.bf16.gmra.mxu0 %v1881_v42  ;;  %1774 = vmatmul.mubr.bf16.vlgmr.msra.gmra.mxu1 %v1882_v43 }
  0x4d   : > { %773 = vmatprep.mubr.bf16.mxu0 %v1883_v44  ;;  %1777 = vmatprep.mubr.bf16.mxu1 %v1885_v45 }
  0x54   : > { %774 = vmatmul.mubr.bf16.gmra.mxu0 %v1886_v46  ;;  %1778 = vmatmul.mubr.bf16.gmra.mxu1 %v1887_v47 }
  0x55   : > { %781 = vmatprep.mubr.bf16.mxu0 %v1888_v48  ;;  %1781 = vmatprep.mubr.bf16.mxu1 %v1890_v49 }
  0x5c   : > { %782 = vmatmul.mubr.bf16.gmra.mxu0 %v1891_v50  ;;  %1782 = vmatmul.mubr.bf16.gmra.mxu1 %v1892_v51 }
  0x5d   : > { %789 = vmatprep.mubr.bf16.mxu0 %v1893_v52  ;;  %1785 = vmatprep.mubr.bf16.mxu1 %v1895_v53 }
  0x64   : > { %790 = vmatmul.mubr.bf16.gmra.mxu0 %v1896_v54  ;;  %1786 = vmatmul.mubr.bf16.gmra.mxu1 %v1897_v55 }
  0x65   : > { %797 = vmatprep.mubr.bf16.mxu0 %v1898_v56  ;;  %1789 = vmatprep.mubr.bf16.mxu1 %v1900_v57 }
  0x6c   : > { %798 = vmatmul.mubr.bf16.gmra.mxu0 %v1901_v58  ;;  %1790 = vmatmul.mubr.bf16.gmra.mxu1 %v1902_v59 }
  0x6d   : > { %805 = vmatprep.mubr.bf16.mxu0 %v1903_v60  ;;  %1793 = vmatprep.mubr.bf16.mxu1 %v1905_v61 }
  0x74   : > { %806 = vmatmul.mubr.bf16.gmra.mxu0 %v1906_v62  ;;  %1794 = vmatmul.mubr.bf16.gmra.mxu1 %v1907_v63 }
  0x75   : > { %813 = vmatprep.mubr.bf16.mxu0 %v1908_v0  ;;  %1797 = vmatprep.mubr.bf16.mxu1 %v1910_v1 }
  0x7c   : > { %814 = vmatmul.mubr.bf16.gmra.mxu0 %v1911_v2  ;;  %1798 = vmatmul.mubr.bf16.gmra.mxu1 %v1912_v3 }
  0x7d   : > { %821 = vmatprep.mubr.bf16.mxu0 %v1913_v4  ;;  %1801 = vmatprep.mubr.bf16.mxu1 %v1915_v5 }
  0x84   : > { %822 = vmatmul.mubr.bf16.gmra.mxu0 %v1916_v6  ;;  %1802 = vmatmul.mubr.bf16.gmra.mxu1 %v1917_v7 }
  0xec   : > { %v1637_v8 = vpop.f32.mrf.mxu0  ;;  %v1709_v9 = vpop.f32.mrf.mxu1 }
  0xee   : > { %v1638_v10 = vpop.f32.mrf.mxu0  ;;  %v1710_v11 = vpop.f32.mrf.mxu1 }
  0xef   : > { %v2085_v12 = vadd.f32 %v1710_v11, %v1709_v9  ;;  %v1639_v51 = vadd.f32 %v1638_v10, %v1637_v8 }
  0xf0   : > { %v1640_v13 = vpop.f32.mrf.mxu0  ;;  %v1712_v14 = vpop.f32.mrf.mxu1 }
  0xf2   : > { %v1641_v15 = vpop.f32.mrf.mxu0  ;;  %v1713_v16 = vpop.f32.mrf.mxu1 }
  0xf3   : > { %v2087_v17 = vadd.f32 %v1713_v16, %v1712_v14  ;;  %v1642_v56 = vadd.f32 %v1641_v15, %v1640_v13 }
  0xf4   : > { %v1643_v18 = vpop.f32.mrf.mxu0  ;;  %v1715_v19 = vpop.f32.mrf.mxu1 }
  0xf6   : > { %v1644_v20 = vpop.f32.mrf.mxu0  ;;  %v1716_v21 = vpop.f32.mrf.mxu1 }
  0xf7   : > { %v2089_v22 = vadd.f32 %v1716_v21, %v1715_v19  ;;  %v1645_v52 = vadd.f32 %v1644_v20, %v1643_v18 }
  0xf8   : > { %v1646_v23 = vpop.f32.mrf.mxu0  ;;  %v1718_v24 = vpop.f32.mrf.mxu1 }
  0xfa   : > { %v1647_v25 = vpop.f32.mrf.mxu0  ;;  %v1719_v26 = vpop.f32.mrf.mxu1 }
  0xfb   : > { %v2091_v27 = vadd.f32 %v1719_v26, %v1718_v24  ;;  %v1648_v53 = vadd.f32 %v1647_v25, %v1646_v23 }
  0xfc   : > { %v1649_v28 = vpop.f32.mrf.mxu0  ;;  %v1721_v29 = vpop.f32.mrf.mxu1 }
  0xfe   : > { %v1650_v30 = vpop.f32.mrf.mxu0  ;;  %v1722_v31 = vpop.f32.mrf.mxu1 }
  0xff   : > { %v2093_v32 = vadd.f32 %v1722_v31, %v1721_v29  ;;  %v1651_v6 = vadd.f32 %v1650_v30, %v1649_v28 }
 0x100   : > { %v1652_v33 = vpop.f32.mrf.mxu0  ;;  %v1724_v34 = vpop.f32.mrf.mxu1 }
 0x102   : > { %v1653_v35 = vpop.f32.mrf.mxu0  ;;  %v1725_v36 = vpop.f32.mrf.mxu1 }
 0x103   : > { %v2095_v37 = vadd.f32 %v1725_v36, %v1724_v34  ;;  %v1654_v25 = vadd.f32 %v1653_v35, %v1652_v33 }
 0x104   : > { %v1655_v38 = vpop.f32.mrf.mxu0  ;;  %v1727_v39 = vpop.f32.mrf.mxu1 }
 0x106   : > { %v1656_v40 = vpop.f32.mrf.mxu0  ;;  %v1728_v41 = vpop.f32.mrf.mxu1 }
 0x107   : > { %v2097_v42 = vadd.f32 %v1728_v41, %v1727_v39  ;;  %v1657_v7 = vadd.f32 %v1656_v40, %v1655_v38 }
 0x108   : > { %v1658_v43 = vpop.f32.mrf.mxu0  ;;  %v2099_v44 = vpop.f32.mrf.mxu1 }
 0x10a   : > { %v1659_v45 = vpop.f32.mrf.mxu0  ;;  %v2101_v46 = vpop.f32.mrf.mxu1 }
 0x10b   : > { %v1660_v10 = vadd.f32 %v1659_v45, %v1658_v43 }
 0x10c   : > { %v1661_v47 = vpop.f32.mrf.mxu0  ;;  %v1775_v48 = vpop.f32.mrf.mxu1 }
 0x10d   : > { %v905_v57 = vadd.f32 %v1775_v48, %v1645_v52 }
 0x10e   : > { %v1662_v49 = vpop.f32.mrf.mxu0  ;;  %v896_v50 = vpop.f32.mrf.mxu1 }
 0x10f   : > { %v897_v58 = vadd.f32 %v1639_v51, %v896_v50  ;;  %v1223_v11 = vmul.f32 %v905_v57, %v905_v57  ;;  %v1663_v41 = vadd.f32 %v1662_v49, %v1661_v47 }
 0x110   : > { %v1664_v54 = vpop.f32.mrf.mxu0  ;;  %v1776_v55 = vpop.f32.mrf.mxu1 }
 0x111   : > { %v908_v59 = vadd.f32 %v1776_v55, %v1648_v53  ;;  %v1221_v2 = vmul.f32 %v897_v58, %v897_v58 }
 0x112   : > { %v1665_v60 = vpop.f32.mrf.mxu0  ;;  %v899_v61 = vpop.f32.mrf.mxu1 }
 0x113   : > { %v1534_v62 = vpack.c.bf16 %v908_v59, %v905_v57  ;;  %v900_v63 = vadd.f32 %v1642_v56, %v899_v61  ;;  %v1224_v15 = vmul.f32 %v908_v59, %v908_v59 }
 0x114   : > { %v1667_v0 = vpop.f32.mrf.mxu0  ;;  %v1779_v1 = vpop.f32.mrf.mxu1 }
 0x115   : > { %1606 = vst [vmem:[%s2107_s22 + $0x8] sm:$0xff] %v1534_v62   ;;  %v1529_v3 = vpack.c.bf16 %v900_v63, %v897_v58  ;;  %v1183_v4 = vadd.f32 %v900_v63, %v897_v58  ;;  %v1222_v5 = vmul.f32 %v900_v63, %v900_v63  ;;  %v921_v21 = vadd.f32 %v1779_v1, %v1657_v7 }
 0x116   : > { %v1668_v8 = vpop.f32.mrf.mxu0  ;;  %v912_v9 = vpop.f32.mrf.mxu1 }
 0x117   : > { %1530 = vst [vmem:[%s2107_s22] sm:$0xff] %v1529_v3   ;;  %v1184_v13 = vadd.f32 %v1183_v4, %v905_v57  ;;  %v1253_v14 = vadd.f32 %v1222_v5, %v1221_v2  ;;  %v913_v16 = vadd.f32 %v1651_v6, %v912_v9  ;;  %v1669_v52 = vadd.f32 %v1668_v8, %v1667_v0 }
 0x118   : > { %v1670_v18 = vpop.f32.mrf.mxu0  ;;  %v1780_v19 = vpop.f32.mrf.mxu1  ;;  %v1227_v35 = vmul.f32 %v921_v21, %v921_v21 }
 0x119   : > { %v1254_v20 = vadd.f32 %v1253_v14, %v1223_v11  ;;  %v1185_v23 = vadd.f32 %v1184_v13, %v908_v59  ;;  %v924_v24 = vadd.f32 %v1780_v19, %v1660_v10  ;;  %v1225_v30 = vmul.f32 %v913_v16, %v913_v16 }
 0x11a   : > { %v1671_v26 = vpop.f32.mrf.mxu0  ;;  %v915_v28 = vpop.f32.mrf.mxu1  ;;  %v1666_v59 = vadd.f32 %v1665_v60, %v1664_v54 }
 0x11b   : > { %v1186_v29 = vadd.f32 %v1185_v23, %v913_v16  ;;  %v1255_v31 = vadd.f32 %v1254_v20, %v1224_v15  ;;  %v1544_v34 = vpack.c.bf16 %v924_v24, %v921_v21  ;;  %v916_v36 = vadd.f32 %v1654_v25, %v915_v28 }
 0x11c   : > { %v1673_v38 = vpop.f32.mrf.mxu0  ;;  %v1783_v39 = vpop.f32.mrf.mxu1  ;;  %v1672_v33 = vadd.f32 %v1671_v26, %v1670_v18  ;;  %v1228_v63 = vmul.f32 %v924_v24, %v924_v24 }
 0x11d   : > { %v1256_v40 = vadd.f32 %v1255_v31, %v1225_v30  ;;  %1608 = vst [vmem:[%s2107_s22 + $0x18] sm:$0xff] %v1544_v34   ;;  %v1539_v43 = vpack.c.bf16 %v916_v36, %v913_v16  ;;  %v1187_v45 = vadd.f32 %v1186_v29, %v916_v36  ;;  %v1226_v48 = vmul.f32 %v916_v36, %v916_v36 }
 0x11e   : > { %v1674_v50 = vpop.f32.mrf.mxu0  ;;  %v928_v51 = vpop.f32.mrf.mxu1  ;;  %v937_v61 = vadd.f32 %v1783_v39, %v1669_v52 }
 0x11f   : > { %1607 = vst [vmem:[%s2107_s22 + $0x10] sm:$0xff] %v1539_v43   ;;  %v1188_v53 = vadd.f32 %v1187_v45, %v921_v21  ;;  %v1257_v55 = vadd.f32 %v1256_v40, %v1226_v48  ;;  %v929_v56 = vadd.f32 %v1663_v41, %v928_v51  ;;  %v1675_v20 = vadd.f32 %v1674_v50, %v1673_v38 }
 0x120   : > { %v1676_v57 = vpop.f32.mrf.mxu0  ;;  %v1784_v58 = vpop.f32.mrf.mxu1  ;;  %v1231_v14 = vmul.f32 %v937_v61, %v937_v61 }
 0x121   : > { %v940_v62 = vadd.f32 %v1784_v58, %v1672_v33  ;;  %v1258_v47 = vadd.f32 %v1257_v55, %v1227_v35  ;;  %v1189_v49 = vadd.f32 %v1188_v53, %v924_v24  ;;  %v1229_v5 = vmul.f32 %v929_v56, %v929_v56 }
 0x122   : > { %v1677_v1 = vpop.f32.mrf.mxu0  ;;  %v931_v2 = vpop.f32.mrf.mxu1 }
 0x123   : > { %v1554_v3 = vpack.c.bf16 %v940_v62, %v937_v61  ;;  %v932_v0 = vadd.f32 %v1666_v59, %v931_v2  ;;  %v1190_v4 = vadd.f32 %v1189_v49, %v929_v56  ;;  %v1259_v6 = vadd.f32 %v1258_v47, %v1228_v63 }
 0x124   : > { %v1679_v7 = vpop.f32.mrf.mxu0  ;;  %v1787_v8 = vpop.f32.mrf.mxu1  ;;  %v1678_v21 = vadd.f32 %v1677_v1, %v1676_v57  ;;  %v1232_v31 = vmul.f32 %v940_v62, %v940_v62 }
 0x125   : > { %1610 = vst [vmem:[%s2107_s22 + $0x28] sm:$0xff] %v1554_v3   ;;  %v1549_v9 = vpack.c.bf16 %v932_v0, %v929_v56  ;;  %v1230_v10 = vmul.f32 %v932_v0, %v932_v0  ;;  %v1260_v11 = vadd.f32 %v1259_v6, %v1229_v5  ;;  %v1191_v54 = vadd.f32 %v1190_v4, %v932_v0 }
 0x126   : > { %v1680_v60 = vpop.f32.mrf.mxu0  ;;  %v944_v13 = vpop.f32.mrf.mxu1 }
 0x127   : > { %1609 = vst [vmem:[%s2107_s22 + $0x20] sm:$0xff] %v1549_v9   ;;  %v1192_v15 = vadd.f32 %v1191_v54, %v937_v61  ;;  %v1261_v16 = vadd.f32 %v1260_v11, %v1230_v10  ;;  %v1681_v23 = vadd.f32 %v1680_v60, %v1679_v7  ;;  %v945_v28 = vadd.f32 %v1675_v20, %v944_v13 }
 0x128   : > { %v1682_v18 = vpop.f32.mrf.mxu0  ;;  %v1788_v19 = vpop.f32.mrf.mxu1 }
 0x129   : > { %v1262_v24 = vadd.f32 %v1261_v16, %v1231_v14  ;;  %v1193_v34 = vadd.f32 %v1192_v15, %v940_v62  ;;  %v953_v40 = vadd.f32 %v1787_v8, %v1681_v23  ;;  %v1233_v52 = vmul.f32 %v945_v28, %v945_v28 }
 0x12a   : > { %v1683_v25 = vpop.f32.mrf.mxu0  ;;  %v947_v26 = vpop.f32.mrf.mxu1 }
 0x12b   : > { %v1684_v29 = vadd.f32 %v1683_v25, %v1682_v18  ;;  %v948_v30 = vadd.f32 %v1678_v21, %v947_v26  ;;  %v1263_v45 = vadd.f32 %v1262_v24, %v1232_v31  ;;  %v1194_v51 = vadd.f32 %v1193_v34, %v945_v28 }
 0x12c   : > { %v1685_v36 = vpop.f32.mrf.mxu0  ;;  %v1791_v39 = vpop.f32.mrf.mxu1  ;;  %v1235_v4 = vmul.f32 %v953_v40, %v953_v40 }
 0x12d   : > { %v956_v41 = vadd.f32 %v1788_v19, %v1684_v29  ;;  %v1559_v43 = vpack.c.bf16 %v948_v30, %v945_v28  ;;  %v1264_v55 = vadd.f32 %v1263_v45, %v1233_v52  ;;  %v1234_v56 = vmul.f32 %v948_v30, %v948_v30 }
 0x12e   : > { %v1686_v48 = vpop.f32.mrf.mxu0  ;;  %v960_v38 = vpop.f32.mrf.mxu1  ;;  %v1195_v61 = vadd.f32 %v1194_v51, %v948_v30 }
 0x12f   : > { %v1564_v50 = vpack.c.bf16 %v956_v41, %v953_v40  ;;  %1611 = vst [vmem:[%s2107_s22 + $0x30] sm:$0xff] %v1559_v43   ;;  %v1687_v53 = vadd.f32 %v1686_v48, %v1685_v36  ;;  %v1265_v1 = vadd.f32 %v1264_v55, %v1234_v56  ;;  %v1236_v60 = vmul.f32 %v956_v41, %v956_v41 }
 0x130   : > { %v1688_v33 = vpop.f32.mrf.mxu0  ;;  %v1792_v35 = vpop.f32.mrf.mxu1  ;;  %v1196_v5 = vadd.f32 %v1195_v61, %v953_v40  ;;  %v1732_v61 = vadd.f32 %v2101_v46, %v2099_v44 }
 0x131   : > { %1612 = vst [vmem:[%s2107_s22 + $0x38] sm:$0xff] %v1564_v50   ;;  %v961_v47 = vadd.f32 %v1687_v53, %v960_v38  ;;  %v1266_v9 = vadd.f32 %v1265_v1, %v1235_v4 }
 0x132   : > { %v1689_v57 = vpop.f32.mrf.mxu0  ;;  %v963_v58 = vpop.f32.mrf.mxu1  ;;  %v1197_v13 = vadd.f32 %v1196_v5, %v956_v41 }
 0x133   : > { %v1690_v59 = vadd.f32 %v1689_v57, %v1688_v33  ;;  %v1237_v19 = vmul.f32 %v961_v47, %v961_v47  ;;  %v1267_v20 = vadd.f32 %v1266_v9, %v1236_v60 }
 0x134   : > { %v1691_v62 = vpop.f32.mrf.mxu0  ;;  %v2117_v63 = vpop.f32.mrf.mxu1  ;;  %v1198_v25 = vadd.f32 %v1197_v13, %v961_v47 }
 0x135   : > { %v964_v49 = vadd.f32 %v1690_v59, %v963_v58  ;;  %v1268_v36 = vadd.f32 %v1267_v20, %v1237_v19 }
 0x136   : > { %v1692_v2 = vpop.f32.mrf.mxu0  ;;  %v976_v3 = vpop.f32.mrf.mxu1 }
 0x137   : > { %v1569_v0 = vpack.c.bf16 %v964_v49, %v961_v47  ;;  %v1693_v8 = vadd.f32 %v1692_v2, %v1691_v62  ;;  %v1238_v26 = vmul.f32 %v964_v49, %v964_v49 }
 0x138   : > { %v1694_v6 = vpop.f32.mrf.mxu0  ;;  %v2119_v7 = vpop.f32.mrf.mxu1 }
 0x139   : > { %1613 = vst [vmem:[%s2107_s22 + $0x40] sm:$0xff] %v1569_v0   ;;  %v969_v16 = vadd.f32 %v1791_v39, %v1693_v8  ;;  %v1199_v39 = vadd.f32 %v1198_v25, %v964_v49 }
 0x13a   : > { %v1695_v10 = vpop.f32.mrf.mxu0  ;;  %v979_v11 = vpop.f32.mrf.mxu1 }
 0x13b   : > { %v1696_v54 = vadd.f32 %v1695_v10, %v1694_v6  ;;  %v1239_v40 = vmul.f32 %v969_v16, %v969_v16  ;;  %v1200_v52 = vadd.f32 %v1199_v39, %v969_v16 }
 0x13c   : > { %v1697_v14 = vpop.f32.mrf.mxu0  ;;  %v1799_v15 = vpop.f32.mrf.mxu1 }
 0x13d   : > { %v972_v18 = vadd.f32 %v1792_v35, %v1696_v54  ;;  %v2124_v31 = vadd.f32 %v1799_v15, %v2089_v22  ;;  %v1269_v22 = vadd.f32 %v1268_v36, %v1238_v26 }
 0x13e   : > { %v1698_v21 = vpop.f32.mrf.mxu0  ;;  %v992_v23 = vpop.f32.mrf.mxu1 }
 0x13f   : > { %v1574_v24 = vpack.c.bf16 %v972_v18, %v969_v16  ;;  %v1699_v28 = vadd.f32 %v1698_v21, %v1697_v14  ;;  %v993_v48 = vadd.f32 %v2085_v12, %v992_v23  ;;  %v1270_v56 = vadd.f32 %v1269_v22, %v1239_v40 }
 0x140   : > { %v1700_v29 = vpop.f32.mrf.mxu0  ;;  %v1800_v30 = vpop.f32.mrf.mxu1  ;;  %v1201_v57 = vadd.f32 %v1200_v52, %v972_v18 }
 0x141   : > { %1614 = vst [vmem:[%s2107_s22 + $0x48] sm:$0xff] %v1574_v24   ;;  %v2127_v34 = vadd.f32 %v1800_v30, %v2091_v27  ;;  %v977_v41 = vadd.f32 %v1699_v28, %v976_v3  ;;  %v1240_v27 = vmul.f32 %v972_v18, %v972_v18  ;;  %v1245_v20 = vmul.f32 %v993_v48, %v993_v48 }
 0x142   : > { %v1701_v43 = vpop.f32.mrf.mxu0  ;;  %v995_v45 = vpop.f32.mrf.mxu1 }
 0x143   : > { %v1594_v38 = vpack.c.bf16 %v2127_v34, %v2124_v31  ;;  %v1702_v50 = vadd.f32 %v1701_v43, %v1700_v29  ;;  %v996_v51 = vadd.f32 %v2087_v17, %v995_v45  ;;  %v1241_v58 = vmul.f32 %v977_v41, %v977_v41 }
 0x144   : > { %v1703_v33 = vpop.f32.mrf.mxu0  ;;  %v1803_v35 = vpop.f32.mrf.mxu1  ;;  %v1271_v17 = vadd.f32 %v1270_v56, %v1240_v27  ;;  %v1202_v47 = vadd.f32 %v1201_v57, %v977_v41  ;;  %v1248_v28 = vmul.f32 %v2127_v34, %v2127_v34 }
 0x145   : > { %1618 = vst [vmem:[%s2107_s22 + $0x68] sm:$0xff] %v1594_v38   ;;  %v980_v53 = vadd.f32 %v1702_v50, %v979_v11  ;;  %v1589_v55 = vpack.c.bf16 %v996_v51, %v993_v48  ;;  %v1017_v0 = vadd.f32 %v1803_v35, %v2097_v42  ;;  %v1246_v23 = vmul.f32 %v996_v51, %v996_v51 }
 0x146   : > { %v1704_v12 = vpop.f32.mrf.mxu0  ;;  %v1008_v59 = vpop.f32.mrf.mxu1  ;;  %v1272_v5 = vadd.f32 %v1271_v17, %v1241_v58 }
 0x147   : > { %v1579_v62 = vpack.c.bf16 %v980_v53, %v977_v41  ;;  %1617 = vst [vmem:[%s2107_s22 + $0x60] sm:$0xff] %v1589_v55   ;;  %v1705_v49 = vadd.f32 %v1704_v12, %v1703_v33  ;;  %v1242_v3 = vmul.f32 %v980_v53, %v980_v53  ;;  %v1203_v6 = vadd.f32 %v1202_v47, %v980_v53 }
 0x148   : > { %v1706_v1 = vpop.f32.mrf.mxu0  ;;  %v1804_v2 = vpop.f32.mrf.mxu1  ;;  %v1009_v46 = vadd.f32 %v2093_v32, %v1008_v59 }
 0x149   : > { %1615 = vst [vmem:[%s2107_s22 + $0x50] sm:$0xff] %v1579_v62   ;;  %v1020_v4 = vadd.f32 %v1804_v2, %v1732_v61  ;;  %v985_v8 = vadd.f32 %v2117_v63, %v1705_v49  ;;  %v1273_v13 = vadd.f32 %v1272_v5, %v1242_v3 }
 0x14a   : > { %v1707_v9 = vpop.f32.mrf.mxu0  ;;  %v1011_v44 = vpop.f32.mrf.mxu1  ;;  %v1249_v36 = vmul.f32 %v1009_v46, %v1009_v46 }
 0x14b   : > { %v1604_v10 = vpack.c.bf16 %v1020_v4, %v1017_v0  ;;  %v1708_v11 = vadd.f32 %v1707_v9, %v1706_v1  ;;  %v1012_v54 = vadd.f32 %v2095_v37, %v1011_v44  ;;  %v1243_v60 = vmul.f32 %v985_v8, %v985_v8 }
 0x14c   : > { %v1204_v14 = vadd.f32 %v1203_v6, %v985_v8  ;;  %v1247_v37 = vmul.f32 %v2124_v31, %v2124_v31 }
 0x14d   : > { %1620 = vst [vmem:[%s2107_s22 + $0x78] sm:$0xff] %v1604_v10   ;;  %v988_v42 = vadd.f32 %v2119_v7, %v1708_v11  ;;  %v1599_v15 = vpack.c.bf16 %v1012_v54, %v1009_v46  ;;  %v1274_v16 = vadd.f32 %v1273_v13, %v1243_v60  ;;  %v1250_v43 = vmul.f32 %v1012_v54, %v1012_v54 }
 0x14f   : > { %v1584_v18 = vpack.c.bf16 %v988_v42, %v985_v8  ;;  %v1205_v63 = vadd.f32 %v1204_v14, %v988_v42  ;;  %v1244_v19 = vmul.f32 %v988_v42, %v988_v42  ;;  %1619 = vst [vmem:[%s2107_s22 + $0x70] sm:$0xff] %v1599_v15  }
 0x151   : > { %1616 = vst [vmem:[%s2107_s22 + $0x58] sm:$0xff] %v1584_v18   ;;  %v1206_v32 = vadd.f32 %v1205_v63, %v993_v48  ;;  %v1275_v21 = vadd.f32 %v1274_v16, %v1244_v19  ;;  %v1251_v48 = vmul.f32 %v1017_v0, %v1017_v0 }
 0x153   : > { %v1207_v24 = vadd.f32 %v1206_v32, %v996_v51  ;;  %v1276_v25 = vadd.f32 %v1275_v21, %v1245_v20  ;;  %v1252_v51 = vmul.f32 %v1020_v4, %v1020_v4 }
 0x155   : > { %v1277_v26 = vadd.f32 %v1276_v25, %v1246_v23  ;;  %v1208_v7 = vadd.f32 %v1207_v24, %v2124_v31 }
 0x157   : > { %v1209_v29 = vadd.f32 %v1208_v7, %v2127_v34  ;;  %v1278_v30 = vadd.f32 %v1277_v26, %v1247_v37 }
 0x159   : > { %v1210_v39 = vadd.f32 %v1209_v29, %v1009_v46  ;;  %v1279_v40 = vadd.f32 %v1278_v30, %v1248_v28 }
 0x15b   : > { %v1211_v41 = vadd.f32 %v1210_v39, %v1012_v54  ;;  %v1280_v45 = vadd.f32 %v1279_v40, %v1249_v36 }
 0x15d   : > { %v1212_v38 = vadd.f32 %v1211_v41, %v1017_v0  ;;  %v1281_v50 = vadd.f32 %v1280_v45, %v1250_v43 }
 0x15f   : > { %v1213_v22 = vadd.f32 %v1212_v38, %v1020_v4  ;;  %v1282_v31 = vadd.f32 %v1281_v50, %v1251_v48 }
 0x161   : > { %v1214_v52 = vrot.slane %v1213_v22, 4  ;;  %v1283_v27 = vadd.f32 %v1282_v31, %v1252_v51 }
 0x163   : > { %v1215_v33 = vadd.f32 %v1214_v52, %v1213_v22  ;;  %v1284_v34 = vrot.slane %v1283_v27, 4 }
 0x165   : > { %v1216_v35 = vrot.slane %v1215_v33, 2  ;;  %v1285_v53 = vadd.f32 %v1284_v34, %v1283_v27 }
 0x167   : > { %v1217_v55 = vadd.f32 %v1216_v35, %v1215_v33  ;;  %v1286_v56 = vrot.slane %v1285_v53, 2 }
 0x169   : > { %v1218_v57 = vrot.slane %v1217_v55, 1  ;;  %v1287_v58 = vadd.f32 %v1286_v56, %v1285_v53 }
 0x16b   : > { %v1219_v12 = vadd.f32 %v1218_v57, %v1217_v55  ;;  %v1288_v59 = vrot.slane %v1287_v58, 1 }
 0x16d   : > { %1220 = vst [vmem:[%s187_s25] sm:$0x1] %v1219_v12  ;;  %v1289_v61 = vadd.f32 %v1288_v59, %v1287_v58 }
 0x16f   : > { %1290 = vst [vmem:[%s187_s25 + $0x1] sm:$0x1] %v1289_v61 }
 0x170 PF: > { %s14_s12 = sadd.s32 1, %s1924_s12  }
 0x171   : > { %p11_p5 = scmp.ge.s32.totalorder %s14_s12, 4  }
 0x173   :  { %13 = sbr.rel (!%p11_p5) target bundleno = 1 (0x1), region = 70 }

// kernel: _lambda_.17
= control target key start
LH: loop header
LB: loop body
LE: loop exit
PB: predicated region body
PF: predicated region fallthrough
CT: control target
= control target key end

     0   :  { %s438_s12 = smov 0   ;;  %s522_s0 = inlined_call_operand.vmem [shape: bf16[112,256], index: 0, kind: input, shape index: {}]   ;;  %s523_s1 = inlined_call_operand.vmem [shape: f32[1,256], index: 1, kind: input, shape index: {}]   ;;  %s524_s2 = inlined_call_operand.vmem [shape: f32[1,256], index: 2, kind: input, shape index: {}]   ;;  %s525_s3 = inlined_call_operand.vmem [shape: bf16[112,256], index: 3, kind: output, shape index: {}]  }
   0x1 LB: > { %s375_s13 = sadd.s32 4294967295, %s416_s12   ;;  %p379_p0 = scmp.ge.s32.totalorder %s416_s12, 1  ;;  %s416_s12 = sphi %s438_s12, %s13_s12  }
   0x2   : > { %p139_p1 = scmp.lt.s32.totalorder %s416_s12, 3 }
   0x4   : > { %p140_p2 = pnand %p379_p0, %p139_p1 }
   0x5   : > { %s165_s14 = smul.u32 (!%p140_p2), 7, %s375_s13 }
   0x6   : > { %143 = sbr.rel (%p140_p2) target bundleno = 38 (0x26), region = 32 }
   0x7   : > { %p166_p3 = scmp.lt.s32.totalorder (!%p140_p2), %s165_s14, 13 }
   0xb   : > { %v202_v0 = vlaneseq  ;;  %s527_s14 = smov (!%p166_p3, %s165_s14), 13  ;;  %v200_v2 = vld [vmem:[%s523_s1] sm:$0x3] }
   0xc   : > { %v226_v5 = vld [vmem:[%s524_s2] sm:$0x3]  ;;  %s393_s19 = sshll.u32 %s527_s14, 3 }
   0xd   : > { %v203_v1 = vshrl.u32 %v202_v0, 7  ;;  %s460_s22 = scalar_lea.vmem %s522_s0, %s393_s19  ;;  %s497_s25 = scalar_lea.vmem %s525_s3, %s393_s19 }
   0xe   : > { %v179_v8 = vld [vmem:[%s460_s22] sm:$0xff]  ;;  %v180_v11 = vld [vmem:[%s460_s22 + $0x8] sm:$0xff]  ;;  %v181_v12 = vld [vmem:[%s460_s22 + $0x10] sm:$0xff] }
   0xf   : > { %v204_v3 = vsub.s32 0, %v203_v1  ;;  %v208_v4 = vsub.s32 1, %v203_v1  ;;  %v186_v13 = vunpack.c.l.bf16 %v179_v8  ;;  %v187_v14 = vunpack.c.h.bf16 %v179_v8  ;;  %v182_v17 = vld [vmem:[%s460_s22 + $0x18] sm:$0xff]  ;;  %v183_v38 = vld [vmem:[%s460_s22 + $0x20] sm:$0xff]  ;;  %v184_v43 = vld [vmem:[%s460_s22 + $0x28] sm:$0xff] }
  0x10   : > { %v188_v15 = vunpack.c.l.bf16 %v180_v11  ;;  %v189_v16 = vunpack.c.h.bf16 %v180_v11  ;;  %v190_v18 = vunpack.c.l.bf16 %v181_v12  ;;  %v191_v19 = vunpack.c.h.bf16 %v181_v12  ;;  %v185_v48 = vld [vmem:[%s460_s22 + $0x30] sm:$0xff] }
  0x11   : > { %v462_v6 = vrot.slane %v200_v2, %v204_v3  ;;  %v464_v7 = vrot.slane %v200_v2, %v208_v4  ;;  %v467_v9 = vrot.slane %v226_v5, %v204_v3  ;;  %v469_v10 = vrot.slane %v226_v5, %v208_v4 }
  0x12   : > { %v192_v20 = vunpack.c.l.bf16 %v182_v17  ;;  %v193_v21 = vunpack.c.h.bf16 %v182_v17  ;;  %v194_v51 = vunpack.c.l.bf16 %v183_v38  ;;  %v195_v52 = vunpack.c.h.bf16 %v183_v38 }
  0x13   : > { %v212_v22 = vmul.f32 %v462_v6, %v186_v13  ;;  %v213_v23 = vmul.f32 %v464_v7, %v187_v14  ;;  %v214_v24 = vmul.f32 %v462_v6, %v188_v15  ;;  %v215_v25 = vmul.f32 %v464_v7, %v189_v16 }
  0x14   : > { %v216_v26 = vmul.f32 %v462_v6, %v190_v18  ;;  %v217_v27 = vmul.f32 %v464_v7, %v191_v19  ;;  %v218_v28 = vmul.f32 %v462_v6, %v192_v20  ;;  %v219_v29 = vmul.f32 %v464_v7, %v193_v21 }
  0x15   : > { %v238_v30 = vadd.f32 %v467_v9, %v212_v22  ;;  %v239_v31 = vadd.f32 %v469_v10, %v213_v23  ;;  %v240_v32 = vadd.f32 %v467_v9, %v214_v24  ;;  %v241_v33 = vadd.f32 %v469_v10, %v215_v25 }
  0x16   : > { %v242_v34 = vadd.f32 %v467_v9, %v216_v26  ;;  %v243_v35 = vadd.f32 %v469_v10, %v217_v27  ;;  %v244_v36 = vadd.f32 %v467_v9, %v218_v28  ;;  %v245_v37 = vadd.f32 %v469_v10, %v219_v29 }
  0x17   : > { %v252_v39 = vmax.f32 %v238_v30, 0.0  ;;  %v253_v40 = vmax.f32 %v239_v31, 0.0  ;;  %v254_v41 = vmax.f32 %v240_v32, 0.0  ;;  %v255_v42 = vmax.f32 %v241_v33, 0.0 }
  0x18   : > { %v256_v44 = vmax.f32 %v242_v34, 0.0  ;;  %v257_v45 = vmax.f32 %v243_v35, 0.0  ;;  %v258_v46 = vmax.f32 %v244_v36, 0.0  ;;  %v259_v47 = vmax.f32 %v245_v37, 0.0 }
  0x19   : > { %v395_v49 = vpack.c.bf16 %v253_v40, %v252_v39  ;;  %v396_v50 = vpack.c.bf16 %v255_v42, %v254_v41  ;;  %v196_v55 = vunpack.c.l.bf16 %v184_v43  ;;  %v197_v56 = vunpack.c.h.bf16 %v184_v43 }
  0x1a   : > { %v397_v53 = vpack.c.bf16 %v257_v45, %v256_v44  ;;  %v398_v54 = vpack.c.bf16 %v259_v47, %v258_v46  ;;  %v220_v57 = vmul.f32 %v462_v6, %v194_v51  ;;  %v221_v58 = vmul.f32 %v464_v7, %v195_v52 }
  0x1b   : > { %310 = vst [vmem:[%s497_s25] sm:$0xff] %v395_v49  ;;  %311 = vst [vmem:[%s497_s25 + $0x8] sm:$0xff] %v396_v50  ;;  %v198_v59 = vunpack.c.l.bf16 %v185_v48  ;;  %v199_v60 = vunpack.c.h.bf16 %v185_v48  ;;  %v222_v61 = vmul.f32 %v462_v6, %v196_v55  ;;  %v223_v62 = vmul.f32 %v464_v7, %v197_v56 }
  0x1c   : > { %312 = vst [vmem:[%s497_s25 + $0x10] sm:$0xff] %v397_v53  ;;  %313 = vst [vmem:[%s497_s25 + $0x18] sm:$0xff] %v398_v54  ;;  %v246_v63 = vadd.f32 %v467_v9, %v220_v57  ;;  %v247_v0 = vadd.f32 %v469_v10, %v221_v58 }
  0x1d   : > { %v224_v1 = vmul.f32 %v462_v6, %v198_v59  ;;  %v225_v2 = vmul.f32 %v464_v7, %v199_v60  ;;  %v248_v3 = vadd.f32 %v467_v9, %v222_v61  ;;  %v249_v4 = vadd.f32 %v469_v10, %v223_v62 }
  0x1e   : > { %v260_v5 = vmax.f32 %v246_v63, 0.0  ;;  %v261_v8 = vmax.f32 %v247_v0, 0.0 }
  0x1f   : > { %v250_v11 = vadd.f32 %v467_v9, %v224_v1  ;;  %v251_v12 = vadd.f32 %v469_v10, %v225_v2  ;;  %v262_v13 = vmax.f32 %v248_v3, 0.0  ;;  %v263_v14 = vmax.f32 %v249_v4, 0.0 }
  0x20   : > { %v399_v15 = vpack.c.bf16 %v261_v8, %v260_v5 }
  0x21   : > { %v264_v16 = vmax.f32 %v250_v11, 0.0  ;;  %v265_v17 = vmax.f32 %v251_v12, 0.0  ;;  %v400_v6 = vpack.c.bf16 %v263_v14, %v262_v13 }
  0x22   : > { %314 = vst [vmem:[%s497_s25 + $0x20] sm:$0xff] %v399_v15 }
  0x23   : > { %v401_v18 = vpack.c.bf16 %v265_v17, %v264_v16  ;;  %315 = vst [vmem:[%s497_s25 + $0x28] sm:$0xff] %v400_v6 }
  0x25   : > { %316 = vst [vmem:[%s497_s25 + $0x30] sm:$0xff] %v401_v18 }
  0x26 PF: > { %s13_s12 = sadd.s32 1, %s416_s12  }
  0x27   : > { %p10_p4 = scmp.ge.s32.totalorder %s13_s12, 4  }
  0x29   :  { %12 = sbr.rel (!%p10_p4) target bundleno = 1 (0x1), region = 62 }

// kernel: _lambda_.18
= control target key start
LH: loop header
LB: loop body
LE: loop exit
PB: predicated region body
PF: predicated region fallthrough
CT: control target
= control target key end

     0   :  { %s610_s12 = smov 0   ;;  %s612_s13 = smov 0   ;;  %s678_s0 = inlined_call_operand.vmem [shape: bf16[2,7,3,256], index: 0, kind: input, shape index: {}, may-alias: {0,1,2}]   ;;  %s679_s1 = inlined_call_operand.vmem [shape: bf16[2,7,3,256], index: 1, kind: input, shape index: {}, may-alias: {0,1,2}]   ;;  %s680_s2 = inlined_call_operand.vmem [shape: bf16[2,7,3,256], index: 2, kind: input, shape index: {}, may-alias: {0,1,2}]   ;;  %s681_s3 = inlined_call_operand.vmem [shape: bf16[2,3,3,256], index: 3, kind: output, shape index: {}]  }
   0x1   :  { %s614_s14 = smov 0   ;;  %s616_s15 = smov 0  }
   0x2   :  { %s618_s16 = smov 0  }
   0x3 LB: > { %s22_s17 = sadd.s32 1, %s579_s14  ;;  %s25_s18 = sadd.s32 1, %s583_s15  ;;  %s587_s16 = sphi %s618_s16, %s13_s16   ;;  %s583_s15 = sphi %s616_s15, %s685_s15   ;;  %s579_s14 = sphi %s614_s14, %s684_s14   ;;  %s575_s13 = sphi %s612_s13, %s683_s13   ;;  %s571_s12 = sphi %s610_s12, %s682_s12  }
   0x4   : > { %p23_p0 = scmp.ge.s32.totalorder %s22_s17, 3  ;;  %p491_p1 = scmp.ge.s32.totalorder %s587_s16, 1 }
   0x5   : > { %p209_p2 = scmp.lt.s32.totalorder %s587_s16, 7 }
   0x6   : > { %s687_s17 = smov (%p23_p0, %s22_s17), 0  ;;  %s689_s18 = smov (!%p23_p0, %s25_s18), %s583_s15 }
   0x7   : > { %p210_p3 = pnand %p491_p1, %p209_p2  ;;  %p27_p4 = scmp.ge.s32.totalorder %s689_s18, 2 }
   0x8   : > { %s492_s19 = sshll.u32 (!%p210_p3), %s571_s12, 1  ;;  %p265_p5 = scmp.lt.s32.totalorder (!%p210_p3), %s575_s13, 1 }
   0x9   : > { %s691_s18 = smov (%p27_p4, %s689_s18), 0  ;;  %213 = sbr.rel (%p210_p3) target bundleno = 37 (0x25), region = 32 }
   0xa   : > { %p267_p6 = scmp.lt.s32.totalorder (!%p210_p3), %s492_s19, 6  ;;  %s276_s20 = sadd.s32 (!%p210_p3), 1, %s492_s19 }
   0xb   : > { %p279_p7 = scmp.lt.s32.totalorder (!%p210_p3), %s276_s20, 6  ;;  %s289_s24 = sadd.s32 (!%p210_p3), 2, %s492_s19 }
   0xc   : > { %p292_p8 = scmp.lt.s32.totalorder (!%p210_p3), %s289_s24, 6  ;;  %p303_p9 = scmp.lt.s32.totalorder (!%p210_p3), %s571_s12, 2 }
   0xe   : > { %s693_s13 = smov (!%p265_p5, %s575_s13), 1  ;;  %s695_s20 = smov (!%p279_p7, %s276_s20), 6  ;;  %v589_v2 = vmov 1983009808   ;;  %v329_v4 = vlaneseq  ;;  %vm334_vm0 = vcmask 1041408   ;;  %vm337_vm2 = vcmask 1043458  }
   0xf   : > { %s268_s21 = scalar_select %p267_p6, %s492_s19, 6  ;;  %v327_v3 = vunpack.c.l.s4 %v589_v2  ;;  %vm335_vm1 = vsmask.f32 1280  ;;  %vm338_vm3 = vsmask.f32 3328 }
  0x10   : > { %s506_s22 = smul.u32 14, %s693_s13  ;;  %s697_s24 = smov (!%p292_p8, %s289_s24), 6  ;;  %v330_v11 = vshrl.u32 %v329_v4, 7  ;;  %vm336_vm4 = vmand %vm334_vm0, %vm335_vm1 }
  0x11   : > { %s493_s23 = sshll.u32 %s268_s21, 1  ;;  %s496_s30 = sshll.u32 %s695_s20, 1  ;;  %v328_v10 = vunpack.c.0.s8 %v327_v3  ;;  %vm339_vm5 = vmand %vm337_vm2, %vm338_vm3 }
  0x12   : > { %s271_s25 = sadd.s32 %s506_s22, %s493_s23  ;;  %s283_s4 = sadd.s32 %s506_s22, %s496_s30  ;;  %vm340_vm6 = vmor %vm339_vm5, %vm336_vm4 }
  0x13   : > { %s494_s26 = sshll.u32 %s271_s25, 1  ;;  %s499_s5 = sshll.u32 %s697_s24, 1  ;;  %v331_v14 = vsub.s32 %v328_v10, %v330_v11 }
  0x14   : > { %s273_s29 = scalar_lea.vmem %s678_s0, %s494_s26  ;;  %s497_s6 = sshll.u32 %s283_s4, 1 }
  0x15   : > { %v310_v0 = vld [vmem:[%s273_s29] sm:$0xf]  ;;  %s296_s7 = sadd.s32 %s506_s22, %s499_s5  ;;  %s285_s10 = scalar_lea.vmem %s679_s1, %s497_s6 }
  0x16   : > { %s500_s11 = sshll.u32 %s296_s7, 1  ;;  %v311_v1 = vunpack.c.l.bf16 %v310_v0  ;;  %s507_s23 = smul.u32 6, %s693_s13  ;;  %v312_v5 = vld [vmem:[%s285_s10] sm:$0xf] }
  0x17   : > { %s298_s20 = scalar_lea.vmem %s680_s2, %s500_s11  ;;  %s699_s12 = smov (!%p303_p9, %s571_s12), 2  ;;  %v313_v6 = vunpack.c.l.bf16 %v312_v5 }
  0x18   : > { %v315_v7 = vld [vmem:[%s298_s20] sm:$0xf]  ;;  %s501_s22 = sshll.u32 %s699_s12, 1 }
  0x19   : > { %v316_v8 = vunpack.c.l.bf16 %v315_v7  ;;  %v314_v9 = vmax.f32 %v311_v1, %v313_v6  ;;  %s307_s24 = sadd.s32 %s507_s23, %s501_s22 }
  0x1a   : > { %s502_s25 = sshll.u32 %s307_s24, 1 }
  0x1b   : > { %v317_v12 = vmax.f32 %v314_v9, %v316_v8  ;;  %s309_s27 = scalar_lea.vmem %s681_s3, %s502_s25 }
  0x1c   : > { %v341_v16 = vld [vmem:[%s309_s27] sm:$0xf] }
  0x1d   : > { %v319_v13 = vcombine.high %v317_v12, %v317_v12 }
  0x1f   : > { %v503_v15 = vpack.c.bf16 %v319_v13, %v317_v12 }
  0x21   : > { %v332_v17 = vrot.slane %v503_v15, %v331_v14 }
  0x23   : > { %v342_v18 = vsel %vm340_vm6, %v332_v17, %v341_v16 }
  0x24   : > { %343 = vst [vmem:[%s309_s27] sm:$0xf] %v342_v18 }
  0x25 PF: > { %s13_s16 = sadd.s32 1, %s587_s16   ;;  %s682_s12 = smov %s579_s14 }
  0x26   : > { %p10_p10 = scmp.ge.s32.totalorder %s13_s16, 8   ;;  %s683_s13 = smov %s583_s15 }
  0x27   : > { %s684_s14 = smov %s687_s17  ;;  %s685_s15 = smov %s691_s18 }
  0x28   :  { %12 = sbr.rel (!%p10_p10) target bundleno = 3 (0x3), region = 68 }

// kernel: _lambda_.16
= control target key start
LH: loop header
LB: loop body
LE: loop exit
PB: predicated region body
PF: predicated region fallthrough
CT: control target
= control target key end

     0   :  { %s5644_s12 = smov 0   ;;  %s7140_s0 = inlined_call_operand.vmem [shape: bf16[112,3200], index: 0, kind: input, shape index: {}]   ;;  %s7141_s1 = inlined_call_operand.vmem [shape: bf16[3200,256], index: 1, kind: input, shape index: {}]   ;;  %s7142_s2 = inlined_call_operand.vmem [shape: bf16[112,256], index: 2, kind: output, shape index: {0}]   ;;  %s7143_s3 = inlined_call_operand.vmem [shape: f32[16,256], index: 3, kind: output, shape index: {1}]  }
   0x1 LB: > { %s5650_s13 = sadd.s32 4294967295, %s5620_s12   ;;  %p4326_p0 = scmp.ge.s32.totalorder %s5620_s12, 1  ;;  %s5620_s12 = sphi %s5644_s12, %s14_s12  }
   0x2   : > { %p142_p1 = scmp.lt.s32.totalorder %s5620_s12, 3 }
   0x4   : > { %p143_p2 = pnand %p4326_p0, %p142_p1 }
   0x5   : > { %s173_s22 = smul.u32 (!%p143_p2), 7, %s5650_s13  ;;  %p187_p4 = scmp.lt.s32.totalorder (!%p143_p2), %s5650_s13, 1 }
   0x6   : > { %146 = sbr.rel (%p143_p2) target bundleno = 666 (0x29a), region = 28 }
   0x7   : > { %p174_p3 = scmp.lt.s32.totalorder (!%p143_p2), %s173_s22, 13 }
   0xb   : > { %v4878_v0 = vld [vmem:[%s7141_s1 + $0x74] ss:$8 sps:$4 sm:$0xff]   ;;  %v4882_v2 = vld [vmem:[%s7141_s1 + $0x70] ss:$8 sps:$4 sm:$0xff]   ;;  %v4884_v4 = vld [vmem:[%s7141_s1 + $0x64] ss:$8 sps:$4 sm:$0xff]  }
   0xc   : > { %v4880_v1 = vld [vmem:[%s7141_s1 + $0x174] ss:$8 sps:$4 sm:$0xff]   ;;  %3150 = vmatprep.subr.bf16.mxu0 %v4878_v0  ;;  %v4883_v3 = vld [vmem:[%s7141_s1 + $0x170] ss:$8 sps:$4 sm:$0xff]   ;;  %v4886_v5 = vld [vmem:[%s7141_s1 + $0x164] ss:$8 sps:$4 sm:$0xff]  }
   0xd   : > { %3221 = vmatprep.subr.bf16.mxu1 %v4880_v1  ;;  %3151 = vmatpush1.bf16.msra.mxu0 %v4882_v2  ;;  %v4888_v6 = vld [vmem:[%s7141_s1 + $0x60] ss:$8 sps:$4 sm:$0xff]   ;;  %v4890_v8 = vld [vmem:[%s7141_s1 + $0x54] ss:$8 sps:$4 sm:$0xff]   ;;  %v4894_v10 = vld [vmem:[%s7141_s1 + $0x50] ss:$8 sps:$4 sm:$0xff]  }
   0xe   : > { %3222 = vmatpush1.bf16.msra.mxu1 %v4883_v3  ;;  %3152 = vmatprep.subr.bf16.mxu0 %v4884_v4  ;;  %v4889_v7 = vld [vmem:[%s7141_s1 + $0x160] ss:$8 sps:$4 sm:$0xff]   ;;  %v4892_v9 = vld [vmem:[%s7141_s1 + $0x154] ss:$8 sps:$4 sm:$0xff]   ;;  %v4895_v11 = vld [vmem:[%s7141_s1 + $0x150] ss:$8 sps:$4 sm:$0xff]  }
   0xf   : > { %3223 = vmatprep.subr.bf16.mxu1 %v4886_v5  ;;  %v4896_v12 = vld [vmem:[%s7141_s1 + $0x44] ss:$8 sps:$4 sm:$0xff]   ;;  %v4900_v14 = vld [vmem:[%s7141_s1 + $0x40] ss:$8 sps:$4 sm:$0xff]   ;;  %v4902_v16 = vld [vmem:[%s7141_s1 + $0x34] ss:$8 sps:$4 sm:$0xff]  }
  0x10   : > { %v4898_v13 = vld [vmem:[%s7141_s1 + $0x144] ss:$8 sps:$4 sm:$0xff]   ;;  %v4901_v15 = vld [vmem:[%s7141_s1 + $0x140] ss:$8 sps:$4 sm:$0xff]   ;;  %v4904_v17 = vld [vmem:[%s7141_s1 + $0x134] ss:$8 sps:$4 sm:$0xff]  }
  0x11   : > { %3153 = vmatpush1.bf16.msra.mxu0 %v4888_v6  ;;  %v4906_v18 = vld [vmem:[%s7141_s1 + $0x30] ss:$8 sps:$4 sm:$0xff]   ;;  %v4908_v20 = vld [vmem:[%s7141_s1 + $0x24] ss:$8 sps:$4 sm:$0xff]   ;;  %v4912_v22 = vld [vmem:[%s7141_s1 + $0x20] ss:$8 sps:$4 sm:$0xff]  }
  0x12   : > { %3224 = vmatpush1.bf16.msra.mxu1 %v4889_v7  ;;  %3154 = vmatprep.subr.bf16.mxu0 %v4890_v8  ;;  %v4907_v19 = vld [vmem:[%s7141_s1 + $0x130] ss:$8 sps:$4 sm:$0xff]   ;;  %v4910_v21 = vld [vmem:[%s7141_s1 + $0x124] ss:$8 sps:$4 sm:$0xff]   ;;  %v4913_v23 = vld [vmem:[%s7141_s1 + $0x120] ss:$8 sps:$4 sm:$0xff]  }
  0x13   : > { %3225 = vmatprep.subr.bf16.mxu1 %v4892_v9  ;;  %v4914_v24 = vld [vmem:[%s7141_s1 + $0x14] ss:$8 sps:$4 sm:$0xff]   ;;  %v4918_v26 = vld [vmem:[%s7141_s1 + $0x10] ss:$8 sps:$4 sm:$0xff]   ;;  %v4920_v28 = vld [vmem:[%s7141_s1 + $0x4] ss:$8 sps:$4 sm:$0xff]  }
  0x14   : > { %v4916_v25 = vld [vmem:[%s7141_s1 + $0x114] ss:$8 sps:$4 sm:$0xff]   ;;  %v4919_v27 = vld [vmem:[%s7141_s1 + $0x110] ss:$8 sps:$4 sm:$0xff]   ;;  %v4922_v29 = vld [vmem:[%s7141_s1 + $0x104] ss:$8 sps:$4 sm:$0xff]  }
  0x15   : > { %3155 = vmatpush1.bf16.msra.mxu0 %v4894_v10  ;;  %v4924_v30 = vld [vmem:[%s7141_s1] ss:$8 sps:$4 sm:$0xff]   ;;  %v4926_v32 = vld [vmem:[%s7141_s1 + $0xf4] ss:$8 sps:$4 sm:$0xff]   ;;  %v4930_v34 = vld [vmem:[%s7141_s1 + $0xf0] ss:$8 sps:$4 sm:$0xff]  }
  0x16   : > { %3226 = vmatpush1.bf16.msra.mxu1 %v4895_v11  ;;  %3156 = vmatprep.subr.bf16.mxu0 %v4896_v12  ;;  %v4925_v31 = vld [vmem:[%s7141_s1 + $0x100] ss:$8 sps:$4 sm:$0xff]   ;;  %v4928_v33 = vld [vmem:[%s7141_s1 + $0x1f4] ss:$8 sps:$4 sm:$0xff]   ;;  %v4931_v35 = vld [vmem:[%s7141_s1 + $0x1f0] ss:$8 sps:$4 sm:$0xff]  }
  0x17   : > { %3227 = vmatprep.subr.bf16.mxu1 %v4898_v13  ;;  %v4932_v36 = vld [vmem:[%s7141_s1 + $0xe4] ss:$8 sps:$4 sm:$0xff]   ;;  %s7145_s22 = smov (!%p174_p3, %s173_s22), 13  ;;  %v4936_v38 = vld [vmem:[%s7141_s1 + $0xe0] ss:$8 sps:$4 sm:$0xff]   ;;  %s7147_s13 = smov (!%p187_p4, %s5650_s13), 1 }
  0x18   : > { %v4934_v37 = vld [vmem:[%s7141_s1 + $0x1e4] ss:$8 sps:$4 sm:$0xff]   ;;  %v4937_v39 = vld [vmem:[%s7141_s1 + $0x1e0] ss:$8 sps:$4 sm:$0xff]   ;;  %v4938_v40 = vld [vmem:[%s7141_s1 + $0xd4] ss:$8 sps:$4 sm:$0xff]  }
  0x19   : > { %3157 = vmatpush1.bf16.msra.mxu0 %v4900_v14  ;;  %s4867_s23 = smul.u32 100, %s7145_s22  ;;  %v4940_v41 = vld [vmem:[%s7141_s1 + $0x1d4] ss:$8 sps:$4 sm:$0xff]   ;;  %v4942_v42 = vld [vmem:[%s7141_s1 + $0xd0] ss:$8 sps:$4 sm:$0xff]  }
  0x1a   : > { %3228 = vmatpush1.bf16.msra.mxu1 %v4901_v15  ;;  %3158 = vmatprep.subr.bf16.mxu0 %v4902_v16  ;;  %v4943_v43 = vld [vmem:[%s7141_s1 + $0x1d0] ss:$8 sps:$4 sm:$0xff]   ;;  %v4944_v44 = vld [vmem:[%s7141_s1 + $0xc4] ss:$8 sps:$4 sm:$0xff]   ;;  %v4948_v46 = vld [vmem:[%s7141_s1 + $0xc0] ss:$8 sps:$4 sm:$0xff]  }
  0x1b   : > { %3229 = vmatprep.subr.bf16.mxu1 %v4904_v17  ;;  %s5796_s7 = scalar_lea.vmem %s7140_s0, %s4867_s23  ;;  %v4946_v45 = vld [vmem:[%s7141_s1 + $0x1c4] ss:$8 sps:$4 sm:$0xff]   ;;  %v4949_v47 = vld [vmem:[%s7141_s1 + $0x1c0] ss:$8 sps:$4 sm:$0xff]   ;;  %v4950_v48 = vld [vmem:[%s7141_s1 + $0xb4] ss:$8 sps:$4 sm:$0xff]  }
  0x1c   : > { %v4976_v49 = vld [vmem:[%s5796_s7 + $0x4] ss:$100 sps:$4 sm:$0xff]   ;;  %v4952_v50 = vld [vmem:[%s7141_s1 + $0x1b4] ss:$8 sps:$4 sm:$0xff]   ;;  %v4979_v51 = vld [vmem:[%s5796_s7 + $0xc] ss:$100 sps:$4 sm:$0xff]  }
  0x1d   : > { %3159 = vmatpush1.bf16.msra.mxu0 %v4906_v18  ;;  %3182 = vmatprep.mubr.bf16.mxu0 %v4976_v49  ;;  %v4954_v52 = vld [vmem:[%s7141_s1 + $0xb0] ss:$8 sps:$4 sm:$0xff]   ;;  %v4956_v54 = vld [vmem:[%s7141_s1 + $0xa4] ss:$8 sps:$4 sm:$0xff]   ;;  %v4960_v56 = vld [vmem:[%s7141_s1 + $0xa0] ss:$8 sps:$4 sm:$0xff]  }
  0x1e   : > { %3230 = vmatpush1.bf16.msra.mxu1 %v4907_v19  ;;  %3160 = vmatprep.subr.bf16.mxu0 %v4908_v20  ;;  %v4955_v53 = vld [vmem:[%s7141_s1 + $0x1b0] ss:$8 sps:$4 sm:$0xff]   ;;  %v4958_v55 = vld [vmem:[%s7141_s1 + $0x1a4] ss:$8 sps:$4 sm:$0xff]   ;;  %v4961_v57 = vld [vmem:[%s7141_s1 + $0x1a0] ss:$8 sps:$4 sm:$0xff]  }
  0x1f   : > { %3231 = vmatprep.subr.bf16.mxu1 %v4910_v21  ;;  %3253 = vmatprep.mubr.bf16.mxu1 %v4979_v51  ;;  %v4962_v58 = vld [vmem:[%s7141_s1 + $0x94] ss:$8 sps:$4 sm:$0xff]   ;;  %v4966_v60 = vld [vmem:[%s7141_s1 + $0x90] ss:$8 sps:$4 sm:$0xff]   ;;  %v4968_v62 = vld [vmem:[%s7141_s1 + $0x84] ss:$8 sps:$4 sm:$0xff]  }
  0x20   : > { %v4964_v59 = vld [vmem:[%s7141_s1 + $0x194] ss:$8 sps:$4 sm:$0xff]   ;;  %v4967_v61 = vld [vmem:[%s7141_s1 + $0x190] ss:$8 sps:$4 sm:$0xff]   ;;  %v4970_v63 = vld [vmem:[%s7141_s1 + $0x184] ss:$8 sps:$4 sm:$0xff]  }
  0x21   : > { %3161 = vmatpush1.bf16.msra.mxu0 %v4912_v22  ;;  %v4972_v0 = vld [vmem:[%s7141_s1 + $0x80] ss:$8 sps:$4 sm:$0xff]   ;;  %v4982_v2 = vld [vmem:[%s7141_s1 + $0x274] ss:$8 sps:$4 sm:$0xff]   ;;  %v4980_v6 = vld [vmem:[%s7141_s1 + $0x270] ss:$8 sps:$4 sm:$0xff]  }
  0x22   : > { %3232 = vmatpush1.bf16.msra.mxu1 %v4913_v23  ;;  %3162 = vmatprep.subr.bf16.mxu0 %v4914_v24  ;;  %v4973_v1 = vld [vmem:[%s7141_s1 + $0x180] ss:$8 sps:$4 sm:$0xff]   ;;  %v4985_v3 = vld [vmem:[%s7141_s1 + $0x374] ss:$8 sps:$4 sm:$0xff]   ;;  %v4983_v7 = vld [vmem:[%s7141_s1 + $0x370] ss:$8 sps:$4 sm:$0xff]  }
  0x23   : > { %3233 = vmatprep.subr.bf16.mxu1 %v4916_v25  ;;  %v4974_v4 = vld [vmem:[%s5796_s7] ss:$100 sps:$4 sm:$0xff]   ;;  %v4977_v5 = vld [vmem:[%s5796_s7 + $0x8] ss:$100 sps:$4 sm:$0xff]   ;;  %v4994_v12 = vld [vmem:[%s7141_s1 + $0x254] ss:$8 sps:$4 sm:$0xff]  }
  0x24   : > { %v4988_v8 = vld [vmem:[%s7141_s1 + $0x264] ss:$8 sps:$4 sm:$0xff]   ;;  %v4986_v10 = vld [vmem:[%s7141_s1 + $0x260] ss:$8 sps:$4 sm:$0xff]   ;;  %v4997_v13 = vld [vmem:[%s7141_s1 + $0x354] ss:$8 sps:$4 sm:$0xff]  }
  0x25   : > { %3163 = vmatpush1.bf16.msra.mxu0 %v4918_v26  ;;  %v4991_v9 = vld [vmem:[%s7141_s1 + $0x364] ss:$8 sps:$4 sm:$0xff]   ;;  %v4989_v11 = vld [vmem:[%s7141_s1 + $0x360] ss:$8 sps:$4 sm:$0xff]   ;;  %v4992_v14 = vld [vmem:[%s7141_s1 + $0x250] ss:$8 sps:$4 sm:$0xff]  }
  0x26   : > { %3234 = vmatpush1.bf16.msra.mxu1 %v4919_v27  ;;  %3164 = vmatprep.subr.bf16.mxu0 %v4920_v28  ;;  %v4995_v15 = vld [vmem:[%s7141_s1 + $0x350] ss:$8 sps:$4 sm:$0xff]   ;;  %v5038_v18 = vld [vmem:[%s5796_s7 + $0xc8] ss:$100 sps:$4 sm:$0xff]   ;;  %v5006_v24 = vld [vmem:[%s7141_s1 + $0x234] ss:$8 sps:$4 sm:$0xff]  }
  0x27   : > { %3235 = vmatprep.subr.bf16.mxu1 %v4922_v29  ;;  %v5034_v16 = vld [vmem:[%s5796_s7 + $0xcc] ss:$100 sps:$4 sm:$0xff]   ;;  %v5036_v17 = vld [vmem:[%s5796_s7 + $0xd4] ss:$100 sps:$4 sm:$0xff]   ;;  %v4998_v22 = vld [vmem:[%s7141_s1 + $0x240] ss:$8 sps:$4 sm:$0xff]  }
  0x28   : > { %v5039_v19 = vld [vmem:[%s5796_s7 + $0xd0] ss:$100 sps:$4 sm:$0xff]   ;;  %v5000_v20 = vld [vmem:[%s7141_s1 + $0x244] ss:$8 sps:$4 sm:$0xff]   ;;  %v5001_v23 = vld [vmem:[%s7141_s1 + $0x340] ss:$8 sps:$4 sm:$0xff]  }
  0x29   : > { %3165 = vmatpush1.bf16.msra.mxu0 %v4924_v30  ;;  %v5003_v21 = vld [vmem:[%s7141_s1 + $0x344] ss:$8 sps:$4 sm:$0xff]   ;;  %v5009_v25 = vld [vmem:[%s7141_s1 + $0x334] ss:$8 sps:$4 sm:$0xff]   ;;  %v5004_v26 = vld [vmem:[%s7141_s1 + $0x230] ss:$8 sps:$4 sm:$0xff]  }
  0x2a   : > { %3236 = vmatpush1.bf16.msra.mxu1 %v4925_v31  ;;  %3166 = vmatprep.subr.bf16.mxu0 %v4926_v32  ;;  %v5007_v27 = vld [vmem:[%s7141_s1 + $0x330] ss:$8 sps:$4 sm:$0xff]   ;;  %v5054_v29 = vld [vmem:[%s5796_s7 + $0x19c] ss:$100 sps:$4 sm:$0xff]   ;;  %v5012_v32 = vld [vmem:[%s7141_s1 + $0x224] ss:$8 sps:$4 sm:$0xff]  }
  0x2b   : > { %3237 = vmatprep.subr.bf16.mxu1 %v4928_v33  ;;  %v5052_v28 = vld [vmem:[%s5796_s7 + $0x194] ss:$100 sps:$4 sm:$0xff]   ;;  %v5015_v33 = vld [vmem:[%s7141_s1 + $0x324] ss:$8 sps:$4 sm:$0xff]   ;;  %v5025_v49 = vld [vmem:[%s7141_s1 + $0x300] ss:$8 sps:$4 sm:$0xff]  }
  0x2c   : > { %v5056_v30 = vld [vmem:[%s5796_s7 + $0x190] ss:$100 sps:$4 sm:$0xff]   ;;  %v5057_v31 = vld [vmem:[%s5796_s7 + $0x198] ss:$100 sps:$4 sm:$0xff]  }
  0x2d   : > { %3167 = vmatpush2.bf16.msra.mxu0 %v4930_v34  ;;  %v5010_v34 = vld [vmem:[%s7141_s1 + $0x220] ss:$8 sps:$4 sm:$0xff]   ;;  %v5033_v51 = vld [vmem:[%s7141_s1 + $0x3f4] ss:$8 sps:$4 sm:$0xff]  }
  0x2e   : > { %3238 = vmatpush2.bf16.msra.mxu1 %v4931_v35  ;;  %3168 = vmatprep.subr.bf16.mxu0 %v4932_v36  ;;  %v5013_v35 = vld [vmem:[%s7141_s1 + $0x320] ss:$8 sps:$4 sm:$0xff]   ;;  %v5018_v36 = vld [vmem:[%s7141_s1 + $0x214] ss:$8 sps:$4 sm:$0xff]  }
  0x2f   : > { %3239 = vmatprep.subr.bf16.mxu1 %v4934_v37  ;;  %v5021_v37 = vld [vmem:[%s7141_s1 + $0x314] ss:$8 sps:$4 sm:$0xff]  }
  0x31   : > { %3169 = vmatpush2.bf16.msra.mxu0 %v4936_v38  ;;  %v271_v38 = vld [vmem:[%s5796_s7 + $0x258] sm:$0xff] }
  0x32   : > { %3240 = vmatpush2.bf16.msra.mxu1 %v4937_v39  ;;  %3170 = vmatprep.subr.bf16.mxu0 %v4938_v40  ;;  %v4408_v39 = vcombine.high %v271_v38, %v271_v38  ;;  %v5016_v40 = vld [vmem:[%s7141_s1 + $0x210] ss:$8 sps:$4 sm:$0xff]  }
  0x33   : > { %3241 = vmatprep.subr.bf16.mxu1 %v4940_v41  ;;  %v4407_v41 = vcombine.low %v271_v38, %v271_v38  ;;  %v5124_v38 = vld [vmem:[%s7141_s1 + $0x444] ss:$8 sps:$4 sm:$0xff]  }
  0x35   : > { %3171 = vmatpush2.bf16.msra.mxu0 %v4942_v42  ;;  %v5019_v42 = vld [vmem:[%s7141_s1 + $0x310] ss:$8 sps:$4 sm:$0xff]  }
  0x36   : > { %3242 = vmatpush2.bf16.msra.mxu1 %v4943_v43  ;;  %3172 = vmatprep.subr.bf16.mxu0 %v4944_v44  ;;  %v272_v43 = vld [vmem:[%s5796_s7 + $0x260] sm:$0xff] }
  0x37   : > { %3243 = vmatprep.subr.bf16.mxu1 %v4946_v45  ;;  %v5024_v44 = vld [vmem:[%s7141_s1 + $0x204] ss:$8 sps:$4 sm:$0xff]  }
  0x38   : > { %v5027_v45 = vld [vmem:[%s7141_s1 + $0x304] ss:$8 sps:$4 sm:$0xff]  }
  0x39   : > { %3173 = vmatpush2.bf16.msra.mxu0 %v4948_v46  ;;  %v4410_v46 = vcombine.high %v272_v43, %v272_v43 }
  0x3a   : > { %3244 = vmatpush2.bf16.msra.mxu1 %v4949_v47  ;;  %3174 = vmatprep.subr.bf16.mxu0 %v4950_v48  ;;  %v4409_v47 = vcombine.low %v272_v43, %v272_v43  ;;  %v5022_v48 = vld [vmem:[%s7141_s1 + $0x200] ss:$8 sps:$4 sm:$0xff]  }
  0x3b   : > { %3245 = vmatprep.subr.bf16.mxu1 %v4952_v50  ;;  %v5030_v50 = vld [vmem:[%s7141_s1 + $0x2f4] ss:$8 sps:$4 sm:$0xff]   ;;  %v5125_v43 = vld [vmem:[%s7141_s1 + $0x540] ss:$8 sps:$4 sm:$0xff]  }
  0x3d   : > { %3175 = vmatpush2.bf16.msra.mxu0 %v4954_v52  ;;  %v5028_v52 = vld [vmem:[%s7141_s1 + $0x2f0] ss:$8 sps:$4 sm:$0xff]  }
  0x3e   : > { %3246 = vmatpush2.bf16.msra.mxu1 %v4955_v53  ;;  %3176 = vmatprep.subr.bf16.mxu0 %v4956_v54  ;;  %v5094_v53 = vld [vmem:[%s5796_s7 + $0x14] ss:$100 sps:$4 sm:$0xff]  }
  0x3f   : > { %3247 = vmatprep.subr.bf16.mxu1 %v4958_v55  ;;  %v5031_v54 = vld [vmem:[%s7141_s1 + $0x3f0] ss:$8 sps:$4 sm:$0xff]   ;;  %v5097_v55 = vld [vmem:[%s5796_s7 + $0x1c] ss:$100 sps:$4 sm:$0xff]  }
  0x41   : > { %3177 = vmatpush2.bf16.msra.mxu0 %v4960_v56  ;;  %v5042_v56 = vld [vmem:[%s7141_s1 + $0x2e4] ss:$8 sps:$4 sm:$0xff]  }
  0x42   : > { %3248 = vmatpush2.bf16.msra.mxu1 %v4961_v57  ;;  %3178 = vmatprep.subr.bf16.mxu0 %v4962_v58  ;;  %v5045_v57 = vld [vmem:[%s7141_s1 + $0x3e4] ss:$8 sps:$4 sm:$0xff]   ;;  %v5040_v58 = vld [vmem:[%s7141_s1 + $0x2e0] ss:$8 sps:$4 sm:$0xff]  }
  0x43   : > { %3249 = vmatprep.subr.bf16.mxu1 %v4964_v59  ;;  %v5043_v59 = vld [vmem:[%s7141_s1 + $0x3e0] ss:$8 sps:$4 sm:$0xff]  }
  0x45   : > { %3179 = vmatpush2.bf16.msra.mxu0 %v4966_v60  ;;  %v5048_v60 = vld [vmem:[%s7141_s1 + $0x2d4] ss:$8 sps:$4 sm:$0xff]  }
  0x46   : > { %3250 = vmatpush2.bf16.msra.mxu1 %v4967_v61  ;;  %3180 = vmatprep.subr.bf16.mxu0 %v4968_v62  ;;  %v5051_v61 = vld [vmem:[%s7141_s1 + $0x3d4] ss:$8 sps:$4 sm:$0xff]   ;;  %v5046_v62 = vld [vmem:[%s7141_s1 + $0x2d0] ss:$8 sps:$4 sm:$0xff]  }
  0x47   : > { %3251 = vmatprep.subr.bf16.mxu1 %v4970_v63  ;;  %v5049_v63 = vld [vmem:[%s7141_s1 + $0x3d0] ss:$8 sps:$4 sm:$0xff]  }
  0x49   : > { %3181 = vmatpush2.bf16.msra.mxu0 %v4972_v0  ;;  %v5060_v0 = vld [vmem:[%s7141_s1 + $0x2c4] ss:$8 sps:$4 sm:$0xff]  }
  0x4a   : > { %3252 = vmatpush2.bf16.msra.mxu1 %v4973_v1  ;;  %3292 = vmatprep.subr.bf16.mxu0 %v4982_v2  ;;  %v5063_v1 = vld [vmem:[%s7141_s1 + $0x3c4] ss:$8 sps:$4 sm:$0xff]   ;;  %v5058_v2 = vld [vmem:[%s7141_s1 + $0x2c0] ss:$8 sps:$4 sm:$0xff]  }
  0x4b   : > { %3363 = vmatprep.subr.bf16.mxu1 %v4985_v3  ;;  %v5061_v3 = vld [vmem:[%s7141_s1 + $0x3c0] ss:$8 sps:$4 sm:$0xff]  }
  0x4c   : > { %3183 = vmatmul.mubr.bf16.vlgmr.msra.gmra.mxu0 %v4974_v4  ;;  %v5066_v4 = vld [vmem:[%s7141_s1 + $0x2b4] ss:$8 sps:$4 sm:$0xff]  }
  0x4d   : > { %3254 = vmatmul.mubr.bf16.vlgmr.msra.gmra.mxu1 %v4977_v5  ;;  %3293 = vmatpush1.bf16.msra.mxu0 %v4980_v6  ;;  %v5069_v5 = vld [vmem:[%s7141_s1 + $0x3b4] ss:$8 sps:$4 sm:$0xff]   ;;  %v5064_v6 = vld [vmem:[%s7141_s1 + $0x2b0] ss:$8 sps:$4 sm:$0xff]  }
  0x4e   : > { %3364 = vmatpush1.bf16.msra.mxu1 %v4983_v7  ;;  %3294 = vmatprep.subr.bf16.mxu0 %v4988_v8  ;;  %v5067_v7 = vld [vmem:[%s7141_s1 + $0x3b0] ss:$8 sps:$4 sm:$0xff]   ;;  %v5074_v8 = vld [vmem:[%s7141_s1 + $0x2a4] ss:$8 sps:$4 sm:$0xff]  }
  0x4f   : > { %3365 = vmatprep.subr.bf16.mxu1 %v4991_v9  ;;  %3192 = vmatprep.mubr.bf16.mxu0 %v5034_v16  ;;  %v5077_v9 = vld [vmem:[%s7141_s1 + $0x3a4] ss:$8 sps:$4 sm:$0xff]  }
  0x50   : > { %3263 = vmatprep.mubr.bf16.mxu1 %v5036_v17  ;;  %v5088_v16 = vld [vmem:[%s7141_s1 + $0x284] ss:$8 sps:$4 sm:$0xff]  }
  0x51   : > { %3295 = vmatpush1.bf16.msra.mxu0 %v4986_v10  ;;  %v5072_v10 = vld [vmem:[%s7141_s1 + $0x2a0] ss:$8 sps:$4 sm:$0xff]   ;;  %v5091_v17 = vld [vmem:[%s7141_s1 + $0x384] ss:$8 sps:$4 sm:$0xff]  }
  0x52   : > { %3366 = vmatpush1.bf16.msra.mxu1 %v4989_v11  ;;  %3296 = vmatprep.subr.bf16.mxu0 %v4994_v12  ;;  %v5075_v11 = vld [vmem:[%s7141_s1 + $0x3a0] ss:$8 sps:$4 sm:$0xff]   ;;  %v5082_v12 = vld [vmem:[%s7141_s1 + $0x294] ss:$8 sps:$4 sm:$0xff]  }
  0x53   : > { %3367 = vmatprep.subr.bf16.mxu1 %v4997_v13  ;;  %v5085_v13 = vld [vmem:[%s7141_s1 + $0x394] ss:$8 sps:$4 sm:$0xff]  }
  0x54   : > { %3193 = vmatmul.mubr.bf16.gmra.mxu0 %v5038_v18  ;;  %v5086_v18 = vld [vmem:[%s7141_s1 + $0x280] ss:$8 sps:$4 sm:$0xff]  }
  0x55   : > { %3264 = vmatmul.mubr.bf16.gmra.mxu1 %v5039_v19  ;;  %3297 = vmatpush1.bf16.msra.mxu0 %v4992_v14  ;;  %v5080_v14 = vld [vmem:[%s7141_s1 + $0x290] ss:$8 sps:$4 sm:$0xff]   ;;  %v5089_v19 = vld [vmem:[%s7141_s1 + $0x380] ss:$8 sps:$4 sm:$0xff]  }
  0x56   : > { %3368 = vmatpush1.bf16.msra.mxu1 %v4995_v15  ;;  %3298 = vmatprep.subr.bf16.mxu0 %v5000_v20  ;;  %v5083_v15 = vld [vmem:[%s7141_s1 + $0x390] ss:$8 sps:$4 sm:$0xff]   ;;  %v5100_v20 = vld [vmem:[%s7141_s1 + $0x474] ss:$8 sps:$4 sm:$0xff]  }
  0x57   : > { %3369 = vmatprep.subr.bf16.mxu1 %v5003_v21  ;;  %3202 = vmatprep.mubr.bf16.mxu0 %v5052_v28  ;;  %v5103_v21 = vld [vmem:[%s7141_s1 + $0x574] ss:$8 sps:$4 sm:$0xff]  }
  0x58   : > { %3273 = vmatprep.mubr.bf16.mxu1 %v5054_v29  ;;  %v5110_v28 = vld [vmem:[%s5796_s7 + $0xdc] ss:$100 sps:$4 sm:$0xff]   ;;  %v5119_v29 = vld [vmem:[%s5796_s7 + $0xe4] ss:$100 sps:$4 sm:$0xff]  }
  0x59   : > { %3299 = vmatpush1.bf16.msra.mxu0 %v4998_v22  ;;  %v5092_v22 = vld [vmem:[%s5796_s7 + $0x10] ss:$100 sps:$4 sm:$0xff]  }
  0x5a   : > { %3370 = vmatpush1.bf16.msra.mxu1 %v5001_v23  ;;  %3300 = vmatprep.subr.bf16.mxu0 %v5006_v24  ;;  %v5095_v23 = vld [vmem:[%s5796_s7 + $0x18] ss:$100 sps:$4 sm:$0xff]  }
  0x5b   : > { %3371 = vmatprep.subr.bf16.mxu1 %v5009_v25  ;;  %v5098_v24 = vld [vmem:[%s7141_s1 + $0x470] ss:$8 sps:$4 sm:$0xff]  }
  0x5c   : > { %3203 = vmatmul.mubr.bf16.gmra.mxu0 %v5056_v30  ;;  %v5101_v25 = vld [vmem:[%s7141_s1 + $0x570] ss:$8 sps:$4 sm:$0xff]   ;;  %v5104_v30 = vld [vmem:[%s7141_s1 + $0x460] ss:$8 sps:$4 sm:$0xff]  }
  0x5d   : > { %3274 = vmatmul.mubr.bf16.gmra.mxu1 %v5057_v31  ;;  %3301 = vmatpush1.bf16.msra.mxu0 %v5004_v26  ;;  %v5106_v26 = vld [vmem:[%s7141_s1 + $0x464] ss:$8 sps:$4 sm:$0xff]   ;;  %v5107_v31 = vld [vmem:[%s7141_s1 + $0x560] ss:$8 sps:$4 sm:$0xff]  }
  0x5e   : > { %3372 = vmatpush1.bf16.msra.mxu1 %v5007_v27  ;;  %3302 = vmatprep.subr.bf16.mxu0 %v5012_v32  ;;  %v5109_v27 = vld [vmem:[%s7141_s1 + $0x564] ss:$8 sps:$4 sm:$0xff]   ;;  %v5115_v32 = vld [vmem:[%s7141_s1 + $0x454] ss:$8 sps:$4 sm:$0xff]  }
  0x5f   : > { %3373 = vmatprep.subr.bf16.mxu1 %v5015_v33  ;;  %3212 = vmatprep.mubr.bf16.mxu0 %v4408_v39  ;;  %v5118_v33 = vld [vmem:[%s7141_s1 + $0x554] ss:$8 sps:$4 sm:$0xff]   ;;  %v5127_v39 = vld [vmem:[%s7141_s1 + $0x544] ss:$8 sps:$4 sm:$0xff]  }
  0x60   : > { %3283 = vmatprep.mubr.bf16.mxu1 %v4410_v46  ;;  %v5136_v46 = vld [vmem:[%s7141_s1 + $0x534] ss:$8 sps:$4 sm:$0xff]  }
  0x61   : > { %3303 = vmatpush1.bf16.msra.mxu0 %v5010_v34  ;;  %v5112_v34 = vld [vmem:[%s5796_s7 + $0xd8] ss:$100 sps:$4 sm:$0xff]  }
  0x62   : > { %3374 = vmatpush1.bf16.msra.mxu1 %v5013_v35  ;;  %3304 = vmatprep.subr.bf16.mxu0 %v5018_v36  ;;  %v5113_v35 = vld [vmem:[%s7141_s1 + $0x450] ss:$8 sps:$4 sm:$0xff]  }
  0x63   : > { %3375 = vmatprep.subr.bf16.mxu1 %v5021_v37  ;;  %v5116_v36 = vld [vmem:[%s7141_s1 + $0x550] ss:$8 sps:$4 sm:$0xff]   ;;  %v5121_v37 = vld [vmem:[%s5796_s7 + $0xe0] ss:$100 sps:$4 sm:$0xff]  }
  0x64   : > { %3213 = vmatmul.mubr.bf16.gmra.mxu0 %v4407_v41  ;;  %v5137_v41 = vld [vmem:[%s5796_s7 + $0x1ac] ss:$100 sps:$4 sm:$0xff]  }
  0x65   : > { %3305 = vmatpush1.bf16.msra.mxu0 %v5016_v40  ;;  %3284 = vmatmul.mubr.bf16.gmra.mxu1 %v4409_v47  ;;  %v5128_v40 = vld [vmem:[%s5796_s7 + $0x1a4] ss:$100 sps:$4 sm:$0xff]   ;;  %v5131_v47 = vld [vmem:[%s7141_s1 + $0x430] ss:$8 sps:$4 sm:$0xff]  }
  0x66   : > { %3376 = vmatpush1.bf16.msra.mxu1 %v5019_v42  ;;  %3306 = vmatprep.subr.bf16.mxu0 %v5024_v44  ;;  %v5122_v42 = vld [vmem:[%s7141_s1 + $0x440] ss:$8 sps:$4 sm:$0xff]   ;;  %v5133_v44 = vld [vmem:[%s7141_s1 + $0x434] ss:$8 sps:$4 sm:$0xff]  }
  0x67   : > { %3377 = vmatprep.subr.bf16.mxu1 %v5027_v45  ;;  %3324 = vmatprep.mubr.bf16.mxu0 %v5094_v53  ;;  %v5130_v45 = vld [vmem:[%s5796_s7 + $0x1a0] ss:$100 sps:$4 sm:$0xff]  }
  0x68   : > { %3395 = vmatprep.mubr.bf16.mxu1 %v5097_v55  ;;  %v5145_v53 = vld [vmem:[%s7141_s1 + $0x524] ss:$8 sps:$4 sm:$0xff]  }
  0x69   : > { %3307 = vmatpush1.bf16.msra.mxu0 %v5022_v48  ;;  %v5134_v48 = vld [vmem:[%s7141_s1 + $0x530] ss:$8 sps:$4 sm:$0xff]  }
  0x6a   : > { %3378 = vmatpush1.bf16.msra.mxu1 %v5025_v49  ;;  %3308 = vmatprep.subr.bf16.mxu0 %v5030_v50  ;;  %v5139_v49 = vld [vmem:[%s5796_s7 + $0x1a8] ss:$100 sps:$4 sm:$0xff]  }
  0x6b   : > { %3379 = vmatprep.subr.bf16.mxu1 %v5033_v51  ;;  %v273_v50 = vld [vmem:[%s5796_s7 + $0x268] sm:$0xff]  ;;  %v274_v51 = vld [vmem:[%s5796_s7 + $0x270] sm:$0xff] }
  0x6c   : > { %v4414_v55 = vcombine.high %v274_v51, %v274_v51 }
  0x6d   : > { %3309 = vmatpush2.bf16.msra.mxu0 %v5028_v52  ;;  %v5142_v52 = vld [vmem:[%s7141_s1 + $0x424] ss:$8 sps:$4 sm:$0xff]  }
  0x6e   : > { %3380 = vmatpush2.bf16.msra.mxu1 %v5031_v54  ;;  %3310 = vmatprep.subr.bf16.mxu0 %v5042_v56  ;;  %v4412_v54 = vcombine.high %v273_v50, %v273_v50  ;;  %v5140_v56 = vld [vmem:[%s7141_s1 + $0x420] ss:$8 sps:$4 sm:$0xff]  }
  0x6f   : > { %3381 = vmatprep.subr.bf16.mxu1 %v5045_v57  ;;  %v5143_v57 = vld [vmem:[%s7141_s1 + $0x520] ss:$8 sps:$4 sm:$0xff]  }
  0x71   : > { %3311 = vmatpush2.bf16.msra.mxu0 %v5040_v58  ;;  %v5150_v58 = vld [vmem:[%s7141_s1 + $0x414] ss:$8 sps:$4 sm:$0xff]  }
  0x72   : > { %3382 = vmatpush2.bf16.msra.mxu1 %v5043_v59  ;;  %3312 = vmatprep.subr.bf16.mxu0 %v5048_v60  ;;  %v5153_v59 = vld [vmem:[%s7141_s1 + $0x514] ss:$8 sps:$4 sm:$0xff]   ;;  %v4411_v60 = vcombine.low %v273_v50, %v273_v50  ;;  %v5230_v50 = vld [vmem:[%s5796_s7 + $0xe8] ss:$100 sps:$4 sm:$0xff]  }
  0x73   : > { %3383 = vmatprep.subr.bf16.mxu1 %v5051_v61  ;;  %v5148_v61 = vld [vmem:[%s7141_s1 + $0x410] ss:$8 sps:$4 sm:$0xff]  }
  0x75   : > { %3313 = vmatpush2.bf16.msra.mxu0 %v5046_v62  ;;  %v5151_v62 = vld [vmem:[%s7141_s1 + $0x510] ss:$8 sps:$4 sm:$0xff]  }
  0x76   : > { %3384 = vmatpush2.bf16.msra.mxu1 %v5049_v63  ;;  %3314 = vmatprep.subr.bf16.mxu0 %v5060_v0  ;;  %v4413_v63 = vcombine.low %v274_v51, %v274_v51  ;;  %v5158_v0 = vld [vmem:[%s7141_s1 + $0x404] ss:$8 sps:$4 sm:$0xff]   ;;  %v5233_v51 = vld [vmem:[%s7141_s1 + $0x654] ss:$8 sps:$4 sm:$0xff]  }
  0x77   : > { %3385 = vmatprep.subr.bf16.mxu1 %v5063_v1  ;;  %v5161_v1 = vld [vmem:[%s7141_s1 + $0x504] ss:$8 sps:$4 sm:$0xff]  }
  0x79   : > { %3315 = vmatpush2.bf16.msra.mxu0 %v5058_v2  ;;  %v5212_v2 = vld [vmem:[%s5796_s7 + $0x24] ss:$100 sps:$4 sm:$0xff]  }
  0x7a   : > { %3386 = vmatpush2.bf16.msra.mxu1 %v5061_v3  ;;  %3316 = vmatprep.subr.bf16.mxu0 %v5066_v4  ;;  %v5215_v3 = vld [vmem:[%s5796_s7 + $0x2c] ss:$100 sps:$4 sm:$0xff]   ;;  %v5156_v4 = vld [vmem:[%s7141_s1 + $0x400] ss:$8 sps:$4 sm:$0xff]  }
  0x7b   : > { %3387 = vmatprep.subr.bf16.mxu1 %v5069_v5  ;;  %v5159_v5 = vld [vmem:[%s7141_s1 + $0x500] ss:$8 sps:$4 sm:$0xff]  }
  0x7d   : > { %3317 = vmatpush2.bf16.msra.mxu0 %v5064_v6  ;;  %v5164_v6 = vld [vmem:[%s7141_s1 + $0x4f4] ss:$8 sps:$4 sm:$0xff]  }
  0x7e   : > { %3388 = vmatpush2.bf16.msra.mxu1 %v5067_v7  ;;  %3318 = vmatprep.subr.bf16.mxu0 %v5074_v8  ;;  %v5167_v7 = vld [vmem:[%s7141_s1 + $0x5f4] ss:$8 sps:$4 sm:$0xff]   ;;  %v5162_v8 = vld [vmem:[%s7141_s1 + $0x4f0] ss:$8 sps:$4 sm:$0xff]  }
  0x7f   : > { %3389 = vmatprep.subr.bf16.mxu1 %v5077_v9  ;;  %v5165_v9 = vld [vmem:[%s7141_s1 + $0x5f0] ss:$8 sps:$4 sm:$0xff]  }
  0x81   : > { %3319 = vmatpush2.bf16.msra.mxu0 %v5072_v10  ;;  %v5170_v10 = vld [vmem:[%s7141_s1 + $0x4e4] ss:$8 sps:$4 sm:$0xff]  }
  0x82   : > { %3390 = vmatpush2.bf16.msra.mxu1 %v5075_v11  ;;  %3320 = vmatprep.subr.bf16.mxu0 %v5082_v12  ;;  %v5173_v11 = vld [vmem:[%s7141_s1 + $0x5e4] ss:$8 sps:$4 sm:$0xff]   ;;  %v5168_v12 = vld [vmem:[%s7141_s1 + $0x4e0] ss:$8 sps:$4 sm:$0xff]  }
  0x83   : > { %3391 = vmatprep.subr.bf16.mxu1 %v5085_v13  ;;  %v5171_v13 = vld [vmem:[%s7141_s1 + $0x5e0] ss:$8 sps:$4 sm:$0xff]  }
  0x85   : > { %3321 = vmatpush2.bf16.msra.mxu0 %v5080_v14  ;;  %v5176_v14 = vld [vmem:[%s7141_s1 + $0x4d4] ss:$8 sps:$4 sm:$0xff]  }
  0x86   : > { %3392 = vmatpush2.bf16.msra.mxu1 %v5083_v15  ;;  %3322 = vmatprep.subr.bf16.mxu0 %v5088_v16  ;;  %v5179_v15 = vld [vmem:[%s7141_s1 + $0x5d4] ss:$8 sps:$4 sm:$0xff]   ;;  %v5174_v16 = vld [vmem:[%s7141_s1 + $0x4d0] ss:$8 sps:$4 sm:$0xff]  }
  0x87   : > { %3393 = vmatprep.subr.bf16.mxu1 %v5091_v17  ;;  %v5177_v17 = vld [vmem:[%s7141_s1 + $0x5d0] ss:$8 sps:$4 sm:$0xff]  }
  0x89   : > { %3323 = vmatpush2.bf16.msra.mxu0 %v5086_v18  ;;  %v5182_v18 = vld [vmem:[%s7141_s1 + $0x4c4] ss:$8 sps:$4 sm:$0xff]  }
  0x8a   : > { %3394 = vmatpush2.bf16.msra.mxu1 %v5089_v19  ;;  %3434 = vmatprep.subr.bf16.mxu0 %v5100_v20  ;;  %v5185_v19 = vld [vmem:[%s7141_s1 + $0x5c4] ss:$8 sps:$4 sm:$0xff]   ;;  %v5180_v20 = vld [vmem:[%s7141_s1 + $0x4c0] ss:$8 sps:$4 sm:$0xff]  }
  0x8b   : > { %3505 = vmatprep.subr.bf16.mxu1 %v5103_v21  ;;  %v5183_v21 = vld [vmem:[%s7141_s1 + $0x5c0] ss:$8 sps:$4 sm:$0xff]  }
  0x8c   : > { %3325 = vmatmul.mubr.bf16.vlgmr.msra.gmra.mxu0 %v5092_v22  ;;  %v5188_v22 = vld [vmem:[%s7141_s1 + $0x4b4] ss:$8 sps:$4 sm:$0xff]  }
  0x8d   : > { %3396 = vmatmul.mubr.bf16.vlgmr.msra.gmra.mxu1 %v5095_v23  ;;  %3435 = vmatpush1.bf16.msra.mxu0 %v5098_v24  ;;  %v5191_v23 = vld [vmem:[%s7141_s1 + $0x5b4] ss:$8 sps:$4 sm:$0xff]   ;;  %v5186_v24 = vld [vmem:[%s7141_s1 + $0x4b0] ss:$8 sps:$4 sm:$0xff]  }
  0x8e   : > { %3506 = vmatpush1.bf16.msra.mxu1 %v5101_v25  ;;  %3436 = vmatprep.subr.bf16.mxu0 %v5106_v26  ;;  %v5189_v25 = vld [vmem:[%s7141_s1 + $0x5b0] ss:$8 sps:$4 sm:$0xff]   ;;  %v5194_v26 = vld [vmem:[%s7141_s1 + $0x4a4] ss:$8 sps:$4 sm:$0xff]  }
  0x8f   : > { %3507 = vmatprep.subr.bf16.mxu1 %v5109_v27  ;;  %3334 = vmatprep.mubr.bf16.mxu0 %v5110_v28  ;;  %v5197_v27 = vld [vmem:[%s7141_s1 + $0x5a4] ss:$8 sps:$4 sm:$0xff]   ;;  %v5192_v28 = vld [vmem:[%s7141_s1 + $0x4a0] ss:$8 sps:$4 sm:$0xff]  }
  0x90   : > { %3405 = vmatprep.mubr.bf16.mxu1 %v5119_v29  ;;  %v5195_v29 = vld [vmem:[%s7141_s1 + $0x5a0] ss:$8 sps:$4 sm:$0xff]  }
  0x91   : > { %3437 = vmatpush1.bf16.msra.mxu0 %v5104_v30  ;;  %v5200_v30 = vld [vmem:[%s7141_s1 + $0x494] ss:$8 sps:$4 sm:$0xff]  }
  0x92   : > { %3508 = vmatpush1.bf16.msra.mxu1 %v5107_v31  ;;  %3438 = vmatprep.subr.bf16.mxu0 %v5115_v32  ;;  %v5203_v31 = vld [vmem:[%s7141_s1 + $0x594] ss:$8 sps:$4 sm:$0xff]   ;;  %v5198_v32 = vld [vmem:[%s7141_s1 + $0x490] ss:$8 sps:$4 sm:$0xff]  }
  0x93   : > { %3509 = vmatprep.subr.bf16.mxu1 %v5118_v33  ;;  %v5201_v33 = vld [vmem:[%s7141_s1 + $0x590] ss:$8 sps:$4 sm:$0xff]  }
  0x94   : > { %3335 = vmatmul.mubr.bf16.gmra.mxu0 %v5112_v34  ;;  %v5206_v34 = vld [vmem:[%s7141_s1 + $0x484] ss:$8 sps:$4 sm:$0xff]  }
  0x95   : > { %3406 = vmatmul.mubr.bf16.gmra.mxu1 %v5121_v37  ;;  %3439 = vmatpush1.bf16.msra.mxu0 %v5113_v35  ;;  %v5209_v35 = vld [vmem:[%s7141_s1 + $0x584] ss:$8 sps:$4 sm:$0xff]   ;;  %v5207_v37 = vld [vmem:[%s7141_s1 + $0x580] ss:$8 sps:$4 sm:$0xff]  }
  0x96   : > { %3510 = vmatpush1.bf16.msra.mxu1 %v5116_v36  ;;  %3440 = vmatprep.subr.bf16.mxu0 %v5124_v38  ;;  %v5204_v36 = vld [vmem:[%s7141_s1 + $0x480] ss:$8 sps:$4 sm:$0xff]  }
  0x97   : > { %3511 = vmatprep.subr.bf16.mxu1 %v5127_v39  ;;  %3344 = vmatprep.mubr.bf16.mxu0 %v5128_v40  ;;  %v5210_v38 = vld [vmem:[%s5796_s7 + $0x20] ss:$100 sps:$4 sm:$0xff]   ;;  %v5218_v39 = vld [vmem:[%s7141_s1 + $0x674] ss:$8 sps:$4 sm:$0xff]  }
  0x98   : > { %3415 = vmatprep.mubr.bf16.mxu1 %v5137_v41  ;;  %v5221_v40 = vld [vmem:[%s7141_s1 + $0x774] ss:$8 sps:$4 sm:$0xff]   ;;  %v5213_v41 = vld [vmem:[%s5796_s7 + $0x28] ss:$100 sps:$4 sm:$0xff]  }
  0x99   : > { %3441 = vmatpush1.bf16.msra.mxu0 %v5122_v42  ;;  %v5216_v42 = vld [vmem:[%s7141_s1 + $0x670] ss:$8 sps:$4 sm:$0xff]  }
  0x9a   : > { %3512 = vmatpush1.bf16.msra.mxu1 %v5125_v43  ;;  %3442 = vmatprep.subr.bf16.mxu0 %v5133_v44  ;;  %v5219_v43 = vld [vmem:[%s7141_s1 + $0x770] ss:$8 sps:$4 sm:$0xff]   ;;  %v5224_v44 = vld [vmem:[%s7141_s1 + $0x664] ss:$8 sps:$4 sm:$0xff]  }
  0x9b   : > { %3513 = vmatprep.subr.bf16.mxu1 %v5136_v46  ;;  %v5228_v46 = vld [vmem:[%s5796_s7 + $0xec] ss:$100 sps:$4 sm:$0xff]  }
  0x9c   : > { %3345 = vmatmul.mubr.bf16.gmra.mxu0 %v5130_v45  ;;  %v5227_v45 = vld [vmem:[%s7141_s1 + $0x764] ss:$8 sps:$4 sm:$0xff]  }
  0x9d   : > { %3416 = vmatmul.mubr.bf16.gmra.mxu1 %v5139_v49  ;;  %3443 = vmatpush1.bf16.msra.mxu0 %v5131_v47  ;;  %v5237_v47 = vld [vmem:[%s5796_s7 + $0xf4] ss:$100 sps:$4 sm:$0xff]   ;;  %v5225_v49 = vld [vmem:[%s7141_s1 + $0x760] ss:$8 sps:$4 sm:$0xff]  }
  0x9e   : > { %3514 = vmatpush1.bf16.msra.mxu1 %v5134_v48  ;;  %3444 = vmatprep.subr.bf16.mxu0 %v5142_v52  ;;  %v5222_v48 = vld [vmem:[%s7141_s1 + $0x660] ss:$8 sps:$4 sm:$0xff]   ;;  %v5236_v52 = vld [vmem:[%s7141_s1 + $0x754] ss:$8 sps:$4 sm:$0xff]  }
  0x9f   : > { %3515 = vmatprep.subr.bf16.mxu1 %v5145_v53  ;;  %3354 = vmatprep.mubr.bf16.mxu0 %v4412_v54  ;;  %v5231_v53 = vld [vmem:[%s7141_s1 + $0x650] ss:$8 sps:$4 sm:$0xff]  }
  0xa0   : > { %3425 = vmatprep.mubr.bf16.mxu1 %v4414_v55  ;;  %v5239_v54 = vld [vmem:[%s5796_s7 + $0xf0] ss:$100 sps:$4 sm:$0xff]  }
  0xa1   : > { %3445 = vmatpush1.bf16.msra.mxu0 %v5140_v56  ;;  %v5234_v55 = vld [vmem:[%s7141_s1 + $0x750] ss:$8 sps:$4 sm:$0xff]   ;;  %v5242_v56 = vld [vmem:[%s7141_s1 + $0x644] ss:$8 sps:$4 sm:$0xff]  }
  0xa2   : > { %3516 = vmatpush1.bf16.msra.mxu1 %v5143_v57  ;;  %3446 = vmatprep.subr.bf16.mxu0 %v5150_v58  ;;  %v5245_v57 = vld [vmem:[%s7141_s1 + $0x744] ss:$8 sps:$4 sm:$0xff]   ;;  %v5246_v58 = vld [vmem:[%s5796_s7 + $0x1b4] ss:$100 sps:$4 sm:$0xff]  }
  0xa3   : > { %3517 = vmatprep.subr.bf16.mxu1 %v5153_v59  ;;  %v5255_v59 = vld [vmem:[%s5796_s7 + $0x1bc] ss:$100 sps:$4 sm:$0xff]  }
  0xa4   : > { %3355 = vmatmul.mubr.bf16.gmra.mxu0 %v4411_v60  ;;  %v5240_v60 = vld [vmem:[%s7141_s1 + $0x640] ss:$8 sps:$4 sm:$0xff]  }
  0xa5   : > { %3426 = vmatmul.mubr.bf16.gmra.mxu1 %v4413_v63  ;;  %3447 = vmatpush1.bf16.msra.mxu0 %v5148_v61  ;;  %v5243_v61 = vld [vmem:[%s7141_s1 + $0x740] ss:$8 sps:$4 sm:$0xff]   ;;  %v5248_v63 = vld [vmem:[%s5796_s7 + $0x1b0] ss:$100 sps:$4 sm:$0xff]  }
  0xa6   : > { %3518 = vmatpush1.bf16.msra.mxu1 %v5151_v62  ;;  %3448 = vmatprep.subr.bf16.mxu0 %v5158_v0  ;;  %v5251_v62 = vld [vmem:[%s7141_s1 + $0x634] ss:$8 sps:$4 sm:$0xff]  }
  0xa7   : > { %3519 = vmatprep.subr.bf16.mxu1 %v5161_v1  ;;  %3466 = vmatprep.mubr.bf16.mxu0 %v5212_v2  ;;  %v5254_v0 = vld [vmem:[%s7141_s1 + $0x734] ss:$8 sps:$4 sm:$0xff]  }
  0xa8   : > { %3537 = vmatprep.mubr.bf16.mxu1 %v5215_v3  ;;  %v5257_v1 = vld [vmem:[%s5796_s7 + $0x1b8] ss:$100 sps:$4 sm:$0xff]   ;;  %v276_v3 = vld [vmem:[%s5796_s7 + $0x280] sm:$0xff] }
  0xa9   : > { %3449 = vmatpush1.bf16.msra.mxu0 %v5156_v4  ;;  %v275_v2 = vld [vmem:[%s5796_s7 + $0x278] sm:$0xff] }
  0xaa   : > { %3520 = vmatpush1.bf16.msra.mxu1 %v5159_v5  ;;  %3450 = vmatprep.subr.bf16.mxu0 %v5164_v6  ;;  %v5249_v4 = vld [vmem:[%s7141_s1 + $0x630] ss:$8 sps:$4 sm:$0xff]   ;;  %v5260_v6 = vld [vmem:[%s7141_s1 + $0x624] ss:$8 sps:$4 sm:$0xff]  }
  0xab   : > { %3521 = vmatprep.subr.bf16.mxu1 %v5167_v7  ;;  %v5252_v5 = vld [vmem:[%s7141_s1 + $0x730] ss:$8 sps:$4 sm:$0xff]   ;;  %v5263_v7 = vld [vmem:[%s7141_s1 + $0x724] ss:$8 sps:$4 sm:$0xff]  }
  0xad   : > { %3451 = vmatpush2.bf16.msra.mxu0 %v5162_v8  ;;  %v4416_v8 = vcombine.high %v275_v2, %v275_v2 }
  0xae   : > { %3522 = vmatpush2.bf16.msra.mxu1 %v5165_v9  ;;  %3452 = vmatprep.subr.bf16.mxu0 %v5170_v10  ;;  %v4418_v9 = vcombine.high %v276_v3, %v276_v3  ;;  %v5258_v10 = vld [vmem:[%s7141_s1 + $0x620] ss:$8 sps:$4 sm:$0xff]  }
  0xaf   : > { %3523 = vmatprep.subr.bf16.mxu1 %v5173_v11  ;;  %v5261_v11 = vld [vmem:[%s7141_s1 + $0x720] ss:$8 sps:$4 sm:$0xff]  }
  0xb1   : > { %3453 = vmatpush2.bf16.msra.mxu0 %v5168_v12  ;;  %v5268_v12 = vld [vmem:[%s7141_s1 + $0x614] ss:$8 sps:$4 sm:$0xff]  }
  0xb2   : > { %3524 = vmatpush2.bf16.msra.mxu1 %v5171_v13  ;;  %3454 = vmatprep.subr.bf16.mxu0 %v5176_v14  ;;  %v5271_v13 = vld [vmem:[%s7141_s1 + $0x714] ss:$8 sps:$4 sm:$0xff]   ;;  %v4415_v14 = vcombine.low %v275_v2, %v275_v2 }
  0xb3   : > { %3525 = vmatprep.subr.bf16.mxu1 %v5179_v15  ;;  %v5266_v15 = vld [vmem:[%s7141_s1 + $0x610] ss:$8 sps:$4 sm:$0xff]  }
  0xb5   : > { %3455 = vmatpush2.bf16.msra.mxu0 %v5174_v16  ;;  %v4417_v16 = vcombine.low %v276_v3, %v276_v3 }
  0xb6   : > { %3526 = vmatpush2.bf16.msra.mxu1 %v5177_v17  ;;  %3456 = vmatprep.subr.bf16.mxu0 %v5182_v18  ;;  %v5269_v17 = vld [vmem:[%s7141_s1 + $0x710] ss:$8 sps:$4 sm:$0xff]   ;;  %v5276_v18 = vld [vmem:[%s7141_s1 + $0x604] ss:$8 sps:$4 sm:$0xff]  }
  0xb7   : > { %3527 = vmatprep.subr.bf16.mxu1 %v5185_v19  ;;  %v5279_v19 = vld [vmem:[%s7141_s1 + $0x704] ss:$8 sps:$4 sm:$0xff]  }
  0xb9   : > { %3457 = vmatpush2.bf16.msra.mxu0 %v5180_v20  ;;  %v5330_v20 = vld [vmem:[%s5796_s7 + $0x34] ss:$100 sps:$4 sm:$0xff]  }
  0xba   : > { %3528 = vmatpush2.bf16.msra.mxu1 %v5183_v21  ;;  %3458 = vmatprep.subr.bf16.mxu0 %v5188_v22  ;;  %v5333_v21 = vld [vmem:[%s5796_s7 + $0x3c] ss:$100 sps:$4 sm:$0xff]  }
  0xbb   : > { %3529 = vmatprep.subr.bf16.mxu1 %v5191_v23  ;;  %v5274_v22 = vld [vmem:[%s7141_s1 + $0x600] ss:$8 sps:$4 sm:$0xff]  }
  0xbc   : > { %v5277_v23 = vld [vmem:[%s7141_s1 + $0x700] ss:$8 sps:$4 sm:$0xff]  }
  0xbd   : > { %3459 = vmatpush2.bf16.msra.mxu0 %v5186_v24  ;;  %v5282_v24 = vld [vmem:[%s7141_s1 + $0x6f4] ss:$8 sps:$4 sm:$0xff]  }
  0xbe   : > { %3530 = vmatpush2.bf16.msra.mxu1 %v5189_v25  ;;  %3460 = vmatprep.subr.bf16.mxu0 %v5194_v26  ;;  %v5285_v25 = vld [vmem:[%s7141_s1 + $0x7f4] ss:$8 sps:$4 sm:$0xff]   ;;  %v5280_v26 = vld [vmem:[%s7141_s1 + $0x6f0] ss:$8 sps:$4 sm:$0xff]  }
  0xbf   : > { %3531 = vmatprep.subr.bf16.mxu1 %v5197_v27  ;;  %v5283_v27 = vld [vmem:[%s7141_s1 + $0x7f0] ss:$8 sps:$4 sm:$0xff]  }
  0xc1   : > { %3461 = vmatpush2.bf16.msra.mxu0 %v5192_v28  ;;  %v5288_v28 = vld [vmem:[%s7141_s1 + $0x6e4] ss:$8 sps:$4 sm:$0xff]  }
  0xc2   : > { %3532 = vmatpush2.bf16.msra.mxu1 %v5195_v29  ;;  %3462 = vmatprep.subr.bf16.mxu0 %v5200_v30  ;;  %v5291_v29 = vld [vmem:[%s7141_s1 + $0x7e4] ss:$8 sps:$4 sm:$0xff]   ;;  %v5286_v30 = vld [vmem:[%s7141_s1 + $0x6e0] ss:$8 sps:$4 sm:$0xff]  }
  0xc3   : > { %3533 = vmatprep.subr.bf16.mxu1 %v5203_v31  ;;  %v5289_v31 = vld [vmem:[%s7141_s1 + $0x7e0] ss:$8 sps:$4 sm:$0xff]  }
  0xc5   : > { %3463 = vmatpush2.bf16.msra.mxu0 %v5198_v32  ;;  %v5294_v32 = vld [vmem:[%s7141_s1 + $0x6d4] ss:$8 sps:$4 sm:$0xff]  }
  0xc6   : > { %3534 = vmatpush2.bf16.msra.mxu1 %v5201_v33  ;;  %3464 = vmatprep.subr.bf16.mxu0 %v5206_v34  ;;  %v5297_v33 = vld [vmem:[%s7141_s1 + $0x7d4] ss:$8 sps:$4 sm:$0xff]   ;;  %v5292_v34 = vld [vmem:[%s7141_s1 + $0x6d0] ss:$8 sps:$4 sm:$0xff]  }
  0xc7   : > { %3535 = vmatprep.subr.bf16.mxu1 %v5209_v35  ;;  %v5295_v35 = vld [vmem:[%s7141_s1 + $0x7d0] ss:$8 sps:$4 sm:$0xff]  }
  0xc9   : > { %3465 = vmatpush2.bf16.msra.mxu0 %v5204_v36  ;;  %v5300_v36 = vld [vmem:[%s7141_s1 + $0x6c4] ss:$8 sps:$4 sm:$0xff]  }
  0xca   : > { %3536 = vmatpush2.bf16.msra.mxu1 %v5207_v37  ;;  %3576 = vmatprep.subr.bf16.mxu0 %v5218_v39  ;;  %v5303_v37 = vld [vmem:[%s7141_s1 + $0x7c4] ss:$8 sps:$4 sm:$0xff]   ;;  %v5301_v39 = vld [vmem:[%s7141_s1 + $0x7c0] ss:$8 sps:$4 sm:$0xff]  }
  0xcb   : > { %3647 = vmatprep.subr.bf16.mxu1 %v5221_v40  ;;  %v5306_v40 = vld [vmem:[%s7141_s1 + $0x6b4] ss:$8 sps:$4 sm:$0xff]  }
  0xcc   : > { %3467 = vmatmul.mubr.bf16.vlgmr.msra.gmra.mxu0 %v5210_v38  ;;  %v5298_v38 = vld [vmem:[%s7141_s1 + $0x6c0] ss:$8 sps:$4 sm:$0xff]  }
  0xcd   : > { %3538 = vmatmul.mubr.bf16.vlgmr.msra.gmra.mxu1 %v5213_v41  ;;  %3577 = vmatpush1.bf16.msra.mxu0 %v5216_v42  ;;  %v5309_v41 = vld [vmem:[%s7141_s1 + $0x7b4] ss:$8 sps:$4 sm:$0xff]   ;;  %v5304_v42 = vld [vmem:[%s7141_s1 + $0x6b0] ss:$8 sps:$4 sm:$0xff]  }
  0xce   : > { %3648 = vmatpush1.bf16.msra.mxu1 %v5219_v43  ;;  %3578 = vmatprep.subr.bf16.mxu0 %v5224_v44  ;;  %v5307_v43 = vld [vmem:[%s7141_s1 + $0x7b0] ss:$8 sps:$4 sm:$0xff]   ;;  %v5312_v44 = vld [vmem:[%s7141_s1 + $0x6a4] ss:$8 sps:$4 sm:$0xff]  }
  0xcf   : > { %3649 = vmatprep.subr.bf16.mxu1 %v5227_v45  ;;  %3476 = vmatprep.mubr.bf16.mxu0 %v5228_v46  ;;  %v5315_v45 = vld [vmem:[%s7141_s1 + $0x7a4] ss:$8 sps:$4 sm:$0xff]   ;;  %v5310_v46 = vld [vmem:[%s7141_s1 + $0x6a0] ss:$8 sps:$4 sm:$0xff]  }
  0xd0   : > { %3547 = vmatprep.mubr.bf16.mxu1 %v5237_v47  ;;  %v5313_v47 = vld [vmem:[%s7141_s1 + $0x7a0] ss:$8 sps:$4 sm:$0xff]  }
  0xd1   : > { %3579 = vmatpush1.bf16.msra.mxu0 %v5222_v48  ;;  %v5318_v48 = vld [vmem:[%s7141_s1 + $0x694] ss:$8 sps:$4 sm:$0xff]  }
  0xd2   : > { %3650 = vmatpush1.bf16.msra.mxu1 %v5225_v49  ;;  %3580 = vmatprep.subr.bf16.mxu0 %v5233_v51  ;;  %v5321_v49 = vld [vmem:[%s7141_s1 + $0x794] ss:$8 sps:$4 sm:$0xff]   ;;  %v5319_v51 = vld [vmem:[%s7141_s1 + $0x790] ss:$8 sps:$4 sm:$0xff]  }
  0xd3   : > { %3651 = vmatprep.subr.bf16.mxu1 %v5236_v52  ;;  %v5324_v52 = vld [vmem:[%s7141_s1 + $0x684] ss:$8 sps:$4 sm:$0xff]  }
  0xd4   : > { %3477 = vmatmul.mubr.bf16.gmra.mxu0 %v5230_v50  ;;  %v5316_v50 = vld [vmem:[%s7141_s1 + $0x690] ss:$8 sps:$4 sm:$0xff]  }
  0xd5   : > { %3548 = vmatmul.mubr.bf16.gmra.mxu1 %v5239_v54  ;;  %3581 = vmatpush1.bf16.msra.mxu0 %v5231_v53  ;;  %v5327_v53 = vld [vmem:[%s7141_s1 + $0x784] ss:$8 sps:$4 sm:$0xff]   ;;  %v5322_v54 = vld [vmem:[%s7141_s1 + $0x680] ss:$8 sps:$4 sm:$0xff]  }
  0xd6   : > { %3652 = vmatpush1.bf16.msra.mxu1 %v5234_v55  ;;  %3582 = vmatprep.subr.bf16.mxu0 %v5242_v56  ;;  %v5325_v55 = vld [vmem:[%s7141_s1 + $0x780] ss:$8 sps:$4 sm:$0xff]   ;;  %v5336_v56 = vld [vmem:[%s7141_s1 + $0x874] ss:$8 sps:$4 sm:$0xff]  }
  0xd7   : > { %3653 = vmatprep.subr.bf16.mxu1 %v5245_v57  ;;  %3486 = vmatprep.mubr.bf16.mxu0 %v5246_v58  ;;  %v5339_v57 = vld [vmem:[%s7141_s1 + $0x974] ss:$8 sps:$4 sm:$0xff]  }
  0xd8   : > { %3557 = vmatprep.mubr.bf16.mxu1 %v5255_v59  ;;  %v5328_v58 = vld [vmem:[%s5796_s7 + $0x30] ss:$100 sps:$4 sm:$0xff]   ;;  %v5331_v59 = vld [vmem:[%s5796_s7 + $0x38] ss:$100 sps:$4 sm:$0xff]  }
  0xd9   : > { %3583 = vmatpush1.bf16.msra.mxu0 %v5240_v60  ;;  %v5334_v60 = vld [vmem:[%s7141_s1 + $0x870] ss:$8 sps:$4 sm:$0xff]  }
  0xda   : > { %3654 = vmatpush1.bf16.msra.mxu1 %v5243_v61  ;;  %3584 = vmatprep.subr.bf16.mxu0 %v5251_v62  ;;  %v5337_v61 = vld [vmem:[%s7141_s1 + $0x970] ss:$8 sps:$4 sm:$0xff]   ;;  %v5342_v62 = vld [vmem:[%s7141_s1 + $0x864] ss:$8 sps:$4 sm:$0xff]  }
  0xdb   : > { %3655 = vmatprep.subr.bf16.mxu1 %v5254_v0  ;;  %v5346_v0 = vld [vmem:[%s5796_s7 + $0xfc] ss:$100 sps:$4 sm:$0xff]  }
  0xdc   : > { %3487 = vmatmul.mubr.bf16.gmra.mxu0 %v5248_v63  ;;  %v5345_v63 = vld [vmem:[%s7141_s1 + $0x964] ss:$8 sps:$4 sm:$0xff]  }
  0xdd   : > { %3558 = vmatmul.mubr.bf16.gmra.mxu1 %v5257_v1  ;;  %3585 = vmatpush1.bf16.msra.mxu0 %v5249_v4  ;;  %v5355_v1 = vld [vmem:[%s5796_s7 + $0x104] ss:$100 sps:$4 sm:$0xff]  }
  0xde   : > { %3656 = vmatpush1.bf16.msra.mxu1 %v5252_v5  ;;  %3586 = vmatprep.subr.bf16.mxu0 %v5260_v6  ;;  %v5340_v4 = vld [vmem:[%s7141_s1 + $0x860] ss:$8 sps:$4 sm:$0xff]  }
  0xdf   : > { %3657 = vmatprep.subr.bf16.mxu1 %v5263_v7  ;;  %3496 = vmatprep.mubr.bf16.mxu0 %v4416_v8  ;;  %v5343_v5 = vld [vmem:[%s7141_s1 + $0x960] ss:$8 sps:$4 sm:$0xff]   ;;  %v5351_v7 = vld [vmem:[%s7141_s1 + $0x854] ss:$8 sps:$4 sm:$0xff]  }
  0xe0   : > { %3567 = vmatprep.mubr.bf16.mxu1 %v4418_v9 }
  0xe1   : > { %3587 = vmatpush1.bf16.msra.mxu0 %v5258_v10  ;;  %v5354_v10 = vld [vmem:[%s7141_s1 + $0x954] ss:$8 sps:$4 sm:$0xff]  }
  0xe2   : > { %3658 = vmatpush1.bf16.msra.mxu1 %v5261_v11  ;;  %3588 = vmatprep.subr.bf16.mxu0 %v5268_v12  ;;  %v5348_v12 = vld [vmem:[%s5796_s7 + $0xf8] ss:$100 sps:$4 sm:$0xff]  }
  0xe3   : > { %3659 = vmatprep.subr.bf16.mxu1 %v5271_v13  ;;  %v5349_v13 = vld [vmem:[%s7141_s1 + $0x850] ss:$8 sps:$4 sm:$0xff]  }
  0xe4   : > { %3497 = vmatmul.mubr.bf16.gmra.mxu0 %v4415_v14 }
  0xe5   : > { %3568 = vmatmul.mubr.bf16.gmra.mxu1 %v4417_v16  ;;  %3589 = vmatpush1.bf16.msra.mxu0 %v5266_v15  ;;  %v5352_v16 = vld [vmem:[%s7141_s1 + $0x950] ss:$8 sps:$4 sm:$0xff]  }
  0xe6   : > { %3660 = vmatpush1.bf16.msra.mxu1 %v5269_v17  ;;  %3590 = vmatprep.subr.bf16.mxu0 %v5276_v18  ;;  %v5357_v17 = vld [vmem:[%s5796_s7 + $0x100] ss:$100 sps:$4 sm:$0xff]  }
  0xe7   : > { %3661 = vmatprep.subr.bf16.mxu1 %v5279_v19  ;;  %3608 = vmatprep.mubr.bf16.mxu0 %v5330_v20  ;;  %v5360_v19 = vld [vmem:[%s7141_s1 + $0x844] ss:$8 sps:$4 sm:$0xff]  }
  0xe8   : > { %3679 = vmatprep.mubr.bf16.mxu1 %v5333_v21 }
  0xe9   : > { %3591 = vmatpush1.bf16.msra.mxu0 %v5274_v22  ;;  %v5363_v22 = vld [vmem:[%s7141_s1 + $0x944] ss:$8 sps:$4 sm:$0xff]  }
  0xea   : > { %3662 = vmatpush1.bf16.msra.mxu1 %v5277_v23  ;;  %3592 = vmatprep.subr.bf16.mxu0 %v5282_v24  ;;  %v5364_v24 = vld [vmem:[%s5796_s7 + $0x1c4] ss:$100 sps:$4 sm:$0xff]  }
  0xeb   : > { %3663 = vmatprep.subr.bf16.mxu1 %v5285_v25  ;;  %v5373_v25 = vld [vmem:[%s5796_s7 + $0x1cc] ss:$100 sps:$4 sm:$0xff]  }
  0xed   : > { %3593 = vmatpush2.bf16.msra.mxu0 %v5280_v26  ;;  %v5358_v26 = vld [vmem:[%s7141_s1 + $0x840] ss:$8 sps:$4 sm:$0xff]  }
  0xee   : > { %3664 = vmatpush2.bf16.msra.mxu1 %v5283_v27  ;;  %3594 = vmatprep.subr.bf16.mxu0 %v5288_v28  ;;  %v5361_v27 = vld [vmem:[%s7141_s1 + $0x940] ss:$8 sps:$4 sm:$0xff]  }
  0xef   : > { %3665 = vmatprep.subr.bf16.mxu1 %v5291_v29 }
  0xf1   : > { %3595 = vmatpush2.bf16.msra.mxu0 %v5286_v30  ;;  %v5369_v30 = vld [vmem:[%s7141_s1 + $0x834] ss:$8 sps:$4 sm:$0xff]  }
  0xf2   : > { %3666 = vmatpush2.bf16.msra.mxu1 %v5289_v31  ;;  %3596 = vmatprep.subr.bf16.mxu0 %v5294_v32  ;;  %v5366_v32 = vld [vmem:[%s5796_s7 + $0x1c0] ss:$100 sps:$4 sm:$0xff]  }
  0xf3   : > { %3667 = vmatprep.subr.bf16.mxu1 %v5297_v33  ;;  %v5372_v33 = vld [vmem:[%s7141_s1 + $0x934] ss:$8 sps:$4 sm:$0xff]  }
  0xf5   : > { %3597 = vmatpush2.bf16.msra.mxu0 %v5292_v34 }
  0xf6   : > { %3668 = vmatpush2.bf16.msra.mxu1 %v5295_v35  ;;  %3598 = vmatprep.subr.bf16.mxu0 %v5300_v36  ;;  %v5367_v36 = vld [vmem:[%s7141_s1 + $0x830] ss:$8 sps:$4 sm:$0xff]  }
  0xf7   : > { %3669 = vmatprep.subr.bf16.mxu1 %v5303_v37  ;;  %v5375_v37 = vld [vmem:[%s5796_s7 + $0x1c8] ss:$100 sps:$4 sm:$0xff]  }
  0xf9   : > { %3599 = vmatpush2.bf16.msra.mxu0 %v5298_v38 }
  0xfa   : > { %3670 = vmatpush2.bf16.msra.mxu1 %v5301_v39  ;;  %3600 = vmatprep.subr.bf16.mxu0 %v5306_v40  ;;  %v277_v39 = vld [vmem:[%s5796_s7 + $0x288] sm:$0xff]  ;;  %v278_v40 = vld [vmem:[%s5796_s7 + $0x290] sm:$0xff] }
  0xfb   : > { %3671 = vmatprep.subr.bf16.mxu1 %v5309_v41 }
  0xfd   : > { %3601 = vmatpush2.bf16.msra.mxu0 %v5304_v42 }
  0xfe   : > { %3672 = vmatpush2.bf16.msra.mxu1 %v5307_v43  ;;  %3602 = vmatprep.subr.bf16.mxu0 %v5312_v44  ;;  %v5370_v43 = vld [vmem:[%s7141_s1 + $0x930] ss:$8 sps:$4 sm:$0xff]  }
  0xff   : > { %3673 = vmatprep.subr.bf16.mxu1 %v5315_v45  ;;  %v5378_v45 = vld [vmem:[%s7141_s1 + $0x824] ss:$8 sps:$4 sm:$0xff]  }
 0x101   : > { %3603 = vmatpush2.bf16.msra.mxu0 %v5310_v46  ;;  %v5381_v46 = vld [vmem:[%s7141_s1 + $0x924] ss:$8 sps:$4 sm:$0xff]  }
 0x102   : > { %3674 = vmatpush2.bf16.msra.mxu1 %v5313_v47  ;;  %3604 = vmatprep.subr.bf16.mxu0 %v5318_v48 }
 0x103   : > { %3675 = vmatprep.subr.bf16.mxu1 %v5321_v49  ;;  %v4420_v49 = vcombine.high %v277_v39, %v277_v39 }
 0x105   : > { %3605 = vmatpush2.bf16.msra.mxu0 %v5316_v50  ;;  %v4422_v50 = vcombine.high %v278_v40, %v278_v40 }
 0x106   : > { %3676 = vmatpush2.bf16.msra.mxu1 %v5319_v51  ;;  %3606 = vmatprep.subr.bf16.mxu0 %v5324_v52 }
 0x107   : > { %3677 = vmatprep.subr.bf16.mxu1 %v5327_v53 }
 0x109   : > { %3607 = vmatpush2.bf16.msra.mxu0 %v5322_v54  ;;  %v5376_v54 = vld [vmem:[%s7141_s1 + $0x820] ss:$8 sps:$4 sm:$0xff]  }
 0x10a   : > { %3678 = vmatpush2.bf16.msra.mxu1 %v5325_v55  ;;  %3718 = vmatprep.subr.bf16.mxu0 %v5336_v56  ;;  %v5379_v55 = vld [vmem:[%s7141_s1 + $0x920] ss:$8 sps:$4 sm:$0xff]  }
 0x10b   : > { %3789 = vmatprep.subr.bf16.mxu1 %v5339_v57  ;;  %v5386_v57 = vld [vmem:[%s7141_s1 + $0x814] ss:$8 sps:$4 sm:$0xff]  }
 0x10c   : > { %v3184_v2 = vpop.f32.mrf.mxu0  ;;  %3609 = vmatmul.mubr.bf16.vlgmr.msra.gmra.mxu0 %v5328_v58  ;;  %v5389_v58 = vld [vmem:[%s7141_s1 + $0x914] ss:$8 sps:$4 sm:$0xff]  }
 0x10d   : > { %v3255_v3 = vpop.f32.mrf.mxu1  ;;  %3680 = vmatmul.mubr.bf16.vlgmr.msra.gmra.mxu1 %v5331_v59  ;;  %3719 = vmatpush1.bf16.msra.mxu0 %v5334_v60 }
 0x10e   : > { %v6503_v6 = vadd.f32 %v3255_v3, %v3184_v2  ;;  %3790 = vmatpush1.bf16.msra.mxu1 %v5337_v61  ;;  %v3186_v8 = vpop.f32.mrf.mxu0  ;;  %3720 = vmatprep.subr.bf16.mxu0 %v5342_v62  ;;  %v4419_v62 = vcombine.low %v277_v39, %v277_v39  ;;  %v5387_v3 = vld [vmem:[%s7141_s1 + $0x910] ss:$8 sps:$4 sm:$0xff]   ;;  %v5415_v39 = vld [vmem:[%s7141_s1 + $0x9d4] ss:$8 sps:$4 sm:$0xff]  }
 0x10f   : > { %v3257_v9 = vpop.f32.mrf.mxu1  ;;  %3791 = vmatprep.subr.bf16.mxu1 %v5345_v63  ;;  %3618 = vmatprep.mubr.bf16.mxu0 %v5346_v0  ;;  %v5384_v63 = vld [vmem:[%s7141_s1 + $0x810] ss:$8 sps:$4 sm:$0xff]   ;;  %v4421_v0 = vcombine.low %v278_v40, %v278_v40 }
 0x110   : > { %v6511_v11 = vadd.f32 %v3257_v9, %v3186_v8  ;;  %3689 = vmatprep.mubr.bf16.mxu1 %v5355_v1  ;;  %v3188_v14 = vpop.f32.mrf.mxu0  ;;  %v5410_v40 = vld [vmem:[%s7141_s1 + $0x8d0] ss:$8 sps:$4 sm:$0xff]  }
 0x111   : > { %v3259_v15 = vpop.f32.mrf.mxu1  ;;  %3721 = vmatpush1.bf16.msra.mxu0 %v5340_v4  ;;  %v5394_v4 = vld [vmem:[%s7141_s1 + $0x804] ss:$8 sps:$4 sm:$0xff]  }
 0x112   : > { %v6521_v18 = vadd.f32 %v3259_v15, %v3188_v14  ;;  %3792 = vmatpush1.bf16.msra.mxu1 %v5343_v5  ;;  %v3190_v20 = vpop.f32.mrf.mxu0  ;;  %3722 = vmatprep.subr.bf16.mxu0 %v5351_v7  ;;  %v5397_v7 = vld [vmem:[%s7141_s1 + $0x904] ss:$8 sps:$4 sm:$0xff]   ;;  %v5392_v15 = vld [vmem:[%s7141_s1 + $0x800] ss:$8 sps:$4 sm:$0xff]  }
 0x113   : > { %v3261_v21 = vpop.f32.mrf.mxu1  ;;  %3793 = vmatprep.subr.bf16.mxu1 %v5354_v10  ;;  %v5448_v10 = vld [vmem:[%s5796_s7 + $0x44] ss:$100 sps:$4 sm:$0xff]  }
 0x114   : > { %v6529_v23 = vadd.f32 %v3261_v21, %v3190_v20  ;;  %3619 = vmatmul.mubr.bf16.gmra.mxu0 %v5348_v12  ;;  %v3194_v28 = vpop.f32.mrf.mxu0 }
 0x115   : > { %3690 = vmatmul.mubr.bf16.gmra.mxu1 %v5357_v17  ;;  %v3265_v29 = vpop.f32.mrf.mxu1  ;;  %3723 = vmatpush1.bf16.msra.mxu0 %v5349_v13  ;;  %v5451_v13 = vld [vmem:[%s5796_s7 + $0x4c] ss:$100 sps:$4 sm:$0xff]   ;;  %v5400_v17 = vld [vmem:[%s7141_s1 + $0x8f4] ss:$8 sps:$4 sm:$0xff]  }
 0x116   : > { %3794 = vmatpush1.bf16.msra.mxu1 %v5352_v16  ;;  %v6542_v31 = vadd.f32 %v3265_v29, %v3194_v28  ;;  %3724 = vmatprep.subr.bf16.mxu0 %v5360_v19  ;;  %v3196_v34 = vpop.f32.mrf.mxu0  ;;  %v5395_v16 = vld [vmem:[%s7141_s1 + $0x900] ss:$8 sps:$4 sm:$0xff]   ;;  %v5403_v19 = vld [vmem:[%s7141_s1 + $0x9f4] ss:$8 sps:$4 sm:$0xff]   ;;  %v5406_v28 = vld [vmem:[%s7141_s1 + $0x8e4] ss:$8 sps:$4 sm:$0xff]  }
 0x117   : > { %3795 = vmatprep.subr.bf16.mxu1 %v5363_v22  ;;  %v3267_v35 = vpop.f32.mrf.mxu1  ;;  %3628 = vmatprep.mubr.bf16.mxu0 %v5364_v24  ;;  %v5409_v29 = vld [vmem:[%s7141_s1 + $0x9e4] ss:$8 sps:$4 sm:$0xff]  }
 0x118   : > { %3699 = vmatprep.mubr.bf16.mxu1 %v5373_v25  ;;  %v6552_v38 = vadd.f32 %v3267_v35, %v3196_v34  ;;  %v3198_v41 = vpop.f32.mrf.mxu0  ;;  %v5398_v25 = vld [vmem:[%s7141_s1 + $0x8f0] ss:$8 sps:$4 sm:$0xff]   ;;  %v5404_v34 = vld [vmem:[%s7141_s1 + $0x8e0] ss:$8 sps:$4 sm:$0xff]  }
 0x119   : > { %v3269_v42 = vpop.f32.mrf.mxu1  ;;  %3725 = vmatpush1.bf16.msra.mxu0 %v5358_v26  ;;  %v5401_v26 = vld [vmem:[%s7141_s1 + $0x9f0] ss:$8 sps:$4 sm:$0xff]   ;;  %v5407_v35 = vld [vmem:[%s7141_s1 + $0x9e0] ss:$8 sps:$4 sm:$0xff]  }
 0x11a   : > { %3796 = vmatpush1.bf16.msra.mxu1 %v5361_v27  ;;  %v6559_v44 = vadd.f32 %v3269_v42, %v3198_v41  ;;  %3726 = vmatprep.subr.bf16.mxu0 %v5369_v30  ;;  %v3200_v47 = vpop.f32.mrf.mxu0  ;;  %v5413_v41 = vld [vmem:[%s7141_s1 + $0x9d0] ss:$8 sps:$4 sm:$0xff]   ;;  %v5418_v42 = vld [vmem:[%s7141_s1 + $0x8c4] ss:$8 sps:$4 sm:$0xff]  }
 0x11b   : > { %3797 = vmatprep.subr.bf16.mxu1 %v5372_v33  ;;  %v3271_v48 = vpop.f32.mrf.mxu1 }
 0x11c   : > { %v6567_v51 = vadd.f32 %v3271_v48, %v3200_v47  ;;  %3629 = vmatmul.mubr.bf16.gmra.mxu0 %v5366_v32  ;;  %v3204_v52 = vpop.f32.mrf.mxu0  ;;  %v5424_v47 = vld [vmem:[%s7141_s1 + $0x8b4] ss:$8 sps:$4 sm:$0xff]  }
 0x11d   : > { %3700 = vmatmul.mubr.bf16.gmra.mxu1 %v5375_v37  ;;  %v3275_v53 = vpop.f32.mrf.mxu1  ;;  %3727 = vmatpush1.bf16.msra.mxu0 %v5367_v36  ;;  %v5412_v37 = vld [vmem:[%s7141_s1 + $0x8d4] ss:$8 sps:$4 sm:$0xff]  }
 0x11e   : > { %3798 = vmatpush1.bf16.msra.mxu1 %v5370_v43  ;;  %v6575_v56 = vadd.f32 %v3275_v53, %v3204_v52  ;;  %3728 = vmatprep.subr.bf16.mxu0 %v5378_v45  ;;  %v3206_v59 = vpop.f32.mrf.mxu0  ;;  %v5421_v43 = vld [vmem:[%s7141_s1 + $0x9c4] ss:$8 sps:$4 sm:$0xff]   ;;  %v5416_v45 = vld [vmem:[%s7141_s1 + $0x8c0] ss:$8 sps:$4 sm:$0xff]   ;;  %v5427_v48 = vld [vmem:[%s7141_s1 + $0x9b4] ss:$8 sps:$4 sm:$0xff]  }
 0x11f   : > { %3799 = vmatprep.subr.bf16.mxu1 %v5381_v46  ;;  %v3277_v60 = vpop.f32.mrf.mxu1  ;;  %3638 = vmatprep.mubr.bf16.mxu0 %v4420_v49  ;;  %v5419_v46 = vld [vmem:[%s7141_s1 + $0x9c0] ss:$8 sps:$4 sm:$0xff]   ;;  %v5422_v49 = vld [vmem:[%s7141_s1 + $0x8b0] ss:$8 sps:$4 sm:$0xff]   ;;  %v5430_v52 = vld [vmem:[%s7141_s1 + $0x8a4] ss:$8 sps:$4 sm:$0xff]  }
 0x120   : > { %3709 = vmatprep.mubr.bf16.mxu1 %v4422_v50  ;;  %v6583_v61 = vadd.f32 %v3277_v60, %v3206_v59  ;;  %v3208_v1 = vpop.f32.mrf.mxu0  ;;  %v5425_v50 = vld [vmem:[%s7141_s1 + $0x9b0] ss:$8 sps:$4 sm:$0xff]   ;;  %v5433_v53 = vld [vmem:[%s7141_s1 + $0x9a4] ss:$8 sps:$4 sm:$0xff]  }
 0x121   : > { %v3279_v2 = vpop.f32.mrf.mxu1  ;;  %3729 = vmatpush1.bf16.msra.mxu0 %v5376_v54  ;;  %v5428_v54 = vld [vmem:[%s7141_s1 + $0x8a0] ss:$8 sps:$4 sm:$0xff]   ;;  %v5434_v59 = vld [vmem:[%s7141_s1 + $0x890] ss:$8 sps:$4 sm:$0xff]  }
 0x122   : > { %3800 = vmatpush1.bf16.msra.mxu1 %v5379_v55  ;;  %v6594_v5 = vadd.f32 %v3279_v2, %v3208_v1  ;;  %3730 = vmatprep.subr.bf16.mxu0 %v5386_v57  ;;  %v3210_v8 = vpop.f32.mrf.mxu0  ;;  %v5431_v55 = vld [vmem:[%s7141_s1 + $0x9a0] ss:$8 sps:$4 sm:$0xff]   ;;  %v5436_v57 = vld [vmem:[%s7141_s1 + $0x894] ss:$8 sps:$4 sm:$0xff]   ;;  %v5437_v60 = vld [vmem:[%s7141_s1 + $0x990] ss:$8 sps:$4 sm:$0xff]  }
 0x123   : > { %3801 = vmatprep.subr.bf16.mxu1 %v5389_v58  ;;  %v3281_v9 = vpop.f32.mrf.mxu1  ;;  %v5439_v58 = vld [vmem:[%s7141_s1 + $0x994] ss:$8 sps:$4 sm:$0xff]   ;;  %v5443_v1 = vld [vmem:[%s7141_s1 + $0x980] ss:$8 sps:$4 sm:$0xff]  }
 0x124   : > { %v6600_v12 = vadd.f32 %v3281_v9, %v3210_v8  ;;  %3639 = vmatmul.mubr.bf16.gmra.mxu0 %v4419_v62  ;;  %v3214_v14 = vpop.f32.mrf.mxu0  ;;  %v5442_v62 = vld [vmem:[%s7141_s1 + $0x884] ss:$8 sps:$4 sm:$0xff]   ;;  %v5454_v2 = vld [vmem:[%s7141_s1 + $0xa74] ss:$8 sps:$4 sm:$0xff]   ;;  %v5452_v8 = vld [vmem:[%s7141_s1 + $0xa70] ss:$8 sps:$4 sm:$0xff]  }
 0x125   : > { %3710 = vmatmul.mubr.bf16.gmra.mxu1 %v4421_v0  ;;  %3731 = vmatpush1.bf16.msra.mxu0 %v5384_v63  ;;  %v3285_v21 = vpop.f32.mrf.mxu1  ;;  %v5445_v63 = vld [vmem:[%s7141_s1 + $0x984] ss:$8 sps:$4 sm:$0xff]   ;;  %v5440_v0 = vld [vmem:[%s7141_s1 + $0x880] ss:$8 sps:$4 sm:$0xff]   ;;  %v5455_v9 = vld [vmem:[%s7141_s1 + $0xb70] ss:$8 sps:$4 sm:$0xff]  }
 0x126   : > { %3802 = vmatpush1.bf16.msra.mxu1 %v5387_v3  ;;  %3732 = vmatprep.subr.bf16.mxu0 %v5394_v4  ;;  %v3216_v20 = vpop.f32.mrf.mxu0  ;;  %v6615_v24 = vadd.f32 %v3285_v21, %v3214_v14  ;;  %v5446_v3 = vld [vmem:[%s5796_s7 + $0x40] ss:$100 sps:$4 sm:$0xff]   ;;  %v5457_v4 = vld [vmem:[%s7141_s1 + $0xb74] ss:$8 sps:$4 sm:$0xff]   ;;  %v5464_v14 = vld [vmem:[%s5796_s7 + $0x10c] ss:$100 sps:$4 sm:$0xff]  }
 0x127   : > { %3803 = vmatprep.subr.bf16.mxu1 %v5397_v7  ;;  %3750 = vmatprep.mubr.bf16.mxu0 %v5448_v10  ;;  %v3287_v27 = vpop.f32.mrf.mxu1  ;;  %v5449_v7 = vld [vmem:[%s5796_s7 + $0x48] ss:$100 sps:$4 sm:$0xff]  }
 0x128   : > { %3821 = vmatprep.mubr.bf16.mxu1 %v5451_v13  ;;  %v3218_v22 = vpop.f32.mrf.mxu0  ;;  %v6629_v32 = vadd.f32 %v3287_v27, %v3216_v20  ;;  %v5460_v10 = vld [vmem:[%s7141_s1 + $0xa64] ss:$8 sps:$4 sm:$0xff]   ;;  %v5458_v20 = vld [vmem:[%s7141_s1 + $0xa60] ss:$8 sps:$4 sm:$0xff]  }
 0x129   : > { %3733 = vmatpush1.bf16.msra.mxu0 %v5392_v15  ;;  %v3289_v33 = vpop.f32.mrf.mxu1  ;;  %v5463_v13 = vld [vmem:[%s7141_s1 + $0xb64] ss:$8 sps:$4 sm:$0xff]   ;;  %v5473_v15 = vld [vmem:[%s5796_s7 + $0x114] ss:$100 sps:$4 sm:$0xff]   ;;  %v5461_v21 = vld [vmem:[%s7141_s1 + $0xb60] ss:$8 sps:$4 sm:$0xff]  }
 0x12a   : > { %3804 = vmatpush1.bf16.msra.mxu1 %v5395_v16  ;;  %3734 = vmatprep.subr.bf16.mxu0 %v5400_v17  ;;  %v3219_v30 = vpop.f32.mrf.mxu0  ;;  %v5466_v33 = vld [vmem:[%s5796_s7 + $0x108] ss:$100 sps:$4 sm:$0xff]  }
 0x12b   : > { %3805 = vmatprep.subr.bf16.mxu1 %v5403_v19  ;;  %v3290_v36 = vpop.f32.mrf.mxu1 }
 0x12d   : > { %3735 = vmatpush2.bf16.msra.mxu0 %v5398_v25 }
 0x12e   : > { %3806 = vmatpush2.bf16.msra.mxu1 %v5401_v26  ;;  %3736 = vmatprep.subr.bf16.mxu0 %v5406_v28  ;;  %v5472_v26 = vld [vmem:[%s7141_s1 + $0xb54] ss:$8 sps:$4 sm:$0xff]  }
 0x12f   : > { %3807 = vmatprep.subr.bf16.mxu1 %v5409_v29 }
 0x131   : > { %3737 = vmatpush2.bf16.msra.mxu0 %v5404_v34  ;;  %v5475_v34 = vld [vmem:[%s5796_s7 + $0x110] ss:$100 sps:$4 sm:$0xff]  }
 0x132   : > { %3808 = vmatpush2.bf16.msra.mxu1 %v5407_v35  ;;  %3738 = vmatprep.subr.bf16.mxu0 %v5412_v37  ;;  %v5470_v37 = vld [vmem:[%s7141_s1 + $0xb50] ss:$8 sps:$4 sm:$0xff]  }
 0x133   : > { %3809 = vmatprep.subr.bf16.mxu1 %v5415_v39 }
 0x135   : > { %3739 = vmatpush2.bf16.msra.mxu0 %v5410_v40 }
 0x136   : > { %3810 = vmatpush2.bf16.msra.mxu1 %v5413_v41  ;;  %3740 = vmatprep.subr.bf16.mxu0 %v5418_v42  ;;  %v5481_v41 = vld [vmem:[%s7141_s1 + $0xb44] ss:$8 sps:$4 sm:$0xff]  }
 0x137   : > { %3811 = vmatprep.subr.bf16.mxu1 %v5421_v43 }
 0x139   : > { %3741 = vmatpush2.bf16.msra.mxu0 %v5416_v45  ;;  %v5482_v45 = vld [vmem:[%s5796_s7 + $0x1d4] ss:$100 sps:$4 sm:$0xff]  }
 0x13a   : > { %3812 = vmatpush2.bf16.msra.mxu1 %v5419_v46  ;;  %3742 = vmatprep.subr.bf16.mxu0 %v5424_v47  ;;  %v5491_v46 = vld [vmem:[%s5796_s7 + $0x1dc] ss:$100 sps:$4 sm:$0xff]  }
 0x13b   : > { %3813 = vmatprep.subr.bf16.mxu1 %v5427_v48 }
 0x13d   : > { %3743 = vmatpush2.bf16.msra.mxu0 %v5422_v49 }
 0x13e   : > { %3814 = vmatpush2.bf16.msra.mxu1 %v5425_v50  ;;  %3744 = vmatprep.subr.bf16.mxu0 %v5430_v52  ;;  %v5479_v52 = vld [vmem:[%s7141_s1 + $0xb40] ss:$8 sps:$4 sm:$0xff]  }
 0x13f   : > { %3815 = vmatprep.subr.bf16.mxu1 %v5433_v53 }
 0x141   : > { %3745 = vmatpush2.bf16.msra.mxu0 %v5428_v54 }
 0x142   : > { %3816 = vmatpush2.bf16.msra.mxu1 %v5431_v55  ;;  %3746 = vmatprep.subr.bf16.mxu0 %v5436_v57  ;;  %v5490_v55 = vld [vmem:[%s7141_s1 + $0xb34] ss:$8 sps:$4 sm:$0xff]  }
 0x143   : > { %3817 = vmatprep.subr.bf16.mxu1 %v5439_v58 }
 0x145   : > { %3747 = vmatpush2.bf16.msra.mxu0 %v5434_v59  ;;  %v5484_v59 = vld [vmem:[%s5796_s7 + $0x1d0] ss:$100 sps:$4 sm:$0xff]  }
 0x146   : > { %3818 = vmatpush2.bf16.msra.mxu1 %v5437_v60  ;;  %3748 = vmatprep.subr.bf16.mxu0 %v5442_v62 }
 0x147   : > { %3819 = vmatprep.subr.bf16.mxu1 %v5445_v63  ;;  %v5493_v63 = vld [vmem:[%s5796_s7 + $0x1d8] ss:$100 sps:$4 sm:$0xff]  }
 0x149   : > { %3749 = vmatpush2.bf16.msra.mxu0 %v5440_v0  ;;  %v279_v0 = vld [vmem:[%s5796_s7 + $0x298] sm:$0xff] }
 0x14a   : > { %3820 = vmatpush2.bf16.msra.mxu1 %v5443_v1  ;;  %3860 = vmatprep.subr.bf16.mxu0 %v5454_v2  ;;  %v280_v1 = vld [vmem:[%s5796_s7 + $0x2a0] sm:$0xff] }
 0x14b   : > { %3931 = vmatprep.subr.bf16.mxu1 %v5457_v4  ;;  %v5488_v4 = vld [vmem:[%s7141_s1 + $0xb30] ss:$8 sps:$4 sm:$0xff]  }
 0x14c   : > { %v3326_v16 = vpop.f32.mrf.mxu0  ;;  %3751 = vmatmul.mubr.bf16.vlgmr.msra.gmra.mxu0 %v5446_v3 }
 0x14d   : > { %3822 = vmatmul.mubr.bf16.vlgmr.msra.gmra.mxu1 %v5449_v7  ;;  %v3397_v17 = vpop.f32.mrf.mxu1  ;;  %v3327_v19 = vadd.f32 %v3326_v16, %v6503_v6  ;;  %3861 = vmatpush1.bf16.msra.mxu0 %v5452_v8  ;;  %v5469_v6 = vld [vmem:[%s7141_s1 + $0xa54] ss:$8 sps:$4 sm:$0xff]  }
 0x14e   : > { %3932 = vmatpush1.bf16.msra.mxu1 %v5455_v9  ;;  %v3328_v22 = vpop.f32.mrf.mxu0  ;;  %3862 = vmatprep.subr.bf16.mxu0 %v5460_v10  ;;  %v5499_v9 = vld [vmem:[%s7141_s1 + $0xb24] ss:$8 sps:$4 sm:$0xff]  }
 0x14f   : > { %v3399_v25 = vpop.f32.mrf.mxu1  ;;  %3933 = vmatprep.subr.bf16.mxu1 %v5463_v13  ;;  %v3329_v27 = vadd.f32 %v3328_v22, %v6511_v11  ;;  %v6745_v28 = vadd.f32 %v3397_v17, %v3327_v19  ;;  %3760 = vmatprep.mubr.bf16.mxu0 %v5464_v14  ;;  %v5467_v11 = vld [vmem:[%s7141_s1 + $0xa50] ss:$8 sps:$4 sm:$0xff]   ;;  %v4424_v14 = vcombine.high %v279_v0, %v279_v0 }
 0x150   : > { %3831 = vmatprep.mubr.bf16.mxu1 %v5473_v15  ;;  %v3330_v29 = vpop.f32.mrf.mxu0  ;;  %v4426_v15 = vcombine.high %v280_v1, %v280_v1 }
 0x151   : > { %v3401_v30 = vpop.f32.mrf.mxu1  ;;  %v3331_v35 = vadd.f32 %v3330_v29, %v6521_v18  ;;  %v6750_v36 = vadd.f32 %v3399_v25, %v3329_v27  ;;  %3863 = vmatpush1.bf16.msra.mxu0 %v5458_v20  ;;  %v5478_v18 = vld [vmem:[%s7141_s1 + $0xa44] ss:$8 sps:$4 sm:$0xff]  }
 0x152   : > { %3934 = vmatpush1.bf16.msra.mxu1 %v5461_v21  ;;  %v3332_v39 = vpop.f32.mrf.mxu0  ;;  %3864 = vmatprep.subr.bf16.mxu0 %v5469_v6  ;;  %v5494_v21 = vld [vmem:[%s7141_s1 + $0xa20] ss:$8 sps:$4 sm:$0xff]   ;;  %v5507_v6 = vld [vmem:[%s7141_s1 + $0xb14] ss:$8 sps:$4 sm:$0xff]  }
 0x153   : > { %v3403_v40 = vpop.f32.mrf.mxu1  ;;  %3935 = vmatprep.subr.bf16.mxu1 %v5472_v26  ;;  %v3333_v42 = vadd.f32 %v3332_v39, %v6529_v23  ;;  %v6765_v43 = vadd.f32 %v3401_v30, %v3331_v35  ;;  %v5476_v23 = vld [vmem:[%s7141_s1 + $0xa40] ss:$8 sps:$4 sm:$0xff]  }
 0x154   : > { %v3336_v47 = vpop.f32.mrf.mxu0  ;;  %3761 = vmatmul.mubr.bf16.gmra.mxu0 %v5466_v33  ;;  %v4423_v33 = vcombine.low %v279_v0, %v279_v0  ;;  %v5519_v0 = vld [vmem:[%s7141_s1 + $0xbf0] ss:$8 sps:$4 sm:$0xff]  }
 0x155   : > { %v3407_v48 = vpop.f32.mrf.mxu1  ;;  %3832 = vmatmul.mubr.bf16.gmra.mxu1 %v5475_v34  ;;  %v3337_v49 = vadd.f32 %v3336_v47, %v6542_v31  ;;  %v6770_v50 = vadd.f32 %v3403_v40, %v3333_v42  ;;  %3865 = vmatpush1.bf16.msra.mxu0 %v5467_v11  ;;  %v5487_v31 = vld [vmem:[%s7141_s1 + $0xa34] ss:$8 sps:$4 sm:$0xff]   ;;  %v4425_v34 = vcombine.low %v280_v1, %v280_v1  ;;  %v5527_v1 = vld [vmem:[%s7141_s1 + $0xbe4] ss:$8 sps:$4 sm:$0xff]  }
 0x156   : > { %3936 = vmatpush1.bf16.msra.mxu1 %v5470_v37  ;;  %v3338_v53 = vpop.f32.mrf.mxu0  ;;  %3866 = vmatprep.subr.bf16.mxu0 %v5478_v18  ;;  %v5505_v37 = vld [vmem:[%s7141_s1 + $0xb10] ss:$8 sps:$4 sm:$0xff]   ;;  %v5515_v18 = vld [vmem:[%s7141_s1 + $0xb04] ss:$8 sps:$4 sm:$0xff]  }
 0x157   : > { %v3409_v54 = vpop.f32.mrf.mxu1  ;;  %3937 = vmatprep.subr.bf16.mxu1 %v5481_v41  ;;  %v3339_v57 = vadd.f32 %v3338_v53, %v6552_v38  ;;  %v6785_v58 = vadd.f32 %v3407_v48, %v3337_v49  ;;  %3770 = vmatprep.mubr.bf16.mxu0 %v5482_v45  ;;  %v5485_v38 = vld [vmem:[%s7141_s1 + $0xa30] ss:$8 sps:$4 sm:$0xff]  }
 0x158   : > { %3841 = vmatprep.mubr.bf16.mxu1 %v5491_v46  ;;  %v3340_v60 = vpop.f32.mrf.mxu0  ;;  %v5566_v45 = vld [vmem:[%s5796_s7 + $0x54] ss:$100 sps:$4 sm:$0xff]   ;;  %v5569_v46 = vld [vmem:[%s5796_s7 + $0x5c] ss:$100 sps:$4 sm:$0xff]  }
 0x159   : > { %v3411_v62 = vpop.f32.mrf.mxu1  ;;  %v3341_v2 = vadd.f32 %v3340_v60, %v6559_v44  ;;  %v6792_v3 = vadd.f32 %v3409_v54, %v3339_v57  ;;  %3867 = vmatpush1.bf16.msra.mxu0 %v5476_v23  ;;  %v5496_v44 = vld [vmem:[%s7141_s1 + $0xa24] ss:$8 sps:$4 sm:$0xff]  }
 0x15a   : > { %3938 = vmatpush1.bf16.msra.mxu1 %v5479_v52  ;;  %v3342_v7 = vpop.f32.mrf.mxu0  ;;  %3868 = vmatprep.subr.bf16.mxu0 %v5487_v31  ;;  %v5510_v52 = vld [vmem:[%s7141_s1 + $0xa00] ss:$8 sps:$4 sm:$0xff]   ;;  %v5521_v31 = vld [vmem:[%s7141_s1 + $0xbf4] ss:$8 sps:$4 sm:$0xff]  }
 0x15b   : > { %v3413_v8 = vpop.f32.mrf.mxu1  ;;  %3939 = vmatprep.subr.bf16.mxu1 %v5490_v55  ;;  %v3343_v10 = vadd.f32 %v3342_v7, %v6567_v51  ;;  %v6807_v13 = vadd.f32 %v3411_v62, %v3341_v2  ;;  %v5497_v51 = vld [vmem:[%s7141_s1 + $0xb20] ss:$8 sps:$4 sm:$0xff]  }
 0x15c   : > { %v3346_v16 = vpop.f32.mrf.mxu0  ;;  %3771 = vmatmul.mubr.bf16.gmra.mxu0 %v5484_v59  ;;  %v5525_v7 = vld [vmem:[%s7141_s1 + $0xbe0] ss:$8 sps:$4 sm:$0xff]  }
 0x15d   : > { %v3417_v17 = vpop.f32.mrf.mxu1  ;;  %3842 = vmatmul.mubr.bf16.gmra.mxu1 %v5493_v63  ;;  %v3347_v19 = vadd.f32 %v3346_v16, %v6575_v56  ;;  %v6810_v20 = vadd.f32 %v3413_v8, %v3343_v10  ;;  %3869 = vmatpush1.bf16.msra.mxu0 %v5485_v38  ;;  %v5504_v56 = vld [vmem:[%s7141_s1 + $0xa14] ss:$8 sps:$4 sm:$0xff]   ;;  %v5516_v63 = vld [vmem:[%s7141_s1 + $0xaf0] ss:$8 sps:$4 sm:$0xff]   ;;  %v5534_v16 = vld [vmem:[%s7141_s1 + $0xac0] ss:$8 sps:$4 sm:$0xff]  }
 0x15e   : > { %3940 = vmatpush1.bf16.msra.mxu1 %v5488_v4  ;;  %v3348_v22 = vpop.f32.mrf.mxu0  ;;  %3870 = vmatprep.subr.bf16.mxu0 %v5496_v44  ;;  %v5522_v4 = vld [vmem:[%s7141_s1 + $0xae0] ss:$8 sps:$4 sm:$0xff]   ;;  %v5530_v8 = vld [vmem:[%s7141_s1 + $0xad4] ss:$8 sps:$4 sm:$0xff]   ;;  %v5531_v10 = vld [vmem:[%s7141_s1 + $0xbd0] ss:$8 sps:$4 sm:$0xff]  }
 0x15f   : > { %v3419_v25 = vpop.f32.mrf.mxu1  ;;  %3941 = vmatprep.subr.bf16.mxu1 %v5499_v9  ;;  %v3349_v26 = vadd.f32 %v3348_v22, %v6583_v61  ;;  %v6825_v27 = vadd.f32 %v3417_v17, %v3347_v19  ;;  %3780 = vmatprep.mubr.bf16.mxu0 %v4424_v14  ;;  %v5502_v61 = vld [vmem:[%s7141_s1 + $0xa10] ss:$8 sps:$4 sm:$0xff]   ;;  %v5533_v44 = vld [vmem:[%s7141_s1 + $0xbd4] ss:$8 sps:$4 sm:$0xff]   ;;  %v5536_v14 = vld [vmem:[%s7141_s1 + $0xac4] ss:$8 sps:$4 sm:$0xff]  }
 0x160   : > { %3851 = vmatprep.mubr.bf16.mxu1 %v4426_v15  ;;  %v3350_v29 = vpop.f32.mrf.mxu0  ;;  %v5528_v9 = vld [vmem:[%s7141_s1 + $0xad0] ss:$8 sps:$4 sm:$0xff]   ;;  %v5539_v15 = vld [vmem:[%s7141_s1 + $0xbc4] ss:$8 sps:$4 sm:$0xff]   ;;  %v5537_v17 = vld [vmem:[%s7141_s1 + $0xbc0] ss:$8 sps:$4 sm:$0xff]  }
 0x161   : > { %v3421_v30 = vpop.f32.mrf.mxu1  ;;  %v3351_v35 = vadd.f32 %v3350_v29, %v6594_v5  ;;  %v6828_v11 = vadd.f32 %v3419_v25, %v3349_v26  ;;  %3871 = vmatpush1.bf16.msra.mxu0 %v5494_v21  ;;  %v5512_v5 = vld [vmem:[%s7141_s1 + $0xa04] ss:$8 sps:$4 sm:$0xff]   ;;  %v5542_v19 = vld [vmem:[%s7141_s1 + $0xab4] ss:$8 sps:$4 sm:$0xff]   ;;  %v5543_v22 = vld [vmem:[%s7141_s1 + $0xbb0] ss:$8 sps:$4 sm:$0xff]  }
 0x162   : > { %3942 = vmatpush1.bf16.msra.mxu1 %v5497_v51  ;;  %v3352_v39 = vpop.f32.mrf.mxu0  ;;  %3872 = vmatprep.subr.bf16.mxu0 %v5504_v56  ;;  %v5545_v21 = vld [vmem:[%s7141_s1 + $0xbb4] ss:$8 sps:$4 sm:$0xff]   ;;  %v5540_v51 = vld [vmem:[%s7141_s1 + $0xab0] ss:$8 sps:$4 sm:$0xff]   ;;  %v5548_v25 = vld [vmem:[%s7141_s1 + $0xaa4] ss:$8 sps:$4 sm:$0xff]  }
 0x163   : > { %v3423_v40 = vpop.f32.mrf.mxu1  ;;  %3943 = vmatprep.subr.bf16.mxu1 %v5507_v6  ;;  %v3353_v41 = vadd.f32 %v3352_v39, %v6600_v12  ;;  %v6843_v42 = vadd.f32 %v3421_v30, %v3351_v35  ;;  %v5513_v12 = vld [vmem:[%s7141_s1 + $0xb00] ss:$8 sps:$4 sm:$0xff]   ;;  %v5551_v56 = vld [vmem:[%s7141_s1 + $0xba4] ss:$8 sps:$4 sm:$0xff]   ;;  %v5554_v29 = vld [vmem:[%s7141_s1 + $0xa94] ss:$8 sps:$4 sm:$0xff]  }
 0x164   : > { %v3356_v47 = vpop.f32.mrf.mxu0  ;;  %3781 = vmatmul.mubr.bf16.gmra.mxu0 %v4423_v33  ;;  %v5546_v6 = vld [vmem:[%s7141_s1 + $0xaa0] ss:$8 sps:$4 sm:$0xff]   ;;  %v5557_v30 = vld [vmem:[%s7141_s1 + $0xb94] ss:$8 sps:$4 sm:$0xff]   ;;  %v5552_v33 = vld [vmem:[%s7141_s1 + $0xa90] ss:$8 sps:$4 sm:$0xff]  }
 0x165   : > { %v3427_v48 = vpop.f32.mrf.mxu1  ;;  %3852 = vmatmul.mubr.bf16.gmra.mxu1 %v4425_v34  ;;  %v3357_v49 = vadd.f32 %v3356_v47, %v6615_v24  ;;  %v6848_v23 = vadd.f32 %v3423_v40, %v3353_v41  ;;  %3873 = vmatpush1.bf16.msra.mxu0 %v5502_v61  ;;  %v5518_v24 = vld [vmem:[%s7141_s1 + $0xaf4] ss:$8 sps:$4 sm:$0xff]   ;;  %v5549_v26 = vld [vmem:[%s7141_s1 + $0xba0] ss:$8 sps:$4 sm:$0xff]   ;;  %v5555_v34 = vld [vmem:[%s7141_s1 + $0xb90] ss:$8 sps:$4 sm:$0xff]  }
 0x166   : > { %3944 = vmatpush1.bf16.msra.mxu1 %v5505_v37  ;;  %v3358_v53 = vpop.f32.mrf.mxu0  ;;  %3874 = vmatprep.subr.bf16.mxu0 %v5512_v5  ;;  %v5560_v35 = vld [vmem:[%s7141_s1 + $0xa84] ss:$8 sps:$4 sm:$0xff]   ;;  %v5558_v37 = vld [vmem:[%s7141_s1 + $0xa80] ss:$8 sps:$4 sm:$0xff]   ;;  %v5572_v40 = vld [vmem:[%s7141_s1 + $0xc74] ss:$8 sps:$4 sm:$0xff]  }
 0x167   : > { %v3429_v54 = vpop.f32.mrf.mxu1  ;;  %3945 = vmatprep.subr.bf16.mxu1 %v5515_v18  ;;  %v3359_v55 = vadd.f32 %v3358_v53, %v6629_v32  ;;  %v6863_v57 = vadd.f32 %v3427_v48, %v3357_v49  ;;  %3892 = vmatprep.mubr.bf16.mxu0 %v5566_v45  ;;  %v5524_v32 = vld [vmem:[%s7141_s1 + $0xae4] ss:$8 sps:$4 sm:$0xff]   ;;  %v5561_v39 = vld [vmem:[%s7141_s1 + $0xb80] ss:$8 sps:$4 sm:$0xff]   ;;  %v5564_v5 = vld [vmem:[%s5796_s7 + $0x50] ss:$100 sps:$4 sm:$0xff]  }
 0x168   : > { %3963 = vmatprep.mubr.bf16.mxu1 %v5569_v46  ;;  %v3360_v59 = vpop.f32.mrf.mxu0  ;;  %v5563_v61 = vld [vmem:[%s7141_s1 + $0xb84] ss:$8 sps:$4 sm:$0xff]   ;;  %v5567_v18 = vld [vmem:[%s5796_s7 + $0x58] ss:$100 sps:$4 sm:$0xff]  }
 0x169   : > { %v3431_v60 = vpop.f32.mrf.mxu1  ;;  %v6865_v62 = vadd.f32 %v3429_v54, %v3359_v55  ;;  %3875 = vmatpush1.bf16.msra.mxu0 %v5510_v52  ;;  %v5570_v41 = vld [vmem:[%s7141_s1 + $0xc70] ss:$8 sps:$4 sm:$0xff]   ;;  %v5575_v45 = vld [vmem:[%s7141_s1 + $0xc64] ss:$8 sps:$4 sm:$0xff]   ;;  %v5576_v46 = vld [vmem:[%s5796_s7 + $0x11c] ss:$100 sps:$4 sm:$0xff]  }
 0x16a   : > { %3946 = vmatpush1.bf16.msra.mxu1 %v5513_v12  ;;  %3876 = vmatprep.subr.bf16.mxu0 %v5518_v24  ;;  %v3361_v2 = vpop.f32.mrf.mxu0  ;;  %v5578_v47 = vld [vmem:[%s5796_s7 + $0x124] ss:$100 sps:$4 sm:$0xff]   ;;  %v5584_v24 = vld [vmem:[%s7141_s1 + $0xc54] ss:$8 sps:$4 sm:$0xff]  }
 0x16b   : > { %3947 = vmatprep.subr.bf16.mxu1 %v5521_v31  ;;  %v3432_v38 = vpop.f32.mrf.mxu1  ;;  %v5573_v12 = vld [vmem:[%s7141_s1 + $0xc60] ss:$8 sps:$4 sm:$0xff]   ;;  %v5580_v60 = vld [vmem:[%s5796_s7 + $0x118] ss:$100 sps:$4 sm:$0xff]  }
 0x16c   : > { %v5587_v38 = vld [vmem:[%s7141_s1 + $0xc44] ss:$8 sps:$4 sm:$0xff]  }
 0x16d   : > { %3877 = vmatpush2.bf16.msra.mxu0 %v5516_v63  ;;  %v5581_v63 = vld [vmem:[%s5796_s7 + $0x120] ss:$100 sps:$4 sm:$0xff]  }
 0x16e   : > { %3948 = vmatpush2.bf16.msra.mxu1 %v5519_v0  ;;  %3878 = vmatprep.subr.bf16.mxu0 %v5524_v32 }
 0x16f   : > { %3949 = vmatprep.subr.bf16.mxu1 %v5527_v1 }
 0x171   : > { %3879 = vmatpush2.bf16.msra.mxu0 %v5522_v4 }
 0x172   : > { %3950 = vmatpush2.bf16.msra.mxu1 %v5525_v7  ;;  %3880 = vmatprep.subr.bf16.mxu0 %v5530_v8  ;;  %v5590_v8 = vld [vmem:[%s5796_s7 + $0x1ec] ss:$100 sps:$4 sm:$0xff]  }
 0x173   : > { %3951 = vmatprep.subr.bf16.mxu1 %v5533_v44 }
 0x175   : > { %3881 = vmatpush2.bf16.msra.mxu0 %v5528_v9 }
 0x176   : > { %3952 = vmatpush2.bf16.msra.mxu1 %v5531_v10  ;;  %3882 = vmatprep.subr.bf16.mxu0 %v5536_v14 }
 0x177   : > { %3953 = vmatprep.subr.bf16.mxu1 %v5539_v15 }
 0x179   : > { %3883 = vmatpush2.bf16.msra.mxu0 %v5534_v16 }
 0x17a   : > { %3954 = vmatpush2.bf16.msra.mxu1 %v5537_v17  ;;  %3884 = vmatprep.subr.bf16.mxu0 %v5542_v19  ;;  %v5596_v17 = vld [vmem:[%s7141_s1 + $0xc34] ss:$8 sps:$4 sm:$0xff]  }
 0x17b   : > { %3955 = vmatprep.subr.bf16.mxu1 %v5545_v21  ;;  %v5592_v21 = vld [vmem:[%s5796_s7 + $0x1e0] ss:$100 sps:$4 sm:$0xff]  }
 0x17d   : > { %3885 = vmatpush2.bf16.msra.mxu0 %v5540_v51 }
 0x17e   : > { %3956 = vmatpush2.bf16.msra.mxu1 %v5543_v22  ;;  %3886 = vmatprep.subr.bf16.mxu0 %v5548_v25  ;;  %v5593_v25 = vld [vmem:[%s5796_s7 + $0x1e8] ss:$100 sps:$4 sm:$0xff]  }
 0x17f   : > { %3957 = vmatprep.subr.bf16.mxu1 %v5551_v56  ;;  %v281_v56 = vld [vmem:[%s5796_s7 + $0x2a8] sm:$0xff] }
 0x181   : > { %3887 = vmatpush2.bf16.msra.mxu0 %v5546_v6  ;;  %v282_v6 = vld [vmem:[%s5796_s7 + $0x2b0] sm:$0xff] }
 0x182   : > { %3958 = vmatpush2.bf16.msra.mxu1 %v5549_v26  ;;  %3888 = vmatprep.subr.bf16.mxu0 %v5554_v29 }
 0x183   : > { %3959 = vmatprep.subr.bf16.mxu1 %v5557_v30 }
 0x185   : > { %3889 = vmatpush2.bf16.msra.mxu0 %v5552_v33 }
 0x186   : > { %3960 = vmatpush2.bf16.msra.mxu1 %v5555_v34  ;;  %3890 = vmatprep.subr.bf16.mxu0 %v5560_v35  ;;  %v5599_v34 = vld [vmem:[%s7141_s1 + $0xc24] ss:$8 sps:$4 sm:$0xff]  }
 0x187   : > { %3961 = vmatprep.subr.bf16.mxu1 %v5563_v61 }
 0x189   : > { %3891 = vmatpush2.bf16.msra.mxu0 %v5558_v37  ;;  %v4430_v37 = vcombine.high %v282_v6, %v282_v6 }
 0x18a   : > { %3962 = vmatpush2.bf16.msra.mxu1 %v5561_v39  ;;  %4002 = vmatprep.subr.bf16.mxu0 %v5572_v40 }
 0x18b   : > { %4851 = vmatprep.subr.bf16.mxu1 %v5572_v40 }
 0x18c   : > { %v3468_v48 = vpop.f32.mrf.mxu0  ;;  %3893 = vmatmul.mubr.bf16.vlgmr.msra.gmra.mxu0 %v5564_v5 }
 0x18d   : > { %3964 = vmatmul.mubr.bf16.vlgmr.msra.gmra.mxu1 %v5567_v18  ;;  %v3539_v49 = vpop.f32.mrf.mxu1  ;;  %v3469_v52 = vadd.f32 %v3468_v48, %v6745_v28  ;;  %4003 = vmatpush1.bf16.msra.mxu0 %v5570_v41 }
 0x18e   : > { %4859 = vmatpush1.bf16.msra.mxu1 %v5570_v41  ;;  %v3470_v53 = vpop.f32.mrf.mxu0  ;;  %4004 = vmatprep.subr.bf16.mxu0 %v5575_v45  ;;  %v5597_v41 = vld [vmem:[%s7141_s1 + $0xc20] ss:$8 sps:$4 sm:$0xff]  }
 0x18f   : > { %v3541_v54 = vpop.f32.mrf.mxu1  ;;  %4852 = vmatprep.subr.bf16.mxu1 %v5575_v45  ;;  %v3471_v31 = vadd.f32 %v3470_v53, %v6750_v36  ;;  %v6978_v55 = vadd.f32 %v3539_v49, %v3469_v52  ;;  %3902 = vmatprep.mubr.bf16.mxu0 %v5576_v46  ;;  %v5582_v36 = vld [vmem:[%s7141_s1 + $0xc50] ss:$8 sps:$4 sm:$0xff]   ;;  %v5606_v46 = vld [vmem:[%s7141_s1 + $0xc14] ss:$8 sps:$4 sm:$0xff]   ;;  %v4427_v52 = vcombine.low %v281_v56, %v281_v56 }
 0x190   : > { %3973 = vmatprep.mubr.bf16.mxu1 %v5578_v47  ;;  %v3472_v28 = vpop.f32.mrf.mxu0 }
 0x191   : > { %v3543_v59 = vpop.f32.mrf.mxu1  ;;  %v3473_v0 = vadd.f32 %v3472_v28, %v6765_v43  ;;  %v6983_v32 = vadd.f32 %v3541_v54, %v3471_v31  ;;  %4005 = vmatpush1.bf16.msra.mxu0 %v5573_v12  ;;  %v5588_v43 = vld [vmem:[%s5796_s7 + $0x1e4] ss:$100 sps:$4 sm:$0xff]  }
 0x192   : > { %4860 = vmatpush1.bf16.msra.mxu1 %v5573_v12  ;;  %v3474_v1 = vpop.f32.mrf.mxu0  ;;  %4006 = vmatprep.subr.bf16.mxu0 %v5584_v24  ;;  %v4429_v12 = vcombine.low %v282_v6, %v282_v6  ;;  %v5609_v28 = vld [vmem:[%s7141_s1 + $0xc04] ss:$8 sps:$4 sm:$0xff]  }
 0x193   : > { %v3545_v2 = vpop.f32.mrf.mxu1  ;;  %4853 = vmatprep.subr.bf16.mxu1 %v5584_v24  ;;  %v3475_v4 = vadd.f32 %v3474_v1, %v6770_v50  ;;  %v6992_v7 = vadd.f32 %v3543_v59, %v3473_v0  ;;  %v5585_v50 = vld [vmem:[%s7141_s1 + $0xc40] ss:$8 sps:$4 sm:$0xff]   ;;  %v5604_v24 = vld [vmem:[%s7141_s1 + $0xc10] ss:$8 sps:$4 sm:$0xff]  }
 0x194   : > { %v3478_v44 = vpop.f32.mrf.mxu0  ;;  %3903 = vmatmul.mubr.bf16.gmra.mxu0 %v5580_v60  ;;  %v5607_v1 = vld [vmem:[%s7141_s1 + $0xc00] ss:$8 sps:$4 sm:$0xff]  }
 0x195   : > { %3974 = vmatmul.mubr.bf16.gmra.mxu1 %v5581_v63  ;;  %v3549_v9 = vpop.f32.mrf.mxu1  ;;  %v3479_v10 = vadd.f32 %v3478_v44, %v6785_v58  ;;  %v6997_v14 = vadd.f32 %v3545_v2, %v3475_v4  ;;  %4007 = vmatpush1.bf16.msra.mxu0 %v5582_v36 }
 0x196   : > { %4861 = vmatpush1.bf16.msra.mxu1 %v5582_v36  ;;  %v3480_v15 = vpop.f32.mrf.mxu0  ;;  %4008 = vmatprep.subr.bf16.mxu0 %v5587_v38 }
 0x197   : > { %v3551_v16 = vpop.f32.mrf.mxu1  ;;  %4854 = vmatprep.subr.bf16.mxu1 %v5587_v38  ;;  %v3481_v58 = vadd.f32 %v3480_v15, %v6792_v3  ;;  %v7006_v19 = vadd.f32 %v3549_v9, %v3479_v10  ;;  %3912 = vmatprep.mubr.bf16.mxu0 %v5588_v43  ;;  %v5594_v3 = vld [vmem:[%s7141_s1 + $0xc30] ss:$8 sps:$4 sm:$0xff]   ;;  %v5622_v43 = vmov 0  }
 0x198   : > { %3983 = vmatprep.mubr.bf16.mxu1 %v5590_v8  ;;  %v3482_v51 = vpop.f32.mrf.mxu0  ;;  %v5611_v8 = vld [vmem:[%s5796_s7 + $0x1f0] ss:$100 sps:$4 sm:$0xff]  }
 0x199   : > { %v3553_v22 = vpop.f32.mrf.mxu1  ;;  %v3483_v26 = vadd.f32 %v3482_v51, %v6807_v13  ;;  %v7013_v29 = vadd.f32 %v3551_v16, %v3481_v58  ;;  %4009 = vmatpush1.bf16.msra.mxu0 %v5585_v50  ;;  %v4428_v13 = vcombine.high %v281_v56, %v281_v56  ;;  %v5613_v16 = vld [vmem:[%s5796_s7 + $0x2b8] ss:$0 sps:$4 sm:$0xff]  }
 0x19a   : > { %4862 = vmatpush1.bf16.msra.mxu1 %v5585_v50  ;;  %v3484_v30 = vpop.f32.mrf.mxu0  ;;  %4010 = vmatprep.subr.bf16.mxu0 %v5596_v17 }
 0x19b   : > { %v3555_v33 = vpop.f32.mrf.mxu1  ;;  %4855 = vmatprep.subr.bf16.mxu1 %v5596_v17  ;;  %v3485_v35 = vadd.f32 %v3484_v30, %v6810_v20  ;;  %v7022_v61 = vadd.f32 %v3553_v22, %v3483_v26 }
 0x19c   : > { %v3488_v39 = vpop.f32.mrf.mxu0  ;;  %3913 = vmatmul.mubr.bf16.gmra.mxu0 %v5592_v21 }
 0x19d   : > { %3984 = vmatmul.mubr.bf16.gmra.mxu1 %v5593_v25  ;;  %v3559_v40 = vpop.f32.mrf.mxu1  ;;  %v3489_v5 = vadd.f32 %v3488_v39, %v6825_v27  ;;  %v7025_v18 = vadd.f32 %v3555_v33, %v3485_v35  ;;  %4011 = vmatpush1.bf16.msra.mxu0 %v5594_v3 }
 0x19e   : > { %4863 = vmatpush1.bf16.msra.mxu1 %v5594_v3  ;;  %v3490_v45 = vpop.f32.mrf.mxu0  ;;  %4012 = vmatprep.subr.bf16.mxu0 %v5599_v34 }
 0x19f   : > { %v3561_v20 = vpop.f32.mrf.mxu1  ;;  %4856 = vmatprep.subr.bf16.mxu1 %v5599_v34  ;;  %v3491_v47 = vadd.f32 %v3490_v45, %v6828_v11  ;;  %v7034_v48 = vadd.f32 %v3559_v40, %v3489_v5  ;;  %3922 = vmatprep.mubr.bf16.mxu0 %v4428_v13 }
 0x1a0   : > { %3993 = vmatprep.mubr.bf16.mxu1 %v4430_v37  ;;  %v3492_v27 = vpop.f32.mrf.mxu0 }
 0x1a1   : > { %v3563_v49 = vpop.f32.mrf.mxu1  ;;  %v3493_v53 = vadd.f32 %v3492_v27, %v6843_v42  ;;  %v7037_v54 = vadd.f32 %v3561_v20, %v3491_v47  ;;  %4013 = vmatpush1.bf16.msra.mxu0 %v5597_v41 }
 0x1a2   : > { %4864 = vmatpush1.bf16.msra.mxu1 %v5597_v41  ;;  %v3494_v31 = vpop.f32.mrf.mxu0  ;;  %4014 = vmatprep.subr.bf16.mxu0 %v5606_v46 }
 0x1a3   : > { %v3565_v11 = vpop.f32.mrf.mxu1  ;;  %4857 = vmatprep.subr.bf16.mxu1 %v5606_v46  ;;  %v3495_v59 = vadd.f32 %v3494_v31, %v6848_v23  ;;  %v7046_v60 = vadd.f32 %v3563_v49, %v3493_v53 }
 0x1a4   : > { %v3498_v42 = vpop.f32.mrf.mxu0  ;;  %3923 = vmatmul.mubr.bf16.gmra.mxu0 %v4427_v52 }
 0x1a5   : > { %3994 = vmatmul.mubr.bf16.gmra.mxu1 %v4429_v12  ;;  %v3569_v63 = vpop.f32.mrf.mxu1  ;;  %v3499_v0 = vadd.f32 %v3498_v42, %v6863_v57  ;;  %v7049_v36 = vadd.f32 %v3565_v11, %v3495_v59  ;;  %4015 = vmatpush1.bf16.msra.mxu0 %v5604_v24  ;;  %v5610_v57 = vld [vmem:[%s5796_s7 + $0x60] ss:$100 sps:$4 sm:$0xff]  }
 0x1a6   : > { %4865 = vmatpush1.bf16.msra.mxu1 %v5604_v24  ;;  %v3500_v2 = vpop.f32.mrf.mxu0  ;;  %4016 = vmatprep.subr.bf16.mxu0 %v5609_v28 }
 0x1a7   : > { %v3571_v23 = vpop.f32.mrf.mxu1  ;;  %4858 = vmatprep.subr.bf16.mxu1 %v5609_v28  ;;  %v3501_v38 = vadd.f32 %v3500_v2, %v6865_v62  ;;  %v7055_v4 = vadd.f32 %v3569_v63, %v3499_v0  ;;  %4034 = vmatprep.mubr.bf16.mxu0 %v5622_v43  ;;  %v5612_v62 = vld [vmem:[%s5796_s7 + $0x128] ss:$100 sps:$4 sm:$0xff]   ;;  %s4842_s7 = sshll.u32 %s7145_s22, 3  ;;  %s4843_s22 = sshll.u32 %s7147_s13, 4 }
 0x1a8   : > { %4054 = vmatprep.mubr.bf16.mxu1 %v5622_v43  ;;  %v3502_v44 = vpop.f32.mrf.mxu0  ;;  %s7111_s6 = scalar_lea.vmem %s7142_s2, %s4842_s7  ;;  %s191_s10 = scalar_lea.vmem %s7143_s3, %s4843_s22 }
 0x1a9   : > { %v3573_v9 = vpop.f32.mrf.mxu1  ;;  %v7059_v10 = vadd.f32 %v3571_v23, %v3501_v38  ;;  %4017 = vmatpush1.bf16.msra.mxu0 %v5607_v1 }
 0x1aa   : > { %4866 = vmatpush1.bf16.msra.mxu1 %v5607_v1  ;;  %v3503_v50 = vpop.f32.mrf.mxu0 }
 0x1ab   : > { %v3574_v15 = vpop.f32.mrf.mxu1 }
 0x1ac   : > { %4035 = vmatmul.mubr.bf16.vlgmr.msra.gmra.mxu0 %v5610_v57 }
 0x1ad   : > { %4055 = vmatmul.mubr.bf16.vlgmr.msra.gmra.mxu1 %v5611_v8  ;;  %4044 = vmatprep.mubr.bf16.mxu0 %v5622_v43 }
 0x1ae   : > { %4064 = vmatprep.mubr.bf16.mxu1 %v5622_v43 }
 0x1b4   : > { %4045 = vmatmul.mubr.bf16.gmra.mxu0 %v5612_v62 }
 0x1b5   : > { %4065 = vmatmul.mubr.bf16.gmra.mxu1 %v5613_v16 }
 0x1cc   : > { %v3610_v17 = vpop.f32.mrf.mxu0 }
 0x1cd   : > { %v3681_v58 = vpop.f32.mrf.mxu1  ;;  %v3611_v21 = vadd.f32 %v3610_v17, %v6978_v55 }
 0x1ce   : > { %v3612_v51 = vpop.f32.mrf.mxu0 }
 0x1cf   : > { %v3683_v22 = vpop.f32.mrf.mxu1  ;;  %v3613_v25 = vadd.f32 %v3612_v51, %v6983_v32  ;;  %v3682_v56 = vadd.f32 %v3681_v58, %v3611_v21 }
 0x1d0   : > { %v3614_v6 = vpop.f32.mrf.mxu0 }
 0x1d1   : > { %v3685_v26 = vpop.f32.mrf.mxu1  ;;  %v3615_v3 = vadd.f32 %v3614_v6, %v6992_v7  ;;  %v3684_v30 = vadd.f32 %v3683_v22, %v3613_v25 }
 0x1d2   : > { %v3616_v33 = vpop.f32.mrf.mxu0 }
 0x1d3   : > { %v3687_v34 = vpop.f32.mrf.mxu1  ;;  %v3617_v35 = vadd.f32 %v3616_v33, %v6997_v14  ;;  %v3686_v13 = vadd.f32 %v3685_v26, %v3615_v3 }
 0x1d4   : > { %v3620_v37 = vpop.f32.mrf.mxu0 }
 0x1d5   : > { %v3691_v39 = vpop.f32.mrf.mxu1  ;;  %v3621_v40 = vadd.f32 %v3620_v37, %v7006_v19  ;;  %v3688_v55 = vadd.f32 %v3687_v34, %v3617_v35 }
 0x1d6   : > { %v3622_v5 = vpop.f32.mrf.mxu0 }
 0x1d7   : > { %v3693_v41 = vpop.f32.mrf.mxu1  ;;  %v3623_v32 = vadd.f32 %v3622_v5, %v7013_v29  ;;  %v3692_v45 = vadd.f32 %v3691_v39, %v3621_v40 }
 0x1d8   : > { %v3624_v20 = vpop.f32.mrf.mxu0 }
 0x1d9   : > { %v3695_v46 = vpop.f32.mrf.mxu1  ;;  %v3625_v7 = vadd.f32 %v3624_v20, %v7022_v61  ;;  %v3694_v47 = vadd.f32 %v3693_v41, %v3623_v32 }
 0x1da   : > { %v3626_v27 = vpop.f32.mrf.mxu0 }
 0x1db   : > { %v3697_v49 = vpop.f32.mrf.mxu1  ;;  %v3627_v14 = vadd.f32 %v3626_v27, %v7025_v18  ;;  %v3696_v52 = vadd.f32 %v3695_v46, %v3625_v7 }
 0x1dc   : > { %v3630_v12 = vpop.f32.mrf.mxu0 }
 0x1dd   : > { %v3701_v53 = vpop.f32.mrf.mxu1  ;;  %v3631_v19 = vadd.f32 %v3630_v12, %v7034_v48  ;;  %v3698_v24 = vadd.f32 %v3697_v49, %v3627_v14 }
 0x1de   : > { %v3632_v31 = vpop.f32.mrf.mxu0 }
 0x1df   : > { %v3703_v11 = vpop.f32.mrf.mxu1  ;;  %v3633_v29 = vadd.f32 %v3632_v31, %v7037_v54  ;;  %v3702_v28 = vadd.f32 %v3701_v53, %v3631_v19 }
 0x1e0   : > { %v3634_v59 = vpop.f32.mrf.mxu0 }
 0x1e1   : > { %v3705_v42 = vpop.f32.mrf.mxu1  ;;  %v3635_v61 = vadd.f32 %v3634_v59, %v7046_v60  ;;  %v3704_v63 = vadd.f32 %v3703_v11, %v3633_v29 }
 0x1e2   : > { %v3636_v0 = vpop.f32.mrf.mxu0 }
 0x1e3   : > { %v3707_v1 = vpop.f32.mrf.mxu1  ;;  %v3637_v18 = vadd.f32 %v3636_v0, %v7049_v36  ;;  %v3706_v2 = vadd.f32 %v3705_v42, %v3635_v61 }
 0x1e4   : > { %v3640_v23 = vpop.f32.mrf.mxu0 }
 0x1e5   : > { %v3711_v38 = vpop.f32.mrf.mxu1  ;;  %v3641_v48 = vadd.f32 %v3640_v23, %v7055_v4  ;;  %v3708_v43 = vadd.f32 %v3707_v1, %v3637_v18 }
 0x1e6   : > { %v3642_v57 = vpop.f32.mrf.mxu0 }
 0x1e7   : > { %v3713_v8 = vpop.f32.mrf.mxu1  ;;  %v3643_v54 = vadd.f32 %v3642_v57, %v7059_v10  ;;  %v3712_v44 = vadd.f32 %v3711_v38, %v3641_v48 }
 0x1e8   : > { %v3644_v9 = vpop.f32.mrf.mxu0 }
 0x1e9   : > { %v3715_v50 = vpop.f32.mrf.mxu1  ;;  %v3714_v15 = vadd.f32 %v3713_v8, %v3643_v54 }
 0x1ea   : > { %v3645_v60 = vpop.f32.mrf.mxu0 }
 0x1eb   : > { %v3716_v62 = vpop.f32.mrf.mxu1 }
 0x20c   : > { %v3752_v16 = vpop.f32.mrf.mxu0 }
 0x20d   : > { %v3823_v17 = vpop.f32.mrf.mxu1  ;;  %v3753_v58 = vadd.f32 %v3752_v16, %v3682_v56 }
 0x20e   : > { %v3754_v36 = vpop.f32.mrf.mxu0 }
 0x20f   : > { %v3825_v21 = vpop.f32.mrf.mxu1  ;;  %v3755_v51 = vadd.f32 %v3754_v36, %v3684_v30  ;;  %v7077_v22 = vadd.f32 %v3823_v17, %v3753_v58 }
 0x210   : > { %v3756_v4 = vpop.f32.mrf.mxu0 }
 0x211   : > { %v3827_v25 = vpop.f32.mrf.mxu1  ;;  %v3757_v6 = vadd.f32 %v3756_v4, %v3686_v13  ;;  %v7079_v26 = vadd.f32 %v3825_v21, %v3755_v51 }
 0x212   : > { %v3758_v10 = vpop.f32.mrf.mxu0 }
 0x213   : > { %v3829_v3 = vpop.f32.mrf.mxu1  ;;  %v3759_v33 = vadd.f32 %v3758_v10, %v3688_v55  ;;  %v7081_v34 = vadd.f32 %v3827_v25, %v3757_v6 }
 0x214   : > { %v3762_v35 = vpop.f32.mrf.mxu0 }
 0x215   : > { %v3833_v37 = vpop.f32.mrf.mxu1  ;;  %v3763_v39 = vadd.f32 %v3762_v35, %v3692_v45  ;;  %v7083_v40 = vadd.f32 %v3829_v3, %v3759_v33 }
 0x216   : > { %v3764_v56 = vpop.f32.mrf.mxu0 }
 0x217   : > { %v3835_v5 = vpop.f32.mrf.mxu1  ;;  %v3765_v30 = vadd.f32 %v3764_v56, %v3694_v47  ;;  %v7085_v41 = vadd.f32 %v3833_v37, %v3763_v39 }
 0x218   : > { %v3766_v32 = vpop.f32.mrf.mxu0 }
 0x219   : > { %v3837_v20 = vpop.f32.mrf.mxu1  ;;  %v3767_v13 = vadd.f32 %v3766_v32, %v3696_v52  ;;  %v7087_v46 = vadd.f32 %v3835_v5, %v3765_v30 }
 0x21a   : > { %v3768_v7 = vpop.f32.mrf.mxu0 }
 0x21b   : > { %v3839_v27 = vpop.f32.mrf.mxu1  ;;  %v3769_v55 = vadd.f32 %v3768_v7, %v3698_v24  ;;  %v7089_v49 = vadd.f32 %v3837_v20, %v3767_v13 }
 0x21c   : > { %v3772_v14 = vpop.f32.mrf.mxu0 }
 0x21d   : > { %v3843_v12 = vpop.f32.mrf.mxu1  ;;  %v3773_v45 = vadd.f32 %v3772_v14, %v3702_v28  ;;  %v7091_v53 = vadd.f32 %v3839_v27, %v3769_v55 }
 0x21e   : > { %v3774_v19 = vpop.f32.mrf.mxu0 }
 0x21f   : > { %v3845_v31 = vpop.f32.mrf.mxu1  ;;  %v3775_v47 = vadd.f32 %v3774_v19, %v3704_v63  ;;  %v3844_v11 = vadd.f32 %v3843_v12, %v3773_v45 }
 0x220   : > { %v3776_v29 = vpop.f32.mrf.mxu0 }
 0x221   : > { %v3847_v59 = vpop.f32.mrf.mxu1  ;;  %v3777_v42 = vadd.f32 %v3776_v29, %v3706_v2  ;;  %v3846_v52 = vadd.f32 %v3845_v31, %v3775_v47 }
 0x222   : > { %v3778_v61 = vpop.f32.mrf.mxu0 }
 0x223   : > { %v3849_v0 = vpop.f32.mrf.mxu1  ;;  %v3779_v1 = vadd.f32 %v3778_v61, %v3708_v43  ;;  %v3848_v18 = vadd.f32 %v3847_v59, %v3777_v42 }
 0x224   : > { %v3782_v24 = vpop.f32.mrf.mxu0 }
 0x225   : > { %v3853_v23 = vpop.f32.mrf.mxu1  ;;  %v3783_v38 = vadd.f32 %v3782_v24, %v3712_v44  ;;  %v3850_v48 = vadd.f32 %v3849_v0, %v3779_v1 }
 0x226   : > { %v3784_v57 = vpop.f32.mrf.mxu0 }
 0x227   : > { %v3855_v28 = vpop.f32.mrf.mxu1  ;;  %v3785_v8 = vadd.f32 %v3784_v57, %v3714_v15  ;;  %v3854_v54 = vadd.f32 %v3853_v23, %v3783_v38 }
 0x228   : > { %v3786_v9 = vpop.f32.mrf.mxu0 }
 0x229   : > { %v3857_v50 = vpop.f32.mrf.mxu1  ;;  %v3856_v63 = vadd.f32 %v3855_v28, %v3785_v8 }
 0x22a   : > { %v3787_v60 = vpop.f32.mrf.mxu0 }
 0x22b   : > { %v3858_v62 = vpop.f32.mrf.mxu1 }
 0x24c   : > { %v3894_v16 = vpop.f32.mrf.mxu0 }
 0x24d   : > { %v3965_v2 = vpop.f32.mrf.mxu1  ;;  %v3895_v14 = vadd.f32 %v3894_v16, %v7077_v22 }
 0x24e   : > { %v3896_v17 = vpop.f32.mrf.mxu0 }
 0x24f   : > { %v3967_v58 = vpop.f32.mrf.mxu1  ;;  %v3897_v12 = vadd.f32 %v3896_v17, %v7079_v26  ;;  %v3966_v42 = vadd.f32 %v3965_v2, %v3895_v14 }
 0x250   : > { %v3898_v36 = vpop.f32.mrf.mxu0 }
 0x251   : > { %v3969_v43 = vpop.f32.mrf.mxu1  ;;  %v3968_v61 = vadd.f32 %v3967_v58, %v3897_v12  ;;  %v3899_v0 = vadd.f32 %v3898_v36, %v7081_v34 }
 0x252   : > { %v3900_v21 = vpop.f32.mrf.mxu0 }
 0x253   : > { %v3971_v51 = vpop.f32.mrf.mxu1  ;;  %v3901_v1 = vadd.f32 %v3900_v21, %v7083_v40 }
 0x254   : > { %v3904_v4 = vpop.f32.mrf.mxu0 }
 0x255   : > { %v3975_v44 = vpop.f32.mrf.mxu1  ;;  %v3905_v24 = vadd.f32 %v3904_v4, %v7085_v41  ;;  %v3970_v41 = vadd.f32 %v3969_v43, %v3899_v0  ;;  %v3972_v16 = vadd.f32 %v3971_v51, %v3901_v1 }
 0x256   : > { %v3906_v25 = vpop.f32.mrf.mxu0 }
 0x257   : > { %v3977_v6 = vpop.f32.mrf.mxu1  ;;  %v3907_v23 = vadd.f32 %v3906_v25, %v7087_v46  ;;  %v3976_v46 = vadd.f32 %v3975_v44, %v3905_v24 }
 0x258   : > { %v3908_v10 = vpop.f32.mrf.mxu0 }
 0x259   : > { %v7093_v15 = vpop.f32.mrf.mxu1  ;;  %v3978_v2 = vadd.f32 %v3977_v6, %v3907_v23  ;;  %v3909_v36 = vadd.f32 %v3908_v10, %v7089_v49 }
 0x25a   : > { %v3910_v3 = vpop.f32.mrf.mxu0 }
 0x25b   : > { %v7095_v33 = vpop.f32.mrf.mxu1  ;;  %v3911_v43 = vadd.f32 %v3910_v3, %v7091_v53 }
 0x25c   : > { %v3914_v35 = vpop.f32.mrf.mxu0 }
 0x25d   : > { %v3985_v37 = vpop.f32.mrf.mxu1  ;;  %v3915_v31 = vadd.f32 %v3914_v35, %v3844_v11 }
 0x25e   : > { %v3916_v39 = vpop.f32.mrf.mxu0 }
 0x25f   : > { %v3987_v56 = vpop.f32.mrf.mxu1  ;;  %v3917_v47 = vadd.f32 %v3916_v39, %v3846_v52  ;;  %v3986_v26 = vadd.f32 %v3985_v37, %v3915_v31  ;;  %v3980_v31 = vadd.f32 %v7093_v15, %v3909_v36 }
 0x260   : > { %v3918_v5 = vpop.f32.mrf.mxu0 }
 0x261   : > { %v3989_v30 = vpop.f32.mrf.mxu1  ;;  %v3988_v57 = vadd.f32 %v3987_v56, %v3917_v47  ;;  %v3919_v28 = vadd.f32 %v3918_v5, %v3848_v18  ;;  %v3982_v47 = vadd.f32 %v7095_v33, %v3911_v43 }
 0x262   : > { %v3920_v32 = vpop.f32.mrf.mxu0 }
 0x263   : > { %v3991_v20 = vpop.f32.mrf.mxu1  ;;  %v3921_v11 = vadd.f32 %v3920_v32, %v3850_v48 }
 0x264   : > { %v3924_v13 = vpop.f32.mrf.mxu0 }
 0x265   : > { %v3995_v7 = vpop.f32.mrf.mxu1  ;;  %v3925_v52 = vadd.f32 %v3924_v13, %v3854_v54  ;;  %v3990_v54 = vadd.f32 %v3989_v30, %v3919_v28 }
 0x266   : > { %v3926_v27 = vpop.f32.mrf.mxu0 }
 0x267   : > { %v3997_v55 = vpop.f32.mrf.mxu1  ;;  %v3927_v8 = vadd.f32 %v3926_v27, %v3856_v63  ;;  %v3992_v63 = vadd.f32 %v3991_v20, %v3921_v11  ;;  %v3996_v21 = vadd.f32 %v3995_v7, %v3925_v52 }
 0x268   : > { %v3928_v45 = vpop.f32.mrf.mxu0 }
 0x269   : > { %v3999_v19 = vpop.f32.mrf.mxu1  ;;  %v3998_v25 = vadd.f32 %v3997_v55, %v3927_v8 }
 0x26a   : > { %v3929_v29 = vpop.f32.mrf.mxu0 }
 0x26b   : > { %v4000_v59 = vpop.f32.mrf.mxu1 }
 0x26c   : > { %v4036_v22 = vpop.f32.mrf.mxu0 }
 0x26d   : > { %v4056_v38 = vpop.f32.mrf.mxu1  ;;  %v4037_v60 = vadd.f32 %v4036_v22, %v3966_v42 }
 0x26e   : > { %v4038_v9 = vpop.f32.mrf.mxu0  ;;  %v7104_v62 = vadd.f32 %v4056_v38, %v3986_v26 }
 0x26f   : > { %v4058_v50 = vpop.f32.mrf.mxu1  ;;  %v4039_v34 = vadd.f32 %v4038_v9, %v3968_v61  ;;  %v4172_v39 = vmul.f32 %v4037_v60, %v4037_v60 }
 0x270   : > { %v7106_v40 = vadd.f32 %v4058_v50, %v3988_v57  ;;  %v4040_v18 = vpop.f32.mrf.mxu0  ;;  %v4180_v50 = vmul.f32 %v7104_v62, %v7104_v62 }
 0x271   : > { %v4060_v48 = vpop.f32.mrf.mxu1  ;;  %v4844_v17 = vpack.c.bf16 %v4039_v34, %v4037_v60  ;;  %v4041_v51 = vadd.f32 %v4040_v18, %v3970_v41  ;;  %v4173_v56 = vmul.f32 %v4039_v34, %v4039_v34 }
 0x272   : > { %v4848_v58 = vpack.c.bf16 %v7106_v40, %v7104_v62  ;;  %v4042_v4 = vpop.f32.mrf.mxu0  ;;  %v4061_v6 = vadd.f32 %v4060_v48, %v3990_v54  ;;  %v4181_v41 = vmul.f32 %v7106_v40, %v7106_v40 }
 0x273   : > { %v4062_v44 = vpop.f32.mrf.mxu1  ;;  %4117 = vst [vmem:[%s7111_s6] sm:$0xff] %v4844_v17  ;;  %v4043_v35 = vadd.f32 %v4042_v4, %v3972_v16  ;;  %v4124_v5 = vadd.f32 %v4041_v51, %v4037_v60  ;;  %v4174_v30 = vmul.f32 %v4041_v51, %v4041_v51 }
 0x274   : > { %4121 = vst [vmem:[%s7111_s6 + $0x20] sm:$0xff] %v4848_v58  ;;  %v4063_v37 = vadd.f32 %v4062_v44, %v3992_v63  ;;  %v4046_v32 = vpop.f32.mrf.mxu0 }
 0x275   : > { %v4066_v49 = vpop.f32.mrf.mxu1  ;;  %v4845_v10 = vpack.c.bf16 %v4043_v35, %v4041_v51  ;;  %v4136_v53 = vadd.f32 %v4043_v35, %v4039_v34  ;;  %v4175_v3 = vmul.f32 %v4043_v35, %v4043_v35  ;;  %v4186_v13 = vadd.f32 %v4174_v30, %v4172_v39 }
 0x276   : > { %v4849_v20 = vpack.c.bf16 %v4063_v37, %v4061_v6  ;;  %v4047_v7 = vadd.f32 %v4046_v32, %v3976_v46  ;;  %v4048_v27 = vpop.f32.mrf.mxu0  ;;  %v4067_v12 = vadd.f32 %v4066_v49, %v3996_v21  ;;  %v4183_v54 = vmul.f32 %v4063_v37, %v4063_v37 }
 0x277   : > { %v4068_v55 = vpop.f32.mrf.mxu1  ;;  %4118 = vst [vmem:[%s7111_s6 + $0x8] sm:$0xff] %v4845_v10  ;;  %v4198_v14 = vadd.f32 %v4175_v3, %v4173_v56  ;;  %v4049_v45 = vadd.f32 %v4048_v27, %v3978_v2  ;;  %v4182_v2 = vmul.f32 %v4061_v6, %v4061_v6  ;;  %v4154_v30 = vlaneseq }
 0x278   : > { %4122 = vst [vmem:[%s7111_s6 + $0x28] sm:$0xff] %v4849_v20  ;;  %v4069_v19 = vadd.f32 %v4068_v55, %v3998_v25  ;;  %v4125_v29 = vadd.f32 %v4124_v5, %v4047_v7  ;;  %v4176_v59 = vmul.f32 %v4047_v7, %v4047_v7  ;;  %v4050_v42 = vpop.f32.mrf.mxu0  ;;  %v4184_v58 = vmul.f32 %v4067_v12, %v4067_v12 }
 0x279   : > { %v4070_v61 = vpop.f32.mrf.mxu1  ;;  %v4846_v0 = vpack.c.bf16 %v4049_v45, %v4047_v7  ;;  %v4137_v1 = vadd.f32 %v4136_v53, %v4049_v45  ;;  %v4177_v24 = vmul.f32 %v4049_v45, %v4049_v45  ;;  %v4051_v38 = vadd.f32 %v4050_v42, %v3980_v31 }
 0x27a   : > { %v4850_v23 = vpack.c.bf16 %v4069_v19, %v4067_v12  ;;  %v4187_v22 = vadd.f32 %v4186_v13, %v4176_v59  ;;  %v4052_v26 = vpop.f32.mrf.mxu0  ;;  %v4185_v21 = vmul.f32 %v4069_v19, %v4069_v19  ;;  %v5623_v5 = vmov 1966171168  }
 0x27b   : > { %v4071_v57 = vpop.f32.mrf.mxu1  ;;  %4119 = vst [vmem:[%s7111_s6 + $0x10] sm:$0xff] %v4846_v0  ;;  %v4199_v28 = vadd.f32 %v4198_v14, %v4177_v24  ;;  %v4053_v15 = vadd.f32 %v4052_v26, %v3982_v47  ;;  %v4126_v11 = vadd.f32 %v4125_v29, %v4051_v38  ;;  %v4178_v52 = vmul.f32 %v4051_v38, %v4051_v38 }
 0x27c   : > { %4123 = vst [vmem:[%s7111_s6 + $0x30] sm:$0xff] %v4850_v23  ;;  %v4155_v27 = vshrl.u32 %v4154_v30, 7  ;;  %vm4168_vm0 = vcmp.lt.s32.totalorder %v4154_v30, 256 }
 0x27d   : > { %v4847_v33 = vpack.c.bf16 %v4053_v15, %v4051_v38  ;;  %v4138_v8 = vadd.f32 %v4137_v1, %v4053_v15  ;;  %v4179_v9 = vmul.f32 %v4053_v15, %v4053_v15  ;;  %v4127_v60 = vadd.f32 %v4126_v11, %v7104_v62 }
 0x27e   : > { %v4188_v34 = vadd.f32 %v4187_v22, %v4178_v52 }
 0x27f   : > { %4120 = vst [vmem:[%s7111_s6 + $0x18] sm:$0xff] %v4847_v33  ;;  %v4139_v16 = vadd.f32 %v4138_v8, %v7106_v40  ;;  %v4200_v46 = vadd.f32 %v4199_v28, %v4179_v9  ;;  %v4128_v18 = vadd.f32 %v4127_v60, %v4061_v6  ;;  %v4152_v6 = vunpack.c.l.s4 %v5623_v5 }
 0x280   : > { %v4189_v48 = vadd.f32 %v4188_v34, %v4180_v50 }
 0x281   : > { %v4140_v63 = vadd.f32 %v4139_v16, %v4063_v37  ;;  %v4201_v17 = vadd.f32 %v4200_v46, %v4181_v41  ;;  %v4129_v36 = vadd.f32 %v4128_v18, %v4067_v12  ;;  %v4153_v7 = vunpack.c.0.s8 %v4152_v6 }
 0x282   : > { %v4190_v43 = vadd.f32 %v4189_v48, %v4182_v2 }
 0x283   : > { %v4141_v62 = vadd.f32 %v4140_v63, %v4069_v19  ;;  %v4202_v51 = vadd.f32 %v4201_v17, %v4183_v54  ;;  %v4130_v4 = vrot.slane %v4129_v36, 4  ;;  %v4156_v59 = vsub.s32 %v4153_v7, %v4155_v27 }
 0x284   : > { %v4191_v44 = vadd.f32 %v4190_v43, %v4184_v58 }
 0x285   : > { %v4142_v25 = vrot.slane %v4141_v62, 4  ;;  %v4203_v35 = vadd.f32 %v4202_v51, %v4185_v21  ;;  %v4131_v39 = vadd.f32 %v4130_v4, %v4129_v36 }
 0x286   : > { %v4192_v40 = vrot.slane %v4191_v44, 4 }
 0x287   : > { %v4143_v56 = vadd.f32 %v4142_v25, %v4141_v62  ;;  %v4204_v37 = vrot.slane %v4203_v35, 4  ;;  %v4132_v32 = vrot.slane %v4131_v39, 2 }
 0x288   : > { %v4193_v49 = vadd.f32 %v4192_v40, %v4191_v44 }
 0x289   : > { %v4144_v10 = vrot.slane %v4143_v56, 2  ;;  %v4205_v53 = vadd.f32 %v4204_v37, %v4203_v35  ;;  %v4133_v3 = vadd.f32 %v4132_v32, %v4131_v39 }
 0x28a   : > { %v4194_v20 = vrot.slane %v4193_v49, 2 }
 0x28b   : > { %v4145_v13 = vadd.f32 %v4144_v10, %v4143_v56  ;;  %v4206_v55 = vrot.slane %v4205_v53, 2  ;;  %v4134_v14 = vrot.slane %v4133_v3, 1 }
 0x28c   : > { %v4195_v12 = vadd.f32 %v4194_v20, %v4193_v49 }
 0x28d   : > { %v4146_v45 = vrot.slane %v4145_v13, 1  ;;  %v4207_v19 = vadd.f32 %v4206_v55, %v4205_v53  ;;  %v4135_v47 = vadd.f32 %v4134_v14, %v4133_v3 }
 0x28e   : > { %v4196_v31 = vrot.slane %v4195_v12, 1 }
 0x28f   : > { %v4147_v29 = vadd.f32 %v4146_v45, %v4145_v13  ;;  %v4208_v42 = vrot.slane %v4207_v19, 1 }
 0x290   : > { %v4197_v61 = vadd.f32 %v4196_v31, %v4195_v12 }
 0x291   : > { %v4150_v0 = vcombine.low %v4135_v47, %v4147_v29  ;;  %v4209_v1 = vadd.f32 %v4208_v42, %v4207_v19 }
 0x293   : > { %v4157_v24 = vrot.slane %v4150_v0, %v4156_v59  ;;  %v4212_v23 = vcombine.low %v4197_v61, %v4209_v1 }
 0x295   : > { %v4164_v22 = vrot.slane %v4157_v24, %v4156_v59  ;;  %v4219_v38 = vrot.slane %v4212_v23, %v4156_v59 }
 0x297   : > { %4170 = vst.msk [vmem:[%s191_s10] ss:$8 sm:$0x3] %vm4168_vm0, %v4164_v22  ;;  %v4226_v26 = vrot.slane %v4219_v38, %v4156_v59 }
 0x299   : > { %4839 = vst.msk [vmem:[%s191_s10 + $0x1] ss:$8 sm:$0x3] %vm4168_vm0, %v4226_v26 }
 0x29a PF: > { %s14_s12 = sadd.s32 1, %s5620_s12  }
 0x29b   : > { %p11_p5 = scmp.ge.s32.totalorder %s14_s12, 4  }
 0x29d   :  { %13 = sbr.rel (!%p11_p5) target bundleno = 1 (0x1), region = 71 }

// kernel: _lambda_.20
= control target key start
LH: loop header
LB: loop body
LE: loop exit
PB: predicated region body
PF: predicated region fallthrough
CT: control target
= control target key end

     0   :  { %s379_s12 = smov 0   ;;  %s409_s0 = inlined_call_operand.vmem [shape: bf16[32,384], index: 0, kind: input, shape index: {}]   ;;  %s410_s1 = inlined_call_operand.vmem [shape: f32[1,384], index: 1, kind: input, shape index: {}]   ;;  %s411_s2 = inlined_call_operand.vmem [shape: f32[1,384], index: 2, kind: input, shape index: {}]   ;;  %s412_s3 = inlined_call_operand.vmem [shape: bf16[32,384], index: 3, kind: output, shape index: {}]  }
   0x1 LB: > { %s323_s13 = sadd.s32 4294967295, %s357_s12   ;;  %p327_p0 = scmp.ge.s32.totalorder %s357_s12, 1  ;;  %s357_s12 = sphi %s379_s12, %s13_s12  }
   0x2   : > { %p139_p1 = scmp.lt.s32.totalorder %s357_s12, 3 }
   0x4   : > { %p140_p2 = pnand %p327_p0, %p139_p1 }
   0x5   : > { %s328_s14 = sshll.u32 (!%p140_p2), %s323_s13, 1 }
   0x6   : > { %143 = sbr.rel (%p140_p2) target bundleno = 29 (0x1d), region = 32  ;;  %p166_p3 = scmp.lt.s32.totalorder (!%p140_p2), %s328_s14, 3 }
   0xb   : > { %v191_v0 = vlaneseq  ;;  %s414_s14 = smov (!%p166_p3, %s328_s14), 3  ;;  %v189_v2 = vld [vmem:[%s410_s1] sm:$0x7] }
   0xc   : > { %s342_s17 = smul.u32 12, %s414_s14  ;;  %v212_v6 = vld [vmem:[%s411_s2] sm:$0x7] }
   0xd   : > { %v192_v1 = vshrl.u32 %v191_v0, 7 }
   0xe   : > { %s170_s22 = scalar_lea.vmem %s409_s0, %s342_s17  ;;  %s177_s25 = scalar_lea.vmem %s412_s3, %s342_s17 }
   0xf   : > { %v193_v3 = vsub.s32 0, %v192_v1  ;;  %v197_v4 = vsub.s32 1, %v192_v1  ;;  %v201_v5 = vsub.s32 2, %v192_v1  ;;  %v179_v10 = vld [vmem:[%s170_s22] sm:$0xff]  ;;  %v180_v13 = vld [vmem:[%s170_s22 + $0x8] ss:$12 sps:$4 sm:$0xff]  }
  0x10   : > { %v181_v15 = vld [vmem:[%s170_s22 + $0xc] sm:$0xff]  ;;  %v183_v16 = vunpack.c.l.bf16 %v179_v10  ;;  %v184_v17 = vunpack.c.h.bf16 %v179_v10  ;;  %v185_v18 = vunpack.c.l.bf16 %v180_v13  ;;  %v188_v21 = vunpack.c.h.bf16 %v180_v13 }
  0x11   : > { %v194_v7 = vrot.slane %v189_v2, %v193_v3  ;;  %v198_v8 = vrot.slane %v189_v2, %v197_v4  ;;  %v202_v9 = vrot.slane %v189_v2, %v201_v5  ;;  %v217_v11 = vrot.slane %v212_v6, %v193_v3 }
  0x12   : > { %v221_v12 = vrot.slane %v212_v6, %v197_v4  ;;  %v225_v14 = vrot.slane %v212_v6, %v201_v5  ;;  %v186_v19 = vunpack.c.l.bf16 %v181_v15  ;;  %v187_v20 = vunpack.c.h.bf16 %v181_v15 }
  0x13   : > { %v206_v22 = vmul.f32 %v194_v7, %v183_v16  ;;  %v207_v23 = vmul.f32 %v198_v8, %v184_v17  ;;  %v208_v24 = vmul.f32 %v202_v9, %v185_v18  ;;  %v211_v27 = vmul.f32 %v202_v9, %v188_v21 }
  0x14   : > { %v209_v25 = vmul.f32 %v194_v7, %v186_v19  ;;  %v210_v26 = vmul.f32 %v198_v8, %v187_v20 }
  0x15   : > { %v229_v28 = vadd.f32 %v217_v11, %v206_v22  ;;  %v230_v29 = vadd.f32 %v221_v12, %v207_v23  ;;  %v231_v30 = vadd.f32 %v225_v14, %v208_v24  ;;  %v234_v33 = vadd.f32 %v225_v14, %v211_v27 }
  0x16   : > { %v232_v31 = vadd.f32 %v217_v11, %v209_v25  ;;  %v233_v32 = vadd.f32 %v221_v12, %v210_v26 }
  0x17   : > { %v235_v34 = vmax.f32 %v229_v28, 0.0  ;;  %v236_v35 = vmax.f32 %v230_v29, 0.0  ;;  %v237_v36 = vmax.f32 %v231_v30, 0.0  ;;  %v240_v39 = vmax.f32 %v234_v33, 0.0 }
  0x18   : > { %v238_v37 = vmax.f32 %v232_v31, 0.0  ;;  %v239_v38 = vmax.f32 %v233_v32, 0.0 }
  0x19   : > { %v338_v40 = vpack.c.bf16 %v236_v35, %v235_v34  ;;  %v339_v41 = vpack.c.bf16 %v237_v36, %v237_v36  ;;  %v341_v43 = vpack.c.bf16 %v240_v39, %v240_v39 }
  0x1a   : > { %v340_v42 = vpack.c.bf16 %v239_v38, %v238_v37 }
  0x1b   : > { %261 = vst [vmem:[%s177_s25] sm:$0xff] %v338_v40  ;;  %262 = vst [vmem:[%s177_s25 + $0x8] sm:$0xf] %v339_v41 }
  0x1c   : > { %263 = vst [vmem:[%s177_s25 + $0xc] sm:$0xff] %v340_v42  ;;  %264 = vst [vmem:[%s177_s25 + $0x14] sm:$0xf] %v341_v43 }
  0x1d PF: > { %s13_s12 = sadd.s32 1, %s357_s12  }
  0x1e   : > { %p10_p4 = scmp.ge.s32.totalorder %s13_s12, 4  }
  0x20   :  { %12 = sbr.rel (!%p10_p4) target bundleno = 1 (0x1), region = 62 }

// kernel: _lambda_.22
= control target key start
LH: loop header
LB: loop body
LE: loop exit
PB: predicated region body
PF: predicated region fallthrough
CT: control target
= control target key end

     0   :  { %s348_s12 = smov 0   ;;  %s374_s0 = inlined_call_operand.vmem [shape: bf16[32,256], index: 0, kind: input, shape index: {}]   ;;  %s375_s1 = inlined_call_operand.vmem [shape: f32[1,256], index: 1, kind: input, shape index: {}]   ;;  %s376_s2 = inlined_call_operand.vmem [shape: f32[1,256], index: 2, kind: input, shape index: {}]   ;;  %s377_s3 = inlined_call_operand.vmem [shape: bf16[32,256], index: 3, kind: output, shape index: {}]  }
   0x1 LB: > { %s293_s13 = sadd.s32 4294967295, %s326_s12   ;;  %p297_p0 = scmp.ge.s32.totalorder %s326_s12, 1  ;;  %s326_s12 = sphi %s348_s12, %s13_s12  }
   0x2   : > { %p139_p1 = scmp.lt.s32.totalorder %s326_s12, 3 }
   0x4   : > { %p140_p2 = pnand %p297_p0, %p139_p1 }
   0x5   : > { %s298_s14 = sshll.u32 (!%p140_p2), %s293_s13, 1 }
   0x6   : > { %143 = sbr.rel (%p140_p2) target bundleno = 28 (0x1c), region = 32  ;;  %p166_p3 = scmp.lt.s32.totalorder (!%p140_p2), %s298_s14, 3 }
   0xb   : > { %v187_v0 = vlaneseq  ;;  %s379_s14 = smov (!%p166_p3, %s298_s14), 3  ;;  %v185_v2 = vld [vmem:[%s375_s1] sm:$0x3] }
   0xc   : > { %v201_v5 = vld [vmem:[%s376_s2] sm:$0x3]  ;;  %s308_s19 = sshll.u32 %s379_s14, 3 }
   0xd   : > { %v188_v1 = vshrl.u32 %v187_v0, 7  ;;  %s170_s22 = scalar_lea.vmem %s374_s0, %s308_s19  ;;  %s177_s25 = scalar_lea.vmem %s377_s3, %s308_s19 }
   0xe   : > { %v179_v8 = vld [vmem:[%s170_s22] sm:$0xff]  ;;  %v180_v9 = vld [vmem:[%s170_s22 + $0x8] sm:$0xff] }
   0xf   : > { %v189_v3 = vsub.s32 0, %v188_v1  ;;  %v193_v4 = vsub.s32 1, %v188_v1  ;;  %v181_v12 = vunpack.c.l.bf16 %v179_v8  ;;  %v182_v13 = vunpack.c.h.bf16 %v179_v8 }
  0x10   : > { %v183_v14 = vunpack.c.l.bf16 %v180_v9  ;;  %v184_v15 = vunpack.c.h.bf16 %v180_v9 }
  0x11   : > { %v190_v6 = vrot.slane %v185_v2, %v189_v3  ;;  %v194_v7 = vrot.slane %v185_v2, %v193_v4  ;;  %v206_v10 = vrot.slane %v201_v5, %v189_v3  ;;  %v210_v11 = vrot.slane %v201_v5, %v193_v4 }
  0x13   : > { %v197_v16 = vmul.f32 %v190_v6, %v181_v12  ;;  %v198_v17 = vmul.f32 %v194_v7, %v182_v13  ;;  %v199_v18 = vmul.f32 %v190_v6, %v183_v14  ;;  %v200_v19 = vmul.f32 %v194_v7, %v184_v15 }
  0x15   : > { %v213_v20 = vadd.f32 %v206_v10, %v197_v16  ;;  %v214_v21 = vadd.f32 %v210_v11, %v198_v17  ;;  %v215_v22 = vadd.f32 %v206_v10, %v199_v18  ;;  %v216_v23 = vadd.f32 %v210_v11, %v200_v19 }
  0x17   : > { %v217_v24 = vmax.f32 %v213_v20, 0.0  ;;  %v218_v25 = vmax.f32 %v214_v21, 0.0  ;;  %v219_v26 = vmax.f32 %v215_v22, 0.0  ;;  %v220_v27 = vmax.f32 %v216_v23, 0.0 }
  0x19   : > { %v310_v28 = vpack.c.bf16 %v218_v25, %v217_v24  ;;  %v311_v29 = vpack.c.bf16 %v220_v27, %v219_v26 }
  0x1b   : > { %233 = vst [vmem:[%s177_s25] sm:$0xff] %v310_v28  ;;  %234 = vst [vmem:[%s177_s25 + $0x8] sm:$0xff] %v311_v29 }
  0x1c PF: > { %s13_s12 = sadd.s32 1, %s326_s12  }
  0x1d   : > { %p10_p4 = scmp.ge.s32.totalorder %s13_s12, 4  }
  0x1f   :  { %12 = sbr.rel (!%p10_p4) target bundleno = 1 (0x1), region = 62 }

// kernel: _lambda_.25
= control target key start
LH: loop header
LB: loop body
LE: loop exit
PB: predicated region body
PF: predicated region fallthrough
CT: control target
= control target key end

     0   :  { %s547_s12 = smov 0   ;;  %s549_s13 = smov 0   ;;  %s590_s0 = inlined_call_operand.vmem [shape: bf16[2,3,1,256], index: 0, kind: input, shape index: {}, may-alias: {0,1,2}]   ;;  %s591_s1 = inlined_call_operand.vmem [shape: bf16[2,3,1,256], index: 1, kind: input, shape index: {}, may-alias: {0,1,2}]   ;;  %s592_s2 = inlined_call_operand.vmem [shape: bf16[2,3,1,256], index: 2, kind: input, shape index: {}, may-alias: {0,1,2}]   ;;  %s593_s3 = inlined_call_operand.vmem [shape: bf16[2,1,1,256], index: 3, kind: output, shape index: {}]  }
   0x1   :  { %s551_s14 = smov 0  }
   0x2 LB: > { %s25_s15 = sadd.s32 1, %s520_s13  ;;  %p471_p0 = scmp.ge.s32.totalorder %s524_s14, 1  ;;  %s524_s14 = sphi %s551_s14, %s13_s14   ;;  %s520_s13 = sphi %s549_s13, %s595_s13   ;;  %s516_s12 = sphi %s547_s12, %s594_s12  }
   0x3   : > { %p27_p1 = scmp.ge.s32.totalorder %s25_s15, 2  ;;  %p206_p2 = scmp.lt.s32.totalorder %s524_s14, 3 }
   0x5   : > { %s597_s15 = smov (%p27_p1, %s25_s15), 0  ;;  %p207_p3 = pnand %p471_p0, %p206_p2 }
   0x6   : > { %p258_p4 = scmp.lt.s32.totalorder (!%p207_p3), %s516_s12, 1 }
   0x7   : > { %210 = sbr.rel (%p207_p3) target bundleno = 34 (0x22), region = 32 }
   0xc   : > { %s599_s12 = smov (!%p258_p4, %s516_s12), 1  ;;  %v308_v0 = vlaneseq  ;;  %v526_v3 = vmov 1966171168   ;;  %vm338_vm0 = vcmask 1040384   ;;  %vm339_vm1 = vsmask.f32 256 }
   0xd   : > { %s476_s16 = smul.u32 6, %s599_s12  ;;  %v324_v4 = vunpack.c.l.s4 %v526_v3  ;;  %s472_s28 = sshll.u32 %s599_s12, 1  ;;  %vm341_vm2 = vcmask 1041409   ;;  %vm342_vm3 = vsmask.f32 1280  ;;  %vm340_vm4 = vmand %vm338_vm0, %vm339_vm1 }
   0xe   : > { %v309_v2 = vshrl.u32 %v308_v0, 7  ;;  %s298_s4 = scalar_lea.vmem %s593_s3, %s472_s28  ;;  %vm343_vm5 = vmand %vm341_vm2, %vm342_vm3 }
   0xf   : > { %s265_s19 = scalar_lea.vmem %s590_s0, %s476_s16  ;;  %s275_s20 = sadd.s32 2, %s476_s16  ;;  %v325_v13 = vunpack.c.0.s8 %v324_v4  ;;  %vm344_vm6 = vmor %vm343_vm5, %vm340_vm4  ;;  %v345_v20 = vld [vmem:[%s298_s4] sm:$0x3] }
  0x10   : > { %s276_s23 = scalar_lea.vmem %s591_s1, %s275_s20  ;;  %s287_s24 = sadd.s32 4, %s476_s16  ;;  %v299_v1 = vld [vmem:[%s265_s19] sm:$0x3]  ;;  %v310_v11 = vsub.s32 0, %v309_v2  ;;  %v314_v12 = vsub.s32 2, %v309_v2 }
  0x11   : > { %s288_s27 = scalar_lea.vmem %s592_s2, %s287_s24  ;;  %v300_v5 = vunpack.c.l.bf16 %v299_v1  ;;  %v301_v6 = vld [vmem:[%s276_s23] sm:$0x3]  ;;  %v328_v17 = vsub.s32 %v325_v13, %v309_v2 }
  0x12   : > { %v302_v7 = vunpack.c.l.bf16 %v301_v6  ;;  %v304_v8 = vld [vmem:[%s288_s27] sm:$0x3] }
  0x13   : > { %v305_v9 = vunpack.c.l.bf16 %v304_v8 }
  0x14   : > { %v303_v10 = vmax.f32 %v300_v5, %v302_v7 }
  0x16   : > { %v306_v14 = vmax.f32 %v303_v10, %v305_v9 }
  0x18   : > { %v311_v15 = vrot.slane %v306_v14, %v310_v11  ;;  %v315_v16 = vrot.slane %v306_v14, %v314_v12 }
  0x1a   : > { %v473_v18 = vpack.c.bf16 %v315_v16, %v311_v15 }
  0x1c   : > { %v329_v19 = vrot.slane %v473_v18, %v328_v17 }
  0x1e   : > { %v336_v21 = vrot.slane %v329_v19, %v328_v17 }
  0x20   : > { %v346_v22 = vsel %vm344_vm6, %v336_v21, %v345_v20 }
  0x21   : > { %347 = vst [vmem:[%s298_s4] sm:$0x3] %v346_v22 }
  0x22 PF: > { %s13_s14 = sadd.s32 1, %s524_s14   ;;  %s594_s12 = smov %s520_s13 }
  0x23   : > { %p10_p5 = scmp.ge.s32.totalorder %s13_s14, 4   ;;  %s595_s13 = smov %s597_s15 }
  0x25   :  { %12 = sbr.rel (!%p10_p5) target bundleno = 2 (0x2), region = 68 }

// kernel: _lambda_.19
= control target key start
LH: loop header
LB: loop body
LE: loop exit
PB: predicated region body
PF: predicated region fallthrough
CT: control target
= control target key end

     0   :  { %s5493_s12 = smov 0   ;;  %s6883_s0 = inlined_call_operand.vmem [shape: bf16[32,2304], index: 0, kind: input, shape index: {}]   ;;  %s6884_s1 = inlined_call_operand.vmem [shape: bf16[2304,384], index: 1, kind: input, shape index: {}]   ;;  %s6885_s2 = inlined_call_operand.vmem [shape: bf16[32,384], index: 2, kind: output, shape index: {0}]   ;;  %s6886_s3 = inlined_call_operand.vmem [shape: f32[16,384], index: 3, kind: output, shape index: {1}]  }
   0x1 LB: > { %s5499_s13 = sadd.s32 4294967295, %s5470_s12   ;;  %p4167_p0 = scmp.ge.s32.totalorder %s5470_s12, 1  ;;  %s5470_s12 = sphi %s5493_s12, %s14_s12  }
   0x2   : > { %p142_p1 = scmp.lt.s32.totalorder %s5470_s12, 3 }
   0x4   : > { %p143_p2 = pnand %p4167_p0, %p142_p1 }
   0x5   : > { %s4168_s24 = sshll.u32 (!%p143_p2), %s5499_s13, 1  ;;  %p187_p4 = scmp.lt.s32.totalorder (!%p143_p2), %s5499_s13, 1 }
   0x6   : > { %146 = sbr.rel (%p143_p2) target bundleno = 686 (0x2ae), region = 28  ;;  %p174_p3 = scmp.lt.s32.totalorder (!%p143_p2), %s4168_s24, 3 }
   0xb   : > { %v4844_v0 = vld [vmem:[%s6884_s1 + $0xac] ss:$12 sps:$4 sm:$0xff]   ;;  %v4848_v2 = vld [vmem:[%s6884_s1 + $0xa8] ss:$12 sps:$4 sm:$0xff]   ;;  %v4854_v6 = vld [vmem:[%s6884_s1 + $0x90] ss:$12 sps:$4 sm:$0xff]  }
   0xc   : > { %v4846_v1 = vld [vmem:[%s6884_s1 + $0x22c] ss:$12 sps:$4 sm:$0xff]   ;;  %3181 = vmatprep.subr.bf16.mxu0 %v4844_v0  ;;  %v4849_v3 = vld [vmem:[%s6884_s1 + $0x228] ss:$12 sps:$4 sm:$0xff]   ;;  %v4855_v7 = vld [vmem:[%s6884_s1 + $0x210] ss:$12 sps:$4 sm:$0xff]  }
   0xd   : > { %3224 = vmatprep.subr.bf16.mxu1 %v4846_v1  ;;  %v4850_v4 = vld [vmem:[%s6884_s1 + $0x94] ss:$12 sps:$4 sm:$0xff]   ;;  %3182 = vmatpush1.bf16.msra.mxu0 %v4848_v2  ;;  %v4856_v8 = vld [vmem:[%s6884_s1 + $0x7c] ss:$12 sps:$4 sm:$0xff]   ;;  %v4860_v10 = vld [vmem:[%s6884_s1 + $0x78] ss:$12 sps:$4 sm:$0xff]  }
   0xe   : > { %3225 = vmatpush1.bf16.msra.mxu1 %v4849_v3  ;;  %v4852_v5 = vld [vmem:[%s6884_s1 + $0x214] ss:$12 sps:$4 sm:$0xff]   ;;  %3183 = vmatprep.subr.bf16.mxu0 %v4850_v4  ;;  %v4858_v9 = vld [vmem:[%s6884_s1 + $0x1fc] ss:$12 sps:$4 sm:$0xff]   ;;  %v4861_v11 = vld [vmem:[%s6884_s1 + $0x1f8] ss:$12 sps:$4 sm:$0xff]  }
   0xf   : > { %3226 = vmatprep.subr.bf16.mxu1 %v4852_v5  ;;  %v4862_v12 = vld [vmem:[%s6884_s1 + $0x64] ss:$12 sps:$4 sm:$0xff]   ;;  %v4866_v14 = vld [vmem:[%s6884_s1 + $0x60] ss:$12 sps:$4 sm:$0xff]   ;;  %v4872_v18 = vld [vmem:[%s6884_s1 + $0x48] ss:$12 sps:$4 sm:$0xff]  }
  0x10   : > { %v4864_v13 = vld [vmem:[%s6884_s1 + $0x1e4] ss:$12 sps:$4 sm:$0xff]   ;;  %v4867_v15 = vld [vmem:[%s6884_s1 + $0x1e0] ss:$12 sps:$4 sm:$0xff]   ;;  %v4873_v19 = vld [vmem:[%s6884_s1 + $0x1c8] ss:$12 sps:$4 sm:$0xff]  }
  0x11   : > { %3184 = vmatpush1.bf16.msra.mxu0 %v4854_v6  ;;  %v4868_v16 = vld [vmem:[%s6884_s1 + $0x4c] ss:$12 sps:$4 sm:$0xff]   ;;  %v4874_v20 = vld [vmem:[%s6884_s1 + $0x34] ss:$12 sps:$4 sm:$0xff]   ;;  %v4878_v22 = vld [vmem:[%s6884_s1 + $0x30] ss:$12 sps:$4 sm:$0xff]  }
  0x12   : > { %3227 = vmatpush1.bf16.msra.mxu1 %v4855_v7  ;;  %3185 = vmatprep.subr.bf16.mxu0 %v4856_v8  ;;  %v4870_v17 = vld [vmem:[%s6884_s1 + $0x1cc] ss:$12 sps:$4 sm:$0xff]   ;;  %v4876_v21 = vld [vmem:[%s6884_s1 + $0x1b4] ss:$12 sps:$4 sm:$0xff]   ;;  %v4879_v23 = vld [vmem:[%s6884_s1 + $0x1b0] ss:$12 sps:$4 sm:$0xff]  }
  0x13   : > { %3228 = vmatprep.subr.bf16.mxu1 %v4858_v9  ;;  %v4880_v24 = vld [vmem:[%s6884_s1 + $0x1c] ss:$12 sps:$4 sm:$0xff]   ;;  %v4884_v26 = vld [vmem:[%s6884_s1 + $0x18] ss:$12 sps:$4 sm:$0xff]   ;;  %v4890_v30 = vld [vmem:[%s6884_s1] ss:$12 sps:$4 sm:$0xff]  }
  0x14   : > { %v4882_v25 = vld [vmem:[%s6884_s1 + $0x19c] ss:$12 sps:$4 sm:$0xff]   ;;  %v4885_v27 = vld [vmem:[%s6884_s1 + $0x198] ss:$12 sps:$4 sm:$0xff]   ;;  %v4891_v31 = vld [vmem:[%s6884_s1 + $0x180] ss:$12 sps:$4 sm:$0xff]  }
  0x15   : > { %3186 = vmatpush1.bf16.msra.mxu0 %v4860_v10  ;;  %v4886_v28 = vld [vmem:[%s6884_s1 + $0x4] ss:$12 sps:$4 sm:$0xff]   ;;  %v4892_v32 = vld [vmem:[%s6884_s1 + $0x16c] ss:$12 sps:$4 sm:$0xff]   ;;  %v4896_v34 = vld [vmem:[%s6884_s1 + $0x168] ss:$12 sps:$4 sm:$0xff]  }
  0x16   : > { %3229 = vmatpush1.bf16.msra.mxu1 %v4861_v11  ;;  %3187 = vmatprep.subr.bf16.mxu0 %v4862_v12  ;;  %v4888_v29 = vld [vmem:[%s6884_s1 + $0x184] ss:$12 sps:$4 sm:$0xff]   ;;  %v4894_v33 = vld [vmem:[%s6884_s1 + $0x2ec] ss:$12 sps:$4 sm:$0xff]   ;;  %v4897_v35 = vld [vmem:[%s6884_s1 + $0x2e8] ss:$12 sps:$4 sm:$0xff]  }
  0x17   : > { %3230 = vmatprep.subr.bf16.mxu1 %v4864_v13  ;;  %v4898_v36 = vld [vmem:[%s6884_s1 + $0x154] ss:$12 sps:$4 sm:$0xff]   ;;  %s6888_s24 = smov (!%p174_p3, %s4168_s24), 3  ;;  %v4902_v38 = vld [vmem:[%s6884_s1 + $0x150] ss:$12 sps:$4 sm:$0xff]   ;;  %s6890_s13 = smov (!%p187_p4, %s5499_s13), 1 }
  0x18   : > { %v4900_v37 = vld [vmem:[%s6884_s1 + $0x2d4] ss:$12 sps:$4 sm:$0xff]   ;;  %v4903_v39 = vld [vmem:[%s6884_s1 + $0x2d0] ss:$12 sps:$4 sm:$0xff]   ;;  %s4832_s22 = smul.u32 72, %s6888_s24 }
  0x19   : > { %3188 = vmatpush1.bf16.msra.mxu0 %v4866_v14  ;;  %v4904_v40 = vld [vmem:[%s6884_s1 + $0x13c] ss:$12 sps:$4 sm:$0xff]   ;;  %v4908_v42 = vld [vmem:[%s6884_s1 + $0x138] ss:$12 sps:$4 sm:$0xff]   ;;  %v4914_v46 = vld [vmem:[%s6884_s1 + $0x120] ss:$12 sps:$4 sm:$0xff]  }
  0x1a   : > { %3231 = vmatpush1.bf16.msra.mxu1 %v4867_v15  ;;  %3189 = vmatprep.subr.bf16.mxu0 %v4868_v16  ;;  %v4906_v41 = vld [vmem:[%s6884_s1 + $0x2bc] ss:$12 sps:$4 sm:$0xff]   ;;  %v4909_v43 = vld [vmem:[%s6884_s1 + $0x2b8] ss:$12 sps:$4 sm:$0xff]   ;;  %s5645_s7 = scalar_lea.vmem %s6883_s0, %s4832_s22  ;;  %v4915_v47 = vld [vmem:[%s6884_s1 + $0x2a0] ss:$12 sps:$4 sm:$0xff]  }
  0x1b   : > { %3232 = vmatprep.subr.bf16.mxu1 %v4870_v17  ;;  %v4910_v44 = vld [vmem:[%s6884_s1 + $0x124] ss:$12 sps:$4 sm:$0xff]   ;;  %v4916_v48 = vld [vmem:[%s6884_s1 + $0x10c] ss:$12 sps:$4 sm:$0xff]   ;;  %v4920_v52 = vld [vmem:[%s6884_s1 + $0x108] ss:$12 sps:$4 sm:$0xff]  }
  0x1c   : > { %v4912_v45 = vld [vmem:[%s6884_s1 + $0x2a4] ss:$12 sps:$4 sm:$0xff]   ;;  %v4918_v50 = vld [vmem:[%s6884_s1 + $0x28c] ss:$12 sps:$4 sm:$0xff]   ;;  %v4921_v53 = vld [vmem:[%s6884_s1 + $0x288] ss:$12 sps:$4 sm:$0xff]  }
  0x1d   : > { %3190 = vmatpush1.bf16.msra.mxu0 %v4872_v18  ;;  %v4942_v49 = vld [vmem:[%s5645_s7 + $0x4] ss:$72 sps:$4 sm:$0xff]   ;;  %v4922_v54 = vld [vmem:[%s6884_s1 + $0xf4] ss:$12 sps:$4 sm:$0xff]   ;;  %v4926_v56 = vld [vmem:[%s6884_s1 + $0xf0] ss:$12 sps:$4 sm:$0xff]  }
  0x1e   : > { %3233 = vmatpush1.bf16.msra.mxu1 %v4873_v19  ;;  %3191 = vmatprep.subr.bf16.mxu0 %v4874_v20  ;;  %v4945_v51 = vld [vmem:[%s5645_s7 + $0xc] ss:$72 sps:$4 sm:$0xff]   ;;  %v4927_v57 = vld [vmem:[%s6884_s1 + $0x270] ss:$12 sps:$4 sm:$0xff]   ;;  %v4932_v60 = vld [vmem:[%s6884_s1 + $0xd8] ss:$12 sps:$4 sm:$0xff]  }
  0x1f   : > { %3234 = vmatprep.subr.bf16.mxu1 %v4876_v21  ;;  %3213 = vmatprep.mubr.bf16.mxu0 %v4942_v49  ;;  %v4924_v55 = vld [vmem:[%s6884_s1 + $0x274] ss:$12 sps:$4 sm:$0xff]   ;;  %v4928_v58 = vld [vmem:[%s6884_s1 + $0xdc] ss:$12 sps:$4 sm:$0xff]   ;;  %v4933_v61 = vld [vmem:[%s6884_s1 + $0x258] ss:$12 sps:$4 sm:$0xff]  }
  0x20   : > { %3256 = vmatprep.mubr.bf16.mxu1 %v4945_v51  ;;  %v4930_v59 = vld [vmem:[%s6884_s1 + $0x25c] ss:$12 sps:$4 sm:$0xff]   ;;  %v4934_v62 = vld [vmem:[%s6884_s1 + $0xc4] ss:$12 sps:$4 sm:$0xff]   ;;  %v4938_v0 = vld [vmem:[%s6884_s1 + $0xc0] ss:$12 sps:$4 sm:$0xff]  }
  0x21   : > { %3192 = vmatpush1.bf16.msra.mxu0 %v4878_v22  ;;  %v4936_v63 = vld [vmem:[%s6884_s1 + $0x244] ss:$12 sps:$4 sm:$0xff]   ;;  %v4939_v1 = vld [vmem:[%s6884_s1 + $0x240] ss:$12 sps:$4 sm:$0xff]   ;;  %v4946_v6 = vld [vmem:[%s6884_s1 + $0x3a8] ss:$12 sps:$4 sm:$0xff]  }
  0x22   : > { %3235 = vmatpush1.bf16.msra.mxu1 %v4879_v23  ;;  %3193 = vmatprep.subr.bf16.mxu0 %v4880_v24  ;;  %v4948_v2 = vld [vmem:[%s6884_s1 + $0x3ac] ss:$12 sps:$4 sm:$0xff]   ;;  %v4940_v4 = vld [vmem:[%s5645_s7] ss:$72 sps:$4 sm:$0xff]   ;;  %v4952_v10 = vld [vmem:[%s6884_s1 + $0x390] ss:$12 sps:$4 sm:$0xff]  }
  0x23   : > { %3236 = vmatprep.subr.bf16.mxu1 %v4882_v25  ;;  %v4951_v3 = vld [vmem:[%s6884_s1 + $0x52c] ss:$12 sps:$4 sm:$0xff]   ;;  %v4943_v5 = vld [vmem:[%s5645_s7 + $0x8] ss:$72 sps:$4 sm:$0xff]   ;;  %v4954_v8 = vld [vmem:[%s6884_s1 + $0x394] ss:$12 sps:$4 sm:$0xff]  }
  0x24   : > { %v4949_v7 = vld [vmem:[%s6884_s1 + $0x528] ss:$12 sps:$4 sm:$0xff]   ;;  %v4955_v11 = vld [vmem:[%s6884_s1 + $0x510] ss:$12 sps:$4 sm:$0xff]   ;;  %v4958_v14 = vld [vmem:[%s6884_s1 + $0x378] ss:$12 sps:$4 sm:$0xff]  }
  0x25   : > { %3194 = vmatpush1.bf16.msra.mxu0 %v4884_v26  ;;  %v4957_v9 = vld [vmem:[%s6884_s1 + $0x514] ss:$12 sps:$4 sm:$0xff]   ;;  %v4960_v12 = vld [vmem:[%s6884_s1 + $0x37c] ss:$12 sps:$4 sm:$0xff]   ;;  %v4961_v15 = vld [vmem:[%s6884_s1 + $0x4f8] ss:$12 sps:$4 sm:$0xff]  }
  0x26   : > { %3237 = vmatpush1.bf16.msra.mxu1 %v4885_v27  ;;  %3195 = vmatprep.subr.bf16.mxu0 %v4886_v28  ;;  %v4963_v13 = vld [vmem:[%s6884_s1 + $0x4fc] ss:$12 sps:$4 sm:$0xff]   ;;  %v4966_v16 = vld [vmem:[%s6884_s1 + $0x364] ss:$12 sps:$4 sm:$0xff]   ;;  %v4964_v18 = vld [vmem:[%s6884_s1 + $0x360] ss:$12 sps:$4 sm:$0xff]  }
  0x27   : > { %3238 = vmatprep.subr.bf16.mxu1 %v4888_v29  ;;  %v4969_v17 = vld [vmem:[%s6884_s1 + $0x4e4] ss:$12 sps:$4 sm:$0xff]   ;;  %v4967_v19 = vld [vmem:[%s6884_s1 + $0x4e0] ss:$12 sps:$4 sm:$0xff]   ;;  %v4970_v22 = vld [vmem:[%s6884_s1 + $0x348] ss:$12 sps:$4 sm:$0xff]  }
  0x28   : > { %v4972_v20 = vld [vmem:[%s6884_s1 + $0x34c] ss:$12 sps:$4 sm:$0xff]   ;;  %v4973_v23 = vld [vmem:[%s6884_s1 + $0x4c8] ss:$12 sps:$4 sm:$0xff]   ;;  %v4976_v26 = vld [vmem:[%s6884_s1 + $0x330] ss:$12 sps:$4 sm:$0xff]  }
  0x29   : > { %3196 = vmatpush1.bf16.msra.mxu0 %v4890_v30  ;;  %v4975_v21 = vld [vmem:[%s6884_s1 + $0x4cc] ss:$12 sps:$4 sm:$0xff]   ;;  %v4978_v24 = vld [vmem:[%s6884_s1 + $0x334] ss:$12 sps:$4 sm:$0xff]   ;;  %v4979_v27 = vld [vmem:[%s6884_s1 + $0x4b0] ss:$12 sps:$4 sm:$0xff]  }
  0x2a   : > { %3239 = vmatpush1.bf16.msra.mxu1 %v4891_v31  ;;  %3197 = vmatprep.subr.bf16.mxu0 %v4892_v32  ;;  %v4981_v25 = vld [vmem:[%s6884_s1 + $0x4b4] ss:$12 sps:$4 sm:$0xff]   ;;  %v4984_v28 = vld [vmem:[%s6884_s1 + $0x31c] ss:$12 sps:$4 sm:$0xff]   ;;  %v4982_v30 = vld [vmem:[%s6884_s1 + $0x318] ss:$12 sps:$4 sm:$0xff]  }
  0x2b   : > { %3240 = vmatprep.subr.bf16.mxu1 %v4894_v33  ;;  %v4987_v29 = vld [vmem:[%s6884_s1 + $0x49c] ss:$12 sps:$4 sm:$0xff]   ;;  %v4985_v31 = vld [vmem:[%s6884_s1 + $0x498] ss:$12 sps:$4 sm:$0xff]   ;;  %s4833_s25 = smul.u32 12, %s6888_s24 }
  0x2c   : > { %v4990_v32 = vld [vmem:[%s6884_s1 + $0x304] ss:$12 sps:$4 sm:$0xff]   ;;  %s4834_s24 = smul.u32 24, %s6890_s13 }
  0x2d   : > { %3198 = vmatpush2.bf16.msra.mxu0 %v4896_v34  ;;  %v4993_v33 = vld [vmem:[%s6884_s1 + $0x484] ss:$12 sps:$4 sm:$0xff]   ;;  %v5044_v34 = vld [vmem:[%s5645_s7 + $0x14] ss:$72 sps:$4 sm:$0xff]   ;;  %s6851_s28 = scalar_lea.vmem %s6885_s2, %s4833_s25 }
  0x2e   : > { %3241 = vmatpush2.bf16.msra.mxu1 %v4897_v35  ;;  %3199 = vmatprep.subr.bf16.mxu0 %v4898_v36  ;;  %v5047_v35 = vld [vmem:[%s5645_s7 + $0x1c] ss:$72 sps:$4 sm:$0xff]   ;;  %v4988_v36 = vld [vmem:[%s6884_s1 + $0x300] ss:$12 sps:$4 sm:$0xff]   ;;  %s191_s4 = scalar_lea.vmem %s6886_s3, %s4834_s24 }
  0x2f   : > { %3242 = vmatprep.subr.bf16.mxu1 %v4900_v37  ;;  %v4991_v37 = vld [vmem:[%s6884_s1 + $0x480] ss:$12 sps:$4 sm:$0xff]   ;;  %v5009_v49 = vld [vmem:[%s6884_s1 + $0x5b8] ss:$12 sps:$4 sm:$0xff]  }
  0x30   : > { %v5017_v51 = vld [vmem:[%s6884_s1 + $0x5a4] ss:$12 sps:$4 sm:$0xff]  }
  0x31   : > { %3200 = vmatpush2.bf16.msra.mxu0 %v4902_v38  ;;  %v4996_v38 = vld [vmem:[%s6884_s1 + $0x46c] ss:$12 sps:$4 sm:$0xff]  }
  0x32   : > { %3243 = vmatpush2.bf16.msra.mxu1 %v4903_v39  ;;  %3201 = vmatprep.subr.bf16.mxu0 %v4904_v40  ;;  %v4999_v39 = vld [vmem:[%s6884_s1 + $0x5ec] ss:$12 sps:$4 sm:$0xff]   ;;  %v4994_v40 = vld [vmem:[%s6884_s1 + $0x468] ss:$12 sps:$4 sm:$0xff]  }
  0x33   : > { %3244 = vmatprep.subr.bf16.mxu1 %v4906_v41  ;;  %v4997_v41 = vld [vmem:[%s6884_s1 + $0x5e8] ss:$12 sps:$4 sm:$0xff]  }
  0x35   : > { %3202 = vmatpush2.bf16.msra.mxu0 %v4908_v42  ;;  %v5002_v42 = vld [vmem:[%s6884_s1 + $0x454] ss:$12 sps:$4 sm:$0xff]  }
  0x36   : > { %3245 = vmatpush2.bf16.msra.mxu1 %v4909_v43  ;;  %3203 = vmatprep.subr.bf16.mxu0 %v4910_v44  ;;  %v5005_v43 = vld [vmem:[%s6884_s1 + $0x5d4] ss:$12 sps:$4 sm:$0xff]   ;;  %v5000_v44 = vld [vmem:[%s6884_s1 + $0x450] ss:$12 sps:$4 sm:$0xff]  }
  0x37   : > { %3246 = vmatprep.subr.bf16.mxu1 %v4912_v45  ;;  %v5003_v45 = vld [vmem:[%s6884_s1 + $0x5d0] ss:$12 sps:$4 sm:$0xff]  }
  0x39   : > { %3204 = vmatpush2.bf16.msra.mxu0 %v4914_v46  ;;  %v5008_v46 = vld [vmem:[%s6884_s1 + $0x43c] ss:$12 sps:$4 sm:$0xff]  }
  0x3a   : > { %3247 = vmatpush2.bf16.msra.mxu1 %v4915_v47  ;;  %3205 = vmatprep.subr.bf16.mxu0 %v4916_v48  ;;  %v5011_v47 = vld [vmem:[%s6884_s1 + $0x5bc] ss:$12 sps:$4 sm:$0xff]   ;;  %v5006_v48 = vld [vmem:[%s6884_s1 + $0x438] ss:$12 sps:$4 sm:$0xff]  }
  0x3b   : > { %3248 = vmatprep.subr.bf16.mxu1 %v4918_v50  ;;  %v5014_v50 = vld [vmem:[%s6884_s1 + $0x424] ss:$12 sps:$4 sm:$0xff]  }
  0x3d   : > { %3206 = vmatpush2.bf16.msra.mxu0 %v4920_v52  ;;  %v5012_v52 = vld [vmem:[%s6884_s1 + $0x420] ss:$12 sps:$4 sm:$0xff]  }
  0x3e   : > { %3249 = vmatpush2.bf16.msra.mxu1 %v4921_v53  ;;  %3207 = vmatprep.subr.bf16.mxu0 %v4922_v54  ;;  %v5015_v53 = vld [vmem:[%s6884_s1 + $0x5a0] ss:$12 sps:$4 sm:$0xff]  }
  0x3f   : > { %3250 = vmatprep.subr.bf16.mxu1 %v4924_v55  ;;  %v5020_v54 = vld [vmem:[%s6884_s1 + $0x40c] ss:$12 sps:$4 sm:$0xff]  }
  0x40   : > { %v5023_v55 = vld [vmem:[%s6884_s1 + $0x58c] ss:$12 sps:$4 sm:$0xff]  }
  0x41   : > { %3208 = vmatpush2.bf16.msra.mxu0 %v4926_v56  ;;  %v5018_v56 = vld [vmem:[%s6884_s1 + $0x408] ss:$12 sps:$4 sm:$0xff]  }
  0x42   : > { %3251 = vmatpush2.bf16.msra.mxu1 %v4927_v57  ;;  %3209 = vmatprep.subr.bf16.mxu0 %v4928_v58  ;;  %v5021_v57 = vld [vmem:[%s6884_s1 + $0x588] ss:$12 sps:$4 sm:$0xff]  }
  0x43   : > { %3252 = vmatprep.subr.bf16.mxu1 %v4930_v59  ;;  %v5026_v58 = vld [vmem:[%s6884_s1 + $0x3f4] ss:$12 sps:$4 sm:$0xff]  }
  0x44   : > { %v5029_v59 = vld [vmem:[%s6884_s1 + $0x574] ss:$12 sps:$4 sm:$0xff]  }
  0x45   : > { %3210 = vmatpush2.bf16.msra.mxu0 %v4932_v60  ;;  %v5024_v60 = vld [vmem:[%s6884_s1 + $0x3f0] ss:$12 sps:$4 sm:$0xff]  }
  0x46   : > { %3253 = vmatpush2.bf16.msra.mxu1 %v4933_v61  ;;  %3211 = vmatprep.subr.bf16.mxu0 %v4934_v62  ;;  %v5027_v61 = vld [vmem:[%s6884_s1 + $0x570] ss:$12 sps:$4 sm:$0xff]  }
  0x47   : > { %3254 = vmatprep.subr.bf16.mxu1 %v4936_v63  ;;  %v5032_v62 = vld [vmem:[%s6884_s1 + $0x3dc] ss:$12 sps:$4 sm:$0xff]  }
  0x48   : > { %v5035_v63 = vld [vmem:[%s6884_s1 + $0x55c] ss:$12 sps:$4 sm:$0xff]  }
  0x49   : > { %3212 = vmatpush2.bf16.msra.mxu0 %v4938_v0  ;;  %v5030_v0 = vld [vmem:[%s6884_s1 + $0x3d8] ss:$12 sps:$4 sm:$0xff]  }
  0x4a   : > { %3255 = vmatpush2.bf16.msra.mxu1 %v4939_v1  ;;  %3267 = vmatprep.subr.bf16.mxu0 %v4948_v2  ;;  %v5033_v1 = vld [vmem:[%s6884_s1 + $0x558] ss:$12 sps:$4 sm:$0xff]  }
  0x4b   : > { %3310 = vmatprep.subr.bf16.mxu1 %v4951_v3  ;;  %v5038_v2 = vld [vmem:[%s6884_s1 + $0x3c4] ss:$12 sps:$4 sm:$0xff]  }
  0x4c   : > { %3214 = vmatmul.mubr.bf16.vlgmr.msra.gmra.mxu0 %v4940_v4  ;;  %v5041_v3 = vld [vmem:[%s6884_s1 + $0x544] ss:$12 sps:$4 sm:$0xff]   ;;  %v5036_v4 = vld [vmem:[%s6884_s1 + $0x3c0] ss:$12 sps:$4 sm:$0xff]  }
  0x4d   : > { %3257 = vmatmul.mubr.bf16.vlgmr.msra.gmra.mxu1 %v4943_v5  ;;  %3268 = vmatpush1.bf16.msra.mxu0 %v4946_v6  ;;  %v5039_v5 = vld [vmem:[%s6884_s1 + $0x540] ss:$12 sps:$4 sm:$0xff]  }
  0x4e   : > { %3311 = vmatpush1.bf16.msra.mxu1 %v4949_v7  ;;  %3269 = vmatprep.subr.bf16.mxu0 %v4954_v8  ;;  %v5050_v6 = vld [vmem:[%s6884_s1 + $0x6ac] ss:$12 sps:$4 sm:$0xff]  }
  0x4f   : > { %3312 = vmatprep.subr.bf16.mxu1 %v4957_v9  ;;  %3299 = vmatprep.mubr.bf16.mxu0 %v5044_v34  ;;  %v5053_v7 = vld [vmem:[%s6884_s1 + $0x82c] ss:$12 sps:$4 sm:$0xff]   ;;  %v5086_v34 = vld [vmem:[%s6884_s1 + $0x61c] ss:$12 sps:$4 sm:$0xff]  }
  0x50   : > { %3342 = vmatprep.mubr.bf16.mxu1 %v5047_v35  ;;  %v5042_v8 = vld [vmem:[%s5645_s7 + $0x10] ss:$72 sps:$4 sm:$0xff]   ;;  %v5089_v35 = vld [vmem:[%s6884_s1 + $0x79c] ss:$12 sps:$4 sm:$0xff]  }
  0x51   : > { %3270 = vmatpush1.bf16.msra.mxu0 %v4952_v10  ;;  %v5045_v9 = vld [vmem:[%s5645_s7 + $0x18] ss:$72 sps:$4 sm:$0xff]   ;;  %v5048_v10 = vld [vmem:[%s6884_s1 + $0x6a8] ss:$12 sps:$4 sm:$0xff]  }
  0x52   : > { %3313 = vmatpush1.bf16.msra.mxu1 %v4955_v11  ;;  %3271 = vmatprep.subr.bf16.mxu0 %v4960_v12  ;;  %v5051_v11 = vld [vmem:[%s6884_s1 + $0x828] ss:$12 sps:$4 sm:$0xff]  }
  0x53   : > { %3314 = vmatprep.subr.bf16.mxu1 %v4963_v13  ;;  %v5056_v12 = vld [vmem:[%s6884_s1 + $0x694] ss:$12 sps:$4 sm:$0xff]  }
  0x54   : > { %v5059_v13 = vld [vmem:[%s6884_s1 + $0x814] ss:$12 sps:$4 sm:$0xff]  }
  0x55   : > { %3272 = vmatpush1.bf16.msra.mxu0 %v4958_v14  ;;  %v5054_v14 = vld [vmem:[%s6884_s1 + $0x690] ss:$12 sps:$4 sm:$0xff]  }
  0x56   : > { %3315 = vmatpush1.bf16.msra.mxu1 %v4961_v15  ;;  %3273 = vmatprep.subr.bf16.mxu0 %v4966_v16  ;;  %v5057_v15 = vld [vmem:[%s6884_s1 + $0x810] ss:$12 sps:$4 sm:$0xff]  }
  0x57   : > { %3316 = vmatprep.subr.bf16.mxu1 %v4969_v17  ;;  %v5062_v16 = vld [vmem:[%s6884_s1 + $0x67c] ss:$12 sps:$4 sm:$0xff]  }
  0x58   : > { %v5065_v17 = vld [vmem:[%s6884_s1 + $0x7fc] ss:$12 sps:$4 sm:$0xff]  }
  0x59   : > { %3274 = vmatpush1.bf16.msra.mxu0 %v4964_v18  ;;  %v5060_v18 = vld [vmem:[%s6884_s1 + $0x678] ss:$12 sps:$4 sm:$0xff]  }
  0x5a   : > { %3317 = vmatpush1.bf16.msra.mxu1 %v4967_v19  ;;  %3275 = vmatprep.subr.bf16.mxu0 %v4972_v20  ;;  %v5146_v19 = vld [vmem:[%s5645_s7 + $0x24] ss:$72 sps:$4 sm:$0xff]  }
  0x5b   : > { %3318 = vmatprep.subr.bf16.mxu1 %v4975_v21  ;;  %v5063_v20 = vld [vmem:[%s6884_s1 + $0x7f8] ss:$12 sps:$4 sm:$0xff]   ;;  %v5149_v21 = vld [vmem:[%s5645_s7 + $0x2c] ss:$72 sps:$4 sm:$0xff]  }
  0x5d   : > { %3276 = vmatpush1.bf16.msra.mxu0 %v4970_v22  ;;  %v5068_v22 = vld [vmem:[%s6884_s1 + $0x664] ss:$12 sps:$4 sm:$0xff]  }
  0x5e   : > { %3319 = vmatpush1.bf16.msra.mxu1 %v4973_v23  ;;  %3277 = vmatprep.subr.bf16.mxu0 %v4978_v24  ;;  %v5071_v23 = vld [vmem:[%s6884_s1 + $0x7e4] ss:$12 sps:$4 sm:$0xff]   ;;  %v5066_v24 = vld [vmem:[%s6884_s1 + $0x660] ss:$12 sps:$4 sm:$0xff]  }
  0x5f   : > { %3320 = vmatprep.subr.bf16.mxu1 %v4981_v25  ;;  %v5069_v25 = vld [vmem:[%s6884_s1 + $0x7e0] ss:$12 sps:$4 sm:$0xff]  }
  0x61   : > { %3278 = vmatpush1.bf16.msra.mxu0 %v4976_v26  ;;  %v5074_v26 = vld [vmem:[%s6884_s1 + $0x64c] ss:$12 sps:$4 sm:$0xff]  }
  0x62   : > { %3321 = vmatpush1.bf16.msra.mxu1 %v4979_v27  ;;  %3279 = vmatprep.subr.bf16.mxu0 %v4984_v28  ;;  %v5077_v27 = vld [vmem:[%s6884_s1 + $0x7cc] ss:$12 sps:$4 sm:$0xff]   ;;  %v5072_v28 = vld [vmem:[%s6884_s1 + $0x648] ss:$12 sps:$4 sm:$0xff]  }
  0x63   : > { %3322 = vmatprep.subr.bf16.mxu1 %v4987_v29  ;;  %v5075_v29 = vld [vmem:[%s6884_s1 + $0x7c8] ss:$12 sps:$4 sm:$0xff]  }
  0x65   : > { %3280 = vmatpush1.bf16.msra.mxu0 %v4982_v30  ;;  %v5080_v30 = vld [vmem:[%s6884_s1 + $0x634] ss:$12 sps:$4 sm:$0xff]  }
  0x66   : > { %3323 = vmatpush1.bf16.msra.mxu1 %v4985_v31  ;;  %3281 = vmatprep.subr.bf16.mxu0 %v4990_v32  ;;  %v5083_v31 = vld [vmem:[%s6884_s1 + $0x7b4] ss:$12 sps:$4 sm:$0xff]   ;;  %v5078_v32 = vld [vmem:[%s6884_s1 + $0x630] ss:$12 sps:$4 sm:$0xff]  }
  0x67   : > { %3324 = vmatprep.subr.bf16.mxu1 %v4993_v33  ;;  %v5081_v33 = vld [vmem:[%s6884_s1 + $0x7b0] ss:$12 sps:$4 sm:$0xff]  }
  0x69   : > { %3282 = vmatpush1.bf16.msra.mxu0 %v4988_v36  ;;  %v5084_v36 = vld [vmem:[%s6884_s1 + $0x618] ss:$12 sps:$4 sm:$0xff]  }
  0x6a   : > { %3325 = vmatpush1.bf16.msra.mxu1 %v4991_v37  ;;  %3283 = vmatprep.subr.bf16.mxu0 %v4996_v38  ;;  %v5087_v37 = vld [vmem:[%s6884_s1 + $0x798] ss:$12 sps:$4 sm:$0xff]  }
  0x6b   : > { %3326 = vmatprep.subr.bf16.mxu1 %v4999_v39  ;;  %v5092_v38 = vld [vmem:[%s6884_s1 + $0x604] ss:$12 sps:$4 sm:$0xff]  }
  0x6c   : > { %v5095_v39 = vld [vmem:[%s6884_s1 + $0x784] ss:$12 sps:$4 sm:$0xff]  }
  0x6d   : > { %3284 = vmatpush2.bf16.msra.mxu0 %v4994_v40  ;;  %v5090_v40 = vld [vmem:[%s6884_s1 + $0x600] ss:$12 sps:$4 sm:$0xff]  }
  0x6e   : > { %3327 = vmatpush2.bf16.msra.mxu1 %v4997_v41  ;;  %3285 = vmatprep.subr.bf16.mxu0 %v5002_v42  ;;  %v5093_v41 = vld [vmem:[%s6884_s1 + $0x780] ss:$12 sps:$4 sm:$0xff]  }
  0x6f   : > { %3328 = vmatprep.subr.bf16.mxu1 %v5005_v43  ;;  %v5098_v42 = vld [vmem:[%s6884_s1 + $0x76c] ss:$12 sps:$4 sm:$0xff]  }
  0x70   : > { %v5101_v43 = vld [vmem:[%s6884_s1 + $0x8ec] ss:$12 sps:$4 sm:$0xff]  }
  0x71   : > { %3286 = vmatpush2.bf16.msra.mxu0 %v5000_v44  ;;  %v5096_v44 = vld [vmem:[%s6884_s1 + $0x768] ss:$12 sps:$4 sm:$0xff]  }
  0x72   : > { %3329 = vmatpush2.bf16.msra.mxu1 %v5003_v45  ;;  %3287 = vmatprep.subr.bf16.mxu0 %v5008_v46  ;;  %v5099_v45 = vld [vmem:[%s6884_s1 + $0x8e8] ss:$12 sps:$4 sm:$0xff]  }
  0x73   : > { %3330 = vmatprep.subr.bf16.mxu1 %v5011_v47  ;;  %v5104_v46 = vld [vmem:[%s6884_s1 + $0x754] ss:$12 sps:$4 sm:$0xff]  }
  0x74   : > { %v5107_v47 = vld [vmem:[%s6884_s1 + $0x8d4] ss:$12 sps:$4 sm:$0xff]  }
  0x75   : > { %3288 = vmatpush2.bf16.msra.mxu0 %v5006_v48  ;;  %v5102_v48 = vld [vmem:[%s6884_s1 + $0x750] ss:$12 sps:$4 sm:$0xff]  }
  0x76   : > { %3331 = vmatpush2.bf16.msra.mxu1 %v5009_v49  ;;  %3289 = vmatprep.subr.bf16.mxu0 %v5014_v50  ;;  %v5105_v49 = vld [vmem:[%s6884_s1 + $0x8d0] ss:$12 sps:$4 sm:$0xff]  }
  0x77   : > { %3332 = vmatprep.subr.bf16.mxu1 %v5017_v51  ;;  %v5110_v50 = vld [vmem:[%s6884_s1 + $0x73c] ss:$12 sps:$4 sm:$0xff]  }
  0x78   : > { %v5113_v51 = vld [vmem:[%s6884_s1 + $0x8bc] ss:$12 sps:$4 sm:$0xff]  }
  0x79   : > { %3290 = vmatpush2.bf16.msra.mxu0 %v5012_v52  ;;  %v5108_v52 = vld [vmem:[%s6884_s1 + $0x738] ss:$12 sps:$4 sm:$0xff]  }
  0x7a   : > { %3333 = vmatpush2.bf16.msra.mxu1 %v5015_v53  ;;  %3291 = vmatprep.subr.bf16.mxu0 %v5020_v54  ;;  %v5111_v53 = vld [vmem:[%s6884_s1 + $0x8b8] ss:$12 sps:$4 sm:$0xff]  }
  0x7b   : > { %3334 = vmatprep.subr.bf16.mxu1 %v5023_v55  ;;  %v5116_v54 = vld [vmem:[%s6884_s1 + $0x724] ss:$12 sps:$4 sm:$0xff]  }
  0x7c   : > { %v5119_v55 = vld [vmem:[%s6884_s1 + $0x8a4] ss:$12 sps:$4 sm:$0xff]  }
  0x7d   : > { %3292 = vmatpush2.bf16.msra.mxu0 %v5018_v56  ;;  %v5114_v56 = vld [vmem:[%s6884_s1 + $0x720] ss:$12 sps:$4 sm:$0xff]  }
  0x7e   : > { %3335 = vmatpush2.bf16.msra.mxu1 %v5021_v57  ;;  %3293 = vmatprep.subr.bf16.mxu0 %v5026_v58  ;;  %v5117_v57 = vld [vmem:[%s6884_s1 + $0x8a0] ss:$12 sps:$4 sm:$0xff]  }
  0x7f   : > { %3336 = vmatprep.subr.bf16.mxu1 %v5029_v59  ;;  %v5122_v58 = vld [vmem:[%s6884_s1 + $0x70c] ss:$12 sps:$4 sm:$0xff]  }
  0x80   : > { %v5125_v59 = vld [vmem:[%s6884_s1 + $0x88c] ss:$12 sps:$4 sm:$0xff]  }
  0x81   : > { %3294 = vmatpush2.bf16.msra.mxu0 %v5024_v60  ;;  %v5120_v60 = vld [vmem:[%s6884_s1 + $0x708] ss:$12 sps:$4 sm:$0xff]  }
  0x82   : > { %3337 = vmatpush2.bf16.msra.mxu1 %v5027_v61  ;;  %3295 = vmatprep.subr.bf16.mxu0 %v5032_v62  ;;  %v5123_v61 = vld [vmem:[%s6884_s1 + $0x888] ss:$12 sps:$4 sm:$0xff]  }
  0x83   : > { %3338 = vmatprep.subr.bf16.mxu1 %v5035_v63  ;;  %v5128_v62 = vld [vmem:[%s6884_s1 + $0x6f4] ss:$12 sps:$4 sm:$0xff]  }
  0x84   : > { %v5131_v63 = vld [vmem:[%s6884_s1 + $0x874] ss:$12 sps:$4 sm:$0xff]  }
  0x85   : > { %3296 = vmatpush2.bf16.msra.mxu0 %v5030_v0  ;;  %v5126_v0 = vld [vmem:[%s6884_s1 + $0x6f0] ss:$12 sps:$4 sm:$0xff]  }
  0x86   : > { %3339 = vmatpush2.bf16.msra.mxu1 %v5033_v1  ;;  %3297 = vmatprep.subr.bf16.mxu0 %v5038_v2  ;;  %v5129_v1 = vld [vmem:[%s6884_s1 + $0x870] ss:$12 sps:$4 sm:$0xff]  }
  0x87   : > { %3340 = vmatprep.subr.bf16.mxu1 %v5041_v3  ;;  %v5134_v2 = vld [vmem:[%s6884_s1 + $0x6dc] ss:$12 sps:$4 sm:$0xff]  }
  0x88   : > { %v5137_v3 = vld [vmem:[%s6884_s1 + $0x85c] ss:$12 sps:$4 sm:$0xff]  }
  0x89   : > { %3298 = vmatpush2.bf16.msra.mxu0 %v5036_v4  ;;  %v5132_v4 = vld [vmem:[%s6884_s1 + $0x6d8] ss:$12 sps:$4 sm:$0xff]  }
  0x8a   : > { %3341 = vmatpush2.bf16.msra.mxu1 %v5039_v5  ;;  %3353 = vmatprep.subr.bf16.mxu0 %v5050_v6  ;;  %v5135_v5 = vld [vmem:[%s6884_s1 + $0x858] ss:$12 sps:$4 sm:$0xff]  }
  0x8b   : > { %3396 = vmatprep.subr.bf16.mxu1 %v5053_v7  ;;  %v5140_v6 = vld [vmem:[%s6884_s1 + $0x6c4] ss:$12 sps:$4 sm:$0xff]  }
  0x8c   : > { %3300 = vmatmul.mubr.bf16.vlgmr.msra.gmra.mxu0 %v5042_v8  ;;  %v5143_v7 = vld [vmem:[%s6884_s1 + $0x844] ss:$12 sps:$4 sm:$0xff]   ;;  %v5138_v8 = vld [vmem:[%s6884_s1 + $0x6c0] ss:$12 sps:$4 sm:$0xff]  }
  0x8d   : > { %3343 = vmatmul.mubr.bf16.vlgmr.msra.gmra.mxu1 %v5045_v9  ;;  %3354 = vmatpush1.bf16.msra.mxu0 %v5048_v10  ;;  %v5141_v9 = vld [vmem:[%s6884_s1 + $0x840] ss:$12 sps:$4 sm:$0xff]  }
  0x8e   : > { %3397 = vmatpush1.bf16.msra.mxu1 %v5051_v11  ;;  %3355 = vmatprep.subr.bf16.mxu0 %v5056_v12  ;;  %v5152_v10 = vld [vmem:[%s6884_s1 + $0x9ac] ss:$12 sps:$4 sm:$0xff]   ;;  %v5144_v11 = vld [vmem:[%s5645_s7 + $0x20] ss:$72 sps:$4 sm:$0xff]  }
  0x8f   : > { %3398 = vmatprep.subr.bf16.mxu1 %v5059_v13  ;;  %3385 = vmatprep.mubr.bf16.mxu0 %v5146_v19  ;;  %v5147_v12 = vld [vmem:[%s5645_s7 + $0x28] ss:$72 sps:$4 sm:$0xff]   ;;  %v5155_v13 = vld [vmem:[%s6884_s1 + $0xb2c] ss:$12 sps:$4 sm:$0xff]   ;;  %v5251_v19 = vld [vmem:[%s5645_s7 + $0x3c] ss:$72 sps:$4 sm:$0xff]  }
  0x90   : > { %3428 = vmatprep.mubr.bf16.mxu1 %v5149_v21  ;;  %v5159_v21 = vld [vmem:[%s6884_s1 + $0xb10] ss:$12 sps:$4 sm:$0xff]  }
  0x91   : > { %3356 = vmatpush1.bf16.msra.mxu0 %v5054_v14  ;;  %v5150_v14 = vld [vmem:[%s6884_s1 + $0x9a8] ss:$12 sps:$4 sm:$0xff]  }
  0x92   : > { %3399 = vmatpush1.bf16.msra.mxu1 %v5057_v15  ;;  %3357 = vmatprep.subr.bf16.mxu0 %v5062_v16  ;;  %v5153_v15 = vld [vmem:[%s6884_s1 + $0xb28] ss:$12 sps:$4 sm:$0xff]  }
  0x93   : > { %3400 = vmatprep.subr.bf16.mxu1 %v5065_v17  ;;  %v5158_v16 = vld [vmem:[%s6884_s1 + $0x994] ss:$12 sps:$4 sm:$0xff]  }
  0x94   : > { %v5161_v17 = vld [vmem:[%s6884_s1 + $0xb14] ss:$12 sps:$4 sm:$0xff]  }
  0x95   : > { %3358 = vmatpush1.bf16.msra.mxu0 %v5060_v18  ;;  %v5248_v18 = vld [vmem:[%s5645_s7 + $0x34] ss:$72 sps:$4 sm:$0xff]  }
  0x96   : > { %3401 = vmatpush1.bf16.msra.mxu1 %v5063_v20  ;;  %3359 = vmatprep.subr.bf16.mxu0 %v5068_v22  ;;  %v5156_v20 = vld [vmem:[%s6884_s1 + $0x990] ss:$12 sps:$4 sm:$0xff]  }
  0x97   : > { %3402 = vmatprep.subr.bf16.mxu1 %v5071_v23  ;;  %v5164_v22 = vld [vmem:[%s6884_s1 + $0x97c] ss:$12 sps:$4 sm:$0xff]  }
  0x98   : > { %v5167_v23 = vld [vmem:[%s6884_s1 + $0xafc] ss:$12 sps:$4 sm:$0xff]  }
  0x99   : > { %3360 = vmatpush1.bf16.msra.mxu0 %v5066_v24  ;;  %v5162_v24 = vld [vmem:[%s6884_s1 + $0x978] ss:$12 sps:$4 sm:$0xff]  }
  0x9a   : > { %3403 = vmatpush1.bf16.msra.mxu1 %v5069_v25  ;;  %3361 = vmatprep.subr.bf16.mxu0 %v5074_v26  ;;  %v5165_v25 = vld [vmem:[%s6884_s1 + $0xaf8] ss:$12 sps:$4 sm:$0xff]  }
  0x9b   : > { %3404 = vmatprep.subr.bf16.mxu1 %v5077_v27  ;;  %v5170_v26 = vld [vmem:[%s6884_s1 + $0x964] ss:$12 sps:$4 sm:$0xff]  }
  0x9c   : > { %v5173_v27 = vld [vmem:[%s6884_s1 + $0xae4] ss:$12 sps:$4 sm:$0xff]  }
  0x9d   : > { %3362 = vmatpush1.bf16.msra.mxu0 %v5072_v28  ;;  %v5168_v28 = vld [vmem:[%s6884_s1 + $0x960] ss:$12 sps:$4 sm:$0xff]  }
  0x9e   : > { %3405 = vmatpush1.bf16.msra.mxu1 %v5075_v29  ;;  %3363 = vmatprep.subr.bf16.mxu0 %v5080_v30  ;;  %v5171_v29 = vld [vmem:[%s6884_s1 + $0xae0] ss:$12 sps:$4 sm:$0xff]  }
  0x9f   : > { %3406 = vmatprep.subr.bf16.mxu1 %v5083_v31  ;;  %v5176_v30 = vld [vmem:[%s6884_s1 + $0x94c] ss:$12 sps:$4 sm:$0xff]  }
  0xa0   : > { %v5179_v31 = vld [vmem:[%s6884_s1 + $0xacc] ss:$12 sps:$4 sm:$0xff]  }
  0xa1   : > { %3364 = vmatpush1.bf16.msra.mxu0 %v5078_v32  ;;  %v5174_v32 = vld [vmem:[%s6884_s1 + $0x948] ss:$12 sps:$4 sm:$0xff]  }
  0xa2   : > { %3407 = vmatpush1.bf16.msra.mxu1 %v5081_v33  ;;  %3365 = vmatprep.subr.bf16.mxu0 %v5086_v34  ;;  %v5177_v33 = vld [vmem:[%s6884_s1 + $0xac8] ss:$12 sps:$4 sm:$0xff]  }
  0xa3   : > { %3408 = vmatprep.subr.bf16.mxu1 %v5089_v35  ;;  %v5182_v34 = vld [vmem:[%s6884_s1 + $0x934] ss:$12 sps:$4 sm:$0xff]  }
  0xa4   : > { %v5185_v35 = vld [vmem:[%s6884_s1 + $0xab4] ss:$12 sps:$4 sm:$0xff]  }
  0xa5   : > { %3366 = vmatpush1.bf16.msra.mxu0 %v5084_v36  ;;  %v5180_v36 = vld [vmem:[%s6884_s1 + $0x930] ss:$12 sps:$4 sm:$0xff]  }
  0xa6   : > { %3409 = vmatpush1.bf16.msra.mxu1 %v5087_v37  ;;  %3367 = vmatprep.subr.bf16.mxu0 %v5092_v38  ;;  %v5183_v37 = vld [vmem:[%s6884_s1 + $0xab0] ss:$12 sps:$4 sm:$0xff]  }
  0xa7   : > { %3410 = vmatprep.subr.bf16.mxu1 %v5095_v39  ;;  %v5188_v38 = vld [vmem:[%s6884_s1 + $0x91c] ss:$12 sps:$4 sm:$0xff]  }
  0xa8   : > { %v5191_v39 = vld [vmem:[%s6884_s1 + $0xa9c] ss:$12 sps:$4 sm:$0xff]  }
  0xa9   : > { %3368 = vmatpush1.bf16.msra.mxu0 %v5090_v40  ;;  %v5186_v40 = vld [vmem:[%s6884_s1 + $0x918] ss:$12 sps:$4 sm:$0xff]  }
  0xaa   : > { %3411 = vmatpush1.bf16.msra.mxu1 %v5093_v41  ;;  %3369 = vmatprep.subr.bf16.mxu0 %v5098_v42  ;;  %v5189_v41 = vld [vmem:[%s6884_s1 + $0xa98] ss:$12 sps:$4 sm:$0xff]  }
  0xab   : > { %3412 = vmatprep.subr.bf16.mxu1 %v5101_v43  ;;  %v5194_v42 = vld [vmem:[%s6884_s1 + $0x904] ss:$12 sps:$4 sm:$0xff]  }
  0xac   : > { %v5197_v43 = vld [vmem:[%s6884_s1 + $0xa84] ss:$12 sps:$4 sm:$0xff]  }
  0xad   : > { %3370 = vmatpush2.bf16.msra.mxu0 %v5096_v44  ;;  %v5192_v44 = vld [vmem:[%s6884_s1 + $0x900] ss:$12 sps:$4 sm:$0xff]  }
  0xae   : > { %3413 = vmatpush2.bf16.msra.mxu1 %v5099_v45  ;;  %3371 = vmatprep.subr.bf16.mxu0 %v5104_v46  ;;  %v5195_v45 = vld [vmem:[%s6884_s1 + $0xa80] ss:$12 sps:$4 sm:$0xff]  }
  0xaf   : > { %3414 = vmatprep.subr.bf16.mxu1 %v5107_v47  ;;  %v5200_v46 = vld [vmem:[%s6884_s1 + $0xa6c] ss:$12 sps:$4 sm:$0xff]  }
  0xb0   : > { %v5203_v47 = vld [vmem:[%s6884_s1 + $0xbec] ss:$12 sps:$4 sm:$0xff]  }
  0xb1   : > { %3372 = vmatpush2.bf16.msra.mxu0 %v5102_v48  ;;  %v5198_v48 = vld [vmem:[%s6884_s1 + $0xa68] ss:$12 sps:$4 sm:$0xff]  }
  0xb2   : > { %3415 = vmatpush2.bf16.msra.mxu1 %v5105_v49  ;;  %3373 = vmatprep.subr.bf16.mxu0 %v5110_v50  ;;  %v5201_v49 = vld [vmem:[%s6884_s1 + $0xbe8] ss:$12 sps:$4 sm:$0xff]  }
  0xb3   : > { %3416 = vmatprep.subr.bf16.mxu1 %v5113_v51  ;;  %v5206_v50 = vld [vmem:[%s6884_s1 + $0xa54] ss:$12 sps:$4 sm:$0xff]  }
  0xb4   : > { %v5209_v51 = vld [vmem:[%s6884_s1 + $0xbd4] ss:$12 sps:$4 sm:$0xff]  }
  0xb5   : > { %3374 = vmatpush2.bf16.msra.mxu0 %v5108_v52  ;;  %v5204_v52 = vld [vmem:[%s6884_s1 + $0xa50] ss:$12 sps:$4 sm:$0xff]  }
  0xb6   : > { %3417 = vmatpush2.bf16.msra.mxu1 %v5111_v53  ;;  %3375 = vmatprep.subr.bf16.mxu0 %v5116_v54  ;;  %v5207_v53 = vld [vmem:[%s6884_s1 + $0xbd0] ss:$12 sps:$4 sm:$0xff]  }
  0xb7   : > { %3418 = vmatprep.subr.bf16.mxu1 %v5119_v55  ;;  %v5212_v54 = vld [vmem:[%s6884_s1 + $0xa3c] ss:$12 sps:$4 sm:$0xff]  }
  0xb8   : > { %v5215_v55 = vld [vmem:[%s6884_s1 + $0xbbc] ss:$12 sps:$4 sm:$0xff]  }
  0xb9   : > { %3376 = vmatpush2.bf16.msra.mxu0 %v5114_v56  ;;  %v5210_v56 = vld [vmem:[%s6884_s1 + $0xa38] ss:$12 sps:$4 sm:$0xff]  }
  0xba   : > { %3419 = vmatpush2.bf16.msra.mxu1 %v5117_v57  ;;  %3377 = vmatprep.subr.bf16.mxu0 %v5122_v58  ;;  %v5213_v57 = vld [vmem:[%s6884_s1 + $0xbb8] ss:$12 sps:$4 sm:$0xff]  }
  0xbb   : > { %3420 = vmatprep.subr.bf16.mxu1 %v5125_v59  ;;  %v5218_v58 = vld [vmem:[%s6884_s1 + $0xa24] ss:$12 sps:$4 sm:$0xff]  }
  0xbc   : > { %v5221_v59 = vld [vmem:[%s6884_s1 + $0xba4] ss:$12 sps:$4 sm:$0xff]  }
  0xbd   : > { %3378 = vmatpush2.bf16.msra.mxu0 %v5120_v60  ;;  %v5216_v60 = vld [vmem:[%s6884_s1 + $0xa20] ss:$12 sps:$4 sm:$0xff]  }
  0xbe   : > { %3421 = vmatpush2.bf16.msra.mxu1 %v5123_v61  ;;  %3379 = vmatprep.subr.bf16.mxu0 %v5128_v62  ;;  %v5219_v61 = vld [vmem:[%s6884_s1 + $0xba0] ss:$12 sps:$4 sm:$0xff]  }
  0xbf   : > { %3422 = vmatprep.subr.bf16.mxu1 %v5131_v63  ;;  %v5224_v62 = vld [vmem:[%s6884_s1 + $0xa0c] ss:$12 sps:$4 sm:$0xff]  }
  0xc0   : > { %v5227_v63 = vld [vmem:[%s6884_s1 + $0xb8c] ss:$12 sps:$4 sm:$0xff]  }
  0xc1   : > { %3380 = vmatpush2.bf16.msra.mxu0 %v5126_v0  ;;  %v5222_v0 = vld [vmem:[%s6884_s1 + $0xa08] ss:$12 sps:$4 sm:$0xff]  }
  0xc2   : > { %3423 = vmatpush2.bf16.msra.mxu1 %v5129_v1  ;;  %3381 = vmatprep.subr.bf16.mxu0 %v5134_v2  ;;  %v5225_v1 = vld [vmem:[%s6884_s1 + $0xb88] ss:$12 sps:$4 sm:$0xff]  }
  0xc3   : > { %3424 = vmatprep.subr.bf16.mxu1 %v5137_v3  ;;  %v5230_v2 = vld [vmem:[%s6884_s1 + $0x9f4] ss:$12 sps:$4 sm:$0xff]  }
  0xc4   : > { %v5233_v3 = vld [vmem:[%s6884_s1 + $0xb74] ss:$12 sps:$4 sm:$0xff]  }
  0xc5   : > { %3382 = vmatpush2.bf16.msra.mxu0 %v5132_v4  ;;  %v5228_v4 = vld [vmem:[%s6884_s1 + $0x9f0] ss:$12 sps:$4 sm:$0xff]  }
  0xc6   : > { %3425 = vmatpush2.bf16.msra.mxu1 %v5135_v5  ;;  %3383 = vmatprep.subr.bf16.mxu0 %v5140_v6  ;;  %v5231_v5 = vld [vmem:[%s6884_s1 + $0xb70] ss:$12 sps:$4 sm:$0xff]  }
  0xc7   : > { %3426 = vmatprep.subr.bf16.mxu1 %v5143_v7  ;;  %v5236_v6 = vld [vmem:[%s6884_s1 + $0x9dc] ss:$12 sps:$4 sm:$0xff]  }
  0xc8   : > { %v5239_v7 = vld [vmem:[%s6884_s1 + $0xb5c] ss:$12 sps:$4 sm:$0xff]  }
  0xc9   : > { %3384 = vmatpush2.bf16.msra.mxu0 %v5138_v8  ;;  %v5234_v8 = vld [vmem:[%s6884_s1 + $0x9d8] ss:$12 sps:$4 sm:$0xff]  }
  0xca   : > { %3427 = vmatpush2.bf16.msra.mxu1 %v5141_v9  ;;  %3439 = vmatprep.subr.bf16.mxu0 %v5152_v10  ;;  %v5237_v9 = vld [vmem:[%s6884_s1 + $0xb58] ss:$12 sps:$4 sm:$0xff]  }
  0xcb   : > { %3482 = vmatprep.subr.bf16.mxu1 %v5155_v13  ;;  %v5242_v10 = vld [vmem:[%s6884_s1 + $0x9c4] ss:$12 sps:$4 sm:$0xff]   ;;  %v5243_v13 = vld [vmem:[%s6884_s1 + $0xb40] ss:$12 sps:$4 sm:$0xff]  }
  0xcc   : > { %3386 = vmatmul.mubr.bf16.vlgmr.msra.gmra.mxu0 %v5144_v11  ;;  %v5245_v11 = vld [vmem:[%s6884_s1 + $0xb44] ss:$12 sps:$4 sm:$0xff]  }
  0xcd   : > { %3429 = vmatmul.mubr.bf16.vlgmr.msra.gmra.mxu1 %v5147_v12  ;;  %3440 = vmatpush1.bf16.msra.mxu0 %v5150_v14  ;;  %v5240_v12 = vld [vmem:[%s6884_s1 + $0x9c0] ss:$12 sps:$4 sm:$0xff]  }
  0xce   : > { %3483 = vmatpush1.bf16.msra.mxu1 %v5153_v15  ;;  %3441 = vmatprep.subr.bf16.mxu0 %v5158_v16  ;;  %v5254_v14 = vld [vmem:[%s6884_s1 + $0xcac] ss:$12 sps:$4 sm:$0xff]  }
  0xcf   : > { %3484 = vmatprep.subr.bf16.mxu1 %v5161_v17  ;;  %3471 = vmatprep.mubr.bf16.mxu0 %v5248_v18  ;;  %v5246_v15 = vld [vmem:[%s5645_s7 + $0x30] ss:$72 sps:$4 sm:$0xff]   ;;  %v5252_v18 = vld [vmem:[%s6884_s1 + $0xca8] ss:$12 sps:$4 sm:$0xff]  }
  0xd0   : > { %3514 = vmatprep.mubr.bf16.mxu1 %v5251_v19  ;;  %v5249_v16 = vld [vmem:[%s5645_s7 + $0x38] ss:$72 sps:$4 sm:$0xff]   ;;  %v5255_v17 = vld [vmem:[%s6884_s1 + $0x170] ss:$12 sps:$4 sm:$0xff]  }
  0xd1   : > { %3442 = vmatpush1.bf16.msra.mxu0 %v5156_v20  ;;  %v5256_v19 = vld [vmem:[%s6884_s1 + $0xb0] ss:$12 sps:$4 sm:$0xff]   ;;  %v5259_v20 = vld [vmem:[%s6884_s1 + $0xc94] ss:$12 sps:$4 sm:$0xff]  }
  0xd2   : > { %3485 = vmatpush1.bf16.msra.mxu1 %v5159_v21  ;;  %3443 = vmatprep.subr.bf16.mxu0 %v5164_v22  ;;  %v5260_v21 = vld [vmem:[%s6884_s1 + $0x158] ss:$12 sps:$4 sm:$0xff]   ;;  %v5257_v22 = vld [vmem:[%s6884_s1 + $0xc90] ss:$12 sps:$4 sm:$0xff]  }
  0xd3   : > { %3486 = vmatprep.subr.bf16.mxu1 %v5167_v23  ;;  %v5334_v23 = vld [vmem:[%s5645_s7 + $0x44] ss:$72 sps:$4 sm:$0xff]  }
  0xd5   : > { %3444 = vmatpush1.bf16.msra.mxu0 %v5162_v24  ;;  %v5261_v24 = vld [vmem:[%s6884_s1 + $0x98] ss:$12 sps:$4 sm:$0xff]  }
  0xd6   : > { %3487 = vmatpush1.bf16.msra.mxu1 %v5165_v25  ;;  %3445 = vmatprep.subr.bf16.mxu0 %v5170_v26  ;;  %v5264_v25 = vld [vmem:[%s6884_s1 + $0xc7c] ss:$12 sps:$4 sm:$0xff]   ;;  %v5265_v26 = vld [vmem:[%s6884_s1 + $0x140] ss:$12 sps:$4 sm:$0xff]  }
  0xd7   : > { %3488 = vmatprep.subr.bf16.mxu1 %v5173_v27  ;;  %v5262_v27 = vld [vmem:[%s6884_s1 + $0xc78] ss:$12 sps:$4 sm:$0xff]  }
  0xd9   : > { %3446 = vmatpush1.bf16.msra.mxu0 %v5168_v28  ;;  %v5447_v28 = vld [vmem:[%s5645_s7 + $0x4] ss:$72 sps:$4 sm:$0xff]  }
  0xda   : > { %3489 = vmatpush1.bf16.msra.mxu1 %v5171_v29  ;;  %3447 = vmatprep.subr.bf16.mxu0 %v5176_v30  ;;  %v5266_v29 = vld [vmem:[%s6884_s1 + $0x80] ss:$12 sps:$4 sm:$0xff]   ;;  %v5269_v30 = vld [vmem:[%s6884_s1 + $0xc64] ss:$12 sps:$4 sm:$0xff]  }
  0xdb   : > { %3490 = vmatprep.subr.bf16.mxu1 %v5179_v31  ;;  %v5270_v31 = vld [vmem:[%s6884_s1 + $0x128] ss:$12 sps:$4 sm:$0xff]  }
  0xdd   : > { %3448 = vmatpush1.bf16.msra.mxu0 %v5174_v32  ;;  %v5267_v32 = vld [vmem:[%s6884_s1 + $0xc60] ss:$12 sps:$4 sm:$0xff]  }
  0xde   : > { %3491 = vmatpush1.bf16.msra.mxu1 %v5177_v33  ;;  %3449 = vmatprep.subr.bf16.mxu0 %v5182_v34  ;;  %v5271_v33 = vld [vmem:[%s6884_s1 + $0x68] ss:$12 sps:$4 sm:$0xff]   ;;  %v5274_v34 = vld [vmem:[%s6884_s1 + $0xc4c] ss:$12 sps:$4 sm:$0xff]  }
  0xdf   : > { %3492 = vmatprep.subr.bf16.mxu1 %v5185_v35  ;;  %v5275_v35 = vld [vmem:[%s6884_s1 + $0x110] ss:$12 sps:$4 sm:$0xff]  }
  0xe1   : > { %3450 = vmatpush1.bf16.msra.mxu0 %v5180_v36  ;;  %v5272_v36 = vld [vmem:[%s6884_s1 + $0xc48] ss:$12 sps:$4 sm:$0xff]  }
  0xe2   : > { %3493 = vmatpush1.bf16.msra.mxu1 %v5183_v37  ;;  %3451 = vmatprep.subr.bf16.mxu0 %v5188_v38  ;;  %v5276_v37 = vld [vmem:[%s6884_s1 + $0x50] ss:$12 sps:$4 sm:$0xff]   ;;  %v5279_v38 = vld [vmem:[%s6884_s1 + $0xc34] ss:$12 sps:$4 sm:$0xff]  }
  0xe3   : > { %3494 = vmatprep.subr.bf16.mxu1 %v5191_v39  ;;  %v5280_v39 = vld [vmem:[%s6884_s1 + $0xf8] ss:$12 sps:$4 sm:$0xff]  }
  0xe5   : > { %3452 = vmatpush1.bf16.msra.mxu0 %v5186_v40  ;;  %v5277_v40 = vld [vmem:[%s6884_s1 + $0xc30] ss:$12 sps:$4 sm:$0xff]  }
  0xe6   : > { %3495 = vmatpush1.bf16.msra.mxu1 %v5189_v41  ;;  %3453 = vmatprep.subr.bf16.mxu0 %v5194_v42  ;;  %v5281_v41 = vld [vmem:[%s6884_s1 + $0x38] ss:$12 sps:$4 sm:$0xff]   ;;  %v5284_v42 = vld [vmem:[%s6884_s1 + $0xc1c] ss:$12 sps:$4 sm:$0xff]  }
  0xe7   : > { %3496 = vmatprep.subr.bf16.mxu1 %v5197_v43  ;;  %v5285_v43 = vld [vmem:[%s6884_s1 + $0xe0] ss:$12 sps:$4 sm:$0xff]  }
  0xe9   : > { %3454 = vmatpush1.bf16.msra.mxu0 %v5192_v44  ;;  %v5282_v44 = vld [vmem:[%s6884_s1 + $0xc18] ss:$12 sps:$4 sm:$0xff]  }
  0xea   : > { %3497 = vmatpush1.bf16.msra.mxu1 %v5195_v45  ;;  %3455 = vmatprep.subr.bf16.mxu0 %v5200_v46  ;;  %v5286_v45 = vld [vmem:[%s6884_s1 + $0x20] ss:$12 sps:$4 sm:$0xff]   ;;  %v5289_v46 = vld [vmem:[%s6884_s1 + $0xc04] ss:$12 sps:$4 sm:$0xff]  }
  0xeb   : > { %3498 = vmatprep.subr.bf16.mxu1 %v5203_v47  ;;  %v5290_v47 = vld [vmem:[%s6884_s1 + $0xc8] ss:$12 sps:$4 sm:$0xff]  }
  0xed   : > { %3456 = vmatpush2.bf16.msra.mxu0 %v5198_v48  ;;  %v5287_v48 = vld [vmem:[%s6884_s1 + $0xc00] ss:$12 sps:$4 sm:$0xff]  }
  0xee   : > { %3499 = vmatpush2.bf16.msra.mxu1 %v5201_v49  ;;  %3457 = vmatprep.subr.bf16.mxu0 %v5206_v50  ;;  %v5291_v49 = vld [vmem:[%s6884_s1 + $0x8] ss:$12 sps:$4 sm:$0xff]   ;;  %v5294_v50 = vld [vmem:[%s6884_s1 + $0xd6c] ss:$12 sps:$4 sm:$0xff]  }
  0xef   : > { %3500 = vmatprep.subr.bf16.mxu1 %v5209_v51  ;;  %v5295_v51 = vld [vmem:[%s6884_s1 + $0x2f0] ss:$12 sps:$4 sm:$0xff]  }
  0xf1   : > { %3458 = vmatpush2.bf16.msra.mxu0 %v5204_v52  ;;  %v5292_v52 = vld [vmem:[%s6884_s1 + $0xd68] ss:$12 sps:$4 sm:$0xff]  }
  0xf2   : > { %3501 = vmatpush2.bf16.msra.mxu1 %v5207_v53  ;;  %3459 = vmatprep.subr.bf16.mxu0 %v5212_v54  ;;  %v5296_v53 = vld [vmem:[%s6884_s1 + $0x230] ss:$12 sps:$4 sm:$0xff]   ;;  %v5299_v54 = vld [vmem:[%s6884_s1 + $0xd54] ss:$12 sps:$4 sm:$0xff]  }
  0xf3   : > { %3502 = vmatprep.subr.bf16.mxu1 %v5215_v55  ;;  %v5300_v55 = vld [vmem:[%s6884_s1 + $0x2d8] ss:$12 sps:$4 sm:$0xff]  }
  0xf5   : > { %3460 = vmatpush2.bf16.msra.mxu0 %v5210_v56  ;;  %v5297_v56 = vld [vmem:[%s6884_s1 + $0xd50] ss:$12 sps:$4 sm:$0xff]  }
  0xf6   : > { %3503 = vmatpush2.bf16.msra.mxu1 %v5213_v57  ;;  %3461 = vmatprep.subr.bf16.mxu0 %v5218_v58  ;;  %v5448_v57 = vld [vmem:[%s5645_s7] ss:$72 sps:$4 sm:$0xff]   ;;  %v5301_v58 = vld [vmem:[%s6884_s1 + $0x218] ss:$12 sps:$4 sm:$0xff]  }
  0xf7   : > { %3504 = vmatprep.subr.bf16.mxu1 %v5221_v59  ;;  %v5304_v59 = vld [vmem:[%s6884_s1 + $0xd3c] ss:$12 sps:$4 sm:$0xff]  }
  0xf9   : > { %3462 = vmatpush2.bf16.msra.mxu0 %v5216_v60  ;;  %v5305_v60 = vld [vmem:[%s6884_s1 + $0x2c0] ss:$12 sps:$4 sm:$0xff]  }
  0xfa   : > { %3505 = vmatpush2.bf16.msra.mxu1 %v5219_v61  ;;  %3463 = vmatprep.subr.bf16.mxu0 %v5224_v62  ;;  %v5302_v61 = vld [vmem:[%s6884_s1 + $0xd38] ss:$12 sps:$4 sm:$0xff]   ;;  %v5449_v62 = vld [vmem:[%s5645_s7 + $0xc] ss:$72 sps:$4 sm:$0xff]  }
  0xfb   : > { %3506 = vmatprep.subr.bf16.mxu1 %v5227_v63  ;;  %v5306_v63 = vld [vmem:[%s6884_s1 + $0x200] ss:$12 sps:$4 sm:$0xff]  }
  0xfd   : > { %3464 = vmatpush2.bf16.msra.mxu0 %v5222_v0  ;;  %v5309_v0 = vld [vmem:[%s6884_s1 + $0xd24] ss:$12 sps:$4 sm:$0xff]  }
  0xfe   : > { %3507 = vmatpush2.bf16.msra.mxu1 %v5225_v1  ;;  %3465 = vmatprep.subr.bf16.mxu0 %v5230_v2  ;;  %v5310_v1 = vld [vmem:[%s6884_s1 + $0x2a8] ss:$12 sps:$4 sm:$0xff]   ;;  %v5307_v2 = vld [vmem:[%s6884_s1 + $0xd20] ss:$12 sps:$4 sm:$0xff]  }
  0xff   : > { %3508 = vmatprep.subr.bf16.mxu1 %v5233_v3  ;;  %v5311_v3 = vld [vmem:[%s6884_s1 + $0x1e8] ss:$12 sps:$4 sm:$0xff]  }
 0x101   : > { %3466 = vmatpush2.bf16.msra.mxu0 %v5228_v4  ;;  %v5314_v4 = vld [vmem:[%s6884_s1 + $0xd0c] ss:$12 sps:$4 sm:$0xff]  }
 0x102   : > { %3509 = vmatpush2.bf16.msra.mxu1 %v5231_v5  ;;  %3467 = vmatprep.subr.bf16.mxu0 %v5236_v6  ;;  %v5315_v5 = vld [vmem:[%s6884_s1 + $0x290] ss:$12 sps:$4 sm:$0xff]   ;;  %v5312_v6 = vld [vmem:[%s6884_s1 + $0xd08] ss:$12 sps:$4 sm:$0xff]  }
 0x103   : > { %3510 = vmatprep.subr.bf16.mxu1 %v5239_v7  ;;  %v5316_v7 = vld [vmem:[%s6884_s1 + $0x1d0] ss:$12 sps:$4 sm:$0xff]  }
 0x105   : > { %3468 = vmatpush2.bf16.msra.mxu0 %v5234_v8  ;;  %v5319_v8 = vld [vmem:[%s6884_s1 + $0xcf4] ss:$12 sps:$4 sm:$0xff]  }
 0x106   : > { %3511 = vmatpush2.bf16.msra.mxu1 %v5237_v9  ;;  %3469 = vmatprep.subr.bf16.mxu0 %v5242_v10  ;;  %v5320_v9 = vld [vmem:[%s6884_s1 + $0x278] ss:$12 sps:$4 sm:$0xff]   ;;  %v5317_v10 = vld [vmem:[%s6884_s1 + $0xcf0] ss:$12 sps:$4 sm:$0xff]  }
 0x107   : > { %3512 = vmatprep.subr.bf16.mxu1 %v5245_v11  ;;  %v5321_v11 = vld [vmem:[%s6884_s1 + $0x1b8] ss:$12 sps:$4 sm:$0xff]  }
 0x109   : > { %3470 = vmatpush2.bf16.msra.mxu0 %v5240_v12  ;;  %v5324_v12 = vld [vmem:[%s6884_s1 + $0xcdc] ss:$12 sps:$4 sm:$0xff]  }
 0x10a   : > { %3513 = vmatpush2.bf16.msra.mxu1 %v5243_v13  ;;  %3525 = vmatprep.subr.bf16.mxu0 %v5254_v14  ;;  %v5325_v13 = vld [vmem:[%s6884_s1 + $0x260] ss:$12 sps:$4 sm:$0xff]   ;;  %v5322_v14 = vld [vmem:[%s6884_s1 + $0xcd8] ss:$12 sps:$4 sm:$0xff]  }
 0x10b   : > { %4634 = vmatprep.subr.bf16.mxu1 %v5255_v17  ;;  %v5330_v17 = vld [vmem:[%s6884_s1 + $0x248] ss:$12 sps:$4 sm:$0xff]  }
 0x10c   : > { %3472 = vmatmul.mubr.bf16.vlgmr.msra.gmra.mxu0 %v5246_v15  ;;  %v5326_v15 = vld [vmem:[%s6884_s1 + $0x1a0] ss:$12 sps:$4 sm:$0xff]  }
 0x10d   : > { %3515 = vmatmul.mubr.bf16.vlgmr.msra.gmra.mxu1 %v5249_v16  ;;  %3526 = vmatpush1.bf16.msra.mxu0 %v5252_v18  ;;  %v5329_v16 = vld [vmem:[%s6884_s1 + $0xcc4] ss:$12 sps:$4 sm:$0xff]   ;;  %v5327_v18 = vld [vmem:[%s6884_s1 + $0xcc0] ss:$12 sps:$4 sm:$0xff]  }
 0x10e   : > { %4635 = vmatpush3.bf16.msra.mxu1 %v5256_v19  ;;  %3527 = vmatprep.subr.bf16.mxu0 %v5259_v20  ;;  %v5331_v19 = vld [vmem:[%s6884_s1 + $0x188] ss:$12 sps:$4 sm:$0xff]   ;;  %v5335_v20 = vld [vmem:[%s6884_s1 + $0x470] ss:$12 sps:$4 sm:$0xff]  }
 0x10f   : > { %4636 = vmatprep.subr.bf16.mxu1 %v5260_v21  ;;  %3600 = vmatprep.mubr.bf16.mxu1 %v5447_v28  ;;  %v6496_v21 = vld [vmem:[%s5645_s7 + $0x40] ss:$72 sps:$4 sm:$0xff]  }
 0x110   : > { %3557 = vmatprep.mubr.bf16.mxu0 %v5334_v23  ;;  %v5336_v23 = vld [vmem:[%s6884_s1 + $0x3b0] ss:$12 sps:$4 sm:$0xff]  }
 0x111   : > { %3528 = vmatpush1.bf16.msra.mxu0 %v5257_v22  ;;  %v5337_v22 = vld [vmem:[%s6884_s1 + $0x5f0] ss:$12 sps:$4 sm:$0xff]  }
 0x112   : > { %4637 = vmatpush3.bf16.msra.mxu1 %v5261_v24  ;;  %3529 = vmatprep.subr.bf16.mxu0 %v5264_v25  ;;  %v5338_v24 = vld [vmem:[%s6884_s1 + $0x530] ss:$12 sps:$4 sm:$0xff]   ;;  %v5339_v25 = vld [vmem:[%s6884_s1 + $0x458] ss:$12 sps:$4 sm:$0xff]  }
 0x113   : > { %4638 = vmatprep.subr.bf16.mxu1 %v5265_v26  ;;  %v5341_v26 = vld [vmem:[%s6884_s1 + $0x5d8] ss:$12 sps:$4 sm:$0xff]   ;;  %v5450_v28 = vld [vmem:[%s5645_s7 + $0x8] ss:$72 sps:$4 sm:$0xff]  }
 0x115   : > { %3530 = vmatpush1.bf16.msra.mxu0 %v5262_v27  ;;  %v5340_v27 = vld [vmem:[%s6884_s1 + $0x398] ss:$12 sps:$4 sm:$0xff]  }
 0x116   : > { %4639 = vmatpush3.bf16.msra.mxu1 %v5266_v29  ;;  %3531 = vmatprep.subr.bf16.mxu0 %v5269_v30  ;;  %v5342_v29 = vld [vmem:[%s6884_s1 + $0x518] ss:$12 sps:$4 sm:$0xff]   ;;  %v5343_v30 = vld [vmem:[%s6884_s1 + $0x440] ss:$12 sps:$4 sm:$0xff]  }
 0x117   : > { %4640 = vmatprep.subr.bf16.mxu1 %v5270_v31  ;;  %v5345_v31 = vld [vmem:[%s6884_s1 + $0x5c0] ss:$12 sps:$4 sm:$0xff]  }
 0x119   : > { %3532 = vmatpush1.bf16.msra.mxu0 %v5267_v32  ;;  %v5344_v32 = vld [vmem:[%s6884_s1 + $0x380] ss:$12 sps:$4 sm:$0xff]  }
 0x11a   : > { %4641 = vmatpush3.bf16.msra.mxu1 %v5271_v33  ;;  %3533 = vmatprep.subr.bf16.mxu0 %v5274_v34  ;;  %v5451_v33 = vld [vmem:[%s5645_s7 + $0x14] ss:$72 sps:$4 sm:$0xff]  }
 0x11b   : > { %4642 = vmatprep.subr.bf16.mxu1 %v5275_v35  ;;  %v5452_v34 = vld [vmem:[%s5645_s7 + $0x1c] ss:$72 sps:$4 sm:$0xff]   ;;  %v5346_v35 = vld [vmem:[%s6884_s1 + $0x500] ss:$12 sps:$4 sm:$0xff]  }
 0x11d   : > { %3534 = vmatpush1.bf16.msra.mxu0 %v5272_v36  ;;  %v5347_v36 = vld [vmem:[%s6884_s1 + $0x428] ss:$12 sps:$4 sm:$0xff]  }
 0x11e   : > { %4643 = vmatpush3.bf16.msra.mxu1 %v5276_v37  ;;  %3535 = vmatprep.subr.bf16.mxu0 %v5279_v38  ;;  %v5349_v37 = vld [vmem:[%s6884_s1 + $0x5a8] ss:$12 sps:$4 sm:$0xff]  }
 0x11f   : > { %4644 = vmatprep.subr.bf16.mxu1 %v5280_v39  ;;  %v5348_v38 = vld [vmem:[%s6884_s1 + $0x368] ss:$12 sps:$4 sm:$0xff]  }
 0x120   : > { %v5350_v39 = vld [vmem:[%s6884_s1 + $0x4e8] ss:$12 sps:$4 sm:$0xff]  }
 0x121   : > { %3536 = vmatpush1.bf16.msra.mxu0 %v5277_v40  ;;  %v5351_v40 = vld [vmem:[%s6884_s1 + $0x410] ss:$12 sps:$4 sm:$0xff]  }
 0x122   : > { %4645 = vmatpush3.bf16.msra.mxu1 %v5281_v41  ;;  %3537 = vmatprep.subr.bf16.mxu0 %v5284_v42  ;;  %v5353_v41 = vld [vmem:[%s6884_s1 + $0x590] ss:$12 sps:$4 sm:$0xff]  }
 0x123   : > { %4646 = vmatprep.subr.bf16.mxu1 %v5285_v43  ;;  %v5352_v42 = vld [vmem:[%s6884_s1 + $0x350] ss:$12 sps:$4 sm:$0xff]  }
 0x124   : > { %v5354_v43 = vld [vmem:[%s6884_s1 + $0x4d0] ss:$12 sps:$4 sm:$0xff]  }
 0x125   : > { %3538 = vmatpush1.bf16.msra.mxu0 %v5282_v44  ;;  %v5355_v44 = vld [vmem:[%s6884_s1 + $0x3f8] ss:$12 sps:$4 sm:$0xff]  }
 0x126   : > { %4647 = vmatpush3.bf16.msra.mxu1 %v5286_v45  ;;  %3539 = vmatprep.subr.bf16.mxu0 %v5289_v46  ;;  %v5357_v45 = vld [vmem:[%s6884_s1 + $0x578] ss:$12 sps:$4 sm:$0xff]  }
 0x127   : > { %4648 = vmatprep.subr.bf16.mxu1 %v5290_v47  ;;  %v5356_v46 = vld [vmem:[%s6884_s1 + $0x338] ss:$12 sps:$4 sm:$0xff]  }
 0x128   : > { %v5358_v47 = vld [vmem:[%s6884_s1 + $0x4b8] ss:$12 sps:$4 sm:$0xff]  }
 0x129   : > { %3540 = vmatpush1.bf16.msra.mxu0 %v5287_v48  ;;  %v5359_v48 = vld [vmem:[%s6884_s1 + $0x3e0] ss:$12 sps:$4 sm:$0xff]  }
 0x12a   : > { %4649 = vmatpush3.bf16.msra.mxu1 %v5291_v49  ;;  %3541 = vmatprep.subr.bf16.mxu0 %v5294_v50  ;;  %v5361_v49 = vld [vmem:[%s6884_s1 + $0x560] ss:$12 sps:$4 sm:$0xff]  }
 0x12b   : > { %4656 = vmatprep.subr.bf16.mxu1 %v5295_v51  ;;  %v5360_v50 = vld [vmem:[%s6884_s1 + $0x320] ss:$12 sps:$4 sm:$0xff]  }
 0x12c   : > { %v5362_v51 = vld [vmem:[%s6884_s1 + $0x4a0] ss:$12 sps:$4 sm:$0xff]  }
 0x12d   : > { %3601 = vmatmul.mubr.bf16.vlgmr.msra.gmra.mxu1 %v5448_v57  ;;  %3542 = vmatpush2.bf16.msra.mxu0 %v5292_v52  ;;  %v5363_v52 = vld [vmem:[%s6884_s1 + $0x3c8] ss:$12 sps:$4 sm:$0xff]   ;;  %v5369_v57 = vld [vmem:[%s6884_s1 + $0x8f0] ss:$12 sps:$4 sm:$0xff]  }
 0x12e   : > { %4657 = vmatpush3.bf16.msra.mxu1 %v5296_v53  ;;  %3543 = vmatprep.subr.bf16.mxu0 %v5299_v54  ;;  %v5365_v53 = vld [vmem:[%s6884_s1 + $0x548] ss:$12 sps:$4 sm:$0xff]  }
 0x12f   : > { %4658 = vmatprep.subr.bf16.mxu1 %v5300_v55  ;;  %3641 = vmatprep.mubr.bf16.mxu1 %v5449_v62  ;;  %v5364_v54 = vld [vmem:[%s6884_s1 + $0x308] ss:$12 sps:$4 sm:$0xff]   ;;  %v5453_v62 = vld [vmem:[%s5645_s7 + $0x10] ss:$72 sps:$4 sm:$0xff]  }
 0x130   : > { %v5366_v55 = vld [vmem:[%s6884_s1 + $0x488] ss:$12 sps:$4 sm:$0xff]  }
 0x131   : > { %3544 = vmatpush2.bf16.msra.mxu0 %v5297_v56  ;;  %v5367_v56 = vld [vmem:[%s6884_s1 + $0x770] ss:$12 sps:$4 sm:$0xff]  }
 0x132   : > { %4659 = vmatpush3.bf16.msra.mxu1 %v5301_v58  ;;  %3545 = vmatprep.subr.bf16.mxu0 %v5304_v59  ;;  %v5368_v58 = vld [vmem:[%s6884_s1 + $0x6b0] ss:$12 sps:$4 sm:$0xff]  }
 0x133   : > { %4660 = vmatprep.subr.bf16.mxu1 %v5305_v60  ;;  %v5370_v59 = vld [vmem:[%s6884_s1 + $0x830] ss:$12 sps:$4 sm:$0xff]   ;;  %v5371_v60 = vld [vmem:[%s6884_s1 + $0x758] ss:$12 sps:$4 sm:$0xff]  }
 0x135   : > { %3546 = vmatpush2.bf16.msra.mxu0 %v5302_v61  ;;  %v5373_v61 = vld [vmem:[%s6884_s1 + $0x8d8] ss:$12 sps:$4 sm:$0xff]  }
 0x136   : > { %4661 = vmatpush3.bf16.msra.mxu1 %v5306_v63  ;;  %3547 = vmatprep.subr.bf16.mxu0 %v5309_v0  ;;  %v5454_v63 = vld [vmem:[%s5645_s7 + $0x18] ss:$72 sps:$4 sm:$0xff]  }
 0x137   : > { %4662 = vmatprep.subr.bf16.mxu1 %v5310_v1  ;;  %v5372_v0 = vld [vmem:[%s6884_s1 + $0x698] ss:$12 sps:$4 sm:$0xff]  }
 0x138   : > { %v5374_v1 = vld [vmem:[%s6884_s1 + $0x818] ss:$12 sps:$4 sm:$0xff]  }
 0x139   : > { %3548 = vmatpush2.bf16.msra.mxu0 %v5307_v2  ;;  %v5375_v2 = vld [vmem:[%s6884_s1 + $0x740] ss:$12 sps:$4 sm:$0xff]  }
 0x13a   : > { %4663 = vmatpush3.bf16.msra.mxu1 %v5311_v3  ;;  %3549 = vmatprep.subr.bf16.mxu0 %v5314_v4  ;;  %v5377_v3 = vld [vmem:[%s6884_s1 + $0x8c0] ss:$12 sps:$4 sm:$0xff]  }
 0x13b   : > { %4664 = vmatprep.subr.bf16.mxu1 %v5315_v5  ;;  %v5455_v4 = vld [vmem:[%s5645_s7 + $0x24] ss:$72 sps:$4 sm:$0xff]  }
 0x13c   : > { %v5456_v5 = vld [vmem:[%s5645_s7 + $0x2c] ss:$72 sps:$4 sm:$0xff]  }
 0x13d   : > { %3550 = vmatpush2.bf16.msra.mxu0 %v5312_v6  ;;  %v5376_v6 = vld [vmem:[%s6884_s1 + $0x680] ss:$12 sps:$4 sm:$0xff]  }
 0x13e   : > { %4665 = vmatpush3.bf16.msra.mxu1 %v5316_v7  ;;  %3551 = vmatprep.subr.bf16.mxu0 %v5319_v8  ;;  %v5378_v7 = vld [vmem:[%s6884_s1 + $0x800] ss:$12 sps:$4 sm:$0xff]   ;;  %v5379_v8 = vld [vmem:[%s6884_s1 + $0x728] ss:$12 sps:$4 sm:$0xff]  }
 0x13f   : > { %4666 = vmatprep.subr.bf16.mxu1 %v5320_v9  ;;  %v5381_v9 = vld [vmem:[%s6884_s1 + $0x8a8] ss:$12 sps:$4 sm:$0xff]  }
 0x141   : > { %3552 = vmatpush2.bf16.msra.mxu0 %v5317_v10  ;;  %v5380_v10 = vld [vmem:[%s6884_s1 + $0x668] ss:$12 sps:$4 sm:$0xff]  }
 0x142   : > { %4667 = vmatpush3.bf16.msra.mxu1 %v5321_v11  ;;  %3553 = vmatprep.subr.bf16.mxu0 %v5324_v12  ;;  %v5382_v11 = vld [vmem:[%s6884_s1 + $0x7e8] ss:$12 sps:$4 sm:$0xff]   ;;  %v5383_v12 = vld [vmem:[%s6884_s1 + $0x710] ss:$12 sps:$4 sm:$0xff]  }
 0x143   : > { %4668 = vmatprep.subr.bf16.mxu1 %v5325_v13  ;;  %v5385_v13 = vld [vmem:[%s6884_s1 + $0x890] ss:$12 sps:$4 sm:$0xff]  }
 0x145   : > { %3554 = vmatpush2.bf16.msra.mxu0 %v5322_v14  ;;  %v5384_v14 = vld [vmem:[%s6884_s1 + $0x650] ss:$12 sps:$4 sm:$0xff]  }
 0x146   : > { %4669 = vmatpush3.bf16.msra.mxu1 %v5326_v15  ;;  %3555 = vmatprep.subr.bf16.mxu0 %v5329_v16  ;;  %v5386_v15 = vld [vmem:[%s6884_s1 + $0x7d0] ss:$12 sps:$4 sm:$0xff]   ;;  %v5387_v16 = vld [vmem:[%s6884_s1 + $0x6f8] ss:$12 sps:$4 sm:$0xff]  }
 0x147   : > { %4670 = vmatprep.subr.bf16.mxu1 %v5330_v17  ;;  %v5389_v17 = vld [vmem:[%s6884_s1 + $0x878] ss:$12 sps:$4 sm:$0xff]  }
 0x149   : > { %3556 = vmatpush2.bf16.msra.mxu0 %v5327_v18  ;;  %v5388_v18 = vld [vmem:[%s6884_s1 + $0x638] ss:$12 sps:$4 sm:$0xff]  }
 0x14a   : > { %4671 = vmatpush3.bf16.msra.mxu1 %v5331_v19  ;;  %4678 = vmatprep.subr.bf16.mxu0 %v5335_v20  ;;  %v5390_v19 = vld [vmem:[%s6884_s1 + $0x7b8] ss:$12 sps:$4 sm:$0xff]   ;;  %v5391_v20 = vld [vmem:[%s6884_s1 + $0x6e0] ss:$12 sps:$4 sm:$0xff]  }
 0x14b   : > { %4700 = vmatprep.subr.bf16.mxu1 %v5337_v22  ;;  %v5393_v22 = vld [vmem:[%s6884_s1 + $0x860] ss:$12 sps:$4 sm:$0xff]  }
 0x14c   : > { %3558 = vmatmul.mubr.bf16.vlgmr.msra.gmra.mxu0 %v6496_v21 }
 0x14d   : > { %3642 = vmatmul.mubr.bf16.vlgmr.msra.gmra.mxu1 %v5450_v28  ;;  %4679 = vmatpush3.bf16.msra.mxu0 %v5336_v23  ;;  %v5392_v23 = vld [vmem:[%s6884_s1 + $0x620] ss:$12 sps:$4 sm:$0xff]   ;;  %v5398_v28 = vld [vmem:[%s6884_s1 + $0x788] ss:$12 sps:$4 sm:$0xff]  }
 0x14e   : > { %4701 = vmatpush3.bf16.msra.mxu1 %v5338_v24  ;;  %4680 = vmatprep.subr.bf16.mxu0 %v5339_v25  ;;  %v5394_v24 = vld [vmem:[%s6884_s1 + $0x7a0] ss:$12 sps:$4 sm:$0xff]   ;;  %v5395_v25 = vld [vmem:[%s6884_s1 + $0x6c8] ss:$12 sps:$4 sm:$0xff]  }
 0x14f   : > { %4702 = vmatprep.subr.bf16.mxu1 %v5341_v26  ;;  %3682 = vmatprep.mubr.bf16.mxu0 %v5451_v33  ;;  %v5397_v26 = vld [vmem:[%s6884_s1 + $0x848] ss:$12 sps:$4 sm:$0xff]   ;;  %v5403_v33 = vld [vmem:[%s6884_s1 + $0xa58] ss:$12 sps:$4 sm:$0xff]  }
 0x150   : > { %3723 = vmatprep.mubr.bf16.mxu1 %v5452_v34  ;;  %v5405_v34 = vld [vmem:[%s6884_s1 + $0xbd8] ss:$12 sps:$4 sm:$0xff]  }
 0x151   : > { %4681 = vmatpush3.bf16.msra.mxu0 %v5340_v27  ;;  %v5396_v27 = vld [vmem:[%s6884_s1 + $0x608] ss:$12 sps:$4 sm:$0xff]  }
 0x152   : > { %4703 = vmatpush3.bf16.msra.mxu1 %v5342_v29  ;;  %4682 = vmatprep.subr.bf16.mxu0 %v5343_v30  ;;  %v5399_v29 = vld [vmem:[%s6884_s1 + $0xa70] ss:$12 sps:$4 sm:$0xff]  }
 0x153   : > { %4704 = vmatprep.subr.bf16.mxu1 %v5345_v31  ;;  %v5401_v30 = vld [vmem:[%s6884_s1 + $0xbf0] ss:$12 sps:$4 sm:$0xff]  }
 0x154   : > { %v5400_v31 = vld [vmem:[%s6884_s1 + $0x9b0] ss:$12 sps:$4 sm:$0xff]  }
 0x155   : > { %4683 = vmatpush3.bf16.msra.mxu0 %v5344_v32  ;;  %v5402_v32 = vld [vmem:[%s6884_s1 + $0xb30] ss:$12 sps:$4 sm:$0xff]  }
 0x156   : > { %4705 = vmatpush3.bf16.msra.mxu1 %v5346_v35  ;;  %4684 = vmatprep.subr.bf16.mxu0 %v5347_v36  ;;  %v5457_v35 = vld [vmem:[%s5645_s7 + $0x20] ss:$72 sps:$4 sm:$0xff]  }
 0x157   : > { %4706 = vmatprep.subr.bf16.mxu1 %v5349_v37  ;;  %v5458_v36 = vld [vmem:[%s5645_s7 + $0x28] ss:$72 sps:$4 sm:$0xff]   ;;  %v5404_v37 = vld [vmem:[%s6884_s1 + $0x998] ss:$12 sps:$4 sm:$0xff]  }
 0x159   : > { %4685 = vmatpush3.bf16.msra.mxu0 %v5348_v38  ;;  %v5406_v38 = vld [vmem:[%s6884_s1 + $0xb18] ss:$12 sps:$4 sm:$0xff]  }
 0x15a   : > { %4707 = vmatpush3.bf16.msra.mxu1 %v5350_v39  ;;  %4686 = vmatprep.subr.bf16.mxu0 %v5351_v40  ;;  %v5407_v39 = vld [vmem:[%s6884_s1 + $0xa40] ss:$12 sps:$4 sm:$0xff]  }
 0x15b   : > { %4708 = vmatprep.subr.bf16.mxu1 %v5353_v41  ;;  %v5409_v40 = vld [vmem:[%s6884_s1 + $0xbc0] ss:$12 sps:$4 sm:$0xff]   ;;  %v5459_v41 = vld [vmem:[%s5645_s7 + $0x34] ss:$72 sps:$4 sm:$0xff]  }
 0x15d   : > { %4687 = vmatpush3.bf16.msra.mxu0 %v5352_v42  ;;  %v5460_v42 = vld [vmem:[%s5645_s7 + $0x3c] ss:$72 sps:$4 sm:$0xff]  }
 0x15e   : > { %4709 = vmatpush3.bf16.msra.mxu1 %v5354_v43  ;;  %4688 = vmatprep.subr.bf16.mxu0 %v5355_v44  ;;  %v5408_v43 = vld [vmem:[%s6884_s1 + $0x980] ss:$12 sps:$4 sm:$0xff]  }
 0x15f   : > { %4710 = vmatprep.subr.bf16.mxu1 %v5357_v45  ;;  %v5410_v44 = vld [vmem:[%s6884_s1 + $0xb00] ss:$12 sps:$4 sm:$0xff]   ;;  %v5411_v45 = vld [vmem:[%s6884_s1 + $0xa28] ss:$12 sps:$4 sm:$0xff]  }
 0x161   : > { %4689 = vmatpush3.bf16.msra.mxu0 %v5356_v46  ;;  %v5413_v46 = vld [vmem:[%s6884_s1 + $0xba8] ss:$12 sps:$4 sm:$0xff]  }
 0x162   : > { %4711 = vmatpush3.bf16.msra.mxu1 %v5358_v47  ;;  %4690 = vmatprep.subr.bf16.mxu0 %v5359_v48  ;;  %v5412_v47 = vld [vmem:[%s6884_s1 + $0x968] ss:$12 sps:$4 sm:$0xff]  }
 0x163   : > { %4712 = vmatprep.subr.bf16.mxu1 %v5361_v49  ;;  %v5414_v48 = vld [vmem:[%s6884_s1 + $0xae8] ss:$12 sps:$4 sm:$0xff]   ;;  %v5415_v49 = vld [vmem:[%s6884_s1 + $0xa10] ss:$12 sps:$4 sm:$0xff]  }
 0x165   : > { %4691 = vmatpush3.bf16.msra.mxu0 %v5360_v50  ;;  %v5417_v50 = vld [vmem:[%s6884_s1 + $0xb90] ss:$12 sps:$4 sm:$0xff]  }
 0x166   : > { %4713 = vmatpush3.bf16.msra.mxu1 %v5362_v51  ;;  %4692 = vmatprep.subr.bf16.mxu0 %v5363_v52  ;;  %v5416_v51 = vld [vmem:[%s6884_s1 + $0x950] ss:$12 sps:$4 sm:$0xff]  }
 0x167   : > { %4714 = vmatprep.subr.bf16.mxu1 %v5365_v53  ;;  %v5418_v52 = vld [vmem:[%s6884_s1 + $0xad0] ss:$12 sps:$4 sm:$0xff]   ;;  %v5419_v53 = vld [vmem:[%s6884_s1 + $0x9f8] ss:$12 sps:$4 sm:$0xff]  }
 0x169   : > { %4693 = vmatpush3.bf16.msra.mxu0 %v5364_v54  ;;  %v5421_v54 = vld [vmem:[%s6884_s1 + $0xb78] ss:$12 sps:$4 sm:$0xff]  }
 0x16a   : > { %4715 = vmatpush3.bf16.msra.mxu1 %v5366_v55  ;;  %4722 = vmatprep.subr.bf16.mxu0 %v5367_v56  ;;  %v5420_v55 = vld [vmem:[%s6884_s1 + $0x938] ss:$12 sps:$4 sm:$0xff]  }
 0x16b   : > { %4744 = vmatprep.subr.bf16.mxu1 %v5369_v57  ;;  %v5422_v56 = vld [vmem:[%s6884_s1 + $0xab8] ss:$12 sps:$4 sm:$0xff]   ;;  %v5423_v57 = vld [vmem:[%s6884_s1 + $0x9e0] ss:$12 sps:$4 sm:$0xff]  }
 0x16c   : > { %3683 = vmatmul.mubr.bf16.vlgmr.msra.gmra.mxu0 %v5453_v62  ;;  %v5429_v62 = vld [vmem:[%s6884_s1 + $0xb48] ss:$12 sps:$4 sm:$0xff]  }
 0x16d   : > { %3724 = vmatmul.mubr.bf16.vlgmr.msra.gmra.mxu1 %v5454_v63  ;;  %4723 = vmatpush3.bf16.msra.mxu0 %v5368_v58  ;;  %v5425_v58 = vld [vmem:[%s6884_s1 + $0xb60] ss:$12 sps:$4 sm:$0xff]   ;;  %v5428_v63 = vld [vmem:[%s6884_s1 + $0x908] ss:$12 sps:$4 sm:$0xff]  }
 0x16e   : > { %4745 = vmatpush3.bf16.msra.mxu1 %v5370_v59  ;;  %4724 = vmatprep.subr.bf16.mxu0 %v5371_v60  ;;  %v5424_v59 = vld [vmem:[%s6884_s1 + $0x920] ss:$12 sps:$4 sm:$0xff]  }
 0x16f   : > { %4746 = vmatprep.subr.bf16.mxu1 %v5373_v61  ;;  %3764 = vmatprep.mubr.bf16.mxu0 %v5455_v4  ;;  %v5426_v60 = vld [vmem:[%s6884_s1 + $0xaa0] ss:$12 sps:$4 sm:$0xff]   ;;  %v5427_v61 = vld [vmem:[%s6884_s1 + $0x9c8] ss:$12 sps:$4 sm:$0xff]   ;;  %v5461_v4 = vld [vmem:[%s5645_s7 + $0x30] ss:$72 sps:$4 sm:$0xff]  }
 0x170   : > { %3805 = vmatprep.mubr.bf16.mxu1 %v5456_v5  ;;  %v5462_v5 = vld [vmem:[%s5645_s7 + $0x38] ss:$72 sps:$4 sm:$0xff]  }
 0x171   : > { %4725 = vmatpush3.bf16.msra.mxu0 %v5372_v0  ;;  %v5430_v0 = vld [vmem:[%s6884_s1 + $0xa88] ss:$12 sps:$4 sm:$0xff]  }
 0x172   : > { %4747 = vmatpush3.bf16.msra.mxu1 %v5374_v1  ;;  %4726 = vmatprep.subr.bf16.mxu0 %v5375_v2  ;;  %v5431_v1 = vld [vmem:[%s6884_s1 + $0xd70] ss:$12 sps:$4 sm:$0xff]  }
 0x173   : > { %4748 = vmatprep.subr.bf16.mxu1 %v5377_v3  ;;  %v5432_v2 = vld [vmem:[%s6884_s1 + $0xcb0] ss:$12 sps:$4 sm:$0xff]   ;;  %v5433_v3 = vld [vmem:[%s6884_s1 + $0xd58] ss:$12 sps:$4 sm:$0xff]  }
 0x175   : > { %4727 = vmatpush3.bf16.msra.mxu0 %v5376_v6  ;;  %v5434_v6 = vld [vmem:[%s6884_s1 + $0xc98] ss:$12 sps:$4 sm:$0xff]  }
 0x176   : > { %4749 = vmatpush3.bf16.msra.mxu1 %v5378_v7  ;;  %4728 = vmatprep.subr.bf16.mxu0 %v5379_v8  ;;  %v5463_v7 = vld [vmem:[%s5645_s7 + $0x44] ss:$72 sps:$4 sm:$0xff]  }
 0x177   : > { %4750 = vmatprep.subr.bf16.mxu1 %v5381_v9  ;;  %v5435_v8 = vld [vmem:[%s6884_s1 + $0xd40] ss:$12 sps:$4 sm:$0xff]  }
 0x178   : > { %v5436_v9 = vld [vmem:[%s6884_s1 + $0xc80] ss:$12 sps:$4 sm:$0xff]  }
 0x179   : > { %4729 = vmatpush3.bf16.msra.mxu0 %v5380_v10  ;;  %v5437_v10 = vld [vmem:[%s6884_s1 + $0xd28] ss:$12 sps:$4 sm:$0xff]  }
 0x17a   : > { %4751 = vmatpush3.bf16.msra.mxu1 %v5382_v11  ;;  %4730 = vmatprep.subr.bf16.mxu0 %v5383_v12  ;;  %v5438_v11 = vld [vmem:[%s6884_s1 + $0xc68] ss:$12 sps:$4 sm:$0xff]   ;;  %v5439_v12 = vld [vmem:[%s6884_s1 + $0xd10] ss:$12 sps:$4 sm:$0xff]  }
 0x17b   : > { %4752 = vmatprep.subr.bf16.mxu1 %v5385_v13  ;;  %v5440_v13 = vld [vmem:[%s6884_s1 + $0xc50] ss:$12 sps:$4 sm:$0xff]  }
 0x17d   : > { %4731 = vmatpush3.bf16.msra.mxu0 %v5384_v14  ;;  %v5441_v14 = vld [vmem:[%s6884_s1 + $0xcf8] ss:$12 sps:$4 sm:$0xff]  }
 0x17e   : > { %4753 = vmatpush3.bf16.msra.mxu1 %v5386_v15  ;;  %4732 = vmatprep.subr.bf16.mxu0 %v5387_v16  ;;  %v5442_v15 = vld [vmem:[%s6884_s1 + $0xc38] ss:$12 sps:$4 sm:$0xff]   ;;  %v5443_v16 = vld [vmem:[%s6884_s1 + $0xce0] ss:$12 sps:$4 sm:$0xff]  }
 0x17f   : > { %4754 = vmatprep.subr.bf16.mxu1 %v5389_v17  ;;  %v5444_v17 = vld [vmem:[%s6884_s1 + $0xc20] ss:$12 sps:$4 sm:$0xff]  }
 0x181   : > { %4733 = vmatpush3.bf16.msra.mxu0 %v5388_v18  ;;  %v5445_v18 = vld [vmem:[%s6884_s1 + $0xcc8] ss:$12 sps:$4 sm:$0xff]  }
 0x182   : > { %4755 = vmatpush3.bf16.msra.mxu1 %v5390_v19  ;;  %4734 = vmatprep.subr.bf16.mxu0 %v5391_v20  ;;  %v5446_v19 = vld [vmem:[%s6884_s1 + $0xc08] ss:$12 sps:$4 sm:$0xff]   ;;  %v3215_v20 = vpop.f32.mrf.mxu0 }
 0x183   : > { %4756 = vmatprep.subr.bf16.mxu1 %v5393_v22  ;;  %v3258_v22 = vpop.f32.mrf.mxu1 }
 0x185   : > { %4735 = vmatpush3.bf16.msra.mxu0 %v5392_v23  ;;  %v3217_v23 = vpop.f32.mrf.mxu0 }
 0x186   : > { %4757 = vmatpush3.bf16.msra.mxu1 %v5394_v24  ;;  %4736 = vmatprep.subr.bf16.mxu0 %v5395_v25  ;;  %v3260_v24 = vpop.f32.mrf.mxu1 }
 0x187   : > { %4758 = vmatprep.subr.bf16.mxu1 %v5397_v26  ;;  %v3219_v25 = vpop.f32.mrf.mxu0 }
 0x188   : > { %v3262_v26 = vpop.f32.mrf.mxu1 }
 0x189   : > { %4737 = vmatpush3.bf16.msra.mxu0 %v5396_v27  ;;  %v3221_v27 = vpop.f32.mrf.mxu0 }
 0x18a   : > { %4759 = vmatpush3.bf16.msra.mxu1 %v5398_v28  ;;  %4766 = vmatprep.subr.bf16.mxu0 %v5399_v29  ;;  %v3264_v29 = vpop.f32.mrf.mxu1 }
 0x18b   : > { %4788 = vmatprep.subr.bf16.mxu1 %v5401_v30  ;;  %v3301_v28 = vpop.f32.mrf.mxu0 }
 0x18c   : > { %3765 = vmatmul.mubr.bf16.vlgmr.msra.gmra.mxu0 %v5457_v35 }
 0x18d   : > { %3806 = vmatmul.mubr.bf16.vlgmr.msra.gmra.mxu1 %v5458_v36  ;;  %4767 = vmatpush3.bf16.msra.mxu0 %v5400_v31  ;;  %v3303_v30 = vpop.f32.mrf.mxu0  ;;  %v3344_v31 = vpop.f32.mrf.mxu1 }
 0x18e   : > { %4789 = vmatpush3.bf16.msra.mxu1 %v5402_v32  ;;  %4768 = vmatprep.subr.bf16.mxu0 %v5403_v33 }
 0x18f   : > { %4790 = vmatprep.subr.bf16.mxu1 %v5405_v34  ;;  %3846 = vmatprep.mubr.bf16.mxu0 %v5459_v41  ;;  %v3305_v32 = vpop.f32.mrf.mxu0  ;;  %v3346_v33 = vpop.f32.mrf.mxu1  ;;  %v3259_v41 = vadd.f32 %v3258_v22, %v3215_v20 }
 0x190   : > { %3887 = vmatprep.mubr.bf16.mxu1 %v5460_v42  ;;  %v3261_v42 = vadd.f32 %v3260_v24, %v3217_v23 }
 0x191   : > { %4769 = vmatpush3.bf16.msra.mxu0 %v5404_v37  ;;  %v3307_v34 = vpop.f32.mrf.mxu0  ;;  %v3348_v35 = vpop.f32.mrf.mxu1 }
 0x192   : > { %4791 = vmatpush3.bf16.msra.mxu1 %v5406_v38  ;;  %4770 = vmatprep.subr.bf16.mxu0 %v5407_v39 }
 0x193   : > { %4792 = vmatprep.subr.bf16.mxu1 %v5409_v40  ;;  %v3387_v36 = vpop.f32.mrf.mxu0  ;;  %v3350_v37 = vpop.f32.mrf.mxu1 }
 0x195   : > { %4771 = vmatpush3.bf16.msra.mxu0 %v5408_v43  ;;  %v3389_v38 = vpop.f32.mrf.mxu0  ;;  %v3430_v39 = vpop.f32.mrf.mxu1 }
 0x196   : > { %4793 = vmatpush3.bf16.msra.mxu1 %v5410_v44  ;;  %4772 = vmatprep.subr.bf16.mxu0 %v5411_v45  ;;  %v3263_v45 = vadd.f32 %v3262_v26, %v3219_v25 }
 0x197   : > { %4794 = vmatprep.subr.bf16.mxu1 %v5413_v46  ;;  %v3432_v40 = vpop.f32.mrf.mxu1  ;;  %v3302_v46 = vadd.f32 %v3301_v28, %v3259_v41 }
 0x199   : > { %4773 = vmatpush3.bf16.msra.mxu0 %v5412_v47  ;;  %v3434_v44 = vpop.f32.mrf.mxu1  ;;  %v3304_v47 = vadd.f32 %v3303_v30, %v3261_v42 }
 0x19a   : > { %4795 = vmatpush3.bf16.msra.mxu1 %v5414_v48  ;;  %4774 = vmatprep.subr.bf16.mxu0 %v5415_v49  ;;  %v3265_v49 = vadd.f32 %v3264_v29, %v3221_v27 }
 0x19b   : > { %4796 = vmatprep.subr.bf16.mxu1 %v5417_v50  ;;  %v3306_v50 = vadd.f32 %v3305_v32, %v3263_v45 }
 0x19d   : > { %4775 = vmatpush3.bf16.msra.mxu0 %v5416_v51  ;;  %v3436_v51 = vpop.f32.mrf.mxu1 }
 0x19e   : > { %4797 = vmatpush3.bf16.msra.mxu1 %v5418_v52  ;;  %4776 = vmatprep.subr.bf16.mxu0 %v5419_v53  ;;  %v3345_v52 = vadd.f32 %v3344_v31, %v3302_v46  ;;  %v3347_v53 = vadd.f32 %v3346_v33, %v3304_v47 }
 0x19f   : > { %4798 = vmatprep.subr.bf16.mxu1 %v5421_v54  ;;  %v3308_v54 = vadd.f32 %v3307_v34, %v3265_v49 }
 0x1a1   : > { %4777 = vmatpush3.bf16.msra.mxu0 %v5420_v55 }
 0x1a2   : > { %4799 = vmatpush3.bf16.msra.mxu1 %v5422_v56  ;;  %4778 = vmatprep.subr.bf16.mxu0 %v5423_v57  ;;  %v3349_v57 = vadd.f32 %v3348_v35, %v3306_v50 }
 0x1a3   : > { %4800 = vmatprep.subr.bf16.mxu1 %v5425_v58  ;;  %v3388_v58 = vadd.f32 %v3387_v36, %v3345_v52 }
 0x1a5   : > { %4779 = vmatpush3.bf16.msra.mxu0 %v5424_v59  ;;  %v3390_v59 = vadd.f32 %v3389_v38, %v3347_v53 }
 0x1a6   : > { %4801 = vmatpush3.bf16.msra.mxu1 %v5426_v60  ;;  %4780 = vmatprep.subr.bf16.mxu0 %v5427_v61  ;;  %v3351_v60 = vadd.f32 %v3350_v37, %v3308_v54 }
 0x1a7   : > { %4802 = vmatprep.subr.bf16.mxu1 %v5429_v62 }
 0x1a9   : > { %4781 = vmatpush3.bf16.msra.mxu0 %v5428_v63 }
 0x1aa   : > { %4803 = vmatpush3.bf16.msra.mxu1 %v5430_v0  ;;  %4810 = vmatprep.subr.bf16.mxu0 %v5431_v1  ;;  %v3431_v0 = vadd.f32 %v3430_v39, %v3388_v58  ;;  %v3433_v1 = vadd.f32 %v3432_v40, %v3390_v59 }
 0x1ac   : > { %3847 = vmatmul.mubr.bf16.vlgmr.msra.gmra.mxu0 %v5461_v4 }
 0x1ad   : > { %3888 = vmatmul.mubr.bf16.vlgmr.msra.gmra.mxu1 %v5462_v5  ;;  %4811 = vmatpush3.bf16.msra.mxu0 %v5432_v2 }
 0x1ae   : > { %3928 = vmatprep.mubr.bf16.mxu0 %v5463_v7  ;;  %4812 = vmatprep.subr.bf16.mxu0 %v5433_v3 }
 0x1b1   : > { %4813 = vmatpush3.bf16.msra.mxu0 %v5434_v6 }
 0x1b2   : > { %4814 = vmatprep.subr.bf16.mxu0 %v5435_v8 }
 0x1b5   : > { %4815 = vmatpush3.bf16.msra.mxu0 %v5436_v9 }
 0x1b6   : > { %4816 = vmatprep.subr.bf16.mxu0 %v5437_v10 }
 0x1b9   : > { %4817 = vmatpush3.bf16.msra.mxu0 %v5438_v11 }
 0x1ba   : > { %4818 = vmatprep.subr.bf16.mxu0 %v5439_v12 }
 0x1bd   : > { %4819 = vmatpush3.bf16.msra.mxu0 %v5440_v13 }
 0x1be   : > { %4820 = vmatprep.subr.bf16.mxu0 %v5441_v14 }
 0x1c1   : > { %4821 = vmatpush3.bf16.msra.mxu0 %v5442_v15 }
 0x1c2   : > { %4822 = vmatprep.subr.bf16.mxu0 %v5443_v16 }
 0x1c5   : > { %4823 = vmatpush3.bf16.msra.mxu0 %v5444_v17 }
 0x1c6   : > { %4824 = vmatprep.subr.bf16.mxu0 %v5445_v18 }
 0x1c9   : > { %4825 = vmatpush3.bf16.msra.mxu0 %v5446_v19 }
 0x1cc   : > { %3929 = vmatmul.mubr.bf16.vlgmr.msra.gmra.mxu0 %v6496_v21  ;;  %v3391_v21 = vpop.f32.mrf.mxu0 }
 0x1cd   : > { %v3516_v56 = vpop.f32.mrf.mxu1  ;;  %v3392_v61 = vadd.f32 %v3391_v21, %v3349_v57 }
 0x1ce   : > { %v3393_v43 = vpop.f32.mrf.mxu0 }
 0x1cf   : > { %v3518_v63 = vpop.f32.mrf.mxu1  ;;  %v3394_v2 = vadd.f32 %v3393_v43, %v3351_v60  ;;  %v3435_v3 = vadd.f32 %v3434_v44, %v3392_v61 }
 0x1d0   : > { %v3473_v48 = vpop.f32.mrf.mxu0 }
 0x1d1   : > { %v3474_v4 = vadd.f32 %v3473_v48, %v3431_v0  ;;  %v3520_v7 = vpop.f32.mrf.mxu1  ;;  %v3437_v8 = vadd.f32 %v3436_v51, %v3394_v2 }
 0x1d2   : > { %v3475_v55 = vpop.f32.mrf.mxu0 }
 0x1d3   : > { %v3476_v5 = vadd.f32 %v3475_v55, %v3433_v1  ;;  %v3517_v11 = vadd.f32 %v3516_v56, %v3474_v4  ;;  %v3522_v14 = vpop.f32.mrf.mxu1 }
 0x1d4   : > { %v3477_v62 = vpop.f32.mrf.mxu0 }
 0x1d5   : > { %v3478_v9 = vadd.f32 %v3477_v62, %v3435_v3  ;;  %v3519_v12 = vadd.f32 %v3518_v63, %v3476_v5 }
 0x1d6   : > { %v3479_v6 = vpop.f32.mrf.mxu0 }
 0x1d7   : > { %v3480_v13 = vadd.f32 %v3479_v6, %v3437_v8  ;;  %v3521_v16 = vadd.f32 %v3520_v7, %v3478_v9 }
 0x1d9   : > { %v3523_v20 = vadd.f32 %v3522_v14, %v3480_v13 }
 0x1ed   : > { %v4650_v60 = vpop.f32.mrf.mxu1 }
 0x1ef   : > { %v4651_v61 = vpop.f32.mrf.mxu1 }
 0x1f1   : > { %v4653_v62 = vpop.f32.mrf.mxu1 }
 0x1f3   : > { %v4654_v63 = vpop.f32.mrf.mxu1 }
 0x20c   : > { %v3559_v10 = vpop.f32.mrf.mxu0 }
 0x20d   : > { %v3560_v17 = vadd.f32 %v3559_v10, %v3517_v11  ;;  %v4672_v0 = vpop.f32.mrf.mxu1 }
 0x20e   : > { %v3561_v15 = vpop.f32.mrf.mxu0 }
 0x20f   : > { %v3562_v18 = vadd.f32 %v3561_v15, %v3519_v12  ;;  %v4015_v25 = vmul.f32 %v3560_v17, %v3560_v17  ;;  %v4673_v1 = vpop.f32.mrf.mxu1 }
 0x210   : > { %v3563_v19 = vpop.f32.mrf.mxu0 }
 0x211   : > { %v4630_v22 = vpack.c.bf16 %v3562_v18, %v3560_v17  ;;  %v3564_v23 = vadd.f32 %v3563_v19, %v3521_v16  ;;  %v4016_v33 = vmul.f32 %v3562_v18, %v3562_v18  ;;  %v4675_v2 = vpop.f32.mrf.mxu1 }
 0x212   : > { %v3565_v24 = vpop.f32.mrf.mxu0 }
 0x213   : > { %3957 = vst [vmem:[%s6851_s28] sm:$0xff] %v4630_v22  ;;  %v3961_v26 = vadd.f32 %v3564_v23, %v3560_v17  ;;  %v4018_v27 = vmul.f32 %v3564_v23, %v3564_v23  ;;  %v3566_v28 = vadd.f32 %v3565_v24, %v3523_v20  ;;  %v4676_v4 = vpop.f32.mrf.mxu1  ;;  %v4674_v17 = vadd.f32 %v4673_v1, %v4672_v0 }
 0x214   : > { %v4652_v20 = vadd.f32 %v4651_v61, %v4650_v60 }
 0x215   : > { %v3962_v29 = vrot.slane %v3961_v26, 4  ;;  %v4021_v30 = vadd.f32 %v4018_v27, %v4015_v25  ;;  %v4632_v31 = vpack.c.bf16 %v3566_v28, %v3564_v23  ;;  %v3968_v32 = vadd.f32 %v3566_v28, %v3562_v18 }
 0x216   : > { %v4019_v34 = vmul.f32 %v3566_v28, %v3566_v28  ;;  %v3644_v24 = vadd.f32 %v4674_v17, %v4652_v20  ;;  %v4677_v25 = vadd.f32 %v4676_v4, %v4675_v2  ;;  %v4655_v27 = vadd.f32 %v4654_v63, %v4653_v62 }
 0x217   : > { %v3963_v35 = vadd.f32 %v3962_v29, %v3961_v26  ;;  %v4022_v36 = vrot.slane %v4021_v30, 4  ;;  %3959 = vst [vmem:[%s6851_s28 + $0xc] sm:$0xff] %v4632_v31  ;;  %v3969_v37 = vrot.slane %v3968_v32, 4 }
 0x218   : > { %v4028_v38 = vadd.f32 %v4019_v34, %v4016_v33  ;;  %v3647_v33 = vadd.f32 %v4677_v25, %v4655_v27 }
 0x219   : > { %v3964_v39 = vrot.slane %v3963_v35, 2  ;;  %v4023_v21 = vadd.f32 %v4022_v36, %v4021_v30  ;;  %v3970_v40 = vadd.f32 %v3969_v37, %v3968_v32 }
 0x21a   : > { %v4029_v41 = vrot.slane %v4028_v38, 4 }
 0x21b   : > { %v3965_v42 = vadd.f32 %v3964_v39, %v3963_v35  ;;  %v4024_v43 = vrot.slane %v4023_v21, 2  ;;  %v3971_v44 = vrot.slane %v3970_v40, 2 }
 0x21c   : > { %v4030_v45 = vadd.f32 %v4029_v41, %v4028_v38 }
 0x21d   : > { %v3966_v46 = vrot.slane %v3965_v42, 1  ;;  %v4025_v47 = vadd.f32 %v4024_v43, %v4023_v21  ;;  %v3972_v48 = vadd.f32 %v3971_v44, %v3970_v40 }
 0x21e   : > { %v4031_v49 = vrot.slane %v4030_v45, 2 }
 0x21f   : > { %v3973_v50 = vrot.slane %v3972_v48, 1  ;;  %v4026_v51 = vrot.slane %v4025_v47, 1  ;;  %v6855_v53 = vadd.f32 %v3966_v46, %v3965_v42 }
 0x220   : > { %v4032_v52 = vadd.f32 %v4031_v49, %v4030_v45 }
 0x221   : > { %v6857_v54 = vadd.f32 %v3973_v50, %v3972_v48  ;;  %v6861_v57 = vadd.f32 %v4026_v51, %v4025_v47 }
 0x222   : > { %v4033_v55 = vrot.slane %v4032_v52, 1 }
 0x223   : > { %v3985_v56 = vcombine.low %v6855_v53, %v6857_v54 }
 0x224   : > { %v6863_v58 = vadd.f32 %v4033_v55, %v4032_v52 }
 0x226   : > { %v4045_v59 = vcombine.low %v6861_v57, %v6863_v58 }
 0x22c   : > { %v4694_v3 = vpop.f32.mrf.mxu0 }
 0x22d   : > { %v4716_v6 = vpop.f32.mrf.mxu1 }
 0x22e   : > { %v4695_v5 = vpop.f32.mrf.mxu0 }
 0x22f   : > { %v4717_v8 = vpop.f32.mrf.mxu1  ;;  %v4696_v22 = vadd.f32 %v4695_v5, %v4694_v3 }
 0x230   : > { %v4697_v7 = vpop.f32.mrf.mxu0  ;;  %v4718_v29 = vadd.f32 %v4717_v8, %v4716_v6 }
 0x231   : > { %v4719_v10 = vpop.f32.mrf.mxu1  ;;  %v3685_v28 = vadd.f32 %v4696_v22, %v3644_v24 }
 0x232   : > { %v4698_v9 = vpop.f32.mrf.mxu0 }
 0x233   : > { %v4720_v12 = vpop.f32.mrf.mxu1  ;;  %v4699_v30 = vadd.f32 %v4698_v9, %v4697_v7  ;;  %v3726_v35 = vadd.f32 %v4718_v29, %v3685_v28 }
 0x234   : > { %v4721_v37 = vadd.f32 %v4720_v12, %v4719_v10 }
 0x235   : > { %v3688_v36 = vadd.f32 %v4699_v30, %v3647_v33 }
 0x237   : > { %v3729_v42 = vadd.f32 %v4721_v37, %v3688_v36 }
 0x24c   : > { %v4738_v11 = vpop.f32.mrf.mxu0 }
 0x24d   : > { %v4760_v14 = vpop.f32.mrf.mxu1 }
 0x24e   : > { %v4739_v13 = vpop.f32.mrf.mxu0 }
 0x24f   : > { %v4761_v16 = vpop.f32.mrf.mxu1  ;;  %v4740_v34 = vadd.f32 %v4739_v13, %v4738_v11  ;;  %v5472_v13 = vmov 1966171168  }
 0x250   : > { %v4741_v15 = vpop.f32.mrf.mxu0  ;;  %v4762_v40 = vadd.f32 %v4761_v16, %v4760_v14  ;;  %v3987_v14 = vunpack.c.l.s4 %v5472_v13 }
 0x251   : > { %v4763_v19 = vpop.f32.mrf.mxu1  ;;  %v3767_v21 = vadd.f32 %v4740_v34, %v3726_v35 }
 0x252   : > { %v4742_v18 = vpop.f32.mrf.mxu0  ;;  %v3988_v20 = vunpack.c.0.s8 %v3987_v14 }
 0x253   : > { %v4764_v26 = vpop.f32.mrf.mxu1  ;;  %v4743_v41 = vadd.f32 %v4742_v18, %v4741_v15  ;;  %v3808_v46 = vadd.f32 %v4762_v40, %v3767_v21  ;;  %v3989_v15 = vlaneseq }
 0x254   : > { %v4765_v48 = vadd.f32 %v4764_v26, %v4763_v19 }
 0x255   : > { %v3770_v47 = vadd.f32 %v4743_v41, %v3729_v42  ;;  %v3990_v22 = vshrl.u32 %v3989_v15, 7  ;;  %vm4011_vm0 = vcmp.lt.s32.totalorder %v3989_v15, 384 }
 0x257   : > { %v3811_v60 = vadd.f32 %v4765_v48, %v3770_v47  ;;  %v3991_v27 = vsub.s32 %v3988_v20, %v3990_v22 }
 0x259   : > { %v4052_v35 = vrot.slane %v4045_v59, %v3991_v27 }
 0x26c   : > { %v4782_v23 = vpop.f32.mrf.mxu0 }
 0x26d   : > { %v4804_v32 = vpop.f32.mrf.mxu1 }
 0x26e   : > { %v4783_v31 = vpop.f32.mrf.mxu0 }
 0x26f   : > { %v4805_v39 = vpop.f32.mrf.mxu1  ;;  %v4784_v43 = vadd.f32 %v4783_v31, %v4782_v23 }
 0x270   : > { %v4785_v38 = vpop.f32.mrf.mxu0  ;;  %v4806_v50 = vadd.f32 %v4805_v39, %v4804_v32  ;;  %v3992_v32 = vrot.slane %v3985_v56, %v3991_v27 }
 0x271   : > { %v4807_v45 = vpop.f32.mrf.mxu1  ;;  %v3849_v49 = vadd.f32 %v4784_v43, %v3808_v46 }
 0x272   : > { %v4786_v44 = vpop.f32.mrf.mxu0 }
 0x273   : > { %v4787_v51 = vadd.f32 %v4786_v44, %v4785_v38  ;;  %v4808_v52 = vpop.f32.mrf.mxu1  ;;  %v3890_v62 = vadd.f32 %v4806_v50, %v3849_v49 }
 0x274   : > { %v4809_v0 = vadd.f32 %v4808_v52, %v4807_v45 }
 0x275   : > { %v3852_v63 = vadd.f32 %v4787_v51, %v3811_v60 }
 0x277   : > { %v3893_v5 = vadd.f32 %v4809_v0, %v3852_v63 }
 0x28c   : > { %v4826_v55 = vpop.f32.mrf.mxu0 }
 0x28e   : > { %v4827_v61 = vpop.f32.mrf.mxu0 }
 0x28f   : > { %v4828_v1 = vadd.f32 %v4827_v61, %v4826_v55 }
 0x290   : > { %v4829_v2 = vpop.f32.mrf.mxu0 }
 0x291   : > { %v3931_v3 = vadd.f32 %v4828_v1, %v3890_v62 }
 0x292   : > { %v4830_v4 = vpop.f32.mrf.mxu0 }
 0x293   : > { %v4631_v6 = vpack.c.bf16 %v3931_v3, %v3931_v3  ;;  %v4831_v7 = vadd.f32 %v4830_v4, %v4829_v2  ;;  %v4017_v9 = vmul.f32 %v3931_v3, %v3931_v3 }
 0x295   : > { %3958 = vst [vmem:[%s6851_s28 + $0x8] sm:$0xf] %v4631_v6  ;;  %v3934_v8 = vadd.f32 %v4831_v7, %v3893_v5 }
 0x297   : > { %v4633_v10 = vpack.c.bf16 %v3934_v8, %v3934_v8  ;;  %v3975_v11 = vadd.f32 %v3934_v8, %v3931_v3  ;;  %v4020_v12 = vmul.f32 %v3934_v8, %v3934_v8 }
 0x299   : > { %3960 = vst [vmem:[%s6851_s28 + $0x14] sm:$0xf] %v4633_v10  ;;  %v3976_v16 = vrot.slane %v3975_v11, 4  ;;  %v4035_v17 = vadd.f32 %v4020_v12, %v4017_v9 }
 0x29b   : > { %v3977_v18 = vadd.f32 %v3976_v16, %v3975_v11  ;;  %v4036_v19 = vrot.slane %v4035_v17, 4 }
 0x29d   : > { %v3978_v23 = vrot.slane %v3977_v18, 2  ;;  %v4037_v24 = vadd.f32 %v4036_v19, %v4035_v17 }
 0x29f   : > { %v3979_v25 = vadd.f32 %v3978_v23, %v3977_v18  ;;  %v4038_v26 = vrot.slane %v4037_v24, 2 }
 0x2a1   : > { %v3980_v28 = vrot.slane %v3979_v25, 1  ;;  %v4039_v29 = vadd.f32 %v4038_v26, %v4037_v24 }
 0x2a3   : > { %v3981_v30 = vadd.f32 %v3980_v28, %v3979_v25  ;;  %v4040_v31 = vrot.slane %v4039_v29, 1 }
 0x2a5   : > { %v3999_v33 = vrot.slane %v3981_v30, %v3991_v27  ;;  %v4041_v34 = vadd.f32 %v4040_v31, %v4039_v29 }
 0x2a7   : > { %v4000_v36 = vcombine.low %v3992_v32, %v3999_v33  ;;  %v4059_v37 = vrot.slane %v4041_v34, %v3991_v27 }
 0x2a9   : > { %v4007_v38 = vrot.slane %v4000_v36, %v3991_v27  ;;  %v4060_v39 = vcombine.low %v4052_v35, %v4059_v37 }
 0x2ab   : > { %4013 = vst.msk [vmem:[%s191_s4] ss:$8 sm:$0x7] %vm4011_vm0, %v4007_v38  ;;  %v4067_v21 = vrot.slane %v4060_v39, %v3991_v27 }
 0x2ad   : > { %4627 = vst.msk [vmem:[%s191_s4 + $0x1] ss:$8 sm:$0x7] %vm4011_vm0, %v4067_v21 }
 0x2ae PF: > { %s14_s12 = sadd.s32 1, %s5470_s12  }
 0x2af   : > { %p11_p5 = scmp.ge.s32.totalorder %s14_s12, 4  }
 0x2b1   :  { %13 = sbr.rel (!%p11_p5) target bundleno = 1 (0x1), region = 71 }

// kernel: _lambda_.21
= control target key start
LH: loop header
LB: loop body
LE: loop exit
PB: predicated region body
PF: predicated region fallthrough
CT: control target
= control target key end

     0   :  { %s4942_s12 = smov 0   ;;  %s6296_s0 = inlined_call_operand.vmem [shape: bf16[32,3456], index: 0, kind: input, shape index: {}]   ;;  %s6297_s1 = inlined_call_operand.vmem [shape: bf16[3456,256], index: 1, kind: input, shape index: {}]   ;;  %s6298_s2 = inlined_call_operand.vmem [shape: bf16[32,256], index: 2, kind: output, shape index: {0}]   ;;  %s6299_s3 = inlined_call_operand.vmem [shape: f32[16,256], index: 3, kind: output, shape index: {1}]  }
   0x1 LB: > { %s4948_s13 = sadd.s32 4294967295, %s4918_s12   ;;  %p3737_p0 = scmp.ge.s32.totalorder %s4918_s12, 1  ;;  %s4918_s12 = sphi %s4942_s12, %s14_s12  }
   0x2   : > { %p142_p1 = scmp.lt.s32.totalorder %s4918_s12, 3 }
   0x4   : > { %p143_p2 = pnand %p3737_p0, %p142_p1 }
   0x5   : > { %s3738_s24 = sshll.u32 (!%p143_p2), %s4948_s13, 1  ;;  %p187_p4 = scmp.lt.s32.totalorder (!%p143_p2), %s4948_s13, 1 }
   0x6   : > { %146 = sbr.rel (%p143_p2) target bundleno = 687 (0x2af), region = 28  ;;  %p174_p3 = scmp.lt.s32.totalorder (!%p143_p2), %s3738_s24, 3 }
   0xb   : > { %v4224_v0 = vld [vmem:[%s6297_s1 + $0x74] ss:$8 sps:$4 sm:$0xff]   ;;  %v4228_v2 = vld [vmem:[%s6297_s1 + $0x70] ss:$8 sps:$4 sm:$0xff]   ;;  %v4230_v4 = vld [vmem:[%s6297_s1 + $0x64] ss:$8 sps:$4 sm:$0xff]  }
   0xc   : > { %v4226_v1 = vld [vmem:[%s6297_s1 + $0x174] ss:$8 sps:$4 sm:$0xff]   ;;  %2949 = vmatprep.subr.bf16.mxu0 %v4224_v0  ;;  %v4229_v3 = vld [vmem:[%s6297_s1 + $0x170] ss:$8 sps:$4 sm:$0xff]   ;;  %v4232_v5 = vld [vmem:[%s6297_s1 + $0x164] ss:$8 sps:$4 sm:$0xff]  }
   0xd   : > { %2992 = vmatprep.subr.bf16.mxu1 %v4226_v1  ;;  %2950 = vmatpush1.bf16.msra.mxu0 %v4228_v2  ;;  %v4234_v6 = vld [vmem:[%s6297_s1 + $0x60] ss:$8 sps:$4 sm:$0xff]   ;;  %v4236_v8 = vld [vmem:[%s6297_s1 + $0x54] ss:$8 sps:$4 sm:$0xff]   ;;  %v4240_v10 = vld [vmem:[%s6297_s1 + $0x50] ss:$8 sps:$4 sm:$0xff]  }
   0xe   : > { %2993 = vmatpush1.bf16.msra.mxu1 %v4229_v3  ;;  %2951 = vmatprep.subr.bf16.mxu0 %v4230_v4  ;;  %v4235_v7 = vld [vmem:[%s6297_s1 + $0x160] ss:$8 sps:$4 sm:$0xff]   ;;  %v4238_v9 = vld [vmem:[%s6297_s1 + $0x154] ss:$8 sps:$4 sm:$0xff]   ;;  %v4241_v11 = vld [vmem:[%s6297_s1 + $0x150] ss:$8 sps:$4 sm:$0xff]  }
   0xf   : > { %2994 = vmatprep.subr.bf16.mxu1 %v4232_v5  ;;  %v4242_v12 = vld [vmem:[%s6297_s1 + $0x44] ss:$8 sps:$4 sm:$0xff]   ;;  %v4246_v14 = vld [vmem:[%s6297_s1 + $0x40] ss:$8 sps:$4 sm:$0xff]   ;;  %v4248_v16 = vld [vmem:[%s6297_s1 + $0x34] ss:$8 sps:$4 sm:$0xff]  }
  0x10   : > { %v4244_v13 = vld [vmem:[%s6297_s1 + $0x144] ss:$8 sps:$4 sm:$0xff]   ;;  %v4247_v15 = vld [vmem:[%s6297_s1 + $0x140] ss:$8 sps:$4 sm:$0xff]   ;;  %v4250_v17 = vld [vmem:[%s6297_s1 + $0x134] ss:$8 sps:$4 sm:$0xff]  }
  0x11   : > { %2952 = vmatpush1.bf16.msra.mxu0 %v4234_v6  ;;  %v4252_v18 = vld [vmem:[%s6297_s1 + $0x30] ss:$8 sps:$4 sm:$0xff]   ;;  %v4254_v20 = vld [vmem:[%s6297_s1 + $0x24] ss:$8 sps:$4 sm:$0xff]   ;;  %v4258_v22 = vld [vmem:[%s6297_s1 + $0x20] ss:$8 sps:$4 sm:$0xff]  }
  0x12   : > { %2995 = vmatpush1.bf16.msra.mxu1 %v4235_v7  ;;  %2953 = vmatprep.subr.bf16.mxu0 %v4236_v8  ;;  %v4253_v19 = vld [vmem:[%s6297_s1 + $0x130] ss:$8 sps:$4 sm:$0xff]   ;;  %v4256_v21 = vld [vmem:[%s6297_s1 + $0x124] ss:$8 sps:$4 sm:$0xff]   ;;  %v4259_v23 = vld [vmem:[%s6297_s1 + $0x120] ss:$8 sps:$4 sm:$0xff]  }
  0x13   : > { %2996 = vmatprep.subr.bf16.mxu1 %v4238_v9  ;;  %v4260_v24 = vld [vmem:[%s6297_s1 + $0x14] ss:$8 sps:$4 sm:$0xff]   ;;  %v4264_v26 = vld [vmem:[%s6297_s1 + $0x10] ss:$8 sps:$4 sm:$0xff]   ;;  %v4266_v28 = vld [vmem:[%s6297_s1 + $0x4] ss:$8 sps:$4 sm:$0xff]  }
  0x14   : > { %v4262_v25 = vld [vmem:[%s6297_s1 + $0x114] ss:$8 sps:$4 sm:$0xff]   ;;  %v4265_v27 = vld [vmem:[%s6297_s1 + $0x110] ss:$8 sps:$4 sm:$0xff]   ;;  %v4268_v29 = vld [vmem:[%s6297_s1 + $0x104] ss:$8 sps:$4 sm:$0xff]  }
  0x15   : > { %2954 = vmatpush1.bf16.msra.mxu0 %v4240_v10  ;;  %v4270_v30 = vld [vmem:[%s6297_s1] ss:$8 sps:$4 sm:$0xff]   ;;  %v4272_v32 = vld [vmem:[%s6297_s1 + $0xf4] ss:$8 sps:$4 sm:$0xff]   ;;  %v4276_v34 = vld [vmem:[%s6297_s1 + $0xf0] ss:$8 sps:$4 sm:$0xff]  }
  0x16   : > { %2997 = vmatpush1.bf16.msra.mxu1 %v4241_v11  ;;  %2955 = vmatprep.subr.bf16.mxu0 %v4242_v12  ;;  %v4271_v31 = vld [vmem:[%s6297_s1 + $0x100] ss:$8 sps:$4 sm:$0xff]   ;;  %v4274_v33 = vld [vmem:[%s6297_s1 + $0x1f4] ss:$8 sps:$4 sm:$0xff]   ;;  %v4277_v35 = vld [vmem:[%s6297_s1 + $0x1f0] ss:$8 sps:$4 sm:$0xff]  }
  0x17   : > { %2998 = vmatprep.subr.bf16.mxu1 %v4244_v13  ;;  %v4278_v36 = vld [vmem:[%s6297_s1 + $0xe4] ss:$8 sps:$4 sm:$0xff]   ;;  %s6301_s24 = smov (!%p174_p3, %s3738_s24), 3  ;;  %v4282_v38 = vld [vmem:[%s6297_s1 + $0xe0] ss:$8 sps:$4 sm:$0xff]   ;;  %s6303_s13 = smov (!%p187_p4, %s4948_s13), 1 }
  0x18   : > { %v4280_v37 = vld [vmem:[%s6297_s1 + $0x1e4] ss:$8 sps:$4 sm:$0xff]   ;;  %v4283_v39 = vld [vmem:[%s6297_s1 + $0x1e0] ss:$8 sps:$4 sm:$0xff]   ;;  %v4284_v40 = vld [vmem:[%s6297_s1 + $0xd4] ss:$8 sps:$4 sm:$0xff]  }
  0x19   : > { %2956 = vmatpush1.bf16.msra.mxu0 %v4246_v14  ;;  %s4213_s22 = smul.u32 108, %s6301_s24  ;;  %v4286_v41 = vld [vmem:[%s6297_s1 + $0x1d4] ss:$8 sps:$4 sm:$0xff]   ;;  %v4288_v42 = vld [vmem:[%s6297_s1 + $0xd0] ss:$8 sps:$4 sm:$0xff]  }
  0x1a   : > { %2999 = vmatpush1.bf16.msra.mxu1 %v4247_v15  ;;  %2957 = vmatprep.subr.bf16.mxu0 %v4248_v16  ;;  %v4289_v43 = vld [vmem:[%s6297_s1 + $0x1d0] ss:$8 sps:$4 sm:$0xff]   ;;  %v4290_v44 = vld [vmem:[%s6297_s1 + $0xc4] ss:$8 sps:$4 sm:$0xff]   ;;  %v4294_v46 = vld [vmem:[%s6297_s1 + $0xc0] ss:$8 sps:$4 sm:$0xff]  }
  0x1b   : > { %3000 = vmatprep.subr.bf16.mxu1 %v4250_v17  ;;  %s5094_s7 = scalar_lea.vmem %s6296_s0, %s4213_s22  ;;  %v4292_v45 = vld [vmem:[%s6297_s1 + $0x1c4] ss:$8 sps:$4 sm:$0xff]   ;;  %v4295_v47 = vld [vmem:[%s6297_s1 + $0x1c0] ss:$8 sps:$4 sm:$0xff]   ;;  %v4296_v48 = vld [vmem:[%s6297_s1 + $0xb4] ss:$8 sps:$4 sm:$0xff]  }
  0x1c   : > { %v4322_v49 = vld [vmem:[%s5094_s7 + $0x4] ss:$108 sps:$4 sm:$0xff]   ;;  %v4298_v50 = vld [vmem:[%s6297_s1 + $0x1b4] ss:$8 sps:$4 sm:$0xff]   ;;  %v4325_v51 = vld [vmem:[%s5094_s7 + $0xc] ss:$108 sps:$4 sm:$0xff]  }
  0x1d   : > { %2958 = vmatpush1.bf16.msra.mxu0 %v4252_v18  ;;  %2981 = vmatprep.mubr.bf16.mxu0 %v4322_v49  ;;  %v4300_v52 = vld [vmem:[%s6297_s1 + $0xb0] ss:$8 sps:$4 sm:$0xff]   ;;  %v4302_v54 = vld [vmem:[%s6297_s1 + $0xa4] ss:$8 sps:$4 sm:$0xff]   ;;  %v4306_v56 = vld [vmem:[%s6297_s1 + $0xa0] ss:$8 sps:$4 sm:$0xff]  }
  0x1e   : > { %3001 = vmatpush1.bf16.msra.mxu1 %v4253_v19  ;;  %2959 = vmatprep.subr.bf16.mxu0 %v4254_v20  ;;  %v4301_v53 = vld [vmem:[%s6297_s1 + $0x1b0] ss:$8 sps:$4 sm:$0xff]   ;;  %v4304_v55 = vld [vmem:[%s6297_s1 + $0x1a4] ss:$8 sps:$4 sm:$0xff]   ;;  %v4307_v57 = vld [vmem:[%s6297_s1 + $0x1a0] ss:$8 sps:$4 sm:$0xff]  }
  0x1f   : > { %3002 = vmatprep.subr.bf16.mxu1 %v4256_v21  ;;  %3024 = vmatprep.mubr.bf16.mxu1 %v4325_v51  ;;  %v4308_v58 = vld [vmem:[%s6297_s1 + $0x94] ss:$8 sps:$4 sm:$0xff]   ;;  %v4312_v60 = vld [vmem:[%s6297_s1 + $0x90] ss:$8 sps:$4 sm:$0xff]   ;;  %v4314_v62 = vld [vmem:[%s6297_s1 + $0x84] ss:$8 sps:$4 sm:$0xff]  }
  0x20   : > { %v4310_v59 = vld [vmem:[%s6297_s1 + $0x194] ss:$8 sps:$4 sm:$0xff]   ;;  %v4313_v61 = vld [vmem:[%s6297_s1 + $0x190] ss:$8 sps:$4 sm:$0xff]   ;;  %v4316_v63 = vld [vmem:[%s6297_s1 + $0x184] ss:$8 sps:$4 sm:$0xff]  }
  0x21   : > { %2960 = vmatpush1.bf16.msra.mxu0 %v4258_v22  ;;  %v4318_v0 = vld [vmem:[%s6297_s1 + $0x80] ss:$8 sps:$4 sm:$0xff]   ;;  %v4328_v2 = vld [vmem:[%s6297_s1 + $0x274] ss:$8 sps:$4 sm:$0xff]   ;;  %v4326_v6 = vld [vmem:[%s6297_s1 + $0x270] ss:$8 sps:$4 sm:$0xff]  }
  0x22   : > { %3003 = vmatpush1.bf16.msra.mxu1 %v4259_v23  ;;  %2961 = vmatprep.subr.bf16.mxu0 %v4260_v24  ;;  %v4319_v1 = vld [vmem:[%s6297_s1 + $0x180] ss:$8 sps:$4 sm:$0xff]   ;;  %v4331_v3 = vld [vmem:[%s6297_s1 + $0x374] ss:$8 sps:$4 sm:$0xff]   ;;  %v4329_v7 = vld [vmem:[%s6297_s1 + $0x370] ss:$8 sps:$4 sm:$0xff]  }
  0x23   : > { %3004 = vmatprep.subr.bf16.mxu1 %v4262_v25  ;;  %v4320_v4 = vld [vmem:[%s5094_s7] ss:$108 sps:$4 sm:$0xff]   ;;  %v4323_v5 = vld [vmem:[%s5094_s7 + $0x8] ss:$108 sps:$4 sm:$0xff]   ;;  %v4338_v14 = vld [vmem:[%s6297_s1 + $0x250] ss:$8 sps:$4 sm:$0xff]  }
  0x24   : > { %v4334_v8 = vld [vmem:[%s6297_s1 + $0x264] ss:$8 sps:$4 sm:$0xff]   ;;  %v4332_v10 = vld [vmem:[%s6297_s1 + $0x260] ss:$8 sps:$4 sm:$0xff]   ;;  %v4340_v12 = vld [vmem:[%s6297_s1 + $0x254] ss:$8 sps:$4 sm:$0xff]  }
  0x25   : > { %2962 = vmatpush1.bf16.msra.mxu0 %v4264_v26  ;;  %v4337_v9 = vld [vmem:[%s6297_s1 + $0x364] ss:$8 sps:$4 sm:$0xff]   ;;  %v4335_v11 = vld [vmem:[%s6297_s1 + $0x360] ss:$8 sps:$4 sm:$0xff]   ;;  %v4343_v13 = vld [vmem:[%s6297_s1 + $0x354] ss:$8 sps:$4 sm:$0xff]  }
  0x26   : > { %3005 = vmatpush1.bf16.msra.mxu1 %v4265_v27  ;;  %2963 = vmatprep.subr.bf16.mxu0 %v4266_v28  ;;  %v4341_v15 = vld [vmem:[%s6297_s1 + $0x350] ss:$8 sps:$4 sm:$0xff]   ;;  %v4346_v16 = vld [vmem:[%s6297_s1 + $0x244] ss:$8 sps:$4 sm:$0xff]   ;;  %v4344_v18 = vld [vmem:[%s6297_s1 + $0x240] ss:$8 sps:$4 sm:$0xff]  }
  0x27   : > { %3006 = vmatprep.subr.bf16.mxu1 %v4268_v29  ;;  %v4349_v17 = vld [vmem:[%s6297_s1 + $0x344] ss:$8 sps:$4 sm:$0xff]   ;;  %v4347_v19 = vld [vmem:[%s6297_s1 + $0x340] ss:$8 sps:$4 sm:$0xff]   ;;  %v4352_v20 = vld [vmem:[%s6297_s1 + $0x234] ss:$8 sps:$4 sm:$0xff]  }
  0x28   : > { %v4355_v21 = vld [vmem:[%s6297_s1 + $0x334] ss:$8 sps:$4 sm:$0xff]   ;;  %v4350_v22 = vld [vmem:[%s6297_s1 + $0x230] ss:$8 sps:$4 sm:$0xff]   ;;  %v4358_v24 = vld [vmem:[%s6297_s1 + $0x224] ss:$8 sps:$4 sm:$0xff]  }
  0x29   : > { %2964 = vmatpush1.bf16.msra.mxu0 %v4270_v30  ;;  %v4353_v23 = vld [vmem:[%s6297_s1 + $0x330] ss:$8 sps:$4 sm:$0xff]   ;;  %v4361_v25 = vld [vmem:[%s6297_s1 + $0x324] ss:$8 sps:$4 sm:$0xff]   ;;  %v4356_v26 = vld [vmem:[%s6297_s1 + $0x220] ss:$8 sps:$4 sm:$0xff]  }
  0x2a   : > { %3007 = vmatpush1.bf16.msra.mxu1 %v4271_v31  ;;  %2965 = vmatprep.subr.bf16.mxu0 %v4272_v32  ;;  %v4359_v27 = vld [vmem:[%s6297_s1 + $0x320] ss:$8 sps:$4 sm:$0xff]   ;;  %v4364_v28 = vld [vmem:[%s6297_s1 + $0x214] ss:$8 sps:$4 sm:$0xff]   ;;  %v4362_v30 = vld [vmem:[%s6297_s1 + $0x210] ss:$8 sps:$4 sm:$0xff]  }
  0x2b   : > { %3008 = vmatprep.subr.bf16.mxu1 %v4274_v33  ;;  %v4367_v29 = vld [vmem:[%s6297_s1 + $0x314] ss:$8 sps:$4 sm:$0xff]   ;;  %v4365_v31 = vld [vmem:[%s6297_s1 + $0x310] ss:$8 sps:$4 sm:$0xff]   ;;  %v4370_v32 = vld [vmem:[%s6297_s1 + $0x204] ss:$8 sps:$4 sm:$0xff]  }
  0x2c   : > { %v4373_v33 = vld [vmem:[%s6297_s1 + $0x304] ss:$8 sps:$4 sm:$0xff]   ;;  %v4389_v49 = vld [vmem:[%s6297_s1 + $0x3d0] ss:$8 sps:$4 sm:$0xff]  }
  0x2d   : > { %2966 = vmatpush2.bf16.msra.mxu0 %v4276_v34  ;;  %v4424_v34 = vld [vmem:[%s5094_s7 + $0x14] ss:$108 sps:$4 sm:$0xff]   ;;  %v4397_v51 = vld [vmem:[%s6297_s1 + $0x3c4] ss:$8 sps:$4 sm:$0xff]  }
  0x2e   : > { %3009 = vmatpush2.bf16.msra.mxu1 %v4277_v35  ;;  %2967 = vmatprep.subr.bf16.mxu0 %v4278_v36  ;;  %v4368_v35 = vld [vmem:[%s6297_s1 + $0x200] ss:$8 sps:$4 sm:$0xff]  }
  0x2f   : > { %3010 = vmatprep.subr.bf16.mxu1 %v4280_v37  ;;  %v4371_v36 = vld [vmem:[%s6297_s1 + $0x300] ss:$8 sps:$4 sm:$0xff]  }
  0x30   : > { %v4430_v37 = vld [vmem:[%s5094_s7 + $0x1c] ss:$108 sps:$4 sm:$0xff]  }
  0x31   : > { %2968 = vmatpush2.bf16.msra.mxu0 %v4282_v38  ;;  %v4376_v38 = vld [vmem:[%s6297_s1 + $0x2f4] ss:$8 sps:$4 sm:$0xff]  }
  0x32   : > { %3011 = vmatpush2.bf16.msra.mxu1 %v4283_v39  ;;  %2969 = vmatprep.subr.bf16.mxu0 %v4284_v40  ;;  %v4379_v39 = vld [vmem:[%s6297_s1 + $0x3f4] ss:$8 sps:$4 sm:$0xff]   ;;  %v4374_v40 = vld [vmem:[%s6297_s1 + $0x2f0] ss:$8 sps:$4 sm:$0xff]  }
  0x33   : > { %3012 = vmatprep.subr.bf16.mxu1 %v4286_v41  ;;  %v4377_v41 = vld [vmem:[%s6297_s1 + $0x3f0] ss:$8 sps:$4 sm:$0xff]  }
  0x35   : > { %2970 = vmatpush2.bf16.msra.mxu0 %v4288_v42  ;;  %v4382_v42 = vld [vmem:[%s6297_s1 + $0x2e4] ss:$8 sps:$4 sm:$0xff]  }
  0x36   : > { %3013 = vmatpush2.bf16.msra.mxu1 %v4289_v43  ;;  %2971 = vmatprep.subr.bf16.mxu0 %v4290_v44  ;;  %v4385_v43 = vld [vmem:[%s6297_s1 + $0x3e4] ss:$8 sps:$4 sm:$0xff]   ;;  %v4380_v44 = vld [vmem:[%s6297_s1 + $0x2e0] ss:$8 sps:$4 sm:$0xff]  }
  0x37   : > { %3014 = vmatprep.subr.bf16.mxu1 %v4292_v45  ;;  %v4383_v45 = vld [vmem:[%s6297_s1 + $0x3e0] ss:$8 sps:$4 sm:$0xff]  }
  0x39   : > { %2972 = vmatpush2.bf16.msra.mxu0 %v4294_v46  ;;  %v4388_v46 = vld [vmem:[%s6297_s1 + $0x2d4] ss:$8 sps:$4 sm:$0xff]  }
  0x3a   : > { %3015 = vmatpush2.bf16.msra.mxu1 %v4295_v47  ;;  %2973 = vmatprep.subr.bf16.mxu0 %v4296_v48  ;;  %v4391_v47 = vld [vmem:[%s6297_s1 + $0x3d4] ss:$8 sps:$4 sm:$0xff]   ;;  %v4386_v48 = vld [vmem:[%s6297_s1 + $0x2d0] ss:$8 sps:$4 sm:$0xff]  }
  0x3b   : > { %3016 = vmatprep.subr.bf16.mxu1 %v4298_v50  ;;  %v4394_v50 = vld [vmem:[%s6297_s1 + $0x2c4] ss:$8 sps:$4 sm:$0xff]  }
  0x3d   : > { %2974 = vmatpush2.bf16.msra.mxu0 %v4300_v52  ;;  %v4392_v52 = vld [vmem:[%s6297_s1 + $0x2c0] ss:$8 sps:$4 sm:$0xff]  }
  0x3e   : > { %3017 = vmatpush2.bf16.msra.mxu1 %v4301_v53  ;;  %2975 = vmatprep.subr.bf16.mxu0 %v4302_v54  ;;  %v4395_v53 = vld [vmem:[%s6297_s1 + $0x3c0] ss:$8 sps:$4 sm:$0xff]   ;;  %v4400_v54 = vld [vmem:[%s6297_s1 + $0x2b4] ss:$8 sps:$4 sm:$0xff]  }
  0x3f   : > { %3018 = vmatprep.subr.bf16.mxu1 %v4304_v55  ;;  %v4403_v55 = vld [vmem:[%s6297_s1 + $0x3b4] ss:$8 sps:$4 sm:$0xff]  }
  0x41   : > { %2976 = vmatpush2.bf16.msra.mxu0 %v4306_v56  ;;  %v4398_v56 = vld [vmem:[%s6297_s1 + $0x2b0] ss:$8 sps:$4 sm:$0xff]  }
  0x42   : > { %3019 = vmatpush2.bf16.msra.mxu1 %v4307_v57  ;;  %2977 = vmatprep.subr.bf16.mxu0 %v4308_v58  ;;  %v4401_v57 = vld [vmem:[%s6297_s1 + $0x3b0] ss:$8 sps:$4 sm:$0xff]   ;;  %v4406_v58 = vld [vmem:[%s6297_s1 + $0x2a4] ss:$8 sps:$4 sm:$0xff]  }
  0x43   : > { %3020 = vmatprep.subr.bf16.mxu1 %v4310_v59  ;;  %v4409_v59 = vld [vmem:[%s6297_s1 + $0x3a4] ss:$8 sps:$4 sm:$0xff]  }
  0x45   : > { %2978 = vmatpush2.bf16.msra.mxu0 %v4312_v60  ;;  %v4404_v60 = vld [vmem:[%s6297_s1 + $0x2a0] ss:$8 sps:$4 sm:$0xff]  }
  0x46   : > { %3021 = vmatpush2.bf16.msra.mxu1 %v4313_v61  ;;  %2979 = vmatprep.subr.bf16.mxu0 %v4314_v62  ;;  %v4407_v61 = vld [vmem:[%s6297_s1 + $0x3a0] ss:$8 sps:$4 sm:$0xff]   ;;  %v4412_v62 = vld [vmem:[%s6297_s1 + $0x294] ss:$8 sps:$4 sm:$0xff]  }
  0x47   : > { %3022 = vmatprep.subr.bf16.mxu1 %v4316_v63  ;;  %v4415_v63 = vld [vmem:[%s6297_s1 + $0x394] ss:$8 sps:$4 sm:$0xff]  }
  0x49   : > { %2980 = vmatpush2.bf16.msra.mxu0 %v4318_v0  ;;  %v4410_v0 = vld [vmem:[%s6297_s1 + $0x290] ss:$8 sps:$4 sm:$0xff]  }
  0x4a   : > { %3023 = vmatpush2.bf16.msra.mxu1 %v4319_v1  ;;  %3035 = vmatprep.subr.bf16.mxu0 %v4328_v2  ;;  %v4413_v1 = vld [vmem:[%s6297_s1 + $0x390] ss:$8 sps:$4 sm:$0xff]   ;;  %v4418_v2 = vld [vmem:[%s6297_s1 + $0x284] ss:$8 sps:$4 sm:$0xff]  }
  0x4b   : > { %3078 = vmatprep.subr.bf16.mxu1 %v4331_v3  ;;  %v4421_v3 = vld [vmem:[%s6297_s1 + $0x384] ss:$8 sps:$4 sm:$0xff]  }
  0x4c   : > { %2982 = vmatmul.mubr.bf16.vlgmr.msra.gmra.mxu0 %v4320_v4  ;;  %v4416_v4 = vld [vmem:[%s6297_s1 + $0x280] ss:$8 sps:$4 sm:$0xff]  }
  0x4d   : > { %3025 = vmatmul.mubr.bf16.vlgmr.msra.gmra.mxu1 %v4323_v5  ;;  %3036 = vmatpush1.bf16.msra.mxu0 %v4326_v6  ;;  %v4419_v5 = vld [vmem:[%s6297_s1 + $0x380] ss:$8 sps:$4 sm:$0xff]   ;;  %v4427_v6 = vld [vmem:[%s6297_s1 + $0x474] ss:$8 sps:$4 sm:$0xff]  }
  0x4e   : > { %3079 = vmatpush1.bf16.msra.mxu1 %v4329_v7  ;;  %3037 = vmatprep.subr.bf16.mxu0 %v4334_v8  ;;  %v4433_v7 = vld [vmem:[%s6297_s1 + $0x574] ss:$8 sps:$4 sm:$0xff]  }
  0x4f   : > { %3080 = vmatprep.subr.bf16.mxu1 %v4337_v9  ;;  %3067 = vmatprep.mubr.bf16.mxu0 %v4424_v34  ;;  %v4422_v8 = vld [vmem:[%s5094_s7 + $0x10] ss:$108 sps:$4 sm:$0xff]  }
  0x50   : > { %3110 = vmatprep.mubr.bf16.mxu1 %v4430_v37  ;;  %v4425_v9 = vld [vmem:[%s6297_s1 + $0x470] ss:$8 sps:$4 sm:$0xff]   ;;  %v4466_v34 = vld [vmem:[%s6297_s1 + $0x414] ss:$8 sps:$4 sm:$0xff]  }
  0x51   : > { %3038 = vmatpush1.bf16.msra.mxu0 %v4332_v10  ;;  %v4428_v10 = vld [vmem:[%s5094_s7 + $0x18] ss:$108 sps:$4 sm:$0xff]  }
  0x52   : > { %3081 = vmatpush1.bf16.msra.mxu1 %v4335_v11  ;;  %3039 = vmatprep.subr.bf16.mxu0 %v4340_v12  ;;  %v4431_v11 = vld [vmem:[%s6297_s1 + $0x570] ss:$8 sps:$4 sm:$0xff]   ;;  %v4436_v12 = vld [vmem:[%s6297_s1 + $0x464] ss:$8 sps:$4 sm:$0xff]  }
  0x53   : > { %3082 = vmatprep.subr.bf16.mxu1 %v4343_v13  ;;  %v4439_v13 = vld [vmem:[%s6297_s1 + $0x564] ss:$8 sps:$4 sm:$0xff]   ;;  %v4467_v37 = vld [vmem:[%s6297_s1 + $0x510] ss:$8 sps:$4 sm:$0xff]  }
  0x55   : > { %3040 = vmatpush1.bf16.msra.mxu0 %v4338_v14  ;;  %v4434_v14 = vld [vmem:[%s6297_s1 + $0x460] ss:$8 sps:$4 sm:$0xff]  }
  0x56   : > { %3083 = vmatpush1.bf16.msra.mxu1 %v4341_v15  ;;  %3041 = vmatprep.subr.bf16.mxu0 %v4346_v16  ;;  %v4437_v15 = vld [vmem:[%s6297_s1 + $0x560] ss:$8 sps:$4 sm:$0xff]   ;;  %v4442_v16 = vld [vmem:[%s6297_s1 + $0x454] ss:$8 sps:$4 sm:$0xff]  }
  0x57   : > { %3084 = vmatprep.subr.bf16.mxu1 %v4349_v17  ;;  %v4445_v17 = vld [vmem:[%s6297_s1 + $0x554] ss:$8 sps:$4 sm:$0xff]  }
  0x59   : > { %3042 = vmatpush1.bf16.msra.mxu0 %v4344_v18  ;;  %v4440_v18 = vld [vmem:[%s6297_s1 + $0x450] ss:$8 sps:$4 sm:$0xff]  }
  0x5a   : > { %3085 = vmatpush1.bf16.msra.mxu1 %v4347_v19  ;;  %3043 = vmatprep.subr.bf16.mxu0 %v4352_v20  ;;  %v4526_v19 = vld [vmem:[%s5094_s7 + $0x24] ss:$108 sps:$4 sm:$0xff]  }
  0x5b   : > { %3086 = vmatprep.subr.bf16.mxu1 %v4355_v21  ;;  %v4443_v20 = vld [vmem:[%s6297_s1 + $0x550] ss:$8 sps:$4 sm:$0xff]   ;;  %v4448_v21 = vld [vmem:[%s6297_s1 + $0x444] ss:$8 sps:$4 sm:$0xff]  }
  0x5d   : > { %3044 = vmatpush1.bf16.msra.mxu0 %v4350_v22  ;;  %v4451_v22 = vld [vmem:[%s6297_s1 + $0x544] ss:$8 sps:$4 sm:$0xff]  }
  0x5e   : > { %3087 = vmatpush1.bf16.msra.mxu1 %v4353_v23  ;;  %3045 = vmatprep.subr.bf16.mxu0 %v4358_v24  ;;  %v4532_v23 = vld [vmem:[%s5094_s7 + $0x2c] ss:$108 sps:$4 sm:$0xff]   ;;  %v4446_v24 = vld [vmem:[%s6297_s1 + $0x440] ss:$8 sps:$4 sm:$0xff]  }
  0x5f   : > { %3088 = vmatprep.subr.bf16.mxu1 %v4361_v25  ;;  %v4449_v25 = vld [vmem:[%s6297_s1 + $0x540] ss:$8 sps:$4 sm:$0xff]  }
  0x61   : > { %3046 = vmatpush1.bf16.msra.mxu0 %v4356_v26  ;;  %v4454_v26 = vld [vmem:[%s6297_s1 + $0x434] ss:$8 sps:$4 sm:$0xff]  }
  0x62   : > { %3089 = vmatpush1.bf16.msra.mxu1 %v4359_v27  ;;  %3047 = vmatprep.subr.bf16.mxu0 %v4364_v28  ;;  %v4457_v27 = vld [vmem:[%s6297_s1 + $0x534] ss:$8 sps:$4 sm:$0xff]   ;;  %v4452_v28 = vld [vmem:[%s6297_s1 + $0x430] ss:$8 sps:$4 sm:$0xff]  }
  0x63   : > { %3090 = vmatprep.subr.bf16.mxu1 %v4367_v29  ;;  %v4455_v29 = vld [vmem:[%s6297_s1 + $0x530] ss:$8 sps:$4 sm:$0xff]  }
  0x65   : > { %3048 = vmatpush1.bf16.msra.mxu0 %v4362_v30  ;;  %v4460_v30 = vld [vmem:[%s6297_s1 + $0x424] ss:$8 sps:$4 sm:$0xff]  }
  0x66   : > { %3091 = vmatpush1.bf16.msra.mxu1 %v4365_v31  ;;  %3049 = vmatprep.subr.bf16.mxu0 %v4370_v32  ;;  %v4463_v31 = vld [vmem:[%s6297_s1 + $0x524] ss:$8 sps:$4 sm:$0xff]   ;;  %v4458_v32 = vld [vmem:[%s6297_s1 + $0x420] ss:$8 sps:$4 sm:$0xff]  }
  0x67   : > { %3092 = vmatprep.subr.bf16.mxu1 %v4373_v33  ;;  %v4461_v33 = vld [vmem:[%s6297_s1 + $0x520] ss:$8 sps:$4 sm:$0xff]  }
  0x69   : > { %3050 = vmatpush1.bf16.msra.mxu0 %v4368_v35  ;;  %v4469_v35 = vld [vmem:[%s6297_s1 + $0x514] ss:$8 sps:$4 sm:$0xff]  }
  0x6a   : > { %3093 = vmatpush1.bf16.msra.mxu1 %v4371_v36  ;;  %3051 = vmatprep.subr.bf16.mxu0 %v4376_v38  ;;  %v4464_v36 = vld [vmem:[%s6297_s1 + $0x410] ss:$8 sps:$4 sm:$0xff]   ;;  %v4472_v38 = vld [vmem:[%s6297_s1 + $0x404] ss:$8 sps:$4 sm:$0xff]  }
  0x6b   : > { %3094 = vmatprep.subr.bf16.mxu1 %v4379_v39  ;;  %v4475_v39 = vld [vmem:[%s6297_s1 + $0x504] ss:$8 sps:$4 sm:$0xff]  }
  0x6d   : > { %3052 = vmatpush2.bf16.msra.mxu0 %v4374_v40  ;;  %v4470_v40 = vld [vmem:[%s6297_s1 + $0x400] ss:$8 sps:$4 sm:$0xff]  }
  0x6e   : > { %3095 = vmatpush2.bf16.msra.mxu1 %v4377_v41  ;;  %3053 = vmatprep.subr.bf16.mxu0 %v4382_v42  ;;  %v4473_v41 = vld [vmem:[%s6297_s1 + $0x500] ss:$8 sps:$4 sm:$0xff]   ;;  %v4478_v42 = vld [vmem:[%s6297_s1 + $0x4f4] ss:$8 sps:$4 sm:$0xff]  }
  0x6f   : > { %3096 = vmatprep.subr.bf16.mxu1 %v4385_v43  ;;  %v4481_v43 = vld [vmem:[%s6297_s1 + $0x5f4] ss:$8 sps:$4 sm:$0xff]  }
  0x71   : > { %3054 = vmatpush2.bf16.msra.mxu0 %v4380_v44  ;;  %v4476_v44 = vld [vmem:[%s6297_s1 + $0x4f0] ss:$8 sps:$4 sm:$0xff]  }
  0x72   : > { %3097 = vmatpush2.bf16.msra.mxu1 %v4383_v45  ;;  %3055 = vmatprep.subr.bf16.mxu0 %v4388_v46  ;;  %v4479_v45 = vld [vmem:[%s6297_s1 + $0x5f0] ss:$8 sps:$4 sm:$0xff]   ;;  %v4484_v46 = vld [vmem:[%s6297_s1 + $0x4e4] ss:$8 sps:$4 sm:$0xff]  }
  0x73   : > { %3098 = vmatprep.subr.bf16.mxu1 %v4391_v47  ;;  %v4487_v47 = vld [vmem:[%s6297_s1 + $0x5e4] ss:$8 sps:$4 sm:$0xff]  }
  0x75   : > { %3056 = vmatpush2.bf16.msra.mxu0 %v4386_v48  ;;  %v4482_v48 = vld [vmem:[%s6297_s1 + $0x4e0] ss:$8 sps:$4 sm:$0xff]  }
  0x76   : > { %3099 = vmatpush2.bf16.msra.mxu1 %v4389_v49  ;;  %3057 = vmatprep.subr.bf16.mxu0 %v4394_v50  ;;  %v4485_v49 = vld [vmem:[%s6297_s1 + $0x5e0] ss:$8 sps:$4 sm:$0xff]   ;;  %v4490_v50 = vld [vmem:[%s6297_s1 + $0x4d4] ss:$8 sps:$4 sm:$0xff]  }
  0x77   : > { %3100 = vmatprep.subr.bf16.mxu1 %v4397_v51  ;;  %v4493_v51 = vld [vmem:[%s6297_s1 + $0x5d4] ss:$8 sps:$4 sm:$0xff]  }
  0x79   : > { %3058 = vmatpush2.bf16.msra.mxu0 %v4392_v52  ;;  %v4488_v52 = vld [vmem:[%s6297_s1 + $0x4d0] ss:$8 sps:$4 sm:$0xff]  }
  0x7a   : > { %3101 = vmatpush2.bf16.msra.mxu1 %v4395_v53  ;;  %3059 = vmatprep.subr.bf16.mxu0 %v4400_v54  ;;  %v4491_v53 = vld [vmem:[%s6297_s1 + $0x5d0] ss:$8 sps:$4 sm:$0xff]   ;;  %v4496_v54 = vld [vmem:[%s6297_s1 + $0x4c4] ss:$8 sps:$4 sm:$0xff]  }
  0x7b   : > { %3102 = vmatprep.subr.bf16.mxu1 %v4403_v55  ;;  %v4499_v55 = vld [vmem:[%s6297_s1 + $0x5c4] ss:$8 sps:$4 sm:$0xff]  }
  0x7d   : > { %3060 = vmatpush2.bf16.msra.mxu0 %v4398_v56  ;;  %v4494_v56 = vld [vmem:[%s6297_s1 + $0x4c0] ss:$8 sps:$4 sm:$0xff]  }
  0x7e   : > { %3103 = vmatpush2.bf16.msra.mxu1 %v4401_v57  ;;  %3061 = vmatprep.subr.bf16.mxu0 %v4406_v58  ;;  %v4497_v57 = vld [vmem:[%s6297_s1 + $0x5c0] ss:$8 sps:$4 sm:$0xff]   ;;  %v4502_v58 = vld [vmem:[%s6297_s1 + $0x4b4] ss:$8 sps:$4 sm:$0xff]  }
  0x7f   : > { %3104 = vmatprep.subr.bf16.mxu1 %v4409_v59  ;;  %v4505_v59 = vld [vmem:[%s6297_s1 + $0x5b4] ss:$8 sps:$4 sm:$0xff]  }
  0x81   : > { %3062 = vmatpush2.bf16.msra.mxu0 %v4404_v60  ;;  %v4500_v60 = vld [vmem:[%s6297_s1 + $0x4b0] ss:$8 sps:$4 sm:$0xff]  }
  0x82   : > { %3105 = vmatpush2.bf16.msra.mxu1 %v4407_v61  ;;  %3063 = vmatprep.subr.bf16.mxu0 %v4412_v62  ;;  %v4503_v61 = vld [vmem:[%s6297_s1 + $0x5b0] ss:$8 sps:$4 sm:$0xff]   ;;  %v4508_v62 = vld [vmem:[%s6297_s1 + $0x4a4] ss:$8 sps:$4 sm:$0xff]  }
  0x83   : > { %3106 = vmatprep.subr.bf16.mxu1 %v4415_v63  ;;  %v4511_v63 = vld [vmem:[%s6297_s1 + $0x5a4] ss:$8 sps:$4 sm:$0xff]  }
  0x85   : > { %3064 = vmatpush2.bf16.msra.mxu0 %v4410_v0  ;;  %v4506_v0 = vld [vmem:[%s6297_s1 + $0x4a0] ss:$8 sps:$4 sm:$0xff]  }
  0x86   : > { %3107 = vmatpush2.bf16.msra.mxu1 %v4413_v1  ;;  %3065 = vmatprep.subr.bf16.mxu0 %v4418_v2  ;;  %v4509_v1 = vld [vmem:[%s6297_s1 + $0x5a0] ss:$8 sps:$4 sm:$0xff]   ;;  %v4514_v2 = vld [vmem:[%s6297_s1 + $0x494] ss:$8 sps:$4 sm:$0xff]  }
  0x87   : > { %3108 = vmatprep.subr.bf16.mxu1 %v4421_v3  ;;  %v4517_v3 = vld [vmem:[%s6297_s1 + $0x594] ss:$8 sps:$4 sm:$0xff]  }
  0x89   : > { %3066 = vmatpush2.bf16.msra.mxu0 %v4416_v4  ;;  %v4512_v4 = vld [vmem:[%s6297_s1 + $0x490] ss:$8 sps:$4 sm:$0xff]  }
  0x8a   : > { %3109 = vmatpush2.bf16.msra.mxu1 %v4419_v5  ;;  %3121 = vmatprep.subr.bf16.mxu0 %v4427_v6  ;;  %v4515_v5 = vld [vmem:[%s6297_s1 + $0x590] ss:$8 sps:$4 sm:$0xff]   ;;  %v4520_v6 = vld [vmem:[%s6297_s1 + $0x484] ss:$8 sps:$4 sm:$0xff]  }
  0x8b   : > { %3164 = vmatprep.subr.bf16.mxu1 %v4433_v7  ;;  %v4523_v7 = vld [vmem:[%s6297_s1 + $0x584] ss:$8 sps:$4 sm:$0xff]  }
  0x8c   : > { %3068 = vmatmul.mubr.bf16.vlgmr.msra.gmra.mxu0 %v4422_v8  ;;  %v4518_v8 = vld [vmem:[%s6297_s1 + $0x480] ss:$8 sps:$4 sm:$0xff]  }
  0x8d   : > { %3111 = vmatmul.mubr.bf16.vlgmr.msra.gmra.mxu1 %v4428_v10  ;;  %3122 = vmatpush1.bf16.msra.mxu0 %v4425_v9  ;;  %v4521_v9 = vld [vmem:[%s6297_s1 + $0x580] ss:$8 sps:$4 sm:$0xff]   ;;  %v4529_v10 = vld [vmem:[%s6297_s1 + $0x674] ss:$8 sps:$4 sm:$0xff]  }
  0x8e   : > { %3165 = vmatpush1.bf16.msra.mxu1 %v4431_v11  ;;  %3123 = vmatprep.subr.bf16.mxu0 %v4436_v12  ;;  %v4535_v11 = vld [vmem:[%s6297_s1 + $0x774] ss:$8 sps:$4 sm:$0xff]   ;;  %v4524_v12 = vld [vmem:[%s5094_s7 + $0x20] ss:$108 sps:$4 sm:$0xff]  }
  0x8f   : > { %3166 = vmatprep.subr.bf16.mxu1 %v4439_v13  ;;  %3153 = vmatprep.mubr.bf16.mxu0 %v4526_v19  ;;  %v4527_v13 = vld [vmem:[%s6297_s1 + $0x670] ss:$8 sps:$4 sm:$0xff]   ;;  %v4634_v19 = vld [vmem:[%s5094_s7 + $0x3c] ss:$108 sps:$4 sm:$0xff]  }
  0x90   : > { %3196 = vmatprep.mubr.bf16.mxu1 %v4532_v23  ;;  %v4547_v23 = vld [vmem:[%s6297_s1 + $0x754] ss:$8 sps:$4 sm:$0xff]  }
  0x91   : > { %3124 = vmatpush1.bf16.msra.mxu0 %v4434_v14  ;;  %v4530_v14 = vld [vmem:[%s5094_s7 + $0x28] ss:$108 sps:$4 sm:$0xff]  }
  0x92   : > { %3167 = vmatpush1.bf16.msra.mxu1 %v4437_v15  ;;  %3125 = vmatprep.subr.bf16.mxu0 %v4442_v16  ;;  %v4533_v15 = vld [vmem:[%s6297_s1 + $0x770] ss:$8 sps:$4 sm:$0xff]   ;;  %v4538_v16 = vld [vmem:[%s6297_s1 + $0x664] ss:$8 sps:$4 sm:$0xff]  }
  0x93   : > { %3168 = vmatprep.subr.bf16.mxu1 %v4445_v17  ;;  %v4541_v17 = vld [vmem:[%s6297_s1 + $0x764] ss:$8 sps:$4 sm:$0xff]  }
  0x95   : > { %3126 = vmatpush1.bf16.msra.mxu0 %v4440_v18  ;;  %v4628_v18 = vld [vmem:[%s5094_s7 + $0x34] ss:$108 sps:$4 sm:$0xff]  }
  0x96   : > { %3169 = vmatpush1.bf16.msra.mxu1 %v4443_v20  ;;  %3127 = vmatprep.subr.bf16.mxu0 %v4448_v21  ;;  %v4536_v20 = vld [vmem:[%s6297_s1 + $0x660] ss:$8 sps:$4 sm:$0xff]  }
  0x97   : > { %3170 = vmatprep.subr.bf16.mxu1 %v4451_v22  ;;  %v4539_v21 = vld [vmem:[%s6297_s1 + $0x760] ss:$8 sps:$4 sm:$0xff]   ;;  %v4544_v22 = vld [vmem:[%s6297_s1 + $0x654] ss:$8 sps:$4 sm:$0xff]  }
  0x99   : > { %3128 = vmatpush1.bf16.msra.mxu0 %v4446_v24  ;;  %v4542_v24 = vld [vmem:[%s6297_s1 + $0x650] ss:$8 sps:$4 sm:$0xff]  }
  0x9a   : > { %3171 = vmatpush1.bf16.msra.mxu1 %v4449_v25  ;;  %3129 = vmatprep.subr.bf16.mxu0 %v4454_v26  ;;  %v4545_v25 = vld [vmem:[%s6297_s1 + $0x750] ss:$8 sps:$4 sm:$0xff]   ;;  %v4550_v26 = vld [vmem:[%s6297_s1 + $0x644] ss:$8 sps:$4 sm:$0xff]  }
  0x9b   : > { %3172 = vmatprep.subr.bf16.mxu1 %v4457_v27  ;;  %v4553_v27 = vld [vmem:[%s6297_s1 + $0x744] ss:$8 sps:$4 sm:$0xff]  }
  0x9d   : > { %3130 = vmatpush1.bf16.msra.mxu0 %v4452_v28  ;;  %v4548_v28 = vld [vmem:[%s6297_s1 + $0x640] ss:$8 sps:$4 sm:$0xff]  }
  0x9e   : > { %3173 = vmatpush1.bf16.msra.mxu1 %v4455_v29  ;;  %3131 = vmatprep.subr.bf16.mxu0 %v4460_v30  ;;  %v4551_v29 = vld [vmem:[%s6297_s1 + $0x740] ss:$8 sps:$4 sm:$0xff]   ;;  %v4556_v30 = vld [vmem:[%s6297_s1 + $0x634] ss:$8 sps:$4 sm:$0xff]  }
  0x9f   : > { %3174 = vmatprep.subr.bf16.mxu1 %v4463_v31  ;;  %v4559_v31 = vld [vmem:[%s6297_s1 + $0x734] ss:$8 sps:$4 sm:$0xff]  }
  0xa1   : > { %3132 = vmatpush1.bf16.msra.mxu0 %v4458_v32  ;;  %v4554_v32 = vld [vmem:[%s6297_s1 + $0x630] ss:$8 sps:$4 sm:$0xff]  }
  0xa2   : > { %3175 = vmatpush1.bf16.msra.mxu1 %v4461_v33  ;;  %3133 = vmatprep.subr.bf16.mxu0 %v4466_v34  ;;  %v4557_v33 = vld [vmem:[%s6297_s1 + $0x730] ss:$8 sps:$4 sm:$0xff]   ;;  %v4562_v34 = vld [vmem:[%s6297_s1 + $0x624] ss:$8 sps:$4 sm:$0xff]  }
  0xa3   : > { %3176 = vmatprep.subr.bf16.mxu1 %v4469_v35  ;;  %v4565_v35 = vld [vmem:[%s6297_s1 + $0x724] ss:$8 sps:$4 sm:$0xff]  }
  0xa5   : > { %3134 = vmatpush1.bf16.msra.mxu0 %v4464_v36  ;;  %v4560_v36 = vld [vmem:[%s6297_s1 + $0x620] ss:$8 sps:$4 sm:$0xff]  }
  0xa6   : > { %3177 = vmatpush1.bf16.msra.mxu1 %v4467_v37  ;;  %3135 = vmatprep.subr.bf16.mxu0 %v4472_v38  ;;  %v4563_v37 = vld [vmem:[%s6297_s1 + $0x720] ss:$8 sps:$4 sm:$0xff]   ;;  %v4568_v38 = vld [vmem:[%s6297_s1 + $0x614] ss:$8 sps:$4 sm:$0xff]  }
  0xa7   : > { %3178 = vmatprep.subr.bf16.mxu1 %v4475_v39  ;;  %v4571_v39 = vld [vmem:[%s6297_s1 + $0x714] ss:$8 sps:$4 sm:$0xff]  }
  0xa9   : > { %3136 = vmatpush1.bf16.msra.mxu0 %v4470_v40  ;;  %v4566_v40 = vld [vmem:[%s6297_s1 + $0x610] ss:$8 sps:$4 sm:$0xff]  }
  0xaa   : > { %3179 = vmatpush1.bf16.msra.mxu1 %v4473_v41  ;;  %3137 = vmatprep.subr.bf16.mxu0 %v4478_v42  ;;  %v4569_v41 = vld [vmem:[%s6297_s1 + $0x710] ss:$8 sps:$4 sm:$0xff]   ;;  %v4574_v42 = vld [vmem:[%s6297_s1 + $0x604] ss:$8 sps:$4 sm:$0xff]  }
  0xab   : > { %3180 = vmatprep.subr.bf16.mxu1 %v4481_v43  ;;  %v4577_v43 = vld [vmem:[%s6297_s1 + $0x704] ss:$8 sps:$4 sm:$0xff]  }
  0xad   : > { %3138 = vmatpush2.bf16.msra.mxu0 %v4476_v44  ;;  %v4572_v44 = vld [vmem:[%s6297_s1 + $0x600] ss:$8 sps:$4 sm:$0xff]  }
  0xae   : > { %3181 = vmatpush2.bf16.msra.mxu1 %v4479_v45  ;;  %3139 = vmatprep.subr.bf16.mxu0 %v4484_v46  ;;  %v4575_v45 = vld [vmem:[%s6297_s1 + $0x700] ss:$8 sps:$4 sm:$0xff]   ;;  %v4580_v46 = vld [vmem:[%s6297_s1 + $0x6f4] ss:$8 sps:$4 sm:$0xff]  }
  0xaf   : > { %3182 = vmatprep.subr.bf16.mxu1 %v4487_v47  ;;  %v4583_v47 = vld [vmem:[%s6297_s1 + $0x7f4] ss:$8 sps:$4 sm:$0xff]  }
  0xb1   : > { %3140 = vmatpush2.bf16.msra.mxu0 %v4482_v48  ;;  %v4578_v48 = vld [vmem:[%s6297_s1 + $0x6f0] ss:$8 sps:$4 sm:$0xff]  }
  0xb2   : > { %3183 = vmatpush2.bf16.msra.mxu1 %v4485_v49  ;;  %3141 = vmatprep.subr.bf16.mxu0 %v4490_v50  ;;  %v4581_v49 = vld [vmem:[%s6297_s1 + $0x7f0] ss:$8 sps:$4 sm:$0xff]   ;;  %v4586_v50 = vld [vmem:[%s6297_s1 + $0x6e4] ss:$8 sps:$4 sm:$0xff]  }
  0xb3   : > { %3184 = vmatprep.subr.bf16.mxu1 %v4493_v51  ;;  %v4589_v51 = vld [vmem:[%s6297_s1 + $0x7e4] ss:$8 sps:$4 sm:$0xff]  }
  0xb5   : > { %3142 = vmatpush2.bf16.msra.mxu0 %v4488_v52  ;;  %v4584_v52 = vld [vmem:[%s6297_s1 + $0x6e0] ss:$8 sps:$4 sm:$0xff]  }
  0xb6   : > { %3185 = vmatpush2.bf16.msra.mxu1 %v4491_v53  ;;  %3143 = vmatprep.subr.bf16.mxu0 %v4496_v54  ;;  %v4587_v53 = vld [vmem:[%s6297_s1 + $0x7e0] ss:$8 sps:$4 sm:$0xff]   ;;  %v4592_v54 = vld [vmem:[%s6297_s1 + $0x6d4] ss:$8 sps:$4 sm:$0xff]  }
  0xb7   : > { %3186 = vmatprep.subr.bf16.mxu1 %v4499_v55  ;;  %v4595_v55 = vld [vmem:[%s6297_s1 + $0x7d4] ss:$8 sps:$4 sm:$0xff]  }
  0xb9   : > { %3144 = vmatpush2.bf16.msra.mxu0 %v4494_v56  ;;  %v4590_v56 = vld [vmem:[%s6297_s1 + $0x6d0] ss:$8 sps:$4 sm:$0xff]  }
  0xba   : > { %3187 = vmatpush2.bf16.msra.mxu1 %v4497_v57  ;;  %3145 = vmatprep.subr.bf16.mxu0 %v4502_v58  ;;  %v4593_v57 = vld [vmem:[%s6297_s1 + $0x7d0] ss:$8 sps:$4 sm:$0xff]   ;;  %v4598_v58 = vld [vmem:[%s6297_s1 + $0x6c4] ss:$8 sps:$4 sm:$0xff]  }
  0xbb   : > { %3188 = vmatprep.subr.bf16.mxu1 %v4505_v59  ;;  %v4601_v59 = vld [vmem:[%s6297_s1 + $0x7c4] ss:$8 sps:$4 sm:$0xff]  }
  0xbd   : > { %3146 = vmatpush2.bf16.msra.mxu0 %v4500_v60  ;;  %v4596_v60 = vld [vmem:[%s6297_s1 + $0x6c0] ss:$8 sps:$4 sm:$0xff]  }
  0xbe   : > { %3189 = vmatpush2.bf16.msra.mxu1 %v4503_v61  ;;  %3147 = vmatprep.subr.bf16.mxu0 %v4508_v62  ;;  %v4599_v61 = vld [vmem:[%s6297_s1 + $0x7c0] ss:$8 sps:$4 sm:$0xff]   ;;  %v4604_v62 = vld [vmem:[%s6297_s1 + $0x6b4] ss:$8 sps:$4 sm:$0xff]  }
  0xbf   : > { %3190 = vmatprep.subr.bf16.mxu1 %v4511_v63  ;;  %v4607_v63 = vld [vmem:[%s6297_s1 + $0x7b4] ss:$8 sps:$4 sm:$0xff]  }
  0xc1   : > { %3148 = vmatpush2.bf16.msra.mxu0 %v4506_v0  ;;  %v4602_v0 = vld [vmem:[%s6297_s1 + $0x6b0] ss:$8 sps:$4 sm:$0xff]  }
  0xc2   : > { %3191 = vmatpush2.bf16.msra.mxu1 %v4509_v1  ;;  %3149 = vmatprep.subr.bf16.mxu0 %v4514_v2  ;;  %v4605_v1 = vld [vmem:[%s6297_s1 + $0x7b0] ss:$8 sps:$4 sm:$0xff]   ;;  %v4610_v2 = vld [vmem:[%s6297_s1 + $0x6a4] ss:$8 sps:$4 sm:$0xff]  }
  0xc3   : > { %3192 = vmatprep.subr.bf16.mxu1 %v4517_v3  ;;  %v4613_v3 = vld [vmem:[%s6297_s1 + $0x7a4] ss:$8 sps:$4 sm:$0xff]  }
  0xc5   : > { %3150 = vmatpush2.bf16.msra.mxu0 %v4512_v4  ;;  %v4608_v4 = vld [vmem:[%s6297_s1 + $0x6a0] ss:$8 sps:$4 sm:$0xff]  }
  0xc6   : > { %3193 = vmatpush2.bf16.msra.mxu1 %v4515_v5  ;;  %3151 = vmatprep.subr.bf16.mxu0 %v4520_v6  ;;  %v4611_v5 = vld [vmem:[%s6297_s1 + $0x7a0] ss:$8 sps:$4 sm:$0xff]   ;;  %v4616_v6 = vld [vmem:[%s6297_s1 + $0x694] ss:$8 sps:$4 sm:$0xff]  }
  0xc7   : > { %3194 = vmatprep.subr.bf16.mxu1 %v4523_v7  ;;  %v4619_v7 = vld [vmem:[%s6297_s1 + $0x794] ss:$8 sps:$4 sm:$0xff]  }
  0xc9   : > { %3152 = vmatpush2.bf16.msra.mxu0 %v4518_v8  ;;  %v4614_v8 = vld [vmem:[%s6297_s1 + $0x690] ss:$8 sps:$4 sm:$0xff]  }
  0xca   : > { %3195 = vmatpush2.bf16.msra.mxu1 %v4521_v9  ;;  %3207 = vmatprep.subr.bf16.mxu0 %v4529_v10  ;;  %v4617_v9 = vld [vmem:[%s6297_s1 + $0x790] ss:$8 sps:$4 sm:$0xff]   ;;  %v4622_v10 = vld [vmem:[%s6297_s1 + $0x684] ss:$8 sps:$4 sm:$0xff]  }
  0xcb   : > { %3250 = vmatprep.subr.bf16.mxu1 %v4535_v11  ;;  %v4625_v11 = vld [vmem:[%s6297_s1 + $0x784] ss:$8 sps:$4 sm:$0xff]  }
  0xcc   : > { %3154 = vmatmul.mubr.bf16.vlgmr.msra.gmra.mxu0 %v4524_v12  ;;  %v4620_v12 = vld [vmem:[%s6297_s1 + $0x680] ss:$8 sps:$4 sm:$0xff]  }
  0xcd   : > { %3197 = vmatmul.mubr.bf16.vlgmr.msra.gmra.mxu1 %v4530_v14  ;;  %3208 = vmatpush1.bf16.msra.mxu0 %v4527_v13  ;;  %v4623_v13 = vld [vmem:[%s6297_s1 + $0x780] ss:$8 sps:$4 sm:$0xff]   ;;  %v4631_v14 = vld [vmem:[%s6297_s1 + $0x874] ss:$8 sps:$4 sm:$0xff]  }
  0xce   : > { %3251 = vmatpush1.bf16.msra.mxu1 %v4533_v15  ;;  %3209 = vmatprep.subr.bf16.mxu0 %v4538_v16  ;;  %v4637_v15 = vld [vmem:[%s6297_s1 + $0x974] ss:$8 sps:$4 sm:$0xff]  }
  0xcf   : > { %3252 = vmatprep.subr.bf16.mxu1 %v4541_v17  ;;  %3239 = vmatprep.mubr.bf16.mxu0 %v4628_v18  ;;  %v4626_v16 = vld [vmem:[%s5094_s7 + $0x30] ss:$108 sps:$4 sm:$0xff]   ;;  %v4632_v18 = vld [vmem:[%s5094_s7 + $0x38] ss:$108 sps:$4 sm:$0xff]  }
  0xd0   : > { %3282 = vmatprep.mubr.bf16.mxu1 %v4634_v19  ;;  %v4629_v17 = vld [vmem:[%s6297_s1 + $0x870] ss:$8 sps:$4 sm:$0xff]  }
  0xd1   : > { %3210 = vmatpush1.bf16.msra.mxu0 %v4536_v20  ;;  %v4635_v19 = vld [vmem:[%s6297_s1 + $0x970] ss:$8 sps:$4 sm:$0xff]   ;;  %v4640_v20 = vld [vmem:[%s6297_s1 + $0x864] ss:$8 sps:$4 sm:$0xff]  }
  0xd2   : > { %3253 = vmatpush1.bf16.msra.mxu1 %v4539_v21  ;;  %3211 = vmatprep.subr.bf16.mxu0 %v4544_v22  ;;  %v4643_v21 = vld [vmem:[%s6297_s1 + $0x964] ss:$8 sps:$4 sm:$0xff]  }
  0xd3   : > { %3254 = vmatprep.subr.bf16.mxu1 %v4547_v23  ;;  %v4730_v22 = vld [vmem:[%s5094_s7 + $0x44] ss:$108 sps:$4 sm:$0xff]   ;;  %v4736_v23 = vld [vmem:[%s5094_s7 + $0x4c] ss:$108 sps:$4 sm:$0xff]  }
  0xd5   : > { %3212 = vmatpush1.bf16.msra.mxu0 %v4542_v24  ;;  %v4638_v24 = vld [vmem:[%s6297_s1 + $0x860] ss:$8 sps:$4 sm:$0xff]  }
  0xd6   : > { %3255 = vmatpush1.bf16.msra.mxu1 %v4545_v25  ;;  %3213 = vmatprep.subr.bf16.mxu0 %v4550_v26  ;;  %v4641_v25 = vld [vmem:[%s6297_s1 + $0x960] ss:$8 sps:$4 sm:$0xff]   ;;  %v4646_v26 = vld [vmem:[%s6297_s1 + $0x854] ss:$8 sps:$4 sm:$0xff]  }
  0xd7   : > { %3256 = vmatprep.subr.bf16.mxu1 %v4553_v27  ;;  %v4649_v27 = vld [vmem:[%s6297_s1 + $0x954] ss:$8 sps:$4 sm:$0xff]  }
  0xd9   : > { %3214 = vmatpush1.bf16.msra.mxu0 %v4548_v28  ;;  %v4644_v28 = vld [vmem:[%s6297_s1 + $0x850] ss:$8 sps:$4 sm:$0xff]  }
  0xda   : > { %3257 = vmatpush1.bf16.msra.mxu1 %v4551_v29  ;;  %3215 = vmatprep.subr.bf16.mxu0 %v4556_v30  ;;  %v4647_v29 = vld [vmem:[%s6297_s1 + $0x950] ss:$8 sps:$4 sm:$0xff]   ;;  %v4652_v30 = vld [vmem:[%s6297_s1 + $0x844] ss:$8 sps:$4 sm:$0xff]  }
  0xdb   : > { %3258 = vmatprep.subr.bf16.mxu1 %v4559_v31  ;;  %v4655_v31 = vld [vmem:[%s6297_s1 + $0x944] ss:$8 sps:$4 sm:$0xff]  }
  0xdd   : > { %3216 = vmatpush1.bf16.msra.mxu0 %v4554_v32  ;;  %v4650_v32 = vld [vmem:[%s6297_s1 + $0x840] ss:$8 sps:$4 sm:$0xff]  }
  0xde   : > { %3259 = vmatpush1.bf16.msra.mxu1 %v4557_v33  ;;  %3217 = vmatprep.subr.bf16.mxu0 %v4562_v34  ;;  %v4653_v33 = vld [vmem:[%s6297_s1 + $0x940] ss:$8 sps:$4 sm:$0xff]   ;;  %v4658_v34 = vld [vmem:[%s6297_s1 + $0x834] ss:$8 sps:$4 sm:$0xff]  }
  0xdf   : > { %3260 = vmatprep.subr.bf16.mxu1 %v4565_v35  ;;  %v4661_v35 = vld [vmem:[%s6297_s1 + $0x934] ss:$8 sps:$4 sm:$0xff]  }
  0xe1   : > { %3218 = vmatpush1.bf16.msra.mxu0 %v4560_v36  ;;  %v4656_v36 = vld [vmem:[%s6297_s1 + $0x830] ss:$8 sps:$4 sm:$0xff]  }
  0xe2   : > { %3261 = vmatpush1.bf16.msra.mxu1 %v4563_v37  ;;  %3219 = vmatprep.subr.bf16.mxu0 %v4568_v38  ;;  %v4659_v37 = vld [vmem:[%s6297_s1 + $0x930] ss:$8 sps:$4 sm:$0xff]   ;;  %v4664_v38 = vld [vmem:[%s6297_s1 + $0x824] ss:$8 sps:$4 sm:$0xff]  }
  0xe3   : > { %3262 = vmatprep.subr.bf16.mxu1 %v4571_v39  ;;  %v4667_v39 = vld [vmem:[%s6297_s1 + $0x924] ss:$8 sps:$4 sm:$0xff]  }
  0xe5   : > { %3220 = vmatpush1.bf16.msra.mxu0 %v4566_v40  ;;  %v4662_v40 = vld [vmem:[%s6297_s1 + $0x820] ss:$8 sps:$4 sm:$0xff]  }
  0xe6   : > { %3263 = vmatpush1.bf16.msra.mxu1 %v4569_v41  ;;  %3221 = vmatprep.subr.bf16.mxu0 %v4574_v42  ;;  %v4665_v41 = vld [vmem:[%s6297_s1 + $0x920] ss:$8 sps:$4 sm:$0xff]   ;;  %v4670_v42 = vld [vmem:[%s6297_s1 + $0x814] ss:$8 sps:$4 sm:$0xff]  }
  0xe7   : > { %3264 = vmatprep.subr.bf16.mxu1 %v4577_v43  ;;  %v4673_v43 = vld [vmem:[%s6297_s1 + $0x914] ss:$8 sps:$4 sm:$0xff]  }
  0xe9   : > { %3222 = vmatpush1.bf16.msra.mxu0 %v4572_v44  ;;  %v4668_v44 = vld [vmem:[%s6297_s1 + $0x810] ss:$8 sps:$4 sm:$0xff]  }
  0xea   : > { %3265 = vmatpush1.bf16.msra.mxu1 %v4575_v45  ;;  %3223 = vmatprep.subr.bf16.mxu0 %v4580_v46  ;;  %v4671_v45 = vld [vmem:[%s6297_s1 + $0x910] ss:$8 sps:$4 sm:$0xff]   ;;  %v4676_v46 = vld [vmem:[%s6297_s1 + $0x804] ss:$8 sps:$4 sm:$0xff]  }
  0xeb   : > { %3266 = vmatprep.subr.bf16.mxu1 %v4583_v47  ;;  %v4679_v47 = vld [vmem:[%s6297_s1 + $0x904] ss:$8 sps:$4 sm:$0xff]  }
  0xed   : > { %3224 = vmatpush2.bf16.msra.mxu0 %v4578_v48  ;;  %v4674_v48 = vld [vmem:[%s6297_s1 + $0x800] ss:$8 sps:$4 sm:$0xff]  }
  0xee   : > { %3267 = vmatpush2.bf16.msra.mxu1 %v4581_v49  ;;  %3225 = vmatprep.subr.bf16.mxu0 %v4586_v50  ;;  %v4677_v49 = vld [vmem:[%s6297_s1 + $0x900] ss:$8 sps:$4 sm:$0xff]   ;;  %v4682_v50 = vld [vmem:[%s6297_s1 + $0x8f4] ss:$8 sps:$4 sm:$0xff]  }
  0xef   : > { %3268 = vmatprep.subr.bf16.mxu1 %v4589_v51  ;;  %v4685_v51 = vld [vmem:[%s6297_s1 + $0x9f4] ss:$8 sps:$4 sm:$0xff]  }
  0xf1   : > { %3226 = vmatpush2.bf16.msra.mxu0 %v4584_v52  ;;  %v4680_v52 = vld [vmem:[%s6297_s1 + $0x8f0] ss:$8 sps:$4 sm:$0xff]  }
  0xf2   : > { %3269 = vmatpush2.bf16.msra.mxu1 %v4587_v53  ;;  %3227 = vmatprep.subr.bf16.mxu0 %v4592_v54  ;;  %v4683_v53 = vld [vmem:[%s6297_s1 + $0x9f0] ss:$8 sps:$4 sm:$0xff]   ;;  %v4688_v54 = vld [vmem:[%s6297_s1 + $0x8e4] ss:$8 sps:$4 sm:$0xff]  }
  0xf3   : > { %3270 = vmatprep.subr.bf16.mxu1 %v4595_v55  ;;  %v4691_v55 = vld [vmem:[%s6297_s1 + $0x9e4] ss:$8 sps:$4 sm:$0xff]  }
  0xf5   : > { %3228 = vmatpush2.bf16.msra.mxu0 %v4590_v56  ;;  %v4686_v56 = vld [vmem:[%s6297_s1 + $0x8e0] ss:$8 sps:$4 sm:$0xff]  }
  0xf6   : > { %3271 = vmatpush2.bf16.msra.mxu1 %v4593_v57  ;;  %3229 = vmatprep.subr.bf16.mxu0 %v4598_v58  ;;  %v4689_v57 = vld [vmem:[%s6297_s1 + $0x9e0] ss:$8 sps:$4 sm:$0xff]   ;;  %v4694_v58 = vld [vmem:[%s6297_s1 + $0x8d4] ss:$8 sps:$4 sm:$0xff]  }
  0xf7   : > { %3272 = vmatprep.subr.bf16.mxu1 %v4601_v59  ;;  %v4697_v59 = vld [vmem:[%s6297_s1 + $0x9d4] ss:$8 sps:$4 sm:$0xff]  }
  0xf9   : > { %3230 = vmatpush2.bf16.msra.mxu0 %v4596_v60  ;;  %v4692_v60 = vld [vmem:[%s6297_s1 + $0x8d0] ss:$8 sps:$4 sm:$0xff]  }
  0xfa   : > { %3273 = vmatpush2.bf16.msra.mxu1 %v4599_v61  ;;  %3231 = vmatprep.subr.bf16.mxu0 %v4604_v62  ;;  %v4695_v61 = vld [vmem:[%s6297_s1 + $0x9d0] ss:$8 sps:$4 sm:$0xff]   ;;  %v4700_v62 = vld [vmem:[%s6297_s1 + $0x8c4] ss:$8 sps:$4 sm:$0xff]  }
  0xfb   : > { %3274 = vmatprep.subr.bf16.mxu1 %v4607_v63  ;;  %v4703_v63 = vld [vmem:[%s6297_s1 + $0x9c4] ss:$8 sps:$4 sm:$0xff]  }
  0xfd   : > { %3232 = vmatpush2.bf16.msra.mxu0 %v4602_v0  ;;  %v4698_v0 = vld [vmem:[%s6297_s1 + $0x8c0] ss:$8 sps:$4 sm:$0xff]  }
  0xfe   : > { %3275 = vmatpush2.bf16.msra.mxu1 %v4605_v1  ;;  %3233 = vmatprep.subr.bf16.mxu0 %v4610_v2  ;;  %v4701_v1 = vld [vmem:[%s6297_s1 + $0x9c0] ss:$8 sps:$4 sm:$0xff]   ;;  %v4706_v2 = vld [vmem:[%s6297_s1 + $0x8b4] ss:$8 sps:$4 sm:$0xff]  }
  0xff   : > { %3276 = vmatprep.subr.bf16.mxu1 %v4613_v3  ;;  %v4709_v3 = vld [vmem:[%s6297_s1 + $0x9b4] ss:$8 sps:$4 sm:$0xff]  }
 0x101   : > { %3234 = vmatpush2.bf16.msra.mxu0 %v4608_v4  ;;  %v4704_v4 = vld [vmem:[%s6297_s1 + $0x8b0] ss:$8 sps:$4 sm:$0xff]  }
 0x102   : > { %3277 = vmatpush2.bf16.msra.mxu1 %v4611_v5  ;;  %3235 = vmatprep.subr.bf16.mxu0 %v4616_v6  ;;  %v4707_v5 = vld [vmem:[%s6297_s1 + $0x9b0] ss:$8 sps:$4 sm:$0xff]   ;;  %v4712_v6 = vld [vmem:[%s6297_s1 + $0x8a4] ss:$8 sps:$4 sm:$0xff]  }
 0x103   : > { %3278 = vmatprep.subr.bf16.mxu1 %v4619_v7  ;;  %v4715_v7 = vld [vmem:[%s6297_s1 + $0x9a4] ss:$8 sps:$4 sm:$0xff]  }
 0x105   : > { %3236 = vmatpush2.bf16.msra.mxu0 %v4614_v8  ;;  %v4710_v8 = vld [vmem:[%s6297_s1 + $0x8a0] ss:$8 sps:$4 sm:$0xff]  }
 0x106   : > { %3279 = vmatpush2.bf16.msra.mxu1 %v4617_v9  ;;  %3237 = vmatprep.subr.bf16.mxu0 %v4622_v10  ;;  %v4713_v9 = vld [vmem:[%s6297_s1 + $0x9a0] ss:$8 sps:$4 sm:$0xff]   ;;  %v4718_v10 = vld [vmem:[%s6297_s1 + $0x894] ss:$8 sps:$4 sm:$0xff]  }
 0x107   : > { %3280 = vmatprep.subr.bf16.mxu1 %v4625_v11  ;;  %v4721_v11 = vld [vmem:[%s6297_s1 + $0x994] ss:$8 sps:$4 sm:$0xff]  }
 0x109   : > { %3238 = vmatpush2.bf16.msra.mxu0 %v4620_v12  ;;  %v4716_v12 = vld [vmem:[%s6297_s1 + $0x890] ss:$8 sps:$4 sm:$0xff]  }
 0x10a   : > { %3281 = vmatpush2.bf16.msra.mxu1 %v4623_v13  ;;  %3293 = vmatprep.subr.bf16.mxu0 %v4631_v14  ;;  %v4719_v13 = vld [vmem:[%s6297_s1 + $0x990] ss:$8 sps:$4 sm:$0xff]   ;;  %v4724_v14 = vld [vmem:[%s6297_s1 + $0x884] ss:$8 sps:$4 sm:$0xff]  }
 0x10b   : > { %3336 = vmatprep.subr.bf16.mxu1 %v4637_v15  ;;  %v4727_v15 = vld [vmem:[%s6297_s1 + $0x984] ss:$8 sps:$4 sm:$0xff]  }
 0x10c   : > { %3240 = vmatmul.mubr.bf16.vlgmr.msra.gmra.mxu0 %v4626_v16  ;;  %v4722_v16 = vld [vmem:[%s6297_s1 + $0x880] ss:$8 sps:$4 sm:$0xff]  }
 0x10d   : > { %3283 = vmatmul.mubr.bf16.vlgmr.msra.gmra.mxu1 %v4632_v18  ;;  %3294 = vmatpush1.bf16.msra.mxu0 %v4629_v17  ;;  %v4725_v17 = vld [vmem:[%s6297_s1 + $0x980] ss:$8 sps:$4 sm:$0xff]   ;;  %v4733_v18 = vld [vmem:[%s6297_s1 + $0xa74] ss:$8 sps:$4 sm:$0xff]  }
 0x10e   : > { %3337 = vmatpush1.bf16.msra.mxu1 %v4635_v19  ;;  %3295 = vmatprep.subr.bf16.mxu0 %v4640_v20  ;;  %v4739_v19 = vld [vmem:[%s6297_s1 + $0xb74] ss:$8 sps:$4 sm:$0xff]   ;;  %v4728_v20 = vld [vmem:[%s5094_s7 + $0x40] ss:$108 sps:$4 sm:$0xff]  }
 0x10f   : > { %3338 = vmatprep.subr.bf16.mxu1 %v4643_v21  ;;  %3325 = vmatprep.mubr.bf16.mxu0 %v4730_v22  ;;  %v4734_v21 = vld [vmem:[%s5094_s7 + $0x48] ss:$108 sps:$4 sm:$0xff]   ;;  %v4731_v22 = vld [vmem:[%s6297_s1 + $0xa70] ss:$8 sps:$4 sm:$0xff]  }
 0x110   : > { %3368 = vmatprep.mubr.bf16.mxu1 %v4736_v23  ;;  %v4737_v23 = vld [vmem:[%s6297_s1 + $0xb70] ss:$8 sps:$4 sm:$0xff]  }
 0x111   : > { %3296 = vmatpush1.bf16.msra.mxu0 %v4638_v24  ;;  %v4742_v24 = vld [vmem:[%s6297_s1 + $0xa64] ss:$8 sps:$4 sm:$0xff]  }
 0x112   : > { %3339 = vmatpush1.bf16.msra.mxu1 %v4641_v25  ;;  %3297 = vmatprep.subr.bf16.mxu0 %v4646_v26  ;;  %v4745_v25 = vld [vmem:[%s6297_s1 + $0xb64] ss:$8 sps:$4 sm:$0xff]   ;;  %v4832_v26 = vld [vmem:[%s5094_s7 + $0x54] ss:$108 sps:$4 sm:$0xff]  }
 0x113   : > { %3340 = vmatprep.subr.bf16.mxu1 %v4649_v27  ;;  %v4838_v27 = vld [vmem:[%s5094_s7 + $0x5c] ss:$108 sps:$4 sm:$0xff]  }
 0x115   : > { %3298 = vmatpush1.bf16.msra.mxu0 %v4644_v28  ;;  %v4740_v28 = vld [vmem:[%s6297_s1 + $0xa60] ss:$8 sps:$4 sm:$0xff]  }
 0x116   : > { %3341 = vmatpush1.bf16.msra.mxu1 %v4647_v29  ;;  %3299 = vmatprep.subr.bf16.mxu0 %v4652_v30  ;;  %v4743_v29 = vld [vmem:[%s6297_s1 + $0xb60] ss:$8 sps:$4 sm:$0xff]   ;;  %v4748_v30 = vld [vmem:[%s6297_s1 + $0xa54] ss:$8 sps:$4 sm:$0xff]  }
 0x117   : > { %3342 = vmatprep.subr.bf16.mxu1 %v4655_v31  ;;  %v4751_v31 = vld [vmem:[%s6297_s1 + $0xb54] ss:$8 sps:$4 sm:$0xff]  }
 0x119   : > { %3300 = vmatpush1.bf16.msra.mxu0 %v4650_v32  ;;  %v4746_v32 = vld [vmem:[%s6297_s1 + $0xa50] ss:$8 sps:$4 sm:$0xff]  }
 0x11a   : > { %3343 = vmatpush1.bf16.msra.mxu1 %v4653_v33  ;;  %3301 = vmatprep.subr.bf16.mxu0 %v4658_v34  ;;  %v4749_v33 = vld [vmem:[%s6297_s1 + $0xb50] ss:$8 sps:$4 sm:$0xff]   ;;  %v4754_v34 = vld [vmem:[%s6297_s1 + $0xa44] ss:$8 sps:$4 sm:$0xff]  }
 0x11b   : > { %3344 = vmatprep.subr.bf16.mxu1 %v4661_v35  ;;  %v4757_v35 = vld [vmem:[%s6297_s1 + $0xb44] ss:$8 sps:$4 sm:$0xff]  }
 0x11d   : > { %3302 = vmatpush1.bf16.msra.mxu0 %v4656_v36  ;;  %v4752_v36 = vld [vmem:[%s6297_s1 + $0xa40] ss:$8 sps:$4 sm:$0xff]  }
 0x11e   : > { %3345 = vmatpush1.bf16.msra.mxu1 %v4659_v37  ;;  %3303 = vmatprep.subr.bf16.mxu0 %v4664_v38  ;;  %v4755_v37 = vld [vmem:[%s6297_s1 + $0xb40] ss:$8 sps:$4 sm:$0xff]   ;;  %v4760_v38 = vld [vmem:[%s6297_s1 + $0xa34] ss:$8 sps:$4 sm:$0xff]  }
 0x11f   : > { %3346 = vmatprep.subr.bf16.mxu1 %v4667_v39  ;;  %v4763_v39 = vld [vmem:[%s6297_s1 + $0xb34] ss:$8 sps:$4 sm:$0xff]  }
 0x121   : > { %3304 = vmatpush1.bf16.msra.mxu0 %v4662_v40  ;;  %v4758_v40 = vld [vmem:[%s6297_s1 + $0xa30] ss:$8 sps:$4 sm:$0xff]  }
 0x122   : > { %3347 = vmatpush1.bf16.msra.mxu1 %v4665_v41  ;;  %3305 = vmatprep.subr.bf16.mxu0 %v4670_v42  ;;  %v4761_v41 = vld [vmem:[%s6297_s1 + $0xb30] ss:$8 sps:$4 sm:$0xff]   ;;  %v4766_v42 = vld [vmem:[%s6297_s1 + $0xa24] ss:$8 sps:$4 sm:$0xff]  }
 0x123   : > { %3348 = vmatprep.subr.bf16.mxu1 %v4673_v43  ;;  %v4769_v43 = vld [vmem:[%s6297_s1 + $0xb24] ss:$8 sps:$4 sm:$0xff]  }
 0x125   : > { %3306 = vmatpush1.bf16.msra.mxu0 %v4668_v44  ;;  %v4764_v44 = vld [vmem:[%s6297_s1 + $0xa20] ss:$8 sps:$4 sm:$0xff]  }
 0x126   : > { %3349 = vmatpush1.bf16.msra.mxu1 %v4671_v45  ;;  %3307 = vmatprep.subr.bf16.mxu0 %v4676_v46  ;;  %v4767_v45 = vld [vmem:[%s6297_s1 + $0xb20] ss:$8 sps:$4 sm:$0xff]   ;;  %v4772_v46 = vld [vmem:[%s6297_s1 + $0xa14] ss:$8 sps:$4 sm:$0xff]  }
 0x127   : > { %3350 = vmatprep.subr.bf16.mxu1 %v4679_v47  ;;  %v4775_v47 = vld [vmem:[%s6297_s1 + $0xb14] ss:$8 sps:$4 sm:$0xff]  }
 0x129   : > { %3308 = vmatpush1.bf16.msra.mxu0 %v4674_v48  ;;  %v4770_v48 = vld [vmem:[%s6297_s1 + $0xa10] ss:$8 sps:$4 sm:$0xff]  }
 0x12a   : > { %3351 = vmatpush1.bf16.msra.mxu1 %v4677_v49  ;;  %3309 = vmatprep.subr.bf16.mxu0 %v4682_v50  ;;  %v4773_v49 = vld [vmem:[%s6297_s1 + $0xb10] ss:$8 sps:$4 sm:$0xff]   ;;  %v4778_v50 = vld [vmem:[%s6297_s1 + $0xa04] ss:$8 sps:$4 sm:$0xff]  }
 0x12b   : > { %3352 = vmatprep.subr.bf16.mxu1 %v4685_v51  ;;  %v4781_v51 = vld [vmem:[%s6297_s1 + $0xb04] ss:$8 sps:$4 sm:$0xff]  }
 0x12d   : > { %3310 = vmatpush2.bf16.msra.mxu0 %v4680_v52  ;;  %v4776_v52 = vld [vmem:[%s6297_s1 + $0xa00] ss:$8 sps:$4 sm:$0xff]  }
 0x12e   : > { %3353 = vmatpush2.bf16.msra.mxu1 %v4683_v53  ;;  %3311 = vmatprep.subr.bf16.mxu0 %v4688_v54  ;;  %v4779_v53 = vld [vmem:[%s6297_s1 + $0xb00] ss:$8 sps:$4 sm:$0xff]   ;;  %v4784_v54 = vld [vmem:[%s6297_s1 + $0xaf4] ss:$8 sps:$4 sm:$0xff]  }
 0x12f   : > { %3354 = vmatprep.subr.bf16.mxu1 %v4691_v55  ;;  %v4787_v55 = vld [vmem:[%s6297_s1 + $0xbf4] ss:$8 sps:$4 sm:$0xff]  }
 0x131   : > { %3312 = vmatpush2.bf16.msra.mxu0 %v4686_v56  ;;  %v4782_v56 = vld [vmem:[%s6297_s1 + $0xaf0] ss:$8 sps:$4 sm:$0xff]  }
 0x132   : > { %3355 = vmatpush2.bf16.msra.mxu1 %v4689_v57  ;;  %3313 = vmatprep.subr.bf16.mxu0 %v4694_v58  ;;  %v4785_v57 = vld [vmem:[%s6297_s1 + $0xbf0] ss:$8 sps:$4 sm:$0xff]   ;;  %v4790_v58 = vld [vmem:[%s6297_s1 + $0xae4] ss:$8 sps:$4 sm:$0xff]  }
 0x133   : > { %3356 = vmatprep.subr.bf16.mxu1 %v4697_v59  ;;  %v4793_v59 = vld [vmem:[%s6297_s1 + $0xbe4] ss:$8 sps:$4 sm:$0xff]  }
 0x135   : > { %3314 = vmatpush2.bf16.msra.mxu0 %v4692_v60  ;;  %v4788_v60 = vld [vmem:[%s6297_s1 + $0xae0] ss:$8 sps:$4 sm:$0xff]  }
 0x136   : > { %3357 = vmatpush2.bf16.msra.mxu1 %v4695_v61  ;;  %3315 = vmatprep.subr.bf16.mxu0 %v4700_v62  ;;  %v4791_v61 = vld [vmem:[%s6297_s1 + $0xbe0] ss:$8 sps:$4 sm:$0xff]   ;;  %v4796_v62 = vld [vmem:[%s6297_s1 + $0xad4] ss:$8 sps:$4 sm:$0xff]  }
 0x137   : > { %3358 = vmatprep.subr.bf16.mxu1 %v4703_v63  ;;  %v4799_v63 = vld [vmem:[%s6297_s1 + $0xbd4] ss:$8 sps:$4 sm:$0xff]  }
 0x139   : > { %3316 = vmatpush2.bf16.msra.mxu0 %v4698_v0  ;;  %v4794_v0 = vld [vmem:[%s6297_s1 + $0xad0] ss:$8 sps:$4 sm:$0xff]  }
 0x13a   : > { %3359 = vmatpush2.bf16.msra.mxu1 %v4701_v1  ;;  %3317 = vmatprep.subr.bf16.mxu0 %v4706_v2  ;;  %v4797_v1 = vld [vmem:[%s6297_s1 + $0xbd0] ss:$8 sps:$4 sm:$0xff]   ;;  %v4802_v2 = vld [vmem:[%s6297_s1 + $0xac4] ss:$8 sps:$4 sm:$0xff]  }
 0x13b   : > { %3360 = vmatprep.subr.bf16.mxu1 %v4709_v3  ;;  %v4805_v3 = vld [vmem:[%s6297_s1 + $0xbc4] ss:$8 sps:$4 sm:$0xff]  }
 0x13d   : > { %3318 = vmatpush2.bf16.msra.mxu0 %v4704_v4  ;;  %v4800_v4 = vld [vmem:[%s6297_s1 + $0xac0] ss:$8 sps:$4 sm:$0xff]  }
 0x13e   : > { %3361 = vmatpush2.bf16.msra.mxu1 %v4707_v5  ;;  %3319 = vmatprep.subr.bf16.mxu0 %v4712_v6  ;;  %v4803_v5 = vld [vmem:[%s6297_s1 + $0xbc0] ss:$8 sps:$4 sm:$0xff]   ;;  %v4808_v6 = vld [vmem:[%s6297_s1 + $0xab4] ss:$8 sps:$4 sm:$0xff]  }
 0x13f   : > { %3362 = vmatprep.subr.bf16.mxu1 %v4715_v7  ;;  %v4811_v7 = vld [vmem:[%s6297_s1 + $0xbb4] ss:$8 sps:$4 sm:$0xff]  }
 0x141   : > { %3320 = vmatpush2.bf16.msra.mxu0 %v4710_v8  ;;  %v4806_v8 = vld [vmem:[%s6297_s1 + $0xab0] ss:$8 sps:$4 sm:$0xff]  }
 0x142   : > { %3363 = vmatpush2.bf16.msra.mxu1 %v4713_v9  ;;  %3321 = vmatprep.subr.bf16.mxu0 %v4718_v10  ;;  %v4809_v9 = vld [vmem:[%s6297_s1 + $0xbb0] ss:$8 sps:$4 sm:$0xff]   ;;  %v4814_v10 = vld [vmem:[%s6297_s1 + $0xaa4] ss:$8 sps:$4 sm:$0xff]  }
 0x143   : > { %3364 = vmatprep.subr.bf16.mxu1 %v4721_v11  ;;  %v4817_v11 = vld [vmem:[%s6297_s1 + $0xba4] ss:$8 sps:$4 sm:$0xff]  }
 0x145   : > { %3322 = vmatpush2.bf16.msra.mxu0 %v4716_v12  ;;  %v4812_v12 = vld [vmem:[%s6297_s1 + $0xaa0] ss:$8 sps:$4 sm:$0xff]  }
 0x146   : > { %3365 = vmatpush2.bf16.msra.mxu1 %v4719_v13  ;;  %3323 = vmatprep.subr.bf16.mxu0 %v4724_v14  ;;  %v4815_v13 = vld [vmem:[%s6297_s1 + $0xba0] ss:$8 sps:$4 sm:$0xff]   ;;  %v4820_v14 = vld [vmem:[%s6297_s1 + $0xa94] ss:$8 sps:$4 sm:$0xff]  }
 0x147   : > { %3366 = vmatprep.subr.bf16.mxu1 %v4727_v15  ;;  %v4823_v15 = vld [vmem:[%s6297_s1 + $0xb94] ss:$8 sps:$4 sm:$0xff]  }
 0x149   : > { %3324 = vmatpush2.bf16.msra.mxu0 %v4722_v16  ;;  %v4818_v16 = vld [vmem:[%s6297_s1 + $0xa90] ss:$8 sps:$4 sm:$0xff]  }
 0x14a   : > { %3367 = vmatpush2.bf16.msra.mxu1 %v4725_v17  ;;  %3379 = vmatprep.subr.bf16.mxu0 %v4733_v18  ;;  %v4821_v17 = vld [vmem:[%s6297_s1 + $0xb90] ss:$8 sps:$4 sm:$0xff]   ;;  %v4826_v18 = vld [vmem:[%s6297_s1 + $0xa84] ss:$8 sps:$4 sm:$0xff]  }
 0x14b   : > { %3422 = vmatprep.subr.bf16.mxu1 %v4739_v19  ;;  %v4829_v19 = vld [vmem:[%s6297_s1 + $0xb84] ss:$8 sps:$4 sm:$0xff]  }
 0x14c   : > { %3326 = vmatmul.mubr.bf16.vlgmr.msra.gmra.mxu0 %v4728_v20  ;;  %v4824_v20 = vld [vmem:[%s6297_s1 + $0xa80] ss:$8 sps:$4 sm:$0xff]  }
 0x14d   : > { %3369 = vmatmul.mubr.bf16.vlgmr.msra.gmra.mxu1 %v4734_v21  ;;  %3380 = vmatpush1.bf16.msra.mxu0 %v4731_v22  ;;  %v4827_v21 = vld [vmem:[%s6297_s1 + $0xb80] ss:$8 sps:$4 sm:$0xff]   ;;  %v4835_v22 = vld [vmem:[%s6297_s1 + $0xc74] ss:$8 sps:$4 sm:$0xff]  }
 0x14e   : > { %3423 = vmatpush1.bf16.msra.mxu1 %v4737_v23  ;;  %3381 = vmatprep.subr.bf16.mxu0 %v4742_v24  ;;  %v4862_v23 = vld [vmem:[%s6297_s1 + $0xd74] ss:$8 sps:$4 sm:$0xff]  }
 0x14f   : > { %3424 = vmatprep.subr.bf16.mxu1 %v4745_v25  ;;  %3411 = vmatprep.mubr.bf16.mxu0 %v4832_v26  ;;  %v4830_v24 = vld [vmem:[%s5094_s7 + $0x50] ss:$108 sps:$4 sm:$0xff]   ;;  %v4836_v25 = vld [vmem:[%s5094_s7 + $0x58] ss:$108 sps:$4 sm:$0xff]  }
 0x150   : > { %3454 = vmatprep.mubr.bf16.mxu1 %v4838_v27  ;;  %v4833_v26 = vld [vmem:[%s6297_s1 + $0xc70] ss:$8 sps:$4 sm:$0xff]  }
 0x151   : > { %3382 = vmatpush1.bf16.msra.mxu0 %v4740_v28  ;;  %v4860_v27 = vld [vmem:[%s6297_s1 + $0xd70] ss:$8 sps:$4 sm:$0xff]   ;;  %v4841_v28 = vld [vmem:[%s6297_s1 + $0xc64] ss:$8 sps:$4 sm:$0xff]  }
 0x152   : > { %3425 = vmatpush1.bf16.msra.mxu1 %v4743_v29  ;;  %3383 = vmatprep.subr.bf16.mxu0 %v4748_v30  ;;  %v4868_v29 = vld [vmem:[%s6297_s1 + $0xd64] ss:$8 sps:$4 sm:$0xff]  }
 0x153   : > { %3426 = vmatprep.subr.bf16.mxu1 %v4751_v31  ;;  %v4911_v30 = vld [vmem:[%s5094_s7 + $0x64] ss:$108 sps:$4 sm:$0xff]   ;;  %v4839_v31 = vld [vmem:[%s6297_s1 + $0xc60] ss:$8 sps:$4 sm:$0xff]  }
 0x155   : > { %3384 = vmatpush1.bf16.msra.mxu0 %v4746_v32  ;;  %v4866_v32 = vld [vmem:[%s6297_s1 + $0xd60] ss:$8 sps:$4 sm:$0xff]  }
 0x156   : > { %3427 = vmatpush1.bf16.msra.mxu1 %v4749_v33  ;;  %3385 = vmatprep.subr.bf16.mxu0 %v4754_v34  ;;  %v4844_v33 = vld [vmem:[%s6297_s1 + $0xc54] ss:$8 sps:$4 sm:$0xff]  }
 0x157   : > { %3428 = vmatprep.subr.bf16.mxu1 %v4757_v35  ;;  %v4874_v34 = vld [vmem:[%s6297_s1 + $0xd54] ss:$8 sps:$4 sm:$0xff]   ;;  %v4920_v35 = vmov 0  }
 0x159   : > { %3386 = vmatpush1.bf16.msra.mxu0 %v4752_v36  ;;  %v4842_v36 = vld [vmem:[%s6297_s1 + $0xc50] ss:$8 sps:$4 sm:$0xff]  }
 0x15a   : > { %3429 = vmatpush1.bf16.msra.mxu1 %v4755_v37  ;;  %3387 = vmatprep.subr.bf16.mxu0 %v4760_v38  ;;  %v4872_v37 = vld [vmem:[%s6297_s1 + $0xd50] ss:$8 sps:$4 sm:$0xff]   ;;  %v4847_v38 = vld [vmem:[%s6297_s1 + $0xc44] ss:$8 sps:$4 sm:$0xff]  }
 0x15b   : > { %3430 = vmatprep.subr.bf16.mxu1 %v4763_v39  ;;  %v4880_v39 = vld [vmem:[%s6297_s1 + $0xd44] ss:$8 sps:$4 sm:$0xff]  }
 0x15d   : > { %3388 = vmatpush1.bf16.msra.mxu0 %v4758_v40  ;;  %v4845_v40 = vld [vmem:[%s6297_s1 + $0xc40] ss:$8 sps:$4 sm:$0xff]  }
 0x15e   : > { %3431 = vmatpush1.bf16.msra.mxu1 %v4761_v41  ;;  %3389 = vmatprep.subr.bf16.mxu0 %v4766_v42  ;;  %v4878_v41 = vld [vmem:[%s6297_s1 + $0xd40] ss:$8 sps:$4 sm:$0xff]   ;;  %v4850_v42 = vld [vmem:[%s6297_s1 + $0xc34] ss:$8 sps:$4 sm:$0xff]  }
 0x15f   : > { %3432 = vmatprep.subr.bf16.mxu1 %v4769_v43  ;;  %v4886_v43 = vld [vmem:[%s6297_s1 + $0xd34] ss:$8 sps:$4 sm:$0xff]  }
 0x161   : > { %3390 = vmatpush1.bf16.msra.mxu0 %v4764_v44  ;;  %v4848_v44 = vld [vmem:[%s6297_s1 + $0xc30] ss:$8 sps:$4 sm:$0xff]  }
 0x162   : > { %3433 = vmatpush1.bf16.msra.mxu1 %v4767_v45  ;;  %3391 = vmatprep.subr.bf16.mxu0 %v4772_v46  ;;  %v4884_v45 = vld [vmem:[%s6297_s1 + $0xd30] ss:$8 sps:$4 sm:$0xff]   ;;  %v4853_v46 = vld [vmem:[%s6297_s1 + $0xc24] ss:$8 sps:$4 sm:$0xff]  }
 0x163   : > { %3434 = vmatprep.subr.bf16.mxu1 %v4775_v47  ;;  %v4892_v47 = vld [vmem:[%s6297_s1 + $0xd24] ss:$8 sps:$4 sm:$0xff]  }
 0x165   : > { %3392 = vmatpush1.bf16.msra.mxu0 %v4770_v48  ;;  %v4851_v48 = vld [vmem:[%s6297_s1 + $0xc20] ss:$8 sps:$4 sm:$0xff]  }
 0x166   : > { %3435 = vmatpush1.bf16.msra.mxu1 %v4773_v49  ;;  %3393 = vmatprep.subr.bf16.mxu0 %v4778_v50  ;;  %v4890_v49 = vld [vmem:[%s6297_s1 + $0xd20] ss:$8 sps:$4 sm:$0xff]   ;;  %v4856_v50 = vld [vmem:[%s6297_s1 + $0xc14] ss:$8 sps:$4 sm:$0xff]  }
 0x167   : > { %3436 = vmatprep.subr.bf16.mxu1 %v4781_v51  ;;  %v4898_v51 = vld [vmem:[%s6297_s1 + $0xd14] ss:$8 sps:$4 sm:$0xff]  }
 0x169   : > { %3394 = vmatpush1.bf16.msra.mxu0 %v4776_v52  ;;  %v4854_v52 = vld [vmem:[%s6297_s1 + $0xc10] ss:$8 sps:$4 sm:$0xff]  }
 0x16a   : > { %3437 = vmatpush1.bf16.msra.mxu1 %v4779_v53  ;;  %3395 = vmatprep.subr.bf16.mxu0 %v4784_v54  ;;  %v4896_v53 = vld [vmem:[%s6297_s1 + $0xd10] ss:$8 sps:$4 sm:$0xff]   ;;  %v4859_v54 = vld [vmem:[%s6297_s1 + $0xc04] ss:$8 sps:$4 sm:$0xff]  }
 0x16b   : > { %3438 = vmatprep.subr.bf16.mxu1 %v4787_v55  ;;  %v4904_v55 = vld [vmem:[%s6297_s1 + $0xd04] ss:$8 sps:$4 sm:$0xff]  }
 0x16d   : > { %3396 = vmatpush2.bf16.msra.mxu0 %v4782_v56  ;;  %v4857_v56 = vld [vmem:[%s6297_s1 + $0xc00] ss:$8 sps:$4 sm:$0xff]  }
 0x16e   : > { %3439 = vmatpush2.bf16.msra.mxu1 %v4785_v57  ;;  %3397 = vmatprep.subr.bf16.mxu0 %v4790_v58  ;;  %v4902_v57 = vld [vmem:[%s6297_s1 + $0xd00] ss:$8 sps:$4 sm:$0xff]   ;;  %v4865_v58 = vld [vmem:[%s6297_s1 + $0xcf4] ss:$8 sps:$4 sm:$0xff]  }
 0x16f   : > { %3440 = vmatprep.subr.bf16.mxu1 %v4793_v59  ;;  %v4908_v59 = vld [vmem:[%s5094_s7 + $0x68] ss:$108 sps:$4 sm:$0xff]  }
 0x171   : > { %3398 = vmatpush2.bf16.msra.mxu0 %v4788_v60  ;;  %v4863_v60 = vld [vmem:[%s6297_s1 + $0xcf0] ss:$8 sps:$4 sm:$0xff]  }
 0x172   : > { %3441 = vmatpush2.bf16.msra.mxu1 %v4791_v61  ;;  %3399 = vmatprep.subr.bf16.mxu0 %v4796_v62  ;;  %v4871_v61 = vld [vmem:[%s6297_s1 + $0xce4] ss:$8 sps:$4 sm:$0xff]   ;;  %v4869_v62 = vld [vmem:[%s6297_s1 + $0xce0] ss:$8 sps:$4 sm:$0xff]  }
 0x173   : > { %3442 = vmatprep.subr.bf16.mxu1 %v4799_v63  ;;  %v4877_v63 = vld [vmem:[%s6297_s1 + $0xcd4] ss:$8 sps:$4 sm:$0xff]  }
 0x175   : > { %3400 = vmatpush2.bf16.msra.mxu0 %v4794_v0  ;;  %v4875_v0 = vld [vmem:[%s6297_s1 + $0xcd0] ss:$8 sps:$4 sm:$0xff]  }
 0x176   : > { %3443 = vmatpush2.bf16.msra.mxu1 %v4797_v1  ;;  %3401 = vmatprep.subr.bf16.mxu0 %v4802_v2  ;;  %v4883_v1 = vld [vmem:[%s6297_s1 + $0xcc4] ss:$8 sps:$4 sm:$0xff]   ;;  %v4881_v2 = vld [vmem:[%s6297_s1 + $0xcc0] ss:$8 sps:$4 sm:$0xff]  }
 0x177   : > { %3444 = vmatprep.subr.bf16.mxu1 %v4805_v3  ;;  %v4889_v3 = vld [vmem:[%s6297_s1 + $0xcb4] ss:$8 sps:$4 sm:$0xff]  }
 0x179   : > { %3402 = vmatpush2.bf16.msra.mxu0 %v4800_v4  ;;  %v4887_v4 = vld [vmem:[%s6297_s1 + $0xcb0] ss:$8 sps:$4 sm:$0xff]  }
 0x17a   : > { %3445 = vmatpush2.bf16.msra.mxu1 %v4803_v5  ;;  %3403 = vmatprep.subr.bf16.mxu0 %v4808_v6  ;;  %v4895_v5 = vld [vmem:[%s6297_s1 + $0xca4] ss:$8 sps:$4 sm:$0xff]   ;;  %v4893_v6 = vld [vmem:[%s6297_s1 + $0xca0] ss:$8 sps:$4 sm:$0xff]  }
 0x17b   : > { %3446 = vmatprep.subr.bf16.mxu1 %v4811_v7  ;;  %v4901_v7 = vld [vmem:[%s6297_s1 + $0xc94] ss:$8 sps:$4 sm:$0xff]  }
 0x17d   : > { %3404 = vmatpush2.bf16.msra.mxu0 %v4806_v8  ;;  %v4899_v8 = vld [vmem:[%s6297_s1 + $0xc90] ss:$8 sps:$4 sm:$0xff]  }
 0x17e   : > { %3447 = vmatpush2.bf16.msra.mxu1 %v4809_v9  ;;  %3405 = vmatprep.subr.bf16.mxu0 %v4814_v10  ;;  %v4907_v9 = vld [vmem:[%s6297_s1 + $0xc84] ss:$8 sps:$4 sm:$0xff]   ;;  %v4905_v10 = vld [vmem:[%s6297_s1 + $0xc80] ss:$8 sps:$4 sm:$0xff]  }
 0x17f   : > { %3448 = vmatprep.subr.bf16.mxu1 %v4817_v11  ;;  %v4909_v11 = vld [vmem:[%s5094_s7 + $0x60] ss:$108 sps:$4 sm:$0xff]   ;;  %s4209_s7 = sshll.u32 %s6301_s24, 3  ;;  %s4210_s24 = sshll.u32 %s6303_s13, 4 }
 0x180   : > { %s185_s28 = scalar_lea.vmem %s6298_s2, %s4209_s7  ;;  %s191_s4 = scalar_lea.vmem %s6299_s3, %s4210_s24 }
 0x181   : > { %3406 = vmatpush2.bf16.msra.mxu0 %v4812_v12  ;;  %v3026_v12 = vpop.f32.mrf.mxu1 }
 0x182   : > { %3449 = vmatpush2.bf16.msra.mxu1 %v4815_v13  ;;  %3407 = vmatprep.subr.bf16.mxu0 %v4820_v14  ;;  %v2983_v13 = vpop.f32.mrf.mxu0 }
 0x183   : > { %3450 = vmatprep.subr.bf16.mxu1 %v4823_v15  ;;  %v3028_v14 = vpop.f32.mrf.mxu1 }
 0x184   : > { %v2985_v15 = vpop.f32.mrf.mxu0 }
 0x185   : > { %3408 = vmatpush2.bf16.msra.mxu0 %v4818_v16  ;;  %v3030_v16 = vpop.f32.mrf.mxu1 }
 0x186   : > { %3451 = vmatpush2.bf16.msra.mxu1 %v4821_v17  ;;  %3409 = vmatprep.subr.bf16.mxu0 %v4826_v18  ;;  %v2987_v17 = vpop.f32.mrf.mxu0 }
 0x187   : > { %3452 = vmatprep.subr.bf16.mxu1 %v4829_v19  ;;  %v3032_v18 = vpop.f32.mrf.mxu1 }
 0x189   : > { %3410 = vmatpush2.bf16.msra.mxu0 %v4824_v20  ;;  %v3112_v19 = vpop.f32.mrf.mxu1  ;;  %v2989_v20 = vpop.f32.mrf.mxu0 }
 0x18a   : > { %3453 = vmatpush2.bf16.msra.mxu1 %v4827_v21  ;;  %3465 = vmatprep.subr.bf16.mxu0 %v4835_v22 }
 0x18b   : > { %3508 = vmatprep.subr.bf16.mxu1 %v4862_v23  ;;  %v3069_v21 = vpop.f32.mrf.mxu0  ;;  %v3114_v22 = vpop.f32.mrf.mxu1 }
 0x18c   : > { %3412 = vmatmul.mubr.bf16.vlgmr.msra.gmra.mxu0 %v4830_v24 }
 0x18d   : > { %3455 = vmatmul.mubr.bf16.vlgmr.msra.gmra.mxu1 %v4836_v25  ;;  %3466 = vmatpush1.bf16.msra.mxu0 %v4833_v26  ;;  %v3071_v23 = vpop.f32.mrf.mxu0  ;;  %v3116_v24 = vpop.f32.mrf.mxu1 }
 0x18e   : > { %3509 = vmatpush1.bf16.msra.mxu1 %v4860_v27  ;;  %3467 = vmatprep.subr.bf16.mxu0 %v4841_v28 }
 0x18f   : > { %3510 = vmatprep.subr.bf16.mxu1 %v4868_v29  ;;  %3540 = vmatprep.mubr.bf16.mxu1 %v4920_v35  ;;  %v3073_v25 = vpop.f32.mrf.mxu0  ;;  %v3118_v26 = vpop.f32.mrf.mxu1 }
 0x190   : > { %3497 = vmatprep.mubr.bf16.mxu0 %v4911_v30 }
 0x191   : > { %3468 = vmatpush1.bf16.msra.mxu0 %v4839_v31  ;;  %v3198_v27 = vpop.f32.mrf.mxu1  ;;  %v3075_v28 = vpop.f32.mrf.mxu0 }
 0x192   : > { %3511 = vmatpush1.bf16.msra.mxu1 %v4866_v32  ;;  %3469 = vmatprep.subr.bf16.mxu0 %v4844_v33 }
 0x193   : > { %3512 = vmatprep.subr.bf16.mxu1 %v4874_v34  ;;  %v3155_v29 = vpop.f32.mrf.mxu0  ;;  %v3200_v30 = vpop.f32.mrf.mxu1 }
 0x195   : > { %3470 = vmatpush1.bf16.msra.mxu0 %v4842_v36  ;;  %v3157_v31 = vpop.f32.mrf.mxu0  ;;  %v3202_v32 = vpop.f32.mrf.mxu1 }
 0x196   : > { %3513 = vmatpush1.bf16.msra.mxu1 %v4872_v37  ;;  %3471 = vmatprep.subr.bf16.mxu0 %v4847_v38 }
 0x197   : > { %3514 = vmatprep.subr.bf16.mxu1 %v4880_v39  ;;  %v3159_v33 = vpop.f32.mrf.mxu0  ;;  %v3204_v34 = vpop.f32.mrf.mxu1 }
 0x199   : > { %3472 = vmatpush1.bf16.msra.mxu0 %v4845_v40  ;;  %v3161_v36 = vpop.f32.mrf.mxu0 }
 0x19a   : > { %3515 = vmatpush1.bf16.msra.mxu1 %v4878_v41  ;;  %3473 = vmatprep.subr.bf16.mxu0 %v4850_v42 }
 0x19b   : > { %3516 = vmatprep.subr.bf16.mxu1 %v4886_v43 }
 0x19d   : > { %3474 = vmatpush1.bf16.msra.mxu0 %v4848_v44  ;;  %v3027_v44 = vadd.f32 %v3026_v12, %v2983_v13 }
 0x19e   : > { %3517 = vmatpush1.bf16.msra.mxu1 %v4884_v45  ;;  %3475 = vmatprep.subr.bf16.mxu0 %v4853_v46  ;;  %v3029_v46 = vadd.f32 %v3028_v14, %v2985_v15 }
 0x19f   : > { %3518 = vmatprep.subr.bf16.mxu1 %v4892_v47  ;;  %v3070_v47 = vadd.f32 %v3069_v21, %v3027_v44 }
 0x1a1   : > { %3476 = vmatpush1.bf16.msra.mxu0 %v4851_v48 }
 0x1a2   : > { %3519 = vmatpush1.bf16.msra.mxu1 %v4890_v49  ;;  %3477 = vmatprep.subr.bf16.mxu0 %v4856_v50  ;;  %v3031_v50 = vadd.f32 %v3030_v16, %v2987_v17 }
 0x1a3   : > { %3520 = vmatprep.subr.bf16.mxu1 %v4898_v51  ;;  %v3072_v51 = vadd.f32 %v3071_v23, %v3029_v46 }
 0x1a5   : > { %3478 = vmatpush1.bf16.msra.mxu0 %v4854_v52  ;;  %v3033_v52 = vadd.f32 %v3032_v18, %v2989_v20 }
 0x1a6   : > { %3521 = vmatpush1.bf16.msra.mxu1 %v4896_v53  ;;  %3479 = vmatprep.subr.bf16.mxu0 %v4859_v54  ;;  %v3113_v53 = vadd.f32 %v3112_v19, %v3070_v47  ;;  %v3074_v54 = vadd.f32 %v3073_v25, %v3031_v50 }
 0x1a7   : > { %3522 = vmatprep.subr.bf16.mxu1 %v4904_v55 }
 0x1a9   : > { %3480 = vmatpush1.bf16.msra.mxu0 %v4857_v56 }
 0x1aa   : > { %3523 = vmatpush1.bf16.msra.mxu1 %v4902_v57  ;;  %3481 = vmatprep.subr.bf16.mxu0 %v4865_v58  ;;  %v3115_v57 = vadd.f32 %v3114_v22, %v3072_v51  ;;  %v3076_v58 = vadd.f32 %v3075_v28, %v3033_v52 }
 0x1ad   : > { %3541 = vmatmul.mubr.bf16.vlgmr.msra.gmra.mxu1 %v4908_v59  ;;  %3482 = vmatpush2.bf16.msra.mxu0 %v4863_v60  ;;  %v3156_v59 = vadd.f32 %v3155_v29, %v3113_v53  ;;  %v3117_v60 = vadd.f32 %v3116_v24, %v3074_v54 }
 0x1ae   : > { %3483 = vmatprep.subr.bf16.mxu0 %v4871_v61  ;;  %v3158_v61 = vadd.f32 %v3157_v31, %v3115_v57 }
 0x1b1   : > { %3484 = vmatpush2.bf16.msra.mxu0 %v4869_v62 }
 0x1b2   : > { %3485 = vmatprep.subr.bf16.mxu0 %v4877_v63 }
 0x1b5   : > { %3486 = vmatpush2.bf16.msra.mxu0 %v4875_v0  ;;  %v3119_v0 = vadd.f32 %v3118_v26, %v3076_v58 }
 0x1b6   : > { %3487 = vmatprep.subr.bf16.mxu0 %v4883_v1  ;;  %v3199_v1 = vadd.f32 %v3198_v27, %v3156_v59 }
 0x1b9   : > { %3488 = vmatpush2.bf16.msra.mxu0 %v4881_v2  ;;  %v3160_v2 = vadd.f32 %v3159_v33, %v3117_v60 }
 0x1ba   : > { %3489 = vmatprep.subr.bf16.mxu0 %v4889_v3 }
 0x1bd   : > { %3490 = vmatpush2.bf16.msra.mxu0 %v4887_v4  ;;  %v3201_v4 = vadd.f32 %v3200_v30, %v3158_v61 }
 0x1be   : > { %3491 = vmatprep.subr.bf16.mxu0 %v4895_v5  ;;  %v3162_v5 = vadd.f32 %v3161_v36, %v3119_v0 }
 0x1c0   : > { %v3205_v12 = vadd.f32 %v3204_v34, %v3162_v5  ;;  %v4921_v5 = vmov 1966171168  }
 0x1c1   : > { %3492 = vmatpush2.bf16.msra.mxu0 %v4893_v6 }
 0x1c2   : > { %3493 = vmatprep.subr.bf16.mxu0 %v4901_v7 }
 0x1c5   : > { %3494 = vmatpush2.bf16.msra.mxu0 %v4899_v8  ;;  %v3203_v8 = vadd.f32 %v3202_v32, %v3160_v2 }
 0x1c6   : > { %3495 = vmatprep.subr.bf16.mxu0 %v4907_v9 }
 0x1c9   : > { %3496 = vmatpush2.bf16.msra.mxu0 %v4905_v10 }
 0x1cc   : > { %3498 = vmatmul.mubr.bf16.vlgmr.msra.gmra.mxu0 %v4909_v11  ;;  %v3241_v37 = vpop.f32.mrf.mxu0 }
 0x1cd   : > { %v3284_v35 = vpop.f32.mrf.mxu1  ;;  %v3242_v6 = vadd.f32 %v3241_v37, %v3199_v1 }
 0x1ce   : > { %v3243_v39 = vpop.f32.mrf.mxu0 }
 0x1cf   : > { %v3286_v38 = vpop.f32.mrf.mxu1  ;;  %v3244_v9 = vadd.f32 %v3243_v39, %v3201_v4  ;;  %v3285_v13 = vadd.f32 %v3284_v35, %v3242_v6  ;;  %v3583_v6 = vunpack.c.l.s4 %v4921_v5 }
 0x1d0   : > { %v3245_v41 = vpop.f32.mrf.mxu0 }
 0x1d1   : > { %v3288_v40 = vpop.f32.mrf.mxu1  ;;  %v3246_v14 = vadd.f32 %v3245_v41, %v3203_v8  ;;  %v3287_v15 = vadd.f32 %v3286_v38, %v3244_v9 }
 0x1d2   : > { %v3247_v45 = vpop.f32.mrf.mxu0 }
 0x1d3   : > { %v3290_v42 = vpop.f32.mrf.mxu1  ;;  %v3248_v16 = vadd.f32 %v3247_v45, %v3205_v12  ;;  %v3289_v20 = vadd.f32 %v3288_v40, %v3246_v14 }
 0x1d5   : > { %v3291_v22 = vadd.f32 %v3290_v42, %v3248_v16  ;;  %v3584_v16 = vunpack.c.0.s8 %v3583_v6 }
 0x20c   : > { %v3327_v48 = vpop.f32.mrf.mxu0 }
 0x20d   : > { %v3370_v43 = vpop.f32.mrf.mxu1  ;;  %v3328_v17 = vadd.f32 %v3327_v48, %v3285_v13 }
 0x20e   : > { %v3329_v55 = vpop.f32.mrf.mxu0 }
 0x20f   : > { %v3372_v49 = vpop.f32.mrf.mxu1  ;;  %v3330_v21 = vadd.f32 %v3329_v55, %v3287_v15  ;;  %v3371_v23 = vadd.f32 %v3370_v43, %v3328_v17 }
 0x210   : > { %v3331_v62 = vpop.f32.mrf.mxu0 }
 0x211   : > { %v3374_v56 = vpop.f32.mrf.mxu1  ;;  %v3332_v24 = vadd.f32 %v3331_v62, %v3289_v20  ;;  %v3373_v27 = vadd.f32 %v3372_v49, %v3330_v21 }
 0x212   : > { %v3333_v7 = vpop.f32.mrf.mxu0 }
 0x213   : > { %v3376_v63 = vpop.f32.mrf.mxu1  ;;  %v3334_v28 = vadd.f32 %v3333_v7, %v3291_v22  ;;  %v3375_v31 = vadd.f32 %v3374_v56, %v3332_v24 }
 0x215   : > { %v3377_v34 = vadd.f32 %v3376_v63, %v3334_v28 }
 0x24c   : > { %v3413_v10 = vpop.f32.mrf.mxu0 }
 0x24d   : > { %v3456_v3 = vpop.f32.mrf.mxu1  ;;  %v3414_v29 = vadd.f32 %v3413_v10, %v3371_v23 }
 0x24e   : > { %v3415_v18 = vpop.f32.mrf.mxu0 }
 0x24f   : > { %v3458_v11 = vpop.f32.mrf.mxu1  ;;  %v3416_v32 = vadd.f32 %v3415_v18, %v3373_v27  ;;  %v3457_v35 = vadd.f32 %v3456_v3, %v3414_v29 }
 0x250   : > { %v3417_v25 = vpop.f32.mrf.mxu0 }
 0x251   : > { %v3460_v19 = vpop.f32.mrf.mxu1  ;;  %v3418_v36 = vadd.f32 %v3417_v25, %v3375_v31  ;;  %v3459_v39 = vadd.f32 %v3458_v11, %v3416_v32  ;;  %v3585_v11 = vlaneseq }
 0x252   : > { %v3419_v33 = vpop.f32.mrf.mxu0 }
 0x253   : > { %v3462_v26 = vpop.f32.mrf.mxu1  ;;  %v3420_v40 = vadd.f32 %v3419_v33, %v3377_v34  ;;  %v3461_v43 = vadd.f32 %v3460_v19, %v3418_v36  ;;  %v3586_v21 = vshrl.u32 %v3585_v11, 7  ;;  %vm3599_vm0 = vcmp.lt.s32.totalorder %v3585_v11, 256 }
 0x255   : > { %v3463_v47 = vadd.f32 %v3462_v26, %v3420_v40  ;;  %v3587_v28 = vsub.s32 %v3584_v16, %v3586_v21 }
 0x26d   : > { %v3542_v30 = vpop.f32.mrf.mxu1 }
 0x26f   : > { %v3544_v37 = vpop.f32.mrf.mxu1 }
 0x271   : > { %v3546_v45 = vpop.f32.mrf.mxu1 }
 0x273   : > { %v3548_v55 = vpop.f32.mrf.mxu1 }
 0x28c   : > { %v3499_v38 = vpop.f32.mrf.mxu0 }
 0x28d   : > { %v3500_v41 = vadd.f32 %v3499_v38, %v3457_v35 }
 0x28e   : > { %v3501_v42 = vpop.f32.mrf.mxu0 }
 0x28f   : > { %v3502_v44 = vadd.f32 %v3501_v42, %v3459_v39  ;;  %v3543_v48 = vadd.f32 %v3542_v30, %v3500_v41 }
 0x290   : > { %v3503_v46 = vpop.f32.mrf.mxu0 }
 0x291   : > { %v3545_v49 = vadd.f32 %v3544_v37, %v3502_v44  ;;  %v3504_v50 = vadd.f32 %v3503_v46, %v3461_v43  ;;  %v3603_v56 = vmul.f32 %v3543_v48, %v3543_v48 }
 0x292   : > { %v3505_v51 = vpop.f32.mrf.mxu0 }
 0x293   : > { %v4211_v52 = vpack.c.bf16 %v3545_v49, %v3543_v48  ;;  %v3547_v53 = vadd.f32 %v3546_v45, %v3504_v50  ;;  %v3506_v54 = vadd.f32 %v3505_v51, %v3463_v47  ;;  %v3604_v0 = vmul.f32 %v3545_v49, %v3545_v49 }
 0x295   : > { %3563 = vst [vmem:[%s185_s28] sm:$0xff] %v4211_v52  ;;  %v3565_v57 = vadd.f32 %v3547_v53, %v3543_v48  ;;  %v3605_v58 = vmul.f32 %v3547_v53, %v3547_v53  ;;  %v3549_v59 = vadd.f32 %v3548_v55, %v3506_v54 }
 0x297   : > { %v3566_v60 = vrot.slane %v3565_v57, 4  ;;  %v3607_v61 = vadd.f32 %v3605_v58, %v3603_v56  ;;  %v4212_v62 = vpack.c.bf16 %v3549_v59, %v3547_v53  ;;  %v3572_v63 = vadd.f32 %v3549_v59, %v3545_v49 }
 0x298   : > { %v3606_v1 = vmul.f32 %v3549_v59, %v3549_v59 }
 0x299   : > { %v3567_v2 = vadd.f32 %v3566_v60, %v3565_v57  ;;  %v3608_v3 = vrot.slane %v3607_v61, 4  ;;  %3564 = vst [vmem:[%s185_s28 + $0x8] sm:$0xff] %v4212_v62  ;;  %v3573_v4 = vrot.slane %v3572_v63, 4 }
 0x29a   : > { %v3614_v7 = vadd.f32 %v3606_v1, %v3604_v0 }
 0x29b   : > { %v3568_v8 = vrot.slane %v3567_v2, 2  ;;  %v3609_v9 = vadd.f32 %v3608_v3, %v3607_v61  ;;  %v3574_v10 = vadd.f32 %v3573_v4, %v3572_v63 }
 0x29c   : > { %v3615_v12 = vrot.slane %v3614_v7, 4 }
 0x29d   : > { %v3569_v13 = vadd.f32 %v3568_v8, %v3567_v2  ;;  %v3610_v14 = vrot.slane %v3609_v9, 2  ;;  %v3575_v15 = vrot.slane %v3574_v10, 2 }
 0x29e   : > { %v3616_v17 = vadd.f32 %v3615_v12, %v3614_v7 }
 0x29f   : > { %v3570_v18 = vrot.slane %v3569_v13, 1  ;;  %v3611_v19 = vadd.f32 %v3610_v14, %v3609_v9  ;;  %v3576_v20 = vadd.f32 %v3575_v15, %v3574_v10 }
 0x2a0   : > { %v3617_v22 = vrot.slane %v3616_v17, 2 }
 0x2a1   : > { %v3577_v23 = vrot.slane %v3576_v20, 1  ;;  %v3612_v24 = vrot.slane %v3611_v19, 1  ;;  %v3571_v26 = vadd.f32 %v3570_v18, %v3569_v13 }
 0x2a2   : > { %v3618_v25 = vadd.f32 %v3617_v22, %v3616_v17 }
 0x2a3   : > { %v3578_v27 = vadd.f32 %v3577_v23, %v3576_v20  ;;  %v3613_v31 = vadd.f32 %v3612_v24, %v3611_v19 }
 0x2a4   : > { %v3619_v29 = vrot.slane %v3618_v25, 1 }
 0x2a5   : > { %v3581_v30 = vcombine.low %v3571_v26, %v3578_v27 }
 0x2a6   : > { %v3620_v32 = vadd.f32 %v3619_v29, %v3618_v25 }
 0x2a7   : > { %v3588_v33 = vrot.slane %v3581_v30, %v3587_v28 }
 0x2a8   : > { %v3623_v34 = vcombine.low %v3613_v31, %v3620_v32 }
 0x2a9   : > { %v3595_v35 = vrot.slane %v3588_v33, %v3587_v28 }
 0x2aa   : > { %v3630_v36 = vrot.slane %v3623_v34, %v3587_v28 }
 0x2ab   : > { %3601 = vst.msk [vmem:[%s191_s4] ss:$8 sm:$0x3] %vm3599_vm0, %v3595_v35 }
 0x2ac   : > { %v3637_v37 = vrot.slane %v3630_v36, %v3587_v28 }
 0x2ae   : > { %4206 = vst.msk [vmem:[%s191_s4 + $0x1] ss:$8 sm:$0x3] %vm3599_vm0, %v3637_v37 }
 0x2af PF: > { %s14_s12 = sadd.s32 1, %s4918_s12  }
 0x2b0   : > { %p11_p5 = scmp.ge.s32.totalorder %s14_s12, 4  }
 0x2b2   :  { %13 = sbr.rel (!%p11_p5) target bundleno = 1 (0x1), region = 71 }

// kernel: _lambda_.23
= control target key start
LH: loop header
LB: loop body
LE: loop exit
PB: predicated region body
PF: predicated region fallthrough
CT: control target
= control target key end

     0   :  { %s3422_s12 = smov 0   ;;  %s4335_s0 = inlined_call_operand.vmem [shape: bf16[32,2304], index: 0, kind: input, shape index: {}]   ;;  %s4336_s1 = inlined_call_operand.vmem [shape: bf16[2304,256], index: 1, kind: input, shape index: {}]   ;;  %s4337_s2 = inlined_call_operand.vmem [shape: bf16[32,256], index: 2, kind: output, shape index: {0}]   ;;  %s4338_s3 = inlined_call_operand.vmem [shape: f32[16,256], index: 3, kind: output, shape index: {1}]  }
   0x1 LB: > { %s3428_s13 = sadd.s32 4294967295, %s3399_s12   ;;  %p2601_p0 = scmp.ge.s32.totalorder %s3399_s12, 1  ;;  %s3399_s12 = sphi %s3422_s12, %s14_s12  }
   0x2   : > { %p142_p1 = scmp.lt.s32.totalorder %s3399_s12, 3 }
   0x4   : > { %p143_p2 = pnand %p2601_p0, %p142_p1 }
   0x5   : > { %s2602_s24 = sshll.u32 (!%p143_p2), %s3428_s13, 1  ;;  %p187_p4 = scmp.lt.s32.totalorder (!%p143_p2), %s3428_s13, 1 }
   0x6   : > { %146 = sbr.rel (%p143_p2) target bundleno = 557 (0x22d), region = 28  ;;  %p174_p3 = scmp.lt.s32.totalorder (!%p143_p2), %s2602_s24, 3 }
   0xb   : > { %v2934_v0 = vld [vmem:[%s4336_s1 + $0x74] ss:$8 sps:$4 sm:$0xff]   ;;  %v2938_v2 = vld [vmem:[%s4336_s1 + $0x70] ss:$8 sps:$4 sm:$0xff]   ;;  %v2940_v4 = vld [vmem:[%s4336_s1 + $0x64] ss:$8 sps:$4 sm:$0xff]  }
   0xc   : > { %v2936_v1 = vld [vmem:[%s4336_s1 + $0x174] ss:$8 sps:$4 sm:$0xff]   ;;  %2028 = vmatprep.subr.bf16.mxu0 %v2934_v0  ;;  %v2939_v3 = vld [vmem:[%s4336_s1 + $0x170] ss:$8 sps:$4 sm:$0xff]   ;;  %v2942_v5 = vld [vmem:[%s4336_s1 + $0x164] ss:$8 sps:$4 sm:$0xff]  }
   0xd   : > { %2071 = vmatprep.subr.bf16.mxu1 %v2936_v1  ;;  %2029 = vmatpush1.bf16.msra.mxu0 %v2938_v2  ;;  %v2944_v6 = vld [vmem:[%s4336_s1 + $0x60] ss:$8 sps:$4 sm:$0xff]   ;;  %v2946_v8 = vld [vmem:[%s4336_s1 + $0x54] ss:$8 sps:$4 sm:$0xff]   ;;  %v2950_v10 = vld [vmem:[%s4336_s1 + $0x50] ss:$8 sps:$4 sm:$0xff]  }
   0xe   : > { %2072 = vmatpush1.bf16.msra.mxu1 %v2939_v3  ;;  %2030 = vmatprep.subr.bf16.mxu0 %v2940_v4  ;;  %v2945_v7 = vld [vmem:[%s4336_s1 + $0x160] ss:$8 sps:$4 sm:$0xff]   ;;  %v2948_v9 = vld [vmem:[%s4336_s1 + $0x154] ss:$8 sps:$4 sm:$0xff]   ;;  %v2951_v11 = vld [vmem:[%s4336_s1 + $0x150] ss:$8 sps:$4 sm:$0xff]  }
   0xf   : > { %2073 = vmatprep.subr.bf16.mxu1 %v2942_v5  ;;  %v2952_v12 = vld [vmem:[%s4336_s1 + $0x44] ss:$8 sps:$4 sm:$0xff]   ;;  %v2956_v14 = vld [vmem:[%s4336_s1 + $0x40] ss:$8 sps:$4 sm:$0xff]   ;;  %v2958_v16 = vld [vmem:[%s4336_s1 + $0x34] ss:$8 sps:$4 sm:$0xff]  }
  0x10   : > { %v2954_v13 = vld [vmem:[%s4336_s1 + $0x144] ss:$8 sps:$4 sm:$0xff]   ;;  %v2957_v15 = vld [vmem:[%s4336_s1 + $0x140] ss:$8 sps:$4 sm:$0xff]   ;;  %v2960_v17 = vld [vmem:[%s4336_s1 + $0x134] ss:$8 sps:$4 sm:$0xff]  }
  0x11   : > { %2031 = vmatpush1.bf16.msra.mxu0 %v2944_v6  ;;  %v2962_v18 = vld [vmem:[%s4336_s1 + $0x30] ss:$8 sps:$4 sm:$0xff]   ;;  %v2964_v20 = vld [vmem:[%s4336_s1 + $0x24] ss:$8 sps:$4 sm:$0xff]   ;;  %v2968_v22 = vld [vmem:[%s4336_s1 + $0x20] ss:$8 sps:$4 sm:$0xff]  }
  0x12   : > { %2074 = vmatpush1.bf16.msra.mxu1 %v2945_v7  ;;  %2032 = vmatprep.subr.bf16.mxu0 %v2946_v8  ;;  %v2963_v19 = vld [vmem:[%s4336_s1 + $0x130] ss:$8 sps:$4 sm:$0xff]   ;;  %v2966_v21 = vld [vmem:[%s4336_s1 + $0x124] ss:$8 sps:$4 sm:$0xff]   ;;  %v2969_v23 = vld [vmem:[%s4336_s1 + $0x120] ss:$8 sps:$4 sm:$0xff]  }
  0x13   : > { %2075 = vmatprep.subr.bf16.mxu1 %v2948_v9  ;;  %v2970_v24 = vld [vmem:[%s4336_s1 + $0x14] ss:$8 sps:$4 sm:$0xff]   ;;  %v2974_v26 = vld [vmem:[%s4336_s1 + $0x10] ss:$8 sps:$4 sm:$0xff]   ;;  %v2976_v28 = vld [vmem:[%s4336_s1 + $0x4] ss:$8 sps:$4 sm:$0xff]  }
  0x14   : > { %v2972_v25 = vld [vmem:[%s4336_s1 + $0x114] ss:$8 sps:$4 sm:$0xff]   ;;  %v2975_v27 = vld [vmem:[%s4336_s1 + $0x110] ss:$8 sps:$4 sm:$0xff]   ;;  %v2978_v29 = vld [vmem:[%s4336_s1 + $0x104] ss:$8 sps:$4 sm:$0xff]  }
  0x15   : > { %2033 = vmatpush1.bf16.msra.mxu0 %v2950_v10  ;;  %v2980_v30 = vld [vmem:[%s4336_s1] ss:$8 sps:$4 sm:$0xff]   ;;  %v2982_v32 = vld [vmem:[%s4336_s1 + $0xf4] ss:$8 sps:$4 sm:$0xff]   ;;  %v2986_v34 = vld [vmem:[%s4336_s1 + $0xf0] ss:$8 sps:$4 sm:$0xff]  }
  0x16   : > { %2076 = vmatpush1.bf16.msra.mxu1 %v2951_v11  ;;  %2034 = vmatprep.subr.bf16.mxu0 %v2952_v12  ;;  %v2981_v31 = vld [vmem:[%s4336_s1 + $0x100] ss:$8 sps:$4 sm:$0xff]   ;;  %v2984_v33 = vld [vmem:[%s4336_s1 + $0x1f4] ss:$8 sps:$4 sm:$0xff]   ;;  %v2987_v35 = vld [vmem:[%s4336_s1 + $0x1f0] ss:$8 sps:$4 sm:$0xff]  }
  0x17   : > { %2077 = vmatprep.subr.bf16.mxu1 %v2954_v13  ;;  %v2988_v36 = vld [vmem:[%s4336_s1 + $0xe4] ss:$8 sps:$4 sm:$0xff]   ;;  %s4340_s24 = smov (!%p174_p3, %s2602_s24), 3  ;;  %v2992_v38 = vld [vmem:[%s4336_s1 + $0xe0] ss:$8 sps:$4 sm:$0xff]   ;;  %s4342_s13 = smov (!%p187_p4, %s3428_s13), 1 }
  0x18   : > { %v2990_v37 = vld [vmem:[%s4336_s1 + $0x1e4] ss:$8 sps:$4 sm:$0xff]   ;;  %v2993_v39 = vld [vmem:[%s4336_s1 + $0x1e0] ss:$8 sps:$4 sm:$0xff]   ;;  %v2994_v40 = vld [vmem:[%s4336_s1 + $0xd4] ss:$8 sps:$4 sm:$0xff]  }
  0x19   : > { %2035 = vmatpush1.bf16.msra.mxu0 %v2956_v14  ;;  %s2924_s22 = smul.u32 72, %s4340_s24  ;;  %v2996_v41 = vld [vmem:[%s4336_s1 + $0x1d4] ss:$8 sps:$4 sm:$0xff]   ;;  %v2998_v42 = vld [vmem:[%s4336_s1 + $0xd0] ss:$8 sps:$4 sm:$0xff]  }
  0x1a   : > { %2078 = vmatpush1.bf16.msra.mxu1 %v2957_v15  ;;  %2036 = vmatprep.subr.bf16.mxu0 %v2958_v16  ;;  %v2999_v43 = vld [vmem:[%s4336_s1 + $0x1d0] ss:$8 sps:$4 sm:$0xff]   ;;  %v3000_v44 = vld [vmem:[%s4336_s1 + $0xc4] ss:$8 sps:$4 sm:$0xff]   ;;  %v3004_v46 = vld [vmem:[%s4336_s1 + $0xc0] ss:$8 sps:$4 sm:$0xff]  }
  0x1b   : > { %2079 = vmatprep.subr.bf16.mxu1 %v2960_v17  ;;  %s3574_s7 = scalar_lea.vmem %s4335_s0, %s2924_s22  ;;  %v3002_v45 = vld [vmem:[%s4336_s1 + $0x1c4] ss:$8 sps:$4 sm:$0xff]   ;;  %v3005_v47 = vld [vmem:[%s4336_s1 + $0x1c0] ss:$8 sps:$4 sm:$0xff]   ;;  %v3006_v48 = vld [vmem:[%s4336_s1 + $0xb4] ss:$8 sps:$4 sm:$0xff]  }
  0x1c   : > { %v3032_v49 = vld [vmem:[%s3574_s7 + $0x4] ss:$72 sps:$4 sm:$0xff]   ;;  %v3008_v50 = vld [vmem:[%s4336_s1 + $0x1b4] ss:$8 sps:$4 sm:$0xff]   ;;  %v3010_v52 = vld [vmem:[%s4336_s1 + $0xb0] ss:$8 sps:$4 sm:$0xff]  }
  0x1d   : > { %2037 = vmatpush1.bf16.msra.mxu0 %v2962_v18  ;;  %v3035_v51 = vld [vmem:[%s3574_s7 + $0xc] ss:$72 sps:$4 sm:$0xff]   ;;  %2060 = vmatprep.mubr.bf16.mxu0 %v3032_v49  ;;  %v3011_v53 = vld [vmem:[%s4336_s1 + $0x1b0] ss:$8 sps:$4 sm:$0xff]   ;;  %v3016_v56 = vld [vmem:[%s4336_s1 + $0xa0] ss:$8 sps:$4 sm:$0xff]  }
  0x1e   : > { %2080 = vmatpush1.bf16.msra.mxu1 %v2963_v19  ;;  %2038 = vmatprep.subr.bf16.mxu0 %v2964_v20  ;;  %v3012_v54 = vld [vmem:[%s4336_s1 + $0xa4] ss:$8 sps:$4 sm:$0xff]   ;;  %v3017_v57 = vld [vmem:[%s4336_s1 + $0x1a0] ss:$8 sps:$4 sm:$0xff]   ;;  %v3018_v58 = vld [vmem:[%s4336_s1 + $0x94] ss:$8 sps:$4 sm:$0xff]  }
  0x1f   : > { %2081 = vmatprep.subr.bf16.mxu1 %v2966_v21  ;;  %2103 = vmatprep.mubr.bf16.mxu1 %v3035_v51  ;;  %v3014_v55 = vld [vmem:[%s4336_s1 + $0x1a4] ss:$8 sps:$4 sm:$0xff]   ;;  %v3020_v59 = vld [vmem:[%s4336_s1 + $0x194] ss:$8 sps:$4 sm:$0xff]   ;;  %v3022_v60 = vld [vmem:[%s4336_s1 + $0x90] ss:$8 sps:$4 sm:$0xff]  }
  0x20   : > { %v3023_v61 = vld [vmem:[%s4336_s1 + $0x190] ss:$8 sps:$4 sm:$0xff]   ;;  %v3024_v62 = vld [vmem:[%s4336_s1 + $0x84] ss:$8 sps:$4 sm:$0xff]   ;;  %v3028_v0 = vld [vmem:[%s4336_s1 + $0x80] ss:$8 sps:$4 sm:$0xff]  }
  0x21   : > { %2039 = vmatpush1.bf16.msra.mxu0 %v2968_v22  ;;  %v3026_v63 = vld [vmem:[%s4336_s1 + $0x184] ss:$8 sps:$4 sm:$0xff]   ;;  %v3029_v1 = vld [vmem:[%s4336_s1 + $0x180] ss:$8 sps:$4 sm:$0xff]   ;;  %v3038_v2 = vld [vmem:[%s4336_s1 + $0x274] ss:$8 sps:$4 sm:$0xff]  }
  0x22   : > { %2082 = vmatpush1.bf16.msra.mxu1 %v2969_v23  ;;  %2040 = vmatprep.subr.bf16.mxu0 %v2970_v24  ;;  %v3041_v3 = vld [vmem:[%s4336_s1 + $0x374] ss:$8 sps:$4 sm:$0xff]   ;;  %v3030_v4 = vld [vmem:[%s3574_s7] ss:$72 sps:$4 sm:$0xff]   ;;  %v3036_v6 = vld [vmem:[%s4336_s1 + $0x270] ss:$8 sps:$4 sm:$0xff]  }
  0x23   : > { %2083 = vmatprep.subr.bf16.mxu1 %v2972_v25  ;;  %v3033_v5 = vld [vmem:[%s3574_s7 + $0x8] ss:$72 sps:$4 sm:$0xff]   ;;  %v3044_v8 = vld [vmem:[%s4336_s1 + $0x264] ss:$8 sps:$4 sm:$0xff]   ;;  %v3050_v12 = vld [vmem:[%s4336_s1 + $0x254] ss:$8 sps:$4 sm:$0xff]  }
  0x24   : > { %v3039_v7 = vld [vmem:[%s4336_s1 + $0x370] ss:$8 sps:$4 sm:$0xff]   ;;  %v3047_v9 = vld [vmem:[%s4336_s1 + $0x364] ss:$8 sps:$4 sm:$0xff]   ;;  %v3042_v10 = vld [vmem:[%s4336_s1 + $0x260] ss:$8 sps:$4 sm:$0xff]  }
  0x25   : > { %2041 = vmatpush1.bf16.msra.mxu0 %v2974_v26  ;;  %v3045_v11 = vld [vmem:[%s4336_s1 + $0x360] ss:$8 sps:$4 sm:$0xff]   ;;  %v3053_v13 = vld [vmem:[%s4336_s1 + $0x354] ss:$8 sps:$4 sm:$0xff]   ;;  %v3048_v14 = vld [vmem:[%s4336_s1 + $0x250] ss:$8 sps:$4 sm:$0xff]  }
  0x26   : > { %2084 = vmatpush1.bf16.msra.mxu1 %v2975_v27  ;;  %2042 = vmatprep.subr.bf16.mxu0 %v2976_v28  ;;  %v3051_v15 = vld [vmem:[%s4336_s1 + $0x350] ss:$8 sps:$4 sm:$0xff]   ;;  %v3056_v16 = vld [vmem:[%s4336_s1 + $0x244] ss:$8 sps:$4 sm:$0xff]   ;;  %v3054_v18 = vld [vmem:[%s4336_s1 + $0x240] ss:$8 sps:$4 sm:$0xff]  }
  0x27   : > { %2085 = vmatprep.subr.bf16.mxu1 %v2978_v29  ;;  %v3059_v17 = vld [vmem:[%s4336_s1 + $0x344] ss:$8 sps:$4 sm:$0xff]   ;;  %v3057_v19 = vld [vmem:[%s4336_s1 + $0x340] ss:$8 sps:$4 sm:$0xff]   ;;  %v3062_v20 = vld [vmem:[%s4336_s1 + $0x234] ss:$8 sps:$4 sm:$0xff]  }
  0x28   : > { %v3065_v21 = vld [vmem:[%s4336_s1 + $0x334] ss:$8 sps:$4 sm:$0xff]   ;;  %v3060_v22 = vld [vmem:[%s4336_s1 + $0x230] ss:$8 sps:$4 sm:$0xff]   ;;  %v3068_v24 = vld [vmem:[%s4336_s1 + $0x224] ss:$8 sps:$4 sm:$0xff]  }
  0x29   : > { %2043 = vmatpush1.bf16.msra.mxu0 %v2980_v30  ;;  %v3063_v23 = vld [vmem:[%s4336_s1 + $0x330] ss:$8 sps:$4 sm:$0xff]   ;;  %v3071_v25 = vld [vmem:[%s4336_s1 + $0x324] ss:$8 sps:$4 sm:$0xff]   ;;  %v3066_v26 = vld [vmem:[%s4336_s1 + $0x220] ss:$8 sps:$4 sm:$0xff]  }
  0x2a   : > { %2086 = vmatpush1.bf16.msra.mxu1 %v2981_v31  ;;  %2044 = vmatprep.subr.bf16.mxu0 %v2982_v32  ;;  %v3069_v27 = vld [vmem:[%s4336_s1 + $0x320] ss:$8 sps:$4 sm:$0xff]   ;;  %v3074_v28 = vld [vmem:[%s4336_s1 + $0x214] ss:$8 sps:$4 sm:$0xff]   ;;  %v3072_v30 = vld [vmem:[%s4336_s1 + $0x210] ss:$8 sps:$4 sm:$0xff]  }
  0x2b   : > { %2087 = vmatprep.subr.bf16.mxu1 %v2984_v33  ;;  %v3077_v29 = vld [vmem:[%s4336_s1 + $0x314] ss:$8 sps:$4 sm:$0xff]   ;;  %v3075_v31 = vld [vmem:[%s4336_s1 + $0x310] ss:$8 sps:$4 sm:$0xff]   ;;  %v3080_v32 = vld [vmem:[%s4336_s1 + $0x204] ss:$8 sps:$4 sm:$0xff]  }
  0x2c   : > { %v3083_v33 = vld [vmem:[%s4336_s1 + $0x304] ss:$8 sps:$4 sm:$0xff]   ;;  %v3099_v49 = vld [vmem:[%s4336_s1 + $0x3d0] ss:$8 sps:$4 sm:$0xff]  }
  0x2d   : > { %2045 = vmatpush2.bf16.msra.mxu0 %v2986_v34  ;;  %v3134_v34 = vld [vmem:[%s3574_s7 + $0x14] ss:$72 sps:$4 sm:$0xff]   ;;  %v3107_v51 = vld [vmem:[%s4336_s1 + $0x3c4] ss:$8 sps:$4 sm:$0xff]  }
  0x2e   : > { %2088 = vmatpush2.bf16.msra.mxu1 %v2987_v35  ;;  %2046 = vmatprep.subr.bf16.mxu0 %v2988_v36  ;;  %v3078_v35 = vld [vmem:[%s4336_s1 + $0x200] ss:$8 sps:$4 sm:$0xff]  }
  0x2f   : > { %2089 = vmatprep.subr.bf16.mxu1 %v2990_v37  ;;  %v3081_v36 = vld [vmem:[%s4336_s1 + $0x300] ss:$8 sps:$4 sm:$0xff]   ;;  %v3140_v37 = vld [vmem:[%s3574_s7 + $0x1c] ss:$72 sps:$4 sm:$0xff]  }
  0x31   : > { %2047 = vmatpush2.bf16.msra.mxu0 %v2992_v38  ;;  %v3086_v38 = vld [vmem:[%s4336_s1 + $0x2f4] ss:$8 sps:$4 sm:$0xff]  }
  0x32   : > { %2090 = vmatpush2.bf16.msra.mxu1 %v2993_v39  ;;  %2048 = vmatprep.subr.bf16.mxu0 %v2994_v40  ;;  %v3089_v39 = vld [vmem:[%s4336_s1 + $0x3f4] ss:$8 sps:$4 sm:$0xff]   ;;  %v3084_v40 = vld [vmem:[%s4336_s1 + $0x2f0] ss:$8 sps:$4 sm:$0xff]  }
  0x33   : > { %2091 = vmatprep.subr.bf16.mxu1 %v2996_v41  ;;  %v3087_v41 = vld [vmem:[%s4336_s1 + $0x3f0] ss:$8 sps:$4 sm:$0xff]  }
  0x35   : > { %2049 = vmatpush2.bf16.msra.mxu0 %v2998_v42  ;;  %v3092_v42 = vld [vmem:[%s4336_s1 + $0x2e4] ss:$8 sps:$4 sm:$0xff]  }
  0x36   : > { %2092 = vmatpush2.bf16.msra.mxu1 %v2999_v43  ;;  %2050 = vmatprep.subr.bf16.mxu0 %v3000_v44  ;;  %v3095_v43 = vld [vmem:[%s4336_s1 + $0x3e4] ss:$8 sps:$4 sm:$0xff]   ;;  %v3090_v44 = vld [vmem:[%s4336_s1 + $0x2e0] ss:$8 sps:$4 sm:$0xff]  }
  0x37   : > { %2093 = vmatprep.subr.bf16.mxu1 %v3002_v45  ;;  %v3093_v45 = vld [vmem:[%s4336_s1 + $0x3e0] ss:$8 sps:$4 sm:$0xff]  }
  0x39   : > { %2051 = vmatpush2.bf16.msra.mxu0 %v3004_v46  ;;  %v3098_v46 = vld [vmem:[%s4336_s1 + $0x2d4] ss:$8 sps:$4 sm:$0xff]  }
  0x3a   : > { %2094 = vmatpush2.bf16.msra.mxu1 %v3005_v47  ;;  %2052 = vmatprep.subr.bf16.mxu0 %v3006_v48  ;;  %v3101_v47 = vld [vmem:[%s4336_s1 + $0x3d4] ss:$8 sps:$4 sm:$0xff]   ;;  %v3096_v48 = vld [vmem:[%s4336_s1 + $0x2d0] ss:$8 sps:$4 sm:$0xff]  }
  0x3b   : > { %2095 = vmatprep.subr.bf16.mxu1 %v3008_v50  ;;  %v3104_v50 = vld [vmem:[%s4336_s1 + $0x2c4] ss:$8 sps:$4 sm:$0xff]  }
  0x3d   : > { %2053 = vmatpush2.bf16.msra.mxu0 %v3010_v52  ;;  %v3102_v52 = vld [vmem:[%s4336_s1 + $0x2c0] ss:$8 sps:$4 sm:$0xff]  }
  0x3e   : > { %2096 = vmatpush2.bf16.msra.mxu1 %v3011_v53  ;;  %2054 = vmatprep.subr.bf16.mxu0 %v3012_v54  ;;  %v3105_v53 = vld [vmem:[%s4336_s1 + $0x3c0] ss:$8 sps:$4 sm:$0xff]   ;;  %v3110_v54 = vld [vmem:[%s4336_s1 + $0x2b4] ss:$8 sps:$4 sm:$0xff]  }
  0x3f   : > { %2097 = vmatprep.subr.bf16.mxu1 %v3014_v55  ;;  %v3113_v55 = vld [vmem:[%s4336_s1 + $0x3b4] ss:$8 sps:$4 sm:$0xff]  }
  0x41   : > { %2055 = vmatpush2.bf16.msra.mxu0 %v3016_v56  ;;  %v3108_v56 = vld [vmem:[%s4336_s1 + $0x2b0] ss:$8 sps:$4 sm:$0xff]  }
  0x42   : > { %2098 = vmatpush2.bf16.msra.mxu1 %v3017_v57  ;;  %2056 = vmatprep.subr.bf16.mxu0 %v3018_v58  ;;  %v3111_v57 = vld [vmem:[%s4336_s1 + $0x3b0] ss:$8 sps:$4 sm:$0xff]   ;;  %v3116_v58 = vld [vmem:[%s4336_s1 + $0x2a4] ss:$8 sps:$4 sm:$0xff]  }
  0x43   : > { %2099 = vmatprep.subr.bf16.mxu1 %v3020_v59  ;;  %v3119_v59 = vld [vmem:[%s4336_s1 + $0x3a4] ss:$8 sps:$4 sm:$0xff]  }
  0x45   : > { %2057 = vmatpush2.bf16.msra.mxu0 %v3022_v60  ;;  %v3114_v60 = vld [vmem:[%s4336_s1 + $0x2a0] ss:$8 sps:$4 sm:$0xff]  }
  0x46   : > { %2100 = vmatpush2.bf16.msra.mxu1 %v3023_v61  ;;  %2058 = vmatprep.subr.bf16.mxu0 %v3024_v62  ;;  %v3117_v61 = vld [vmem:[%s4336_s1 + $0x3a0] ss:$8 sps:$4 sm:$0xff]   ;;  %v3122_v62 = vld [vmem:[%s4336_s1 + $0x294] ss:$8 sps:$4 sm:$0xff]  }
  0x47   : > { %2101 = vmatprep.subr.bf16.mxu1 %v3026_v63  ;;  %v3125_v63 = vld [vmem:[%s4336_s1 + $0x394] ss:$8 sps:$4 sm:$0xff]  }
  0x49   : > { %2059 = vmatpush2.bf16.msra.mxu0 %v3028_v0  ;;  %v3120_v0 = vld [vmem:[%s4336_s1 + $0x290] ss:$8 sps:$4 sm:$0xff]  }
  0x4a   : > { %2102 = vmatpush2.bf16.msra.mxu1 %v3029_v1  ;;  %2114 = vmatprep.subr.bf16.mxu0 %v3038_v2  ;;  %v3123_v1 = vld [vmem:[%s4336_s1 + $0x390] ss:$8 sps:$4 sm:$0xff]   ;;  %v3128_v2 = vld [vmem:[%s4336_s1 + $0x284] ss:$8 sps:$4 sm:$0xff]  }
  0x4b   : > { %2157 = vmatprep.subr.bf16.mxu1 %v3041_v3  ;;  %v3131_v3 = vld [vmem:[%s4336_s1 + $0x384] ss:$8 sps:$4 sm:$0xff]  }
  0x4c   : > { %2061 = vmatmul.mubr.bf16.vlgmr.msra.gmra.mxu0 %v3030_v4  ;;  %v3126_v4 = vld [vmem:[%s4336_s1 + $0x280] ss:$8 sps:$4 sm:$0xff]  }
  0x4d   : > { %2104 = vmatmul.mubr.bf16.vlgmr.msra.gmra.mxu1 %v3033_v5  ;;  %2115 = vmatpush1.bf16.msra.mxu0 %v3036_v6  ;;  %v3129_v5 = vld [vmem:[%s4336_s1 + $0x380] ss:$8 sps:$4 sm:$0xff]   ;;  %v3137_v6 = vld [vmem:[%s4336_s1 + $0x474] ss:$8 sps:$4 sm:$0xff]  }
  0x4e   : > { %2158 = vmatpush1.bf16.msra.mxu1 %v3039_v7  ;;  %2116 = vmatprep.subr.bf16.mxu0 %v3044_v8  ;;  %v3143_v7 = vld [vmem:[%s4336_s1 + $0x574] ss:$8 sps:$4 sm:$0xff]   ;;  %v3132_v8 = vld [vmem:[%s3574_s7 + $0x10] ss:$72 sps:$4 sm:$0xff]  }
  0x4f   : > { %2159 = vmatprep.subr.bf16.mxu1 %v3047_v9  ;;  %2146 = vmatprep.mubr.bf16.mxu0 %v3134_v34  ;;  %v3135_v9 = vld [vmem:[%s4336_s1 + $0x470] ss:$8 sps:$4 sm:$0xff]   ;;  %v3176_v34 = vld [vmem:[%s4336_s1 + $0x414] ss:$8 sps:$4 sm:$0xff]  }
  0x50   : > { %2189 = vmatprep.mubr.bf16.mxu1 %v3140_v37  ;;  %v3177_v37 = vld [vmem:[%s4336_s1 + $0x510] ss:$8 sps:$4 sm:$0xff]  }
  0x51   : > { %2117 = vmatpush1.bf16.msra.mxu0 %v3042_v10  ;;  %v3138_v10 = vld [vmem:[%s3574_s7 + $0x18] ss:$72 sps:$4 sm:$0xff]  }
  0x52   : > { %2160 = vmatpush1.bf16.msra.mxu1 %v3045_v11  ;;  %2118 = vmatprep.subr.bf16.mxu0 %v3050_v12  ;;  %v3141_v11 = vld [vmem:[%s4336_s1 + $0x570] ss:$8 sps:$4 sm:$0xff]   ;;  %v3146_v12 = vld [vmem:[%s4336_s1 + $0x464] ss:$8 sps:$4 sm:$0xff]  }
  0x53   : > { %2161 = vmatprep.subr.bf16.mxu1 %v3053_v13  ;;  %v3149_v13 = vld [vmem:[%s4336_s1 + $0x564] ss:$8 sps:$4 sm:$0xff]  }
  0x55   : > { %2119 = vmatpush1.bf16.msra.mxu0 %v3048_v14  ;;  %v3144_v14 = vld [vmem:[%s4336_s1 + $0x460] ss:$8 sps:$4 sm:$0xff]  }
  0x56   : > { %2162 = vmatpush1.bf16.msra.mxu1 %v3051_v15  ;;  %2120 = vmatprep.subr.bf16.mxu0 %v3056_v16  ;;  %v3147_v15 = vld [vmem:[%s4336_s1 + $0x560] ss:$8 sps:$4 sm:$0xff]   ;;  %v3152_v16 = vld [vmem:[%s4336_s1 + $0x454] ss:$8 sps:$4 sm:$0xff]  }
  0x57   : > { %2163 = vmatprep.subr.bf16.mxu1 %v3059_v17  ;;  %v3155_v17 = vld [vmem:[%s4336_s1 + $0x554] ss:$8 sps:$4 sm:$0xff]  }
  0x59   : > { %2121 = vmatpush1.bf16.msra.mxu0 %v3054_v18  ;;  %v3150_v18 = vld [vmem:[%s4336_s1 + $0x450] ss:$8 sps:$4 sm:$0xff]  }
  0x5a   : > { %2164 = vmatpush1.bf16.msra.mxu1 %v3057_v19  ;;  %2122 = vmatprep.subr.bf16.mxu0 %v3062_v20  ;;  %v3236_v19 = vld [vmem:[%s3574_s7 + $0x24] ss:$72 sps:$4 sm:$0xff]   ;;  %v3153_v20 = vld [vmem:[%s4336_s1 + $0x550] ss:$8 sps:$4 sm:$0xff]  }
  0x5b   : > { %2165 = vmatprep.subr.bf16.mxu1 %v3065_v21  ;;  %v3158_v21 = vld [vmem:[%s4336_s1 + $0x444] ss:$8 sps:$4 sm:$0xff]  }
  0x5d   : > { %2123 = vmatpush1.bf16.msra.mxu0 %v3060_v22  ;;  %v3161_v22 = vld [vmem:[%s4336_s1 + $0x544] ss:$8 sps:$4 sm:$0xff]  }
  0x5e   : > { %2166 = vmatpush1.bf16.msra.mxu1 %v3063_v23  ;;  %2124 = vmatprep.subr.bf16.mxu0 %v3068_v24  ;;  %v3242_v23 = vld [vmem:[%s3574_s7 + $0x2c] ss:$72 sps:$4 sm:$0xff]   ;;  %v3156_v24 = vld [vmem:[%s4336_s1 + $0x440] ss:$8 sps:$4 sm:$0xff]  }
  0x5f   : > { %2167 = vmatprep.subr.bf16.mxu1 %v3071_v25  ;;  %v3159_v25 = vld [vmem:[%s4336_s1 + $0x540] ss:$8 sps:$4 sm:$0xff]  }
  0x61   : > { %2125 = vmatpush1.bf16.msra.mxu0 %v3066_v26  ;;  %v3164_v26 = vld [vmem:[%s4336_s1 + $0x434] ss:$8 sps:$4 sm:$0xff]  }
  0x62   : > { %2168 = vmatpush1.bf16.msra.mxu1 %v3069_v27  ;;  %2126 = vmatprep.subr.bf16.mxu0 %v3074_v28  ;;  %v3167_v27 = vld [vmem:[%s4336_s1 + $0x534] ss:$8 sps:$4 sm:$0xff]   ;;  %v3162_v28 = vld [vmem:[%s4336_s1 + $0x430] ss:$8 sps:$4 sm:$0xff]  }
  0x63   : > { %2169 = vmatprep.subr.bf16.mxu1 %v3077_v29  ;;  %v3165_v29 = vld [vmem:[%s4336_s1 + $0x530] ss:$8 sps:$4 sm:$0xff]  }
  0x65   : > { %2127 = vmatpush1.bf16.msra.mxu0 %v3072_v30  ;;  %v3170_v30 = vld [vmem:[%s4336_s1 + $0x424] ss:$8 sps:$4 sm:$0xff]  }
  0x66   : > { %2170 = vmatpush1.bf16.msra.mxu1 %v3075_v31  ;;  %2128 = vmatprep.subr.bf16.mxu0 %v3080_v32  ;;  %v3173_v31 = vld [vmem:[%s4336_s1 + $0x524] ss:$8 sps:$4 sm:$0xff]   ;;  %v3168_v32 = vld [vmem:[%s4336_s1 + $0x420] ss:$8 sps:$4 sm:$0xff]  }
  0x67   : > { %2171 = vmatprep.subr.bf16.mxu1 %v3083_v33  ;;  %v3171_v33 = vld [vmem:[%s4336_s1 + $0x520] ss:$8 sps:$4 sm:$0xff]  }
  0x69   : > { %2129 = vmatpush1.bf16.msra.mxu0 %v3078_v35  ;;  %v3179_v35 = vld [vmem:[%s4336_s1 + $0x514] ss:$8 sps:$4 sm:$0xff]  }
  0x6a   : > { %2172 = vmatpush1.bf16.msra.mxu1 %v3081_v36  ;;  %2130 = vmatprep.subr.bf16.mxu0 %v3086_v38  ;;  %v3174_v36 = vld [vmem:[%s4336_s1 + $0x410] ss:$8 sps:$4 sm:$0xff]   ;;  %v3182_v38 = vld [vmem:[%s4336_s1 + $0x404] ss:$8 sps:$4 sm:$0xff]  }
  0x6b   : > { %2173 = vmatprep.subr.bf16.mxu1 %v3089_v39  ;;  %v3185_v39 = vld [vmem:[%s4336_s1 + $0x504] ss:$8 sps:$4 sm:$0xff]  }
  0x6d   : > { %2131 = vmatpush2.bf16.msra.mxu0 %v3084_v40  ;;  %v3180_v40 = vld [vmem:[%s4336_s1 + $0x400] ss:$8 sps:$4 sm:$0xff]  }
  0x6e   : > { %2174 = vmatpush2.bf16.msra.mxu1 %v3087_v41  ;;  %2132 = vmatprep.subr.bf16.mxu0 %v3092_v42  ;;  %v3183_v41 = vld [vmem:[%s4336_s1 + $0x500] ss:$8 sps:$4 sm:$0xff]   ;;  %v3188_v42 = vld [vmem:[%s4336_s1 + $0x4f4] ss:$8 sps:$4 sm:$0xff]  }
  0x6f   : > { %2175 = vmatprep.subr.bf16.mxu1 %v3095_v43  ;;  %v3191_v43 = vld [vmem:[%s4336_s1 + $0x5f4] ss:$8 sps:$4 sm:$0xff]  }
  0x71   : > { %2133 = vmatpush2.bf16.msra.mxu0 %v3090_v44  ;;  %v3186_v44 = vld [vmem:[%s4336_s1 + $0x4f0] ss:$8 sps:$4 sm:$0xff]  }
  0x72   : > { %2176 = vmatpush2.bf16.msra.mxu1 %v3093_v45  ;;  %2134 = vmatprep.subr.bf16.mxu0 %v3098_v46  ;;  %v3189_v45 = vld [vmem:[%s4336_s1 + $0x5f0] ss:$8 sps:$4 sm:$0xff]   ;;  %v3194_v46 = vld [vmem:[%s4336_s1 + $0x4e4] ss:$8 sps:$4 sm:$0xff]  }
  0x73   : > { %2177 = vmatprep.subr.bf16.mxu1 %v3101_v47  ;;  %v3197_v47 = vld [vmem:[%s4336_s1 + $0x5e4] ss:$8 sps:$4 sm:$0xff]  }
  0x75   : > { %2135 = vmatpush2.bf16.msra.mxu0 %v3096_v48  ;;  %v3192_v48 = vld [vmem:[%s4336_s1 + $0x4e0] ss:$8 sps:$4 sm:$0xff]  }
  0x76   : > { %2178 = vmatpush2.bf16.msra.mxu1 %v3099_v49  ;;  %2136 = vmatprep.subr.bf16.mxu0 %v3104_v50  ;;  %v3195_v49 = vld [vmem:[%s4336_s1 + $0x5e0] ss:$8 sps:$4 sm:$0xff]   ;;  %v3200_v50 = vld [vmem:[%s4336_s1 + $0x4d4] ss:$8 sps:$4 sm:$0xff]  }
  0x77   : > { %2179 = vmatprep.subr.bf16.mxu1 %v3107_v51  ;;  %v3203_v51 = vld [vmem:[%s4336_s1 + $0x5d4] ss:$8 sps:$4 sm:$0xff]  }
  0x79   : > { %2137 = vmatpush2.bf16.msra.mxu0 %v3102_v52  ;;  %v3198_v52 = vld [vmem:[%s4336_s1 + $0x4d0] ss:$8 sps:$4 sm:$0xff]  }
  0x7a   : > { %2180 = vmatpush2.bf16.msra.mxu1 %v3105_v53  ;;  %2138 = vmatprep.subr.bf16.mxu0 %v3110_v54  ;;  %v3201_v53 = vld [vmem:[%s4336_s1 + $0x5d0] ss:$8 sps:$4 sm:$0xff]   ;;  %v3206_v54 = vld [vmem:[%s4336_s1 + $0x4c4] ss:$8 sps:$4 sm:$0xff]  }
  0x7b   : > { %2181 = vmatprep.subr.bf16.mxu1 %v3113_v55  ;;  %v3209_v55 = vld [vmem:[%s4336_s1 + $0x5c4] ss:$8 sps:$4 sm:$0xff]  }
  0x7d   : > { %2139 = vmatpush2.bf16.msra.mxu0 %v3108_v56  ;;  %v3204_v56 = vld [vmem:[%s4336_s1 + $0x4c0] ss:$8 sps:$4 sm:$0xff]  }
  0x7e   : > { %2182 = vmatpush2.bf16.msra.mxu1 %v3111_v57  ;;  %2140 = vmatprep.subr.bf16.mxu0 %v3116_v58  ;;  %v3207_v57 = vld [vmem:[%s4336_s1 + $0x5c0] ss:$8 sps:$4 sm:$0xff]   ;;  %v3212_v58 = vld [vmem:[%s4336_s1 + $0x4b4] ss:$8 sps:$4 sm:$0xff]  }
  0x7f   : > { %2183 = vmatprep.subr.bf16.mxu1 %v3119_v59  ;;  %v3215_v59 = vld [vmem:[%s4336_s1 + $0x5b4] ss:$8 sps:$4 sm:$0xff]  }
  0x81   : > { %2141 = vmatpush2.bf16.msra.mxu0 %v3114_v60  ;;  %v3210_v60 = vld [vmem:[%s4336_s1 + $0x4b0] ss:$8 sps:$4 sm:$0xff]  }
  0x82   : > { %2184 = vmatpush2.bf16.msra.mxu1 %v3117_v61  ;;  %2142 = vmatprep.subr.bf16.mxu0 %v3122_v62  ;;  %v3213_v61 = vld [vmem:[%s4336_s1 + $0x5b0] ss:$8 sps:$4 sm:$0xff]   ;;  %v3218_v62 = vld [vmem:[%s4336_s1 + $0x4a4] ss:$8 sps:$4 sm:$0xff]  }
  0x83   : > { %2185 = vmatprep.subr.bf16.mxu1 %v3125_v63  ;;  %v3221_v63 = vld [vmem:[%s4336_s1 + $0x5a4] ss:$8 sps:$4 sm:$0xff]  }
  0x85   : > { %2143 = vmatpush2.bf16.msra.mxu0 %v3120_v0  ;;  %v3216_v0 = vld [vmem:[%s4336_s1 + $0x4a0] ss:$8 sps:$4 sm:$0xff]  }
  0x86   : > { %2186 = vmatpush2.bf16.msra.mxu1 %v3123_v1  ;;  %2144 = vmatprep.subr.bf16.mxu0 %v3128_v2  ;;  %v3219_v1 = vld [vmem:[%s4336_s1 + $0x5a0] ss:$8 sps:$4 sm:$0xff]   ;;  %v3224_v2 = vld [vmem:[%s4336_s1 + $0x494] ss:$8 sps:$4 sm:$0xff]  }
  0x87   : > { %2187 = vmatprep.subr.bf16.mxu1 %v3131_v3  ;;  %v3227_v3 = vld [vmem:[%s4336_s1 + $0x594] ss:$8 sps:$4 sm:$0xff]  }
  0x89   : > { %2145 = vmatpush2.bf16.msra.mxu0 %v3126_v4  ;;  %v3222_v4 = vld [vmem:[%s4336_s1 + $0x490] ss:$8 sps:$4 sm:$0xff]  }
  0x8a   : > { %2188 = vmatpush2.bf16.msra.mxu1 %v3129_v5  ;;  %2200 = vmatprep.subr.bf16.mxu0 %v3137_v6  ;;  %v3225_v5 = vld [vmem:[%s4336_s1 + $0x590] ss:$8 sps:$4 sm:$0xff]   ;;  %v3230_v6 = vld [vmem:[%s4336_s1 + $0x484] ss:$8 sps:$4 sm:$0xff]  }
  0x8b   : > { %2243 = vmatprep.subr.bf16.mxu1 %v3143_v7  ;;  %v3233_v7 = vld [vmem:[%s4336_s1 + $0x584] ss:$8 sps:$4 sm:$0xff]  }
  0x8c   : > { %2147 = vmatmul.mubr.bf16.vlgmr.msra.gmra.mxu0 %v3132_v8  ;;  %v3228_v8 = vld [vmem:[%s4336_s1 + $0x480] ss:$8 sps:$4 sm:$0xff]  }
  0x8d   : > { %2190 = vmatmul.mubr.bf16.vlgmr.msra.gmra.mxu1 %v3138_v10  ;;  %2201 = vmatpush1.bf16.msra.mxu0 %v3135_v9  ;;  %v3231_v9 = vld [vmem:[%s4336_s1 + $0x580] ss:$8 sps:$4 sm:$0xff]   ;;  %v3239_v10 = vld [vmem:[%s4336_s1 + $0x674] ss:$8 sps:$4 sm:$0xff]  }
  0x8e   : > { %2244 = vmatpush1.bf16.msra.mxu1 %v3141_v11  ;;  %2202 = vmatprep.subr.bf16.mxu0 %v3146_v12  ;;  %v3245_v11 = vld [vmem:[%s4336_s1 + $0x774] ss:$8 sps:$4 sm:$0xff]   ;;  %v3234_v12 = vld [vmem:[%s3574_s7 + $0x20] ss:$72 sps:$4 sm:$0xff]  }
  0x8f   : > { %2245 = vmatprep.subr.bf16.mxu1 %v3149_v13  ;;  %2232 = vmatprep.mubr.bf16.mxu0 %v3236_v19  ;;  %v3237_v13 = vld [vmem:[%s4336_s1 + $0x670] ss:$8 sps:$4 sm:$0xff]   ;;  %v3344_v19 = vld [vmem:[%s3574_s7 + $0x3c] ss:$72 sps:$4 sm:$0xff]  }
  0x90   : > { %2275 = vmatprep.mubr.bf16.mxu1 %v3242_v23  ;;  %v3257_v23 = vld [vmem:[%s4336_s1 + $0x754] ss:$8 sps:$4 sm:$0xff]  }
  0x91   : > { %2203 = vmatpush1.bf16.msra.mxu0 %v3144_v14  ;;  %v3240_v14 = vld [vmem:[%s3574_s7 + $0x28] ss:$72 sps:$4 sm:$0xff]  }
  0x92   : > { %2246 = vmatpush1.bf16.msra.mxu1 %v3147_v15  ;;  %2204 = vmatprep.subr.bf16.mxu0 %v3152_v16  ;;  %v3243_v15 = vld [vmem:[%s4336_s1 + $0x770] ss:$8 sps:$4 sm:$0xff]   ;;  %v3248_v16 = vld [vmem:[%s4336_s1 + $0x664] ss:$8 sps:$4 sm:$0xff]  }
  0x93   : > { %2247 = vmatprep.subr.bf16.mxu1 %v3155_v17  ;;  %v3251_v17 = vld [vmem:[%s4336_s1 + $0x764] ss:$8 sps:$4 sm:$0xff]  }
  0x95   : > { %2205 = vmatpush1.bf16.msra.mxu0 %v3150_v18  ;;  %v3338_v18 = vld [vmem:[%s3574_s7 + $0x34] ss:$72 sps:$4 sm:$0xff]  }
  0x96   : > { %2248 = vmatpush1.bf16.msra.mxu1 %v3153_v20  ;;  %2206 = vmatprep.subr.bf16.mxu0 %v3158_v21  ;;  %v3246_v20 = vld [vmem:[%s4336_s1 + $0x660] ss:$8 sps:$4 sm:$0xff]  }
  0x97   : > { %2249 = vmatprep.subr.bf16.mxu1 %v3161_v22  ;;  %v3249_v21 = vld [vmem:[%s4336_s1 + $0x760] ss:$8 sps:$4 sm:$0xff]   ;;  %v3254_v22 = vld [vmem:[%s4336_s1 + $0x654] ss:$8 sps:$4 sm:$0xff]  }
  0x99   : > { %2207 = vmatpush1.bf16.msra.mxu0 %v3156_v24  ;;  %v3252_v24 = vld [vmem:[%s4336_s1 + $0x650] ss:$8 sps:$4 sm:$0xff]  }
  0x9a   : > { %2250 = vmatpush1.bf16.msra.mxu1 %v3159_v25  ;;  %2208 = vmatprep.subr.bf16.mxu0 %v3164_v26  ;;  %v3255_v25 = vld [vmem:[%s4336_s1 + $0x750] ss:$8 sps:$4 sm:$0xff]   ;;  %v3260_v26 = vld [vmem:[%s4336_s1 + $0x644] ss:$8 sps:$4 sm:$0xff]  }
  0x9b   : > { %2251 = vmatprep.subr.bf16.mxu1 %v3167_v27  ;;  %v3263_v27 = vld [vmem:[%s4336_s1 + $0x744] ss:$8 sps:$4 sm:$0xff]  }
  0x9d   : > { %2209 = vmatpush1.bf16.msra.mxu0 %v3162_v28  ;;  %v3258_v28 = vld [vmem:[%s4336_s1 + $0x640] ss:$8 sps:$4 sm:$0xff]  }
  0x9e   : > { %2252 = vmatpush1.bf16.msra.mxu1 %v3165_v29  ;;  %2210 = vmatprep.subr.bf16.mxu0 %v3170_v30  ;;  %v3261_v29 = vld [vmem:[%s4336_s1 + $0x740] ss:$8 sps:$4 sm:$0xff]   ;;  %v3266_v30 = vld [vmem:[%s4336_s1 + $0x634] ss:$8 sps:$4 sm:$0xff]  }
  0x9f   : > { %2253 = vmatprep.subr.bf16.mxu1 %v3173_v31  ;;  %v3269_v31 = vld [vmem:[%s4336_s1 + $0x734] ss:$8 sps:$4 sm:$0xff]  }
  0xa1   : > { %2211 = vmatpush1.bf16.msra.mxu0 %v3168_v32  ;;  %v3264_v32 = vld [vmem:[%s4336_s1 + $0x630] ss:$8 sps:$4 sm:$0xff]  }
  0xa2   : > { %2254 = vmatpush1.bf16.msra.mxu1 %v3171_v33  ;;  %2212 = vmatprep.subr.bf16.mxu0 %v3176_v34  ;;  %v3267_v33 = vld [vmem:[%s4336_s1 + $0x730] ss:$8 sps:$4 sm:$0xff]   ;;  %v3272_v34 = vld [vmem:[%s4336_s1 + $0x624] ss:$8 sps:$4 sm:$0xff]  }
  0xa3   : > { %2255 = vmatprep.subr.bf16.mxu1 %v3179_v35  ;;  %v3275_v35 = vld [vmem:[%s4336_s1 + $0x724] ss:$8 sps:$4 sm:$0xff]  }
  0xa5   : > { %2213 = vmatpush1.bf16.msra.mxu0 %v3174_v36  ;;  %v3270_v36 = vld [vmem:[%s4336_s1 + $0x620] ss:$8 sps:$4 sm:$0xff]  }
  0xa6   : > { %2256 = vmatpush1.bf16.msra.mxu1 %v3177_v37  ;;  %2214 = vmatprep.subr.bf16.mxu0 %v3182_v38  ;;  %v3273_v37 = vld [vmem:[%s4336_s1 + $0x720] ss:$8 sps:$4 sm:$0xff]   ;;  %v3278_v38 = vld [vmem:[%s4336_s1 + $0x614] ss:$8 sps:$4 sm:$0xff]  }
  0xa7   : > { %2257 = vmatprep.subr.bf16.mxu1 %v3185_v39  ;;  %v3281_v39 = vld [vmem:[%s4336_s1 + $0x714] ss:$8 sps:$4 sm:$0xff]  }
  0xa9   : > { %2215 = vmatpush1.bf16.msra.mxu0 %v3180_v40  ;;  %v3276_v40 = vld [vmem:[%s4336_s1 + $0x610] ss:$8 sps:$4 sm:$0xff]  }
  0xaa   : > { %2258 = vmatpush1.bf16.msra.mxu1 %v3183_v41  ;;  %2216 = vmatprep.subr.bf16.mxu0 %v3188_v42  ;;  %v3279_v41 = vld [vmem:[%s4336_s1 + $0x710] ss:$8 sps:$4 sm:$0xff]   ;;  %v3284_v42 = vld [vmem:[%s4336_s1 + $0x604] ss:$8 sps:$4 sm:$0xff]  }
  0xab   : > { %2259 = vmatprep.subr.bf16.mxu1 %v3191_v43  ;;  %v3287_v43 = vld [vmem:[%s4336_s1 + $0x704] ss:$8 sps:$4 sm:$0xff]  }
  0xad   : > { %2217 = vmatpush2.bf16.msra.mxu0 %v3186_v44  ;;  %v3282_v44 = vld [vmem:[%s4336_s1 + $0x600] ss:$8 sps:$4 sm:$0xff]  }
  0xae   : > { %2260 = vmatpush2.bf16.msra.mxu1 %v3189_v45  ;;  %2218 = vmatprep.subr.bf16.mxu0 %v3194_v46  ;;  %v3285_v45 = vld [vmem:[%s4336_s1 + $0x700] ss:$8 sps:$4 sm:$0xff]   ;;  %v3290_v46 = vld [vmem:[%s4336_s1 + $0x6f4] ss:$8 sps:$4 sm:$0xff]  }
  0xaf   : > { %2261 = vmatprep.subr.bf16.mxu1 %v3197_v47  ;;  %v3293_v47 = vld [vmem:[%s4336_s1 + $0x7f4] ss:$8 sps:$4 sm:$0xff]  }
  0xb1   : > { %2219 = vmatpush2.bf16.msra.mxu0 %v3192_v48  ;;  %v3288_v48 = vld [vmem:[%s4336_s1 + $0x6f0] ss:$8 sps:$4 sm:$0xff]  }
  0xb2   : > { %2262 = vmatpush2.bf16.msra.mxu1 %v3195_v49  ;;  %2220 = vmatprep.subr.bf16.mxu0 %v3200_v50  ;;  %v3291_v49 = vld [vmem:[%s4336_s1 + $0x7f0] ss:$8 sps:$4 sm:$0xff]   ;;  %v3296_v50 = vld [vmem:[%s4336_s1 + $0x6e4] ss:$8 sps:$4 sm:$0xff]  }
  0xb3   : > { %2263 = vmatprep.subr.bf16.mxu1 %v3203_v51  ;;  %v3299_v51 = vld [vmem:[%s4336_s1 + $0x7e4] ss:$8 sps:$4 sm:$0xff]  }
  0xb5   : > { %2221 = vmatpush2.bf16.msra.mxu0 %v3198_v52  ;;  %v3294_v52 = vld [vmem:[%s4336_s1 + $0x6e0] ss:$8 sps:$4 sm:$0xff]  }
  0xb6   : > { %2264 = vmatpush2.bf16.msra.mxu1 %v3201_v53  ;;  %2222 = vmatprep.subr.bf16.mxu0 %v3206_v54  ;;  %v3297_v53 = vld [vmem:[%s4336_s1 + $0x7e0] ss:$8 sps:$4 sm:$0xff]   ;;  %v3302_v54 = vld [vmem:[%s4336_s1 + $0x6d4] ss:$8 sps:$4 sm:$0xff]  }
  0xb7   : > { %2265 = vmatprep.subr.bf16.mxu1 %v3209_v55  ;;  %v3305_v55 = vld [vmem:[%s4336_s1 + $0x7d4] ss:$8 sps:$4 sm:$0xff]  }
  0xb9   : > { %2223 = vmatpush2.bf16.msra.mxu0 %v3204_v56  ;;  %v3300_v56 = vld [vmem:[%s4336_s1 + $0x6d0] ss:$8 sps:$4 sm:$0xff]  }
  0xba   : > { %2266 = vmatpush2.bf16.msra.mxu1 %v3207_v57  ;;  %2224 = vmatprep.subr.bf16.mxu0 %v3212_v58  ;;  %v3303_v57 = vld [vmem:[%s4336_s1 + $0x7d0] ss:$8 sps:$4 sm:$0xff]   ;;  %v3308_v58 = vld [vmem:[%s4336_s1 + $0x6c4] ss:$8 sps:$4 sm:$0xff]  }
  0xbb   : > { %2267 = vmatprep.subr.bf16.mxu1 %v3215_v59  ;;  %v3311_v59 = vld [vmem:[%s4336_s1 + $0x7c4] ss:$8 sps:$4 sm:$0xff]  }
  0xbd   : > { %2225 = vmatpush2.bf16.msra.mxu0 %v3210_v60  ;;  %v3306_v60 = vld [vmem:[%s4336_s1 + $0x6c0] ss:$8 sps:$4 sm:$0xff]  }
  0xbe   : > { %2268 = vmatpush2.bf16.msra.mxu1 %v3213_v61  ;;  %2226 = vmatprep.subr.bf16.mxu0 %v3218_v62  ;;  %v3309_v61 = vld [vmem:[%s4336_s1 + $0x7c0] ss:$8 sps:$4 sm:$0xff]   ;;  %v3314_v62 = vld [vmem:[%s4336_s1 + $0x6b4] ss:$8 sps:$4 sm:$0xff]  }
  0xbf   : > { %2269 = vmatprep.subr.bf16.mxu1 %v3221_v63  ;;  %v3317_v63 = vld [vmem:[%s4336_s1 + $0x7b4] ss:$8 sps:$4 sm:$0xff]  }
  0xc1   : > { %2227 = vmatpush2.bf16.msra.mxu0 %v3216_v0  ;;  %v3312_v0 = vld [vmem:[%s4336_s1 + $0x6b0] ss:$8 sps:$4 sm:$0xff]  }
  0xc2   : > { %2270 = vmatpush2.bf16.msra.mxu1 %v3219_v1  ;;  %2228 = vmatprep.subr.bf16.mxu0 %v3224_v2  ;;  %v3315_v1 = vld [vmem:[%s4336_s1 + $0x7b0] ss:$8 sps:$4 sm:$0xff]   ;;  %v3320_v2 = vld [vmem:[%s4336_s1 + $0x6a4] ss:$8 sps:$4 sm:$0xff]  }
  0xc3   : > { %2271 = vmatprep.subr.bf16.mxu1 %v3227_v3  ;;  %v3323_v3 = vld [vmem:[%s4336_s1 + $0x7a4] ss:$8 sps:$4 sm:$0xff]  }
  0xc5   : > { %2229 = vmatpush2.bf16.msra.mxu0 %v3222_v4  ;;  %v3318_v4 = vld [vmem:[%s4336_s1 + $0x6a0] ss:$8 sps:$4 sm:$0xff]  }
  0xc6   : > { %2272 = vmatpush2.bf16.msra.mxu1 %v3225_v5  ;;  %2230 = vmatprep.subr.bf16.mxu0 %v3230_v6  ;;  %v3321_v5 = vld [vmem:[%s4336_s1 + $0x7a0] ss:$8 sps:$4 sm:$0xff]   ;;  %v3326_v6 = vld [vmem:[%s4336_s1 + $0x694] ss:$8 sps:$4 sm:$0xff]  }
  0xc7   : > { %2273 = vmatprep.subr.bf16.mxu1 %v3233_v7  ;;  %v3329_v7 = vld [vmem:[%s4336_s1 + $0x794] ss:$8 sps:$4 sm:$0xff]  }
  0xc9   : > { %2231 = vmatpush2.bf16.msra.mxu0 %v3228_v8  ;;  %v3324_v8 = vld [vmem:[%s4336_s1 + $0x690] ss:$8 sps:$4 sm:$0xff]  }
  0xca   : > { %2274 = vmatpush2.bf16.msra.mxu1 %v3231_v9  ;;  %2286 = vmatprep.subr.bf16.mxu0 %v3239_v10  ;;  %v3327_v9 = vld [vmem:[%s4336_s1 + $0x790] ss:$8 sps:$4 sm:$0xff]   ;;  %v3332_v10 = vld [vmem:[%s4336_s1 + $0x684] ss:$8 sps:$4 sm:$0xff]  }
  0xcb   : > { %2329 = vmatprep.subr.bf16.mxu1 %v3245_v11  ;;  %v3335_v11 = vld [vmem:[%s4336_s1 + $0x784] ss:$8 sps:$4 sm:$0xff]  }
  0xcc   : > { %2233 = vmatmul.mubr.bf16.vlgmr.msra.gmra.mxu0 %v3234_v12  ;;  %v3330_v12 = vld [vmem:[%s4336_s1 + $0x680] ss:$8 sps:$4 sm:$0xff]  }
  0xcd   : > { %2276 = vmatmul.mubr.bf16.vlgmr.msra.gmra.mxu1 %v3240_v14  ;;  %2287 = vmatpush1.bf16.msra.mxu0 %v3237_v13  ;;  %v3333_v13 = vld [vmem:[%s4336_s1 + $0x780] ss:$8 sps:$4 sm:$0xff]   ;;  %v3341_v14 = vld [vmem:[%s4336_s1 + $0x874] ss:$8 sps:$4 sm:$0xff]  }
  0xce   : > { %2330 = vmatpush1.bf16.msra.mxu1 %v3243_v15  ;;  %2288 = vmatprep.subr.bf16.mxu0 %v3248_v16  ;;  %v3336_v15 = vld [vmem:[%s3574_s7 + $0x30] ss:$72 sps:$4 sm:$0xff]  }
  0xcf   : > { %2331 = vmatprep.subr.bf16.mxu1 %v3251_v17  ;;  %2318 = vmatprep.mubr.bf16.mxu0 %v3338_v18  ;;  %v3342_v16 = vld [vmem:[%s3574_s7 + $0x38] ss:$72 sps:$4 sm:$0xff]   ;;  %v3392_v18 = vld [vmem:[%s3574_s7 + $0x44] ss:$72 sps:$4 sm:$0xff]  }
  0xd0   : > { %2361 = vmatprep.mubr.bf16.mxu1 %v3344_v19  ;;  %v3339_v17 = vld [vmem:[%s4336_s1 + $0x870] ss:$8 sps:$4 sm:$0xff]   ;;  %v3347_v19 = vld [vmem:[%s4336_s1 + $0x864] ss:$8 sps:$4 sm:$0xff]  }
  0xd1   : > { %2289 = vmatpush1.bf16.msra.mxu0 %v3246_v20  ;;  %v3345_v20 = vld [vmem:[%s4336_s1 + $0x860] ss:$8 sps:$4 sm:$0xff]  }
  0xd2   : > { %2332 = vmatpush1.bf16.msra.mxu1 %v3249_v21  ;;  %2290 = vmatprep.subr.bf16.mxu0 %v3254_v22  ;;  %v3350_v21 = vld [vmem:[%s4336_s1 + $0x854] ss:$8 sps:$4 sm:$0xff]   ;;  %v3348_v22 = vld [vmem:[%s4336_s1 + $0x850] ss:$8 sps:$4 sm:$0xff]  }
  0xd3   : > { %2333 = vmatprep.subr.bf16.mxu1 %v3257_v23  ;;  %v3353_v23 = vld [vmem:[%s4336_s1 + $0x844] ss:$8 sps:$4 sm:$0xff]  }
  0xd5   : > { %2291 = vmatpush1.bf16.msra.mxu0 %v3252_v24  ;;  %v3351_v24 = vld [vmem:[%s4336_s1 + $0x840] ss:$8 sps:$4 sm:$0xff]  }
  0xd6   : > { %2334 = vmatpush1.bf16.msra.mxu1 %v3255_v25  ;;  %2292 = vmatprep.subr.bf16.mxu0 %v3260_v26  ;;  %v3356_v25 = vld [vmem:[%s4336_s1 + $0x834] ss:$8 sps:$4 sm:$0xff]   ;;  %v3354_v26 = vld [vmem:[%s4336_s1 + $0x830] ss:$8 sps:$4 sm:$0xff]  }
  0xd7   : > { %2335 = vmatprep.subr.bf16.mxu1 %v3263_v27  ;;  %v3359_v27 = vld [vmem:[%s4336_s1 + $0x824] ss:$8 sps:$4 sm:$0xff]  }
  0xd9   : > { %2293 = vmatpush1.bf16.msra.mxu0 %v3258_v28  ;;  %v3357_v28 = vld [vmem:[%s4336_s1 + $0x820] ss:$8 sps:$4 sm:$0xff]  }
  0xda   : > { %2336 = vmatpush1.bf16.msra.mxu1 %v3261_v29  ;;  %2294 = vmatprep.subr.bf16.mxu0 %v3266_v30  ;;  %v3362_v29 = vld [vmem:[%s4336_s1 + $0x814] ss:$8 sps:$4 sm:$0xff]   ;;  %v3360_v30 = vld [vmem:[%s4336_s1 + $0x810] ss:$8 sps:$4 sm:$0xff]  }
  0xdb   : > { %2337 = vmatprep.subr.bf16.mxu1 %v3269_v31  ;;  %v3365_v31 = vld [vmem:[%s4336_s1 + $0x804] ss:$8 sps:$4 sm:$0xff]  }
  0xdd   : > { %2295 = vmatpush1.bf16.msra.mxu0 %v3264_v32  ;;  %v3363_v32 = vld [vmem:[%s4336_s1 + $0x800] ss:$8 sps:$4 sm:$0xff]  }
  0xde   : > { %2338 = vmatpush1.bf16.msra.mxu1 %v3267_v33  ;;  %2296 = vmatprep.subr.bf16.mxu0 %v3272_v34  ;;  %v3368_v33 = vld [vmem:[%s4336_s1 + $0x8f4] ss:$8 sps:$4 sm:$0xff]   ;;  %v3366_v34 = vld [vmem:[%s4336_s1 + $0x8f0] ss:$8 sps:$4 sm:$0xff]  }
  0xdf   : > { %2339 = vmatprep.subr.bf16.mxu1 %v3275_v35  ;;  %v3371_v35 = vld [vmem:[%s4336_s1 + $0x8e4] ss:$8 sps:$4 sm:$0xff]  }
  0xe1   : > { %2297 = vmatpush1.bf16.msra.mxu0 %v3270_v36  ;;  %v3369_v36 = vld [vmem:[%s4336_s1 + $0x8e0] ss:$8 sps:$4 sm:$0xff]  }
  0xe2   : > { %2340 = vmatpush1.bf16.msra.mxu1 %v3273_v37  ;;  %2298 = vmatprep.subr.bf16.mxu0 %v3278_v38  ;;  %v3374_v37 = vld [vmem:[%s4336_s1 + $0x8d4] ss:$8 sps:$4 sm:$0xff]   ;;  %v3372_v38 = vld [vmem:[%s4336_s1 + $0x8d0] ss:$8 sps:$4 sm:$0xff]  }
  0xe3   : > { %2341 = vmatprep.subr.bf16.mxu1 %v3281_v39  ;;  %v3377_v39 = vld [vmem:[%s4336_s1 + $0x8c4] ss:$8 sps:$4 sm:$0xff]  }
  0xe5   : > { %2299 = vmatpush1.bf16.msra.mxu0 %v3276_v40  ;;  %v3375_v40 = vld [vmem:[%s4336_s1 + $0x8c0] ss:$8 sps:$4 sm:$0xff]  }
  0xe6   : > { %2342 = vmatpush1.bf16.msra.mxu1 %v3279_v41  ;;  %2300 = vmatprep.subr.bf16.mxu0 %v3284_v42  ;;  %v3380_v41 = vld [vmem:[%s4336_s1 + $0x8b4] ss:$8 sps:$4 sm:$0xff]   ;;  %v3378_v42 = vld [vmem:[%s4336_s1 + $0x8b0] ss:$8 sps:$4 sm:$0xff]  }
  0xe7   : > { %2343 = vmatprep.subr.bf16.mxu1 %v3287_v43  ;;  %v3383_v43 = vld [vmem:[%s4336_s1 + $0x8a4] ss:$8 sps:$4 sm:$0xff]  }
  0xe9   : > { %2301 = vmatpush1.bf16.msra.mxu0 %v3282_v44  ;;  %v3381_v44 = vld [vmem:[%s4336_s1 + $0x8a0] ss:$8 sps:$4 sm:$0xff]  }
  0xea   : > { %2344 = vmatpush1.bf16.msra.mxu1 %v3285_v45  ;;  %2302 = vmatprep.subr.bf16.mxu0 %v3290_v46  ;;  %v3386_v45 = vld [vmem:[%s4336_s1 + $0x894] ss:$8 sps:$4 sm:$0xff]   ;;  %v3384_v46 = vld [vmem:[%s4336_s1 + $0x890] ss:$8 sps:$4 sm:$0xff]  }
  0xeb   : > { %2345 = vmatprep.subr.bf16.mxu1 %v3293_v47  ;;  %v3389_v47 = vld [vmem:[%s4336_s1 + $0x884] ss:$8 sps:$4 sm:$0xff]  }
  0xed   : > { %2303 = vmatpush2.bf16.msra.mxu0 %v3288_v48  ;;  %v3387_v48 = vld [vmem:[%s4336_s1 + $0x880] ss:$8 sps:$4 sm:$0xff]  }
  0xee   : > { %2346 = vmatpush2.bf16.msra.mxu1 %v3291_v49  ;;  %2304 = vmatprep.subr.bf16.mxu0 %v3296_v50  ;;  %v3390_v49 = vld [vmem:[%s3574_s7 + $0x40] ss:$72 sps:$4 sm:$0xff]   ;;  %s2920_s7 = sshll.u32 %s4340_s24, 3  ;;  %s2921_s24 = sshll.u32 %s4342_s13, 4 }
  0xef   : > { %2347 = vmatprep.subr.bf16.mxu1 %v3299_v51  ;;  %s185_s15 = scalar_lea.vmem %s4337_s2, %s2920_s7  ;;  %s191_s18 = scalar_lea.vmem %s4338_s3, %s2921_s24 }
  0xf1   : > { %2305 = vmatpush2.bf16.msra.mxu0 %v3294_v52 }
  0xf2   : > { %2348 = vmatpush2.bf16.msra.mxu1 %v3297_v53  ;;  %2306 = vmatprep.subr.bf16.mxu0 %v3302_v54 }
  0xf3   : > { %2349 = vmatprep.subr.bf16.mxu1 %v3305_v55 }
  0xf5   : > { %2307 = vmatpush2.bf16.msra.mxu0 %v3300_v56 }
  0xf6   : > { %2350 = vmatpush2.bf16.msra.mxu1 %v3303_v57  ;;  %2308 = vmatprep.subr.bf16.mxu0 %v3308_v58 }
  0xf7   : > { %2351 = vmatprep.subr.bf16.mxu1 %v3311_v59 }
  0xf9   : > { %2309 = vmatpush2.bf16.msra.mxu0 %v3306_v60 }
  0xfa   : > { %2352 = vmatpush2.bf16.msra.mxu1 %v3309_v61  ;;  %2310 = vmatprep.subr.bf16.mxu0 %v3314_v62 }
  0xfb   : > { %2353 = vmatprep.subr.bf16.mxu1 %v3317_v63 }
  0xfd   : > { %2311 = vmatpush2.bf16.msra.mxu0 %v3312_v0 }
  0xfe   : > { %2354 = vmatpush2.bf16.msra.mxu1 %v3315_v1  ;;  %2312 = vmatprep.subr.bf16.mxu0 %v3320_v2 }
  0xff   : > { %2355 = vmatprep.subr.bf16.mxu1 %v3323_v3 }
 0x101   : > { %2313 = vmatpush2.bf16.msra.mxu0 %v3318_v4 }
 0x102   : > { %2356 = vmatpush2.bf16.msra.mxu1 %v3321_v5  ;;  %2314 = vmatprep.subr.bf16.mxu0 %v3326_v6 }
 0x103   : > { %2357 = vmatprep.subr.bf16.mxu1 %v3329_v7 }
 0x105   : > { %2315 = vmatpush2.bf16.msra.mxu0 %v3324_v8 }
 0x106   : > { %2358 = vmatpush2.bf16.msra.mxu1 %v3327_v9  ;;  %2316 = vmatprep.subr.bf16.mxu0 %v3332_v10 }
 0x107   : > { %2359 = vmatprep.subr.bf16.mxu1 %v3335_v11 }
 0x109   : > { %2317 = vmatpush2.bf16.msra.mxu0 %v3330_v12 }
 0x10a   : > { %2360 = vmatpush2.bf16.msra.mxu1 %v3333_v13  ;;  %2372 = vmatprep.subr.bf16.mxu0 %v3341_v14 }
 0x10c   : > { %2319 = vmatmul.mubr.bf16.vlgmr.msra.gmra.mxu0 %v3336_v15  ;;  %v2062_v50 = vpop.f32.mrf.mxu0 }
 0x10d   : > { %2362 = vmatmul.mubr.bf16.vlgmr.msra.gmra.mxu1 %v3342_v16  ;;  %2373 = vmatpush1.bf16.msra.mxu0 %v3339_v17  ;;  %v2105_v51 = vpop.f32.mrf.mxu1 }
 0x10e   : > { %2404 = vmatprep.mubr.bf16.mxu0 %v3392_v18  ;;  %2374 = vmatprep.subr.bf16.mxu0 %v3347_v19  ;;  %v2064_v52 = vpop.f32.mrf.mxu0  ;;  %v2106_v7 = vadd.f32 %v2105_v51, %v2062_v50 }
 0x10f   : > { %v2107_v53 = vpop.f32.mrf.mxu1 }
 0x110   : > { %v2066_v54 = vpop.f32.mrf.mxu0  ;;  %v2108_v8 = vadd.f32 %v2107_v53, %v2064_v52 }
 0x111   : > { %2375 = vmatpush1.bf16.msra.mxu0 %v3345_v20  ;;  %v2109_v55 = vpop.f32.mrf.mxu1 }
 0x112   : > { %2376 = vmatprep.subr.bf16.mxu0 %v3350_v21  ;;  %v2068_v56 = vpop.f32.mrf.mxu0  ;;  %v2110_v11 = vadd.f32 %v2109_v55, %v2066_v54 }
 0x113   : > { %v2111_v58 = vpop.f32.mrf.mxu1 }
 0x114   : > { %v2112_v15 = vadd.f32 %v2111_v58, %v2068_v56 }
 0x115   : > { %2377 = vmatpush1.bf16.msra.mxu0 %v3348_v22 }
 0x116   : > { %2378 = vmatprep.subr.bf16.mxu0 %v3353_v23 }
 0x119   : > { %2379 = vmatpush1.bf16.msra.mxu0 %v3351_v24 }
 0x11a   : > { %2380 = vmatprep.subr.bf16.mxu0 %v3356_v25 }
 0x11d   : > { %2381 = vmatpush1.bf16.msra.mxu0 %v3354_v26 }
 0x11e   : > { %2382 = vmatprep.subr.bf16.mxu0 %v3359_v27 }
 0x121   : > { %2383 = vmatpush1.bf16.msra.mxu0 %v3357_v28 }
 0x122   : > { %2384 = vmatprep.subr.bf16.mxu0 %v3362_v29 }
 0x125   : > { %2385 = vmatpush1.bf16.msra.mxu0 %v3360_v30 }
 0x126   : > { %2386 = vmatprep.subr.bf16.mxu0 %v3365_v31 }
 0x129   : > { %2387 = vmatpush1.bf16.msra.mxu0 %v3363_v32 }
 0x12a   : > { %2388 = vmatprep.subr.bf16.mxu0 %v3368_v33 }
 0x12d   : > { %2389 = vmatpush2.bf16.msra.mxu0 %v3366_v34 }
 0x12e   : > { %2390 = vmatprep.subr.bf16.mxu0 %v3371_v35 }
 0x131   : > { %2391 = vmatpush2.bf16.msra.mxu0 %v3369_v36 }
 0x132   : > { %2392 = vmatprep.subr.bf16.mxu0 %v3374_v37 }
 0x135   : > { %2393 = vmatpush2.bf16.msra.mxu0 %v3372_v38 }
 0x136   : > { %2394 = vmatprep.subr.bf16.mxu0 %v3377_v39 }
 0x139   : > { %2395 = vmatpush2.bf16.msra.mxu0 %v3375_v40 }
 0x13a   : > { %2396 = vmatprep.subr.bf16.mxu0 %v3380_v41 }
 0x13d   : > { %2397 = vmatpush2.bf16.msra.mxu0 %v3378_v42 }
 0x13e   : > { %2398 = vmatprep.subr.bf16.mxu0 %v3383_v43 }
 0x141   : > { %2399 = vmatpush2.bf16.msra.mxu0 %v3381_v44 }
 0x142   : > { %2400 = vmatprep.subr.bf16.mxu0 %v3386_v45 }
 0x145   : > { %2401 = vmatpush2.bf16.msra.mxu0 %v3384_v46 }
 0x146   : > { %2402 = vmatprep.subr.bf16.mxu0 %v3389_v47 }
 0x149   : > { %2403 = vmatpush2.bf16.msra.mxu0 %v3387_v48 }
 0x14c   : > { %2405 = vmatmul.mubr.bf16.vlgmr.msra.gmra.mxu0 %v3390_v49  ;;  %v2148_v57 = vpop.f32.mrf.mxu0 }
 0x14d   : > { %v2191_v60 = vpop.f32.mrf.mxu1  ;;  %v2149_v12 = vadd.f32 %v2148_v57, %v2106_v7 }
 0x14e   : > { %v2150_v59 = vpop.f32.mrf.mxu0 }
 0x14f   : > { %v2193_v62 = vpop.f32.mrf.mxu1  ;;  %v2151_v13 = vadd.f32 %v2150_v59, %v2108_v8  ;;  %v2192_v18 = vadd.f32 %v2191_v60, %v2149_v12 }
 0x150   : > { %v2152_v61 = vpop.f32.mrf.mxu0 }
 0x151   : > { %v2195_v0 = vpop.f32.mrf.mxu1  ;;  %v2153_v16 = vadd.f32 %v2152_v61, %v2110_v11  ;;  %v2194_v19 = vadd.f32 %v2193_v62, %v2151_v13 }
 0x152   : > { %v2154_v63 = vpop.f32.mrf.mxu0 }
 0x153   : > { %v2197_v2 = vpop.f32.mrf.mxu1  ;;  %v2155_v20 = vadd.f32 %v2154_v63, %v2112_v15  ;;  %v2196_v23 = vadd.f32 %v2195_v0, %v2153_v16 }
 0x155   : > { %v2198_v26 = vadd.f32 %v2197_v2, %v2155_v20 }
 0x18c   : > { %v2234_v1 = vpop.f32.mrf.mxu0 }
 0x18d   : > { %v2277_v4 = vpop.f32.mrf.mxu1  ;;  %v2235_v24 = vadd.f32 %v2234_v1, %v2192_v18 }
 0x18e   : > { %v2236_v3 = vpop.f32.mrf.mxu0 }
 0x18f   : > { %v2279_v6 = vpop.f32.mrf.mxu1  ;;  %v2237_v25 = vadd.f32 %v2236_v3, %v2194_v19  ;;  %v2278_v30 = vadd.f32 %v2277_v4, %v2235_v24  ;;  %v3401_v3 = vmov 1966171168  }
 0x190   : > { %v2238_v5 = vpop.f32.mrf.mxu0  ;;  %v2447_v4 = vunpack.c.l.s4 %v3401_v3 }
 0x191   : > { %v2281_v10 = vpop.f32.mrf.mxu1  ;;  %v2239_v27 = vadd.f32 %v2238_v5, %v2196_v23  ;;  %v2280_v31 = vadd.f32 %v2279_v6, %v2237_v25 }
 0x192   : > { %v2240_v9 = vpop.f32.mrf.mxu0 }
 0x193   : > { %v2283_v17 = vpop.f32.mrf.mxu1  ;;  %v2241_v32 = vadd.f32 %v2240_v9, %v2198_v26  ;;  %v2282_v33 = vadd.f32 %v2281_v10, %v2239_v27  ;;  %v2449_v9 = vlaneseq }
 0x195   : > { %v2284_v38 = vadd.f32 %v2283_v17, %v2241_v32  ;;  %v2450_v19 = vshrl.u32 %v2449_v9, 7  ;;  %vm2463_vm0 = vcmp.lt.s32.totalorder %v2449_v9, 256 }
 0x1cc   : > { %v2320_v14 = vpop.f32.mrf.mxu0 }
 0x1cd   : > { %v2363_v22 = vpop.f32.mrf.mxu1  ;;  %v2321_v34 = vadd.f32 %v2320_v14, %v2278_v30  ;;  %v2448_v14 = vunpack.c.0.s8 %v2447_v4 }
 0x1ce   : > { %v2322_v21 = vpop.f32.mrf.mxu0 }
 0x1cf   : > { %v2365_v29 = vpop.f32.mrf.mxu1  ;;  %v2323_v35 = vadd.f32 %v2322_v21, %v2280_v31  ;;  %v2364_v41 = vadd.f32 %v2363_v22, %v2321_v34  ;;  %v2451_v26 = vsub.s32 %v2448_v14, %v2450_v19 }
 0x1d0   : > { %v2324_v28 = vpop.f32.mrf.mxu0 }
 0x1d1   : > { %v2367_v37 = vpop.f32.mrf.mxu1  ;;  %v2325_v39 = vadd.f32 %v2324_v28, %v2282_v33  ;;  %v2366_v42 = vadd.f32 %v2365_v29, %v2323_v35 }
 0x1d2   : > { %v2326_v36 = vpop.f32.mrf.mxu0 }
 0x1d3   : > { %v2327_v43 = vadd.f32 %v2326_v36, %v2284_v38  ;;  %v2369_v44 = vpop.f32.mrf.mxu1  ;;  %v2368_v46 = vadd.f32 %v2367_v37, %v2325_v39 }
 0x1d5   : > { %v2370_v50 = vadd.f32 %v2369_v44, %v2327_v43 }
 0x20c   : > { %v2406_v40 = vpop.f32.mrf.mxu0 }
 0x20d   : > { %v2407_v47 = vadd.f32 %v2406_v40, %v2364_v41 }
 0x20e   : > { %v2408_v45 = vpop.f32.mrf.mxu0 }
 0x20f   : > { %v2409_v48 = vadd.f32 %v2408_v45, %v2366_v42  ;;  %v2467_v54 = vmul.f32 %v2407_v47, %v2407_v47 }
 0x210   : > { %v2410_v49 = vpop.f32.mrf.mxu0 }
 0x211   : > { %v2922_v51 = vpack.c.bf16 %v2409_v48, %v2407_v47  ;;  %v2411_v52 = vadd.f32 %v2410_v49, %v2368_v46  ;;  %v2468_v62 = vmul.f32 %v2409_v48, %v2409_v48 }
 0x212   : > { %v2412_v53 = vpop.f32.mrf.mxu0 }
 0x213   : > { %2427 = vst [vmem:[%s185_s15] sm:$0xff] %v2922_v51  ;;  %v2429_v55 = vadd.f32 %v2411_v52, %v2407_v47  ;;  %v2469_v56 = vmul.f32 %v2411_v52, %v2411_v52  ;;  %v2413_v57 = vadd.f32 %v2412_v53, %v2370_v50 }
 0x215   : > { %v2430_v58 = vrot.slane %v2429_v55, 4  ;;  %v2471_v59 = vadd.f32 %v2469_v56, %v2467_v54  ;;  %v2923_v60 = vpack.c.bf16 %v2413_v57, %v2411_v52  ;;  %v2436_v61 = vadd.f32 %v2413_v57, %v2409_v48 }
 0x216   : > { %v2470_v63 = vmul.f32 %v2413_v57, %v2413_v57 }
 0x217   : > { %v2431_v0 = vadd.f32 %v2430_v58, %v2429_v55  ;;  %v2472_v1 = vrot.slane %v2471_v59, 4  ;;  %2428 = vst [vmem:[%s185_s15 + $0x8] sm:$0xff] %v2923_v60  ;;  %v2437_v2 = vrot.slane %v2436_v61, 4 }
 0x218   : > { %v2478_v5 = vadd.f32 %v2470_v63, %v2468_v62 }
 0x219   : > { %v2432_v6 = vrot.slane %v2431_v0, 2  ;;  %v2473_v7 = vadd.f32 %v2472_v1, %v2471_v59  ;;  %v2438_v8 = vadd.f32 %v2437_v2, %v2436_v61 }
 0x21a   : > { %v2479_v10 = vrot.slane %v2478_v5, 4 }
 0x21b   : > { %v2433_v11 = vadd.f32 %v2432_v6, %v2431_v0  ;;  %v2474_v12 = vrot.slane %v2473_v7, 2  ;;  %v2439_v13 = vrot.slane %v2438_v8, 2 }
 0x21c   : > { %v2480_v15 = vadd.f32 %v2479_v10, %v2478_v5 }
 0x21d   : > { %v2434_v16 = vrot.slane %v2433_v11, 1  ;;  %v2475_v17 = vadd.f32 %v2474_v12, %v2473_v7  ;;  %v2440_v18 = vadd.f32 %v2439_v13, %v2438_v8 }
 0x21e   : > { %v2481_v20 = vrot.slane %v2480_v15, 2 }
 0x21f   : > { %v2441_v21 = vrot.slane %v2440_v18, 1  ;;  %v2476_v22 = vrot.slane %v2475_v17, 1  ;;  %v2435_v24 = vadd.f32 %v2434_v16, %v2433_v11 }
 0x220   : > { %v2482_v23 = vadd.f32 %v2481_v20, %v2480_v15 }
 0x221   : > { %v2442_v25 = vadd.f32 %v2441_v21, %v2440_v18  ;;  %v2477_v29 = vadd.f32 %v2476_v22, %v2475_v17 }
 0x222   : > { %v2483_v27 = vrot.slane %v2482_v23, 1 }
 0x223   : > { %v2445_v28 = vcombine.low %v2435_v24, %v2442_v25 }
 0x224   : > { %v2484_v30 = vadd.f32 %v2483_v27, %v2482_v23 }
 0x225   : > { %v2452_v31 = vrot.slane %v2445_v28, %v2451_v26 }
 0x226   : > { %v2487_v32 = vcombine.low %v2477_v29, %v2484_v30 }
 0x227   : > { %v2459_v33 = vrot.slane %v2452_v31, %v2451_v26 }
 0x228   : > { %v2494_v34 = vrot.slane %v2487_v32, %v2451_v26 }
 0x229   : > { %2465 = vst.msk [vmem:[%s191_s18] ss:$8 sm:$0x3] %vm2463_vm0, %v2459_v33 }
 0x22a   : > { %v2501_v35 = vrot.slane %v2494_v34, %v2451_v26 }
 0x22c   : > { %2917 = vst.msk [vmem:[%s191_s18 + $0x1] ss:$8 sm:$0x3] %vm2463_vm0, %v2501_v35 }
 0x22d PF: > { %s14_s12 = sadd.s32 1, %s3399_s12  }
 0x22e   : > { %p11_p5 = scmp.ge.s32.totalorder %s14_s12, 4  }
 0x230   :  { %13 = sbr.rel (!%p11_p5) target bundleno = 1 (0x1), region = 71 }

</bundles_post_ra>
